<compile_context>
chip_gen: v7x
topology: tpu7x:2x2x1
jax: 0.10.0
libtpu: 0.0.40
codegen_flags: <defaults>
</compile_context>

<pallas_src>
import functools
import math

import jax
import jax.numpy as jnp
from jax.experimental import pallas as pl
from jax.experimental.pallas import tpu as pltpu

EPS = 1e-6


# ---------------------------------------------------------------------------
# In-kernel math helpers (pure jnp, traced inside the fused Pallas kernel)
# ---------------------------------------------------------------------------

def _ln(x2, a_ref, b_ref, eps):
    """Module LayerNorm on (M, D): unbiased std, eps added to std, affine (1, D)."""
    d = x2.shape[-1]
    mean = jnp.mean(x2, axis=-1, keepdims=True)
    xc = x2 - mean
    var = jnp.sum(xc * xc, axis=-1, keepdims=True) * (1.0 / (d - 1))
    inv = pl.reciprocal(jnp.sqrt(var) + eps, approx=False)
    return a_ref[...] * (xc * inv) + b_ref[...]


def _mha(q2, k2, v2, bsz, sq, sk, n_heads):
    """Multi-head attention on flattened activations.

    q2: (bsz*sq, D), k2/v2: (bsz*sk, D), float32.  Returns (bsz*sq, D).
    Heads are folded into the leading batch dim so attention is two rank-3 batched
    contractions and one softmax instead of a per-head einsum loop.
    """
    d = q2.shape[-1]
    dk = d // n_heads
    q3 = q2.reshape(bsz, sq, d) * (1.0 / math.sqrt(dk))   # fold 1/sqrt(dk) into q once
    k3 = k2.reshape(bsz, sk, d)
    v3 = v2.reshape(bsz, sk, d)
    # (bsz, s, H*dk) -> (H*bsz, s, dk): static lane slices + leading-dim concat
    # (kept rank-3 on purpose; 4-D reshapes/transposes avoided for Mosaic lowering).
    qh = jnp.concatenate([q3[:, :, h * dk:(h + 1) * dk] for h in range(n_heads)], axis=0)
    kh = jnp.concatenate([k3[:, :, h * dk:(h + 1) * dk] for h in range(n_heads)], axis=0)
    vh = jnp.concatenate([v3[:, :, h * dk:(h + 1) * dk] for h in range(n_heads)], axis=0)

    s = jnp.einsum("bqd,bkd->bqk", qh, kh, preferred_element_type=jnp.float32)
    s = s - jnp.max(s, axis=-1, keepdims=True)
    p = jnp.exp(s)
    p = p * pl.reciprocal(jnp.sum(p, axis=-1, keepdims=True), approx=False)
    o = jnp.einsum("bqk,bkd->bqd", p, vh, preferred_element_type=jnp.float32)

    # (H*bsz, sq, dk) -> (bsz, sq, D): heads back into lanes.
    o = jnp.concatenate([o[h * bsz:(h + 1) * bsz] for h in range(n_heads)], axis=-1)
    return o.reshape(bsz * sq, d)


def _self_attn_block(x2, p, bsz, s, n_heads, eps):
    """x + MHA(LN(x), LN(x), LN(x)); fused QKV projection."""
    d = x2.shape[-1]
    nx = _ln(x2, p["ln_a"], p["ln_b"], eps)
    qkv = jnp.dot(nx, p["wqkv"][...], preferred_element_type=jnp.float32) + p["bqkv"][...]
    att = _mha(qkv[:, :d], qkv[:, d:2 * d], qkv[:, 2 * d:], bsz, s, s, n_heads)
    out = jnp.dot(att, p["wo"][...], preferred_element_type=jnp.float32) + p["bo"][...]
    return x2 + out


def _cross_attn_block(x2, mem2, p, bsz, sq, sk, n_heads, eps):
    """x + MHA(LN(x), memory, memory); memory is NOT layer-normed; fused KV proj."""
    d = x2.shape[-1]
    nx = _ln(x2, p["ln_a"], p["ln_b"], eps)
    q = jnp.dot(nx, p["wq"][...], preferred_element_type=jnp.float32) + p["bq"][...]
    kv = jnp.dot(mem2, p["wkv"][...], preferred_element_type=jnp.float32) + p["bkv"][...]
    att = _mha(q, kv[:, :d], kv[:, d:], bsz, sq, sk, n_heads)
    out = jnp.dot(att, p["wo"][...], preferred_element_type=jnp.float32) + p["bo"][...]
    return x2 + out


def _ff_block(x2, p, eps):
    """x + W2(ReLU(W1(LN(x)))); (M, dff) intermediate never leaves VMEM."""
    nx = _ln(x2, p["ln_a"], p["ln_b"], eps)
    h = jnp.dot(nx, p["w1"][...], preferred_element_type=jnp.float32) + p["b1"][...]
    h = jnp.maximum(h, 0.0)
    out = jnp.dot(h, p["w2"][...], preferred_element_type=jnp.float32) + p["b2"][...]
    return x2 + out


# ---------------------------------------------------------------------------
# The single fused kernel: one grid step == one full encoder-decoder pass
# ---------------------------------------------------------------------------

def _fused_forward_kernel(enc_ref, dec_ref, *rest, treedef, n_heads, eps):
    params = jax.tree_util.tree_unflatten(treedef, rest[:-1])
    out_ref = rest[-1]
    bsz, d, s = enc_ref.shape

    # Fold the (B, D, S) -> (B, S, D) input transpose into the kernel.
    enc_in = jnp.swapaxes(enc_ref[...].astype(jnp.float32), 1, 2).reshape(bsz * s, d)
    dec_in = jnp.swapaxes(dec_ref[...].astype(jnp.float32), 1, 2).reshape(bsz * s, d)

    # -------- Encoder --------
    x = enc_in
    for lp in params["enc_layers"]:
        x = _self_attn_block(x, lp["self_attn"], bsz, s, n_heads, eps)
        x = _ff_block(x, lp["ff"], eps)
    memory = _ln(x, params["enc_norm"]["a"], params["enc_norm"]["b"], eps)

    # -------- Decoder --------
    x = dec_in
    for lp in params["dec_layers"]:
        x = _self_attn_block(x, lp["self_attn"], bsz, s, n_heads, eps)
        x = _cross_attn_block(x, memory, lp["src_attn"], bsz, s, s, n_heads, eps)
        x = _ff_block(x, lp["ff"], eps)
    x = _ln(x, params["dec_norm"]["a"], params["dec_norm"]["b"], eps)

    # Fold the output transpose back to (B, D, S) into the kernel as well.
    out_ref[...] = jnp.swapaxes(x.reshape(bsz, s, d), 1, 2).astype(out_ref.dtype)


# ---------------------------------------------------------------------------
# Wrapper: ONE pallas_call for the whole forward (both passes)
# ---------------------------------------------------------------------------

@functools.partial(jax.jit, static_argnames=("n_heads",))
def transformer_forward(params, src, tgt, n_heads):
    """src, tgt: (B, emb_dims, S) channels-second, exactly like the PyTorch module.

    Returns (src_embedding, tgt_embedding), both (B, emb_dims, S).
    """
    bsz, d, s = src.shape
    assert d % n_heads == 0

    # Pass 0: encode(src) / decode(tgt) -> tgt_embedding
    # Pass 1: encode(tgt) / decode(src) -> src_embedding
    enc_stack = jnp.stack([src, tgt], axis=0)   # (2, B, D, S)
    dec_stack = jnp.stack([tgt, src], axis=0)   # (2, B, D, S)

    leaves, treedef = jax.tree_util.tree_flatten(params)

    act_spec = pl.BlockSpec((None, bsz, d, s), lambda i: (i, 0, 0, 0))
    param_specs = [pl.BlockSpec(leaf.shape, lambda i, nd=leaf.ndim: (0,) * nd)
                   for leaf in leaves]

    kernel = functools.partial(_fused_forward_kernel, treedef=treedef,
                               n_heads=n_heads, eps=EPS)

    out = pl.pallas_call(
        kernel,
        out_shape=jax.ShapeDtypeStruct((2, bsz, d, s), src.dtype),
        grid=(2,),
        in_specs=[act_spec, act_spec] + param_specs,
        out_specs=act_spec,
        compiler_params=pltpu.CompilerParams(dimension_semantics=("parallel",)),
    )(enc_stack, dec_stack, *leaves)

    tgt_embedding = out[0]
    src_embedding = out[1]
    return src_embedding, tgt_embedding


# ---------------------------------------------------------------------------
# Parameter initialization (deterministic, synthetic; QKV / KV weights pre-fused)
# ---------------------------------------------------------------------------

def _w(key, din, dout, scale=0.05):
    return scale * jax.random.normal(key, (din, dout), jnp.float32)


def _bias(key, n, scale=0.02):
    return scale * jax.random.normal(key, (1, n), jnp.float32)


def init_self_attn(key, d):
    ks = jax.random.split(key, 8)
    wq, wk, wv, wo = (_w(k, d, d) for k in ks[:4])
    return {
        "ln_a": jnp.ones((1, d), jnp.float32),
        "ln_b": jnp.zeros((1, d), jnp.float32),
        "wqkv": jnp.concatenate([wq, wk, wv], axis=1),                   # (d, 3d)
        "bqkv": jnp.concatenate([_bias(ks[4], d), _bias(ks[5], d), _bias(ks[6], d)],
                                axis=1),
        "wo": wo,
        "bo": _bias(ks[7], d),
    }


def init_cross_attn(key, d):
    ks = jax.random.split(key, 8)
    wq, wk, wv, wo = (_w(k, d, d) for k in ks[:4])
    return {
        "ln_a": jnp.ones((1, d), jnp.float32),
        "ln_b": jnp.zeros((1, d), jnp.float32),
        "wq": wq, "bq": _bias(ks[4], d),
        "wkv": jnp.concatenate([wk, wv], axis=1),                        # (d, 2d)
        "bkv": jnp.concatenate([_bias(ks[5], d), _bias(ks[6], d)], axis=1),
        "wo": wo, "bo": _bias(ks[7], d),
    }


def init_ff(key, d, dff):
    ks = jax.random.split(key, 4)
    return {
        "ln_a": jnp.ones((1, d), jnp.float32),
        "ln_b": jnp.zeros((1, d), jnp.float32),
        "w1": _w(ks[0], d, dff), "b1": _bias(ks[1], dff),
        "w2": _w(ks[2], dff, d), "b2": _bias(ks[3], d),
    }


def init_ln(d):
    return {"a": jnp.ones((1, d), jnp.float32), "b": jnp.zeros((1, d), jnp.float32)}


def init_transformer(key, d, dff, n_blocks):
    keys = jax.random.split(key, 2 * n_blocks)
    enc_layers = [{"self_attn": init_self_attn(jax.random.fold_in(keys[i], 0), d),
                   "ff": init_ff(jax.random.fold_in(keys[i], 1), d, dff)}
                  for i in range(n_blocks)]
    dec_layers = [{"self_attn": init_self_attn(jax.random.fold_in(keys[n_blocks + i], 0), d),
                   "src_attn": init_cross_attn(jax.random.fold_in(keys[n_blocks + i], 1), d),
                   "ff": init_ff(jax.random.fold_in(keys[n_blocks + i], 2), d, dff)}
                  for i in range(n_blocks)]
    return {"enc_layers": enc_layers, "enc_norm": init_ln(d),
            "dec_layers": dec_layers, "dec_norm": init_ln(d)}


# ---------------------------------------------------------------------------
# Pure-JAX reference (mirrors the PyTorch module), used for a correctness check
# ---------------------------------------------------------------------------

def _ref_ln(x, a, b, eps=EPS):
    mean = jnp.mean(x, axis=-1, keepdims=True)
    xc = x - mean
    var = jnp.sum(xc * xc, axis=-1, keepdims=True) / (x.shape[-1] - 1)
    return a * xc / (jnp.sqrt(var) + eps) + b


def _ref_attention(q, k, v, n_heads):
    b, sq, d = q.shape
    sk = k.shape[1]
    dk = d // n_heads
    qh = q.reshape(b, sq, n_heads, dk).transpose(0, 2, 1, 3)
    kh = k.reshape(b, sk, n_heads, dk).transpose(0, 2, 1, 3)
    vh = v.reshape(b, sk, n_heads, dk).transpose(0, 2, 1, 3)
    scores = jnp.einsum("bhqd,bhkd->bhqk", qh, kh) / math.sqrt(dk)
    p = jax.nn.softmax(scores, axis=-1)
    o = jnp.einsum("bhqk,bhkd->bhqd", p, vh)
    return o.transpose(0, 2, 1, 3).reshape(b, sq, d)


def _ref_self_attn(x, p, n_heads):
    d = x.shape[-1]
    nx = _ref_ln(x, p["ln_a"], p["ln_b"])
    qkv = nx @ p["wqkv"] + p["bqkv"]
    att = _ref_attention(qkv[..., :d], qkv[..., d:2 * d], qkv[..., 2 * d:], n_heads)
    return x + att @ p["wo"] + p["bo"]


def _ref_cross_attn(x, mem, p, n_heads):
    d = x.shape[-1]
    nx = _ref_ln(x, p["ln_a"], p["ln_b"])
    q = nx @ p["wq"] + p["bq"]
    kv = mem @ p["wkv"] + p["bkv"]
    att = _ref_attention(q, kv[..., :d], kv[..., d:], n_heads)
    return x + att @ p["wo"] + p["bo"]


def _ref_ff(x, p):
    nx = _ref_ln(x, p["ln_a"], p["ln_b"])
    h = jnp.maximum(nx @ p["w1"] + p["b1"], 0.0)
    return x + h @ p["w2"] + p["b2"]


def _ref_encode_decode(params, enc_in, dec_in, n_heads):
    x = enc_in
    for lp in params["enc_layers"]:
        x = _ref_self_attn(x, lp["self_attn"], n_heads)
        x = _ref_ff(x, lp["ff"])
    memory = _ref_ln(x, params["enc_norm"]["a"], params["enc_norm"]["b"])
    x = dec_in
    for lp in params["dec_layers"]:
        x = _ref_self_attn(x, lp["self_attn"], n_heads)
        x = _ref_cross_attn(x, memory, lp["src_attn"], n_heads)
        x = _ref_ff(x, lp["ff"])
    return _ref_ln(x, params["dec_norm"]["a"], params["dec_norm"]["b"])


def reference_forward(params, src, tgt, n_heads):
    src_t = jnp.swapaxes(src, 1, 2)
    tgt_t = jnp.swapaxes(tgt, 1, 2)
    tgt_emb = jnp.swapaxes(_ref_encode_decode(params, src_t, tgt_t, n_heads), 1, 2)
    src_emb = jnp.swapaxes(_ref_encode_decode(params, tgt_t, src_t, n_heads), 1, 2)
    return src_emb, tgt_emb


# ---------------------------------------------------------------------------
# Main
# ---------------------------------------------------------------------------

if __name__ == "__main__":
    # args: emb_dims=32, n_blocks=2, n_heads=4, ff_dims=64 (dropout/masks identity)
    B, D, S = 2, 32, 16
    N_BLOCKS, N_HEADS, FF_DIMS = 2, 4, 64

    key = jax.random.PRNGKey(0)
    k_params, k_src, k_tgt = jax.random.split(key, 3)

    params = init_transformer(k_params, D, FF_DIMS, N_BLOCKS)
    src = jax.random.normal(k_src, (B, D, S), jnp.float32)
    tgt = jax.random.normal(k_tgt, (B, D, S), jnp.float32)

    src_emb, tgt_emb = transformer_forward(params, src, tgt, N_HEADS)
    jax.block_until_ready((src_emb, tgt_emb))

    assert src_emb.shape == (B, D, S) and tgt_emb.shape == (B, D, S)
    assert bool(jnp.all(jnp.isfinite(src_emb))) and bool(jnp.all(jnp.isfinite(tgt_emb)))

    # Pure-JAX reference check (same params, same math, all-f32).
    ref_src, ref_tgt = reference_forward(params, src, tgt, N_HEADS)
    assert bool(jnp.allclose(src_emb, ref_src, atol=2e-3, rtol=2e-3)), \
        f"src_emb max abs err {float(jnp.max(jnp.abs(src_emb - ref_src)))}"
    assert bool(jnp.allclose(tgt_emb, ref_tgt, atol=2e-3, rtol=2e-3)), \
        f"tgt_emb max abs err {float(jnp.max(jnp.abs(tgt_emb - ref_tgt)))}"

    print("KERNEL_OK")
</pallas_src>

<mosaic_0001>
module attributes {stable_mosaic.version = 11 : i64} {
  func.func @_fused_forward_kernel(%arg0: i32, %arg1: memref<1x2x32x16xf32, #tpu.memory_space<vmem>>, %arg2: memref<1x2x32x16xf32, #tpu.memory_space<vmem>>, %arg3: memref<1x64xf32, #tpu.memory_space<vmem>>, %arg4: memref<1x32xf32, #tpu.memory_space<vmem>>, %arg5: memref<1x32xf32, #tpu.memory_space<vmem>>, %arg6: memref<1x32xf32, #tpu.memory_space<vmem>>, %arg7: memref<32x64xf32, #tpu.memory_space<vmem>>, %arg8: memref<64x32xf32, #tpu.memory_space<vmem>>, %arg9: memref<1x32xf32, #tpu.memory_space<vmem>>, %arg10: memref<1x96xf32, #tpu.memory_space<vmem>>, %arg11: memref<1x32xf32, #tpu.memory_space<vmem>>, %arg12: memref<1x32xf32, #tpu.memory_space<vmem>>, %arg13: memref<32x32xf32, #tpu.memory_space<vmem>>, %arg14: memref<32x96xf32, #tpu.memory_space<vmem>>, %arg15: memref<1x64xf32, #tpu.memory_space<vmem>>, %arg16: memref<1x32xf32, #tpu.memory_space<vmem>>, %arg17: memref<1x32xf32, #tpu.memory_space<vmem>>, %arg18: memref<1x32xf32, #tpu.memory_space<vmem>>, %arg19: memref<1x32xf32, #tpu.memory_space<vmem>>, %arg20: memref<32x64xf32, #tpu.memory_space<vmem>>, %arg21: memref<32x32xf32, #tpu.memory_space<vmem>>, %arg22: memref<32x32xf32, #tpu.memory_space<vmem>>, %arg23: memref<1x64xf32, #tpu.memory_space<vmem>>, %arg24: memref<1x32xf32, #tpu.memory_space<vmem>>, %arg25: memref<1x32xf32, #tpu.memory_space<vmem>>, %arg26: memref<1x32xf32, #tpu.memory_space<vmem>>, %arg27: memref<32x64xf32, #tpu.memory_space<vmem>>, %arg28: memref<64x32xf32, #tpu.memory_space<vmem>>, %arg29: memref<1x32xf32, #tpu.memory_space<vmem>>, %arg30: memref<1x96xf32, #tpu.memory_space<vmem>>, %arg31: memref<1x32xf32, #tpu.memory_space<vmem>>, %arg32: memref<1x32xf32, #tpu.memory_space<vmem>>, %arg33: memref<32x32xf32, #tpu.memory_space<vmem>>, %arg34: memref<32x96xf32, #tpu.memory_space<vmem>>, %arg35: memref<1x64xf32, #tpu.memory_space<vmem>>, %arg36: memref<1x32xf32, #tpu.memory_space<vmem>>, %arg37: memref<1x32xf32, #tpu.memory_space<vmem>>, %arg38: memref<1x32xf32, #tpu.memory_space<vmem>>, %arg39: memref<1x32xf32, #tpu.memory_space<vmem>>, %arg40: memref<32x64xf32, #tpu.memory_space<vmem>>, %arg41: memref<32x32xf32, #tpu.memory_space<vmem>>, %arg42: memref<32x32xf32, #tpu.memory_space<vmem>>, %arg43: memref<1x32xf32, #tpu.memory_space<vmem>>, %arg44: memref<1x32xf32, #tpu.memory_space<vmem>>, %arg45: memref<1x64xf32, #tpu.memory_space<vmem>>, %arg46: memref<1x32xf32, #tpu.memory_space<vmem>>, %arg47: memref<1x32xf32, #tpu.memory_space<vmem>>, %arg48: memref<1x32xf32, #tpu.memory_space<vmem>>, %arg49: memref<32x64xf32, #tpu.memory_space<vmem>>, %arg50: memref<64x32xf32, #tpu.memory_space<vmem>>, %arg51: memref<1x32xf32, #tpu.memory_space<vmem>>, %arg52: memref<1x96xf32, #tpu.memory_space<vmem>>, %arg53: memref<1x32xf32, #tpu.memory_space<vmem>>, %arg54: memref<1x32xf32, #tpu.memory_space<vmem>>, %arg55: memref<32x32xf32, #tpu.memory_space<vmem>>, %arg56: memref<32x96xf32, #tpu.memory_space<vmem>>, %arg57: memref<1x64xf32, #tpu.memory_space<vmem>>, %arg58: memref<1x32xf32, #tpu.memory_space<vmem>>, %arg59: memref<1x32xf32, #tpu.memory_space<vmem>>, %arg60: memref<1x32xf32, #tpu.memory_space<vmem>>, %arg61: memref<32x64xf32, #tpu.memory_space<vmem>>, %arg62: memref<64x32xf32, #tpu.memory_space<vmem>>, %arg63: memref<1x32xf32, #tpu.memory_space<vmem>>, %arg64: memref<1x96xf32, #tpu.memory_space<vmem>>, %arg65: memref<1x32xf32, #tpu.memory_space<vmem>>, %arg66: memref<1x32xf32, #tpu.memory_space<vmem>>, %arg67: memref<32x32xf32, #tpu.memory_space<vmem>>, %arg68: memref<32x96xf32, #tpu.memory_space<vmem>>, %arg69: memref<1x32xf32, #tpu.memory_space<vmem>>, %arg70: memref<1x32xf32, #tpu.memory_space<vmem>>, %arg71: memref<1x2x32x16xf32, #tpu.memory_space<vmem>>) attributes {dimension_semantics = [#tpu.dimension_semantics<parallel>], iteration_bounds = array<i64: 2>, scalar_prefetch = 0 : i64, scratch_operands = 0 : i64, tpu.core_type = #tpu.core_type<tc>, window_params = [{transform_indices = @transform_0, window_bounds = array<i64: 1, 2, 32, 16>}, {transform_indices = @transform_1, window_bounds = array<i64: 1, 2, 32, 16>}, {pipeline_mode = #tpu.pipeline_mode<synchronous>, transform_indices = @transform_2, window_bounds = array<i64: 1, 64>}, {pipeline_mode = #tpu.pipeline_mode<synchronous>, transform_indices = @transform_3, window_bounds = array<i64: 1, 32>}, {pipeline_mode = #tpu.pipeline_mode<synchronous>, transform_indices = @transform_4, window_bounds = array<i64: 1, 32>}, {pipeline_mode = #tpu.pipeline_mode<synchronous>, transform_indices = @transform_5, window_bounds = array<i64: 1, 32>}, {pipeline_mode = #tpu.pipeline_mode<synchronous>, transform_indices = @transform_6, window_bounds = array<i64: 32, 64>}, {pipeline_mode = #tpu.pipeline_mode<synchronous>, transform_indices = @transform_7, window_bounds = array<i64: 64, 32>}, {pipeline_mode = #tpu.pipeline_mode<synchronous>, transform_indices = @transform_8, window_bounds = array<i64: 1, 32>}, {pipeline_mode = #tpu.pipeline_mode<synchronous>, transform_indices = @transform_9, window_bounds = array<i64: 1, 96>}, {pipeline_mode = #tpu.pipeline_mode<synchronous>, transform_indices = @transform_10, window_bounds = array<i64: 1, 32>}, {pipeline_mode = #tpu.pipeline_mode<synchronous>, transform_indices = @transform_11, window_bounds = array<i64: 1, 32>}, {pipeline_mode = #tpu.pipeline_mode<synchronous>, transform_indices = @transform_12, window_bounds = array<i64: 32, 32>}, {pipeline_mode = #tpu.pipeline_mode<synchronous>, transform_indices = @transform_13, window_bounds = array<i64: 32, 96>}, {pipeline_mode = #tpu.pipeline_mode<synchronous>, transform_indices = @transform_14, window_bounds = array<i64: 1, 64>}, {pipeline_mode = #tpu.pipeline_mode<synchronous>, transform_indices = @transform_15, window_bounds = array<i64: 1, 32>}, {pipeline_mode = #tpu.pipeline_mode<synchronous>, transform_indices = @transform_16, window_bounds = array<i64: 1, 32>}, {pipeline_mode = #tpu.pipeline_mode<synchronous>, transform_indices = @transform_17, window_bounds = array<i64: 1, 32>}, {pipeline_mode = #tpu.pipeline_mode<synchronous>, transform_indices = @transform_18, window_bounds = array<i64: 1, 32>}, {pipeline_mode = #tpu.pipeline_mode<synchronous>, transform_indices = @transform_19, window_bounds = array<i64: 32, 64>}, {pipeline_mode = #tpu.pipeline_mode<synchronous>, transform_indices = @transform_20, window_bounds = array<i64: 32, 32>}, {pipeline_mode = #tpu.pipeline_mode<synchronous>, transform_indices = @transform_21, window_bounds = array<i64: 32, 32>}, {pipeline_mode = #tpu.pipeline_mode<synchronous>, transform_indices = @transform_22, window_bounds = array<i64: 1, 64>}, {pipeline_mode = #tpu.pipeline_mode<synchronous>, transform_indices = @transform_23, window_bounds = array<i64: 1, 32>}, {pipeline_mode = #tpu.pipeline_mode<synchronous>, transform_indices = @transform_24, window_bounds = array<i64: 1, 32>}, {pipeline_mode = #tpu.pipeline_mode<synchronous>, transform_indices = @transform_25, window_bounds = array<i64: 1, 32>}, {pipeline_mode = #tpu.pipeline_mode<synchronous>, transform_indices = @transform_26, window_bounds = array<i64: 32, 64>}, {pipeline_mode = #tpu.pipeline_mode<synchronous>, transform_indices = @transform_27, window_bounds = array<i64: 64, 32>}, {pipeline_mode = #tpu.pipeline_mode<synchronous>, transform_indices = @transform_28, window_bounds = array<i64: 1, 32>}, {pipeline_mode = #tpu.pipeline_mode<synchronous>, transform_indices = @transform_29, window_bounds = array<i64: 1, 96>}, {pipeline_mode = #tpu.pipeline_mode<synchronous>, transform_indices = @transform_30, window_bounds = array<i64: 1, 32>}, {pipeline_mode = #tpu.pipeline_mode<synchronous>, transform_indices = @transform_31, window_bounds = array<i64: 1, 32>}, {pipeline_mode = #tpu.pipeline_mode<synchronous>, transform_indices = @transform_32, window_bounds = array<i64: 32, 32>}, {pipeline_mode = #tpu.pipeline_mode<synchronous>, transform_indices = @transform_33, window_bounds = array<i64: 32, 96>}, {pipeline_mode = #tpu.pipeline_mode<synchronous>, transform_indices = @transform_34, window_bounds = array<i64: 1, 64>}, {pipeline_mode = #tpu.pipeline_mode<synchronous>, transform_indices = @transform_35, window_bounds = array<i64: 1, 32>}, {pipeline_mode = #tpu.pipeline_mode<synchronous>, transform_indices = @transform_36, window_bounds = array<i64: 1, 32>}, {pipeline_mode = #tpu.pipeline_mode<synchronous>, transform_indices = @transform_37, window_bounds = array<i64: 1, 32>}, {pipeline_mode = #tpu.pipeline_mode<synchronous>, transform_indices = @transform_38, window_bounds = array<i64: 1, 32>}, {pipeline_mode = #tpu.pipeline_mode<synchronous>, transform_indices = @transform_39, window_bounds = array<i64: 32, 64>}, {pipeline_mode = #tpu.pipeline_mode<synchronous>, transform_indices = @transform_40, window_bounds = array<i64: 32, 32>}, {pipeline_mode = #tpu.pipeline_mode<synchronous>, transform_indices = @transform_41, window_bounds = array<i64: 32, 32>}, {pipeline_mode = #tpu.pipeline_mode<synchronous>, transform_indices = @transform_42, window_bounds = array<i64: 1, 32>}, {pipeline_mode = #tpu.pipeline_mode<synchronous>, transform_indices = @transform_43, window_bounds = array<i64: 1, 32>}, {pipeline_mode = #tpu.pipeline_mode<synchronous>, transform_indices = @transform_44, window_bounds = array<i64: 1, 64>}, {pipeline_mode = #tpu.pipeline_mode<synchronous>, transform_indices = @transform_45, window_bounds = array<i64: 1, 32>}, {pipeline_mode = #tpu.pipeline_mode<synchronous>, transform_indices = @transform_46, window_bounds = array<i64: 1, 32>}, {pipeline_mode = #tpu.pipeline_mode<synchronous>, transform_indices = @transform_47, window_bounds = array<i64: 1, 32>}, {pipeline_mode = #tpu.pipeline_mode<synchronous>, transform_indices = @transform_48, window_bounds = array<i64: 32, 64>}, {pipeline_mode = #tpu.pipeline_mode<synchronous>, transform_indices = @transform_49, window_bounds = array<i64: 64, 32>}, {pipeline_mode = #tpu.pipeline_mode<synchronous>, transform_indices = @transform_50, window_bounds = array<i64: 1, 32>}, {pipeline_mode = #tpu.pipeline_mode<synchronous>, transform_indices = @transform_51, window_bounds = array<i64: 1, 96>}, {pipeline_mode = #tpu.pipeline_mode<synchronous>, transform_indices = @transform_52, window_bounds = array<i64: 1, 32>}, {pipeline_mode = #tpu.pipeline_mode<synchronous>, transform_indices = @transform_53, window_bounds = array<i64: 1, 32>}, {pipeline_mode = #tpu.pipeline_mode<synchronous>, transform_indices = @transform_54, window_bounds = array<i64: 32, 32>}, {pipeline_mode = #tpu.pipeline_mode<synchronous>, transform_indices = @transform_55, window_bounds = array<i64: 32, 96>}, {pipeline_mode = #tpu.pipeline_mode<synchronous>, transform_indices = @transform_56, window_bounds = array<i64: 1, 64>}, {pipeline_mode = #tpu.pipeline_mode<synchronous>, transform_indices = @transform_57, window_bounds = array<i64: 1, 32>}, {pipeline_mode = #tpu.pipeline_mode<synchronous>, transform_indices = @transform_58, window_bounds = array<i64: 1, 32>}, {pipeline_mode = #tpu.pipeline_mode<synchronous>, transform_indices = @transform_59, window_bounds = array<i64: 1, 32>}, {pipeline_mode = #tpu.pipeline_mode<synchronous>, transform_indices = @transform_60, window_bounds = array<i64: 32, 64>}, {pipeline_mode = #tpu.pipeline_mode<synchronous>, transform_indices = @transform_61, window_bounds = array<i64: 64, 32>}, {pipeline_mode = #tpu.pipeline_mode<synchronous>, transform_indices = @transform_62, window_bounds = array<i64: 1, 32>}, {pipeline_mode = #tpu.pipeline_mode<synchronous>, transform_indices = @transform_63, window_bounds = array<i64: 1, 96>}, {pipeline_mode = #tpu.pipeline_mode<synchronous>, transform_indices = @transform_64, window_bounds = array<i64: 1, 32>}, {pipeline_mode = #tpu.pipeline_mode<synchronous>, transform_indices = @transform_65, window_bounds = array<i64: 1, 32>}, {pipeline_mode = #tpu.pipeline_mode<synchronous>, transform_indices = @transform_66, window_bounds = array<i64: 32, 32>}, {pipeline_mode = #tpu.pipeline_mode<synchronous>, transform_indices = @transform_67, window_bounds = array<i64: 32, 96>}, {pipeline_mode = #tpu.pipeline_mode<synchronous>, transform_indices = @transform_68, window_bounds = array<i64: 1, 32>}, {pipeline_mode = #tpu.pipeline_mode<synchronous>, transform_indices = @transform_69, window_bounds = array<i64: 1, 32>}, {transform_indices = @transform_70, window_bounds = array<i64: 1, 2, 32, 16>}]} {
    %c0 = arith.constant 0 : index
    %c0_0 = arith.constant 0 : index
    %c0_1 = arith.constant 0 : index
    %c0_2 = arith.constant 0 : index
    %0 = vector.load %arg1[%c0, %c0_0, %c0_1, %c0_2] : memref<1x2x32x16xf32, #tpu.memory_space<vmem>>, vector<1x2x32x16xf32>
    %1 = vector.shape_cast %0 : vector<1x2x32x16xf32> to vector<2x32x16xf32>
    %2 = tpu.transpose %1, [0, 2, 1] : vector<2x32x16xf32> -> vector<2x16x32xf32>
    %3 = vector.shape_cast %2 : vector<2x16x32xf32> to vector<32x32xf32>
    %c0_3 = arith.constant 0 : index
    %c0_4 = arith.constant 0 : index
    %c0_5 = arith.constant 0 : index
    %c0_6 = arith.constant 0 : index
    %4 = vector.load %arg2[%c0_3, %c0_4, %c0_5, %c0_6] : memref<1x2x32x16xf32, #tpu.memory_space<vmem>>, vector<1x2x32x16xf32>
    %5 = vector.shape_cast %4 : vector<1x2x32x16xf32> to vector<2x32x16xf32>
    %6 = tpu.transpose %5, [0, 2, 1] : vector<2x32x16xf32> -> vector<2x16x32xf32>
    %7 = vector.shape_cast %6 : vector<2x16x32xf32> to vector<32x32xf32>
    %cst = arith.constant dense<0.000000e+00> : vector<32xf32>
    %8 = vector.multi_reduction <add>, %3, %cst [1] : vector<32x32xf32> to vector<32xf32>
    %9 = vector.shape_cast %8 : vector<32xf32> to vector<32x1xf32>
    %cst_7 = arith.constant 3.200000e+01 : f32
    %10 = vector.broadcast %cst_7 : f32 to vector<32x1xf32>
    %11 = arith.divf %9, %10 : vector<32x1xf32>
    %12 = vector.broadcast %11 : vector<32x1xf32> to vector<32x32xf32>
    %13 = arith.subf %3, %12 : vector<32x32xf32>
    %14 = arith.mulf %13, %13 : vector<32x32xf32>
    %cst_8 = arith.constant dense<0.000000e+00> : vector<32xf32>
    %15 = vector.multi_reduction <add>, %14, %cst_8 [1] : vector<32x32xf32> to vector<32xf32>
    %16 = vector.shape_cast %15 : vector<32xf32> to vector<32x1xf32>
    %cst_9 = arith.constant 0.0322580636 : f32
    %17 = vector.broadcast %cst_9 : f32 to vector<32x1xf32>
    %18 = arith.mulf %16, %17 : vector<32x1xf32>
    %19 = math.sqrt %18 : vector<32x1xf32>
    %cst_10 = arith.constant 9.99999997E-7 : f32
    %20 = vector.broadcast %cst_10 : f32 to vector<32x1xf32>
    %21 = arith.addf %19, %20 : vector<32x1xf32>
    %22 = tpu.reciprocal %21 : vector<32x1xf32> -> vector<32x1xf32>
    %c0_11 = arith.constant 0 : index
    %c0_12 = arith.constant 0 : index
    %23 = vector.load %arg53[%c0_11, %c0_12] : memref<1x32xf32, #tpu.memory_space<vmem>>, vector<1x32xf32>
    %24 = vector.broadcast %22 : vector<32x1xf32> to vector<32x32xf32>
    %25 = arith.mulf %13, %24 : vector<32x32xf32>
    %26 = vector.broadcast %23 : vector<1x32xf32> to vector<32x32xf32>
    %27 = arith.mulf %26, %25 : vector<32x32xf32>
    %c0_13 = arith.constant 0 : index
    %c0_14 = arith.constant 0 : index
    %28 = vector.load %arg54[%c0_13, %c0_14] : memref<1x32xf32, #tpu.memory_space<vmem>>, vector<1x32xf32>
    %29 = vector.broadcast %28 : vector<1x32xf32> to vector<32x32xf32>
    %30 = arith.addf %27, %29 : vector<32x32xf32>
    %c0_15 = arith.constant 0 : index
    %c0_16 = arith.constant 0 : index
    %31 = vector.load %arg56[%c0_15, %c0_16] : memref<32x96xf32, #tpu.memory_space<vmem>>, vector<32x96xf32>
    %cst_17 = arith.constant dense<0.000000e+00> : vector<32x96xf32>
    %32 = tpu.matmul %30, %31, %cst_17 {dimension_numbers = #tpu.dot_dimension_numbers<[1], [0], [0], [1], [0, 0, 1, 1], [], []>} : vector<32x32xf32>, vector<32x96xf32>, vector<32x96xf32> -> vector<32x96xf32>
    %c0_18 = arith.constant 0 : index
    %c0_19 = arith.constant 0 : index
    %33 = vector.load %arg52[%c0_18, %c0_19] : memref<1x96xf32, #tpu.memory_space<vmem>>, vector<1x96xf32>
    %34 = vector.broadcast %33 : vector<1x96xf32> to vector<32x96xf32>
    %35 = arith.addf %32, %34 : vector<32x96xf32>
    %36 = vector.extract_strided_slice %35 {offsets = [0, 0], sizes = [32, 32], strides = [1, 1]} : vector<32x96xf32> to vector<32x32xf32>
    %37 = vector.extract_strided_slice %35 {offsets = [0, 32], sizes = [32, 32], strides = [1, 1]} : vector<32x96xf32> to vector<32x32xf32>
    %38 = vector.extract_strided_slice %35 {offsets = [0, 64], sizes = [32, 32], strides = [1, 1]} : vector<32x96xf32> to vector<32x32xf32>
    %39 = vector.shape_cast %36 : vector<32x32xf32> to vector<2x16x32xf32>
    %cst_20 = arith.constant 0.353553385 : f32
    %40 = vector.broadcast %cst_20 : f32 to vector<2x16x32xf32>
    %41 = arith.mulf %39, %40 : vector<2x16x32xf32>
    %42 = vector.shape_cast %37 : vector<32x32xf32> to vector<2x16x32xf32>
    %43 = vector.shape_cast %38 : vector<32x32xf32> to vector<2x16x32xf32>
    %44 = vector.extract_strided_slice %41 {offsets = [0, 0, 0], sizes = [2, 16, 8], strides = [1, 1, 1]} : vector<2x16x32xf32> to vector<2x16x8xf32>
    %45 = vector.extract_strided_slice %41 {offsets = [0, 0, 8], sizes = [2, 16, 8], strides = [1, 1, 1]} : vector<2x16x32xf32> to vector<2x16x8xf32>
    %46 = vector.extract_strided_slice %41 {offsets = [0, 0, 16], sizes = [2, 16, 8], strides = [1, 1, 1]} : vector<2x16x32xf32> to vector<2x16x8xf32>
    %47 = vector.extract_strided_slice %41 {offsets = [0, 0, 24], sizes = [2, 16, 8], strides = [1, 1, 1]} : vector<2x16x32xf32> to vector<2x16x8xf32>
    %48 = tpu.concatenate %44, %45, %46, %47 in 0 : vector<2x16x8xf32>, vector<2x16x8xf32>, vector<2x16x8xf32>, vector<2x16x8xf32> -> vector<8x16x8xf32>
    %49 = vector.extract_strided_slice %42 {offsets = [0, 0, 0], sizes = [2, 16, 8], strides = [1, 1, 1]} : vector<2x16x32xf32> to vector<2x16x8xf32>
    %50 = vector.extract_strided_slice %42 {offsets = [0, 0, 8], sizes = [2, 16, 8], strides = [1, 1, 1]} : vector<2x16x32xf32> to vector<2x16x8xf32>
    %51 = vector.extract_strided_slice %42 {offsets = [0, 0, 16], sizes = [2, 16, 8], strides = [1, 1, 1]} : vector<2x16x32xf32> to vector<2x16x8xf32>
    %52 = vector.extract_strided_slice %42 {offsets = [0, 0, 24], sizes = [2, 16, 8], strides = [1, 1, 1]} : vector<2x16x32xf32> to vector<2x16x8xf32>
    %53 = tpu.concatenate %49, %50, %51, %52 in 0 : vector<2x16x8xf32>, vector<2x16x8xf32>, vector<2x16x8xf32>, vector<2x16x8xf32> -> vector<8x16x8xf32>
    %54 = vector.extract_strided_slice %43 {offsets = [0, 0, 0], sizes = [2, 16, 8], strides = [1, 1, 1]} : vector<2x16x32xf32> to vector<2x16x8xf32>
    %55 = vector.extract_strided_slice %43 {offsets = [0, 0, 8], sizes = [2, 16, 8], strides = [1, 1, 1]} : vector<2x16x32xf32> to vector<2x16x8xf32>
    %56 = vector.extract_strided_slice %43 {offsets = [0, 0, 16], sizes = [2, 16, 8], strides = [1, 1, 1]} : vector<2x16x32xf32> to vector<2x16x8xf32>
    %57 = vector.extract_strided_slice %43 {offsets = [0, 0, 24], sizes = [2, 16, 8], strides = [1, 1, 1]} : vector<2x16x32xf32> to vector<2x16x8xf32>
    %58 = tpu.concatenate %54, %55, %56, %57 in 0 : vector<2x16x8xf32>, vector<2x16x8xf32>, vector<2x16x8xf32>, vector<2x16x8xf32> -> vector<8x16x8xf32>
    "tpu.trace_start"() <{level = 10 : i32, message = "bqd,bkd->bqk"}> : () -> ()
    %cst_21 = arith.constant dense<0.000000e+00> : vector<8x16x16xf32>
    %59 = tpu.matmul %48, %53, %cst_21 {dimension_numbers = #tpu.dot_dimension_numbers<[2], [2], [1], [1], [0, 0, 0, 1, 1, 1], [0], [0]>} : vector<8x16x8xf32>, vector<8x16x8xf32>, vector<8x16x16xf32> -> vector<8x16x16xf32>
    "tpu.trace_stop"() : () -> ()
    %cst_22 = arith.constant dense<0xFF800000> : vector<8x16xf32>
    %60 = vector.multi_reduction <maximumf>, %59, %cst_22 [2] : vector<8x16x16xf32> to vector<8x16xf32>
    %61 = vector.shape_cast %60 : vector<8x16xf32> to vector<8x16x1xf32>
    %62 = vector.broadcast %61 : vector<8x16x1xf32> to vector<8x16x16xf32>
    %63 = arith.subf %59, %62 : vector<8x16x16xf32>
    %64 = math.exp %63 : vector<8x16x16xf32>
    %cst_23 = arith.constant dense<0.000000e+00> : vector<8x16xf32>
    %65 = vector.multi_reduction <add>, %64, %cst_23 [2] : vector<8x16x16xf32> to vector<8x16xf32>
    %66 = vector.shape_cast %65 : vector<8x16xf32> to vector<8x16x1xf32>
    %67 = tpu.reciprocal %66 : vector<8x16x1xf32> -> vector<8x16x1xf32>
    %68 = vector.broadcast %67 : vector<8x16x1xf32> to vector<8x16x16xf32>
    %69 = arith.mulf %64, %68 : vector<8x16x16xf32>
    "tpu.trace_start"() <{level = 10 : i32, message = "bqk,bkd->bqd"}> : () -> ()
    %cst_24 = arith.constant dense<0.000000e+00> : vector<8x16x8xf32>
    %70 = tpu.matmul %69, %58, %cst_24 {dimension_numbers = #tpu.dot_dimension_numbers<[2], [1], [1], [2], [0, 0, 0, 1, 1, 2], [0], [0]>} : vector<8x16x16xf32>, vector<8x16x8xf32>, vector<8x16x8xf32> -> vector<8x16x8xf32>
    "tpu.trace_stop"() : () -> ()
    %71 = vector.extract_strided_slice %70 {offsets = [0, 0, 0], sizes = [2, 16, 8], strides = [1, 1, 1]} : vector<8x16x8xf32> to vector<2x16x8xf32>
    %72 = vector.extract_strided_slice %70 {offsets = [2, 0, 0], sizes = [2, 16, 8], strides = [1, 1, 1]} : vector<8x16x8xf32> to vector<2x16x8xf32>
    %73 = vector.extract_strided_slice %70 {offsets = [4, 0, 0], sizes = [2, 16, 8], strides = [1, 1, 1]} : vector<8x16x8xf32> to vector<2x16x8xf32>
    %74 = vector.extract_strided_slice %70 {offsets = [6, 0, 0], sizes = [2, 16, 8], strides = [1, 1, 1]} : vector<8x16x8xf32> to vector<2x16x8xf32>
    %75 = tpu.concatenate %71, %72, %73, %74 in 2 : vector<2x16x8xf32>, vector<2x16x8xf32>, vector<2x16x8xf32>, vector<2x16x8xf32> -> vector<2x16x32xf32>
    %76 = vector.shape_cast %75 : vector<2x16x32xf32> to vector<32x32xf32>
    %c0_25 = arith.constant 0 : index
    %c0_26 = arith.constant 0 : index
    %77 = vector.load %arg55[%c0_25, %c0_26] : memref<32x32xf32, #tpu.memory_space<vmem>>, vector<32x32xf32>
    %cst_27 = arith.constant dense<0.000000e+00> : vector<32x32xf32>
    %78 = tpu.matmul %76, %77, %cst_27 {dimension_numbers = #tpu.dot_dimension_numbers<[1], [0], [0], [1], [0, 0, 1, 1], [], []>} : vector<32x32xf32>, vector<32x32xf32>, vector<32x32xf32> -> vector<32x32xf32>
    %c0_28 = arith.constant 0 : index
    %c0_29 = arith.constant 0 : index
    %79 = vector.load %arg51[%c0_28, %c0_29] : memref<1x32xf32, #tpu.memory_space<vmem>>, vector<1x32xf32>
    %80 = vector.broadcast %79 : vector<1x32xf32> to vector<32x32xf32>
    %81 = arith.addf %78, %80 : vector<32x32xf32>
    %82 = arith.addf %3, %81 : vector<32x32xf32>
    %cst_30 = arith.constant dense<0.000000e+00> : vector<32xf32>
    %83 = vector.multi_reduction <add>, %82, %cst_30 [1] : vector<32x32xf32> to vector<32xf32>
    %84 = vector.shape_cast %83 : vector<32xf32> to vector<32x1xf32>
    %cst_31 = arith.constant 3.200000e+01 : f32
    %85 = vector.broadcast %cst_31 : f32 to vector<32x1xf32>
    %86 = arith.divf %84, %85 : vector<32x1xf32>
    %87 = vector.broadcast %86 : vector<32x1xf32> to vector<32x32xf32>
    %88 = arith.subf %82, %87 : vector<32x32xf32>
    %89 = arith.mulf %88, %88 : vector<32x32xf32>
    %cst_32 = arith.constant dense<0.000000e+00> : vector<32xf32>
    %90 = vector.multi_reduction <add>, %89, %cst_32 [1] : vector<32x32xf32> to vector<32xf32>
    %91 = vector.shape_cast %90 : vector<32xf32> to vector<32x1xf32>
    %cst_33 = arith.constant 0.0322580636 : f32
    %92 = vector.broadcast %cst_33 : f32 to vector<32x1xf32>
    %93 = arith.mulf %91, %92 : vector<32x1xf32>
    %94 = math.sqrt %93 : vector<32x1xf32>
    %cst_34 = arith.constant 9.99999997E-7 : f32
    %95 = vector.broadcast %cst_34 : f32 to vector<32x1xf32>
    %96 = arith.addf %94, %95 : vector<32x1xf32>
    %97 = tpu.reciprocal %96 : vector<32x1xf32> -> vector<32x1xf32>
    %c0_35 = arith.constant 0 : index
    %c0_36 = arith.constant 0 : index
    %98 = vector.load %arg47[%c0_35, %c0_36] : memref<1x32xf32, #tpu.memory_space<vmem>>, vector<1x32xf32>
    %99 = vector.broadcast %97 : vector<32x1xf32> to vector<32x32xf32>
    %100 = arith.mulf %88, %99 : vector<32x32xf32>
    %101 = vector.broadcast %98 : vector<1x32xf32> to vector<32x32xf32>
    %102 = arith.mulf %101, %100 : vector<32x32xf32>
    %c0_37 = arith.constant 0 : index
    %c0_38 = arith.constant 0 : index
    %103 = vector.load %arg48[%c0_37, %c0_38] : memref<1x32xf32, #tpu.memory_space<vmem>>, vector<1x32xf32>
    %104 = vector.broadcast %103 : vector<1x32xf32> to vector<32x32xf32>
    %105 = arith.addf %102, %104 : vector<32x32xf32>
    %c0_39 = arith.constant 0 : index
    %c0_40 = arith.constant 0 : index
    %106 = vector.load %arg49[%c0_39, %c0_40] : memref<32x64xf32, #tpu.memory_space<vmem>>, vector<32x64xf32>
    %cst_41 = arith.constant dense<0.000000e+00> : vector<32x64xf32>
    %107 = tpu.matmul %105, %106, %cst_41 {dimension_numbers = #tpu.dot_dimension_numbers<[1], [0], [0], [1], [0, 0, 1, 1], [], []>} : vector<32x32xf32>, vector<32x64xf32>, vector<32x64xf32> -> vector<32x64xf32>
    %c0_42 = arith.constant 0 : index
    %c0_43 = arith.constant 0 : index
    %108 = vector.load %arg45[%c0_42, %c0_43] : memref<1x64xf32, #tpu.memory_space<vmem>>, vector<1x64xf32>
    %109 = vector.broadcast %108 : vector<1x64xf32> to vector<32x64xf32>
    %110 = arith.addf %107, %109 : vector<32x64xf32>
    %cst_44 = arith.constant 0.000000e+00 : f32
    %111 = vector.broadcast %cst_44 : f32 to vector<32x64xf32>
    %112 = arith.maximumf %110, %111 : vector<32x64xf32>
    %c0_45 = arith.constant 0 : index
    %c0_46 = arith.constant 0 : index
    %113 = vector.load %arg50[%c0_45, %c0_46] : memref<64x32xf32, #tpu.memory_space<vmem>>, vector<64x32xf32>
    %cst_47 = arith.constant dense<0.000000e+00> : vector<32x32xf32>
    %114 = tpu.matmul %112, %113, %cst_47 {dimension_numbers = #tpu.dot_dimension_numbers<[1], [0], [0], [1], [0, 0, 1, 1], [], []>} : vector<32x64xf32>, vector<64x32xf32>, vector<32x32xf32> -> vector<32x32xf32>
    %c0_48 = arith.constant 0 : index
    %c0_49 = arith.constant 0 : index
    %115 = vector.load %arg46[%c0_48, %c0_49] : memref<1x32xf32, #tpu.memory_space<vmem>>, vector<1x32xf32>
    %116 = vector.broadcast %115 : vector<1x32xf32> to vector<32x32xf32>
    %117 = arith.addf %114, %116 : vector<32x32xf32>
    %118 = arith.addf %82, %117 : vector<32x32xf32>
    %cst_50 = arith.constant dense<0.000000e+00> : vector<32xf32>
    %119 = vector.multi_reduction <add>, %118, %cst_50 [1] : vector<32x32xf32> to vector<32xf32>
    %120 = vector.shape_cast %119 : vector<32xf32> to vector<32x1xf32>
    %cst_51 = arith.constant 3.200000e+01 : f32
    %121 = vector.broadcast %cst_51 : f32 to vector<32x1xf32>
    %122 = arith.divf %120, %121 : vector<32x1xf32>
    %123 = vector.broadcast %122 : vector<32x1xf32> to vector<32x32xf32>
    %124 = arith.subf %118, %123 : vector<32x32xf32>
    %125 = arith.mulf %124, %124 : vector<32x32xf32>
    %cst_52 = arith.constant dense<0.000000e+00> : vector<32xf32>
    %126 = vector.multi_reduction <add>, %125, %cst_52 [1] : vector<32x32xf32> to vector<32xf32>
    %127 = vector.shape_cast %126 : vector<32xf32> to vector<32x1xf32>
    %cst_53 = arith.constant 0.0322580636 : f32
    %128 = vector.broadcast %cst_53 : f32 to vector<32x1xf32>
    %129 = arith.mulf %127, %128 : vector<32x1xf32>
    %130 = math.sqrt %129 : vector<32x1xf32>
    %cst_54 = arith.constant 9.99999997E-7 : f32
    %131 = vector.broadcast %cst_54 : f32 to vector<32x1xf32>
    %132 = arith.addf %130, %131 : vector<32x1xf32>
    %133 = tpu.reciprocal %132 : vector<32x1xf32> -> vector<32x1xf32>
    %c0_55 = arith.constant 0 : index
    %c0_56 = arith.constant 0 : index
    %134 = vector.load %arg65[%c0_55, %c0_56] : memref<1x32xf32, #tpu.memory_space<vmem>>, vector<1x32xf32>
    %135 = vector.broadcast %133 : vector<32x1xf32> to vector<32x32xf32>
    %136 = arith.mulf %124, %135 : vector<32x32xf32>
    %137 = vector.broadcast %134 : vector<1x32xf32> to vector<32x32xf32>
    %138 = arith.mulf %137, %136 : vector<32x32xf32>
    %c0_57 = arith.constant 0 : index
    %c0_58 = arith.constant 0 : index
    %139 = vector.load %arg66[%c0_57, %c0_58] : memref<1x32xf32, #tpu.memory_space<vmem>>, vector<1x32xf32>
    %140 = vector.broadcast %139 : vector<1x32xf32> to vector<32x32xf32>
    %141 = arith.addf %138, %140 : vector<32x32xf32>
    %c0_59 = arith.constant 0 : index
    %c0_60 = arith.constant 0 : index
    %142 = vector.load %arg68[%c0_59, %c0_60] : memref<32x96xf32, #tpu.memory_space<vmem>>, vector<32x96xf32>
    %cst_61 = arith.constant dense<0.000000e+00> : vector<32x96xf32>
    %143 = tpu.matmul %141, %142, %cst_61 {dimension_numbers = #tpu.dot_dimension_numbers<[1], [0], [0], [1], [0, 0, 1, 1], [], []>} : vector<32x32xf32>, vector<32x96xf32>, vector<32x96xf32> -> vector<32x96xf32>
    %c0_62 = arith.constant 0 : index
    %c0_63 = arith.constant 0 : index
    %144 = vector.load %arg64[%c0_62, %c0_63] : memref<1x96xf32, #tpu.memory_space<vmem>>, vector<1x96xf32>
    %145 = vector.broadcast %144 : vector<1x96xf32> to vector<32x96xf32>
    %146 = arith.addf %143, %145 : vector<32x96xf32>
    %147 = vector.extract_strided_slice %146 {offsets = [0, 0], sizes = [32, 32], strides = [1, 1]} : vector<32x96xf32> to vector<32x32xf32>
    %148 = vector.extract_strided_slice %146 {offsets = [0, 32], sizes = [32, 32], strides = [1, 1]} : vector<32x96xf32> to vector<32x32xf32>
    %149 = vector.extract_strided_slice %146 {offsets = [0, 64], sizes = [32, 32], strides = [1, 1]} : vector<32x96xf32> to vector<32x32xf32>
    %150 = vector.shape_cast %147 : vector<32x32xf32> to vector<2x16x32xf32>
    %cst_64 = arith.constant 0.353553385 : f32
    %151 = vector.broadcast %cst_64 : f32 to vector<2x16x32xf32>
    %152 = arith.mulf %150, %151 : vector<2x16x32xf32>
    %153 = vector.shape_cast %148 : vector<32x32xf32> to vector<2x16x32xf32>
    %154 = vector.shape_cast %149 : vector<32x32xf32> to vector<2x16x32xf32>
    %155 = vector.extract_strided_slice %152 {offsets = [0, 0, 0], sizes = [2, 16, 8], strides = [1, 1, 1]} : vector<2x16x32xf32> to vector<2x16x8xf32>
    %156 = vector.extract_strided_slice %152 {offsets = [0, 0, 8], sizes = [2, 16, 8], strides = [1, 1, 1]} : vector<2x16x32xf32> to vector<2x16x8xf32>
    %157 = vector.extract_strided_slice %152 {offsets = [0, 0, 16], sizes = [2, 16, 8], strides = [1, 1, 1]} : vector<2x16x32xf32> to vector<2x16x8xf32>
    %158 = vector.extract_strided_slice %152 {offsets = [0, 0, 24], sizes = [2, 16, 8], strides = [1, 1, 1]} : vector<2x16x32xf32> to vector<2x16x8xf32>
    %159 = tpu.concatenate %155, %156, %157, %158 in 0 : vector<2x16x8xf32>, vector<2x16x8xf32>, vector<2x16x8xf32>, vector<2x16x8xf32> -> vector<8x16x8xf32>
    %160 = vector.extract_strided_slice %153 {offsets = [0, 0, 0], sizes = [2, 16, 8], strides = [1, 1, 1]} : vector<2x16x32xf32> to vector<2x16x8xf32>
    %161 = vector.extract_strided_slice %153 {offsets = [0, 0, 8], sizes = [2, 16, 8], strides = [1, 1, 1]} : vector<2x16x32xf32> to vector<2x16x8xf32>
    %162 = vector.extract_strided_slice %153 {offsets = [0, 0, 16], sizes = [2, 16, 8], strides = [1, 1, 1]} : vector<2x16x32xf32> to vector<2x16x8xf32>
    %163 = vector.extract_strided_slice %153 {offsets = [0, 0, 24], sizes = [2, 16, 8], strides = [1, 1, 1]} : vector<2x16x32xf32> to vector<2x16x8xf32>
    %164 = tpu.concatenate %160, %161, %162, %163 in 0 : vector<2x16x8xf32>, vector<2x16x8xf32>, vector<2x16x8xf32>, vector<2x16x8xf32> -> vector<8x16x8xf32>
    %165 = vector.extract_strided_slice %154 {offsets = [0, 0, 0], sizes = [2, 16, 8], strides = [1, 1, 1]} : vector<2x16x32xf32> to vector<2x16x8xf32>
    %166 = vector.extract_strided_slice %154 {offsets = [0, 0, 8], sizes = [2, 16, 8], strides = [1, 1, 1]} : vector<2x16x32xf32> to vector<2x16x8xf32>
    %167 = vector.extract_strided_slice %154 {offsets = [0, 0, 16], sizes = [2, 16, 8], strides = [1, 1, 1]} : vector<2x16x32xf32> to vector<2x16x8xf32>
    %168 = vector.extract_strided_slice %154 {offsets = [0, 0, 24], sizes = [2, 16, 8], strides = [1, 1, 1]} : vector<2x16x32xf32> to vector<2x16x8xf32>
    %169 = tpu.concatenate %165, %166, %167, %168 in 0 : vector<2x16x8xf32>, vector<2x16x8xf32>, vector<2x16x8xf32>, vector<2x16x8xf32> -> vector<8x16x8xf32>
    "tpu.trace_start"() <{level = 10 : i32, message = "bqd,bkd->bqk"}> : () -> ()
    %cst_65 = arith.constant dense<0.000000e+00> : vector<8x16x16xf32>
    %170 = tpu.matmul %159, %164, %cst_65 {dimension_numbers = #tpu.dot_dimension_numbers<[2], [2], [1], [1], [0, 0, 0, 1, 1, 1], [0], [0]>} : vector<8x16x8xf32>, vector<8x16x8xf32>, vector<8x16x16xf32> -> vector<8x16x16xf32>
    "tpu.trace_stop"() : () -> ()
    %cst_66 = arith.constant dense<0xFF800000> : vector<8x16xf32>
    %171 = vector.multi_reduction <maximumf>, %170, %cst_66 [2] : vector<8x16x16xf32> to vector<8x16xf32>
    %172 = vector.shape_cast %171 : vector<8x16xf32> to vector<8x16x1xf32>
    %173 = vector.broadcast %172 : vector<8x16x1xf32> to vector<8x16x16xf32>
    %174 = arith.subf %170, %173 : vector<8x16x16xf32>
    %175 = math.exp %174 : vector<8x16x16xf32>
    %cst_67 = arith.constant dense<0.000000e+00> : vector<8x16xf32>
    %176 = vector.multi_reduction <add>, %175, %cst_67 [2] : vector<8x16x16xf32> to vector<8x16xf32>
    %177 = vector.shape_cast %176 : vector<8x16xf32> to vector<8x16x1xf32>
    %178 = tpu.reciprocal %177 : vector<8x16x1xf32> -> vector<8x16x1xf32>
    %179 = vector.broadcast %178 : vector<8x16x1xf32> to vector<8x16x16xf32>
    %180 = arith.mulf %175, %179 : vector<8x16x16xf32>
    "tpu.trace_start"() <{level = 10 : i32, message = "bqk,bkd->bqd"}> : () -> ()
    %cst_68 = arith.constant dense<0.000000e+00> : vector<8x16x8xf32>
    %181 = tpu.matmul %180, %169, %cst_68 {dimension_numbers = #tpu.dot_dimension_numbers<[2], [1], [1], [2], [0, 0, 0, 1, 1, 2], [0], [0]>} : vector<8x16x16xf32>, vector<8x16x8xf32>, vector<8x16x8xf32> -> vector<8x16x8xf32>
    "tpu.trace_stop"() : () -> ()
    %182 = vector.extract_strided_slice %181 {offsets = [0, 0, 0], sizes = [2, 16, 8], strides = [1, 1, 1]} : vector<8x16x8xf32> to vector<2x16x8xf32>
    %183 = vector.extract_strided_slice %181 {offsets = [2, 0, 0], sizes = [2, 16, 8], strides = [1, 1, 1]} : vector<8x16x8xf32> to vector<2x16x8xf32>
    %184 = vector.extract_strided_slice %181 {offsets = [4, 0, 0], sizes = [2, 16, 8], strides = [1, 1, 1]} : vector<8x16x8xf32> to vector<2x16x8xf32>
    %185 = vector.extract_strided_slice %181 {offsets = [6, 0, 0], sizes = [2, 16, 8], strides = [1, 1, 1]} : vector<8x16x8xf32> to vector<2x16x8xf32>
    %186 = tpu.concatenate %182, %183, %184, %185 in 2 : vector<2x16x8xf32>, vector<2x16x8xf32>, vector<2x16x8xf32>, vector<2x16x8xf32> -> vector<2x16x32xf32>
    %187 = vector.shape_cast %186 : vector<2x16x32xf32> to vector<32x32xf32>
    %c0_69 = arith.constant 0 : index
    %c0_70 = arith.constant 0 : index
    %188 = vector.load %arg67[%c0_69, %c0_70] : memref<32x32xf32, #tpu.memory_space<vmem>>, vector<32x32xf32>
    %cst_71 = arith.constant dense<0.000000e+00> : vector<32x32xf32>
    %189 = tpu.matmul %187, %188, %cst_71 {dimension_numbers = #tpu.dot_dimension_numbers<[1], [0], [0], [1], [0, 0, 1, 1], [], []>} : vector<32x32xf32>, vector<32x32xf32>, vector<32x32xf32> -> vector<32x32xf32>
    %c0_72 = arith.constant 0 : index
    %c0_73 = arith.constant 0 : index
    %190 = vector.load %arg63[%c0_72, %c0_73] : memref<1x32xf32, #tpu.memory_space<vmem>>, vector<1x32xf32>
    %191 = vector.broadcast %190 : vector<1x32xf32> to vector<32x32xf32>
    %192 = arith.addf %189, %191 : vector<32x32xf32>
    %193 = arith.addf %118, %192 : vector<32x32xf32>
    %cst_74 = arith.constant dense<0.000000e+00> : vector<32xf32>
    %194 = vector.multi_reduction <add>, %193, %cst_74 [1] : vector<32x32xf32> to vector<32xf32>
    %195 = vector.shape_cast %194 : vector<32xf32> to vector<32x1xf32>
    %cst_75 = arith.constant 3.200000e+01 : f32
    %196 = vector.broadcast %cst_75 : f32 to vector<32x1xf32>
    %197 = arith.divf %195, %196 : vector<32x1xf32>
    %198 = vector.broadcast %197 : vector<32x1xf32> to vector<32x32xf32>
    %199 = arith.subf %193, %198 : vector<32x32xf32>
    %200 = arith.mulf %199, %199 : vector<32x32xf32>
    %cst_76 = arith.constant dense<0.000000e+00> : vector<32xf32>
    %201 = vector.multi_reduction <add>, %200, %cst_76 [1] : vector<32x32xf32> to vector<32xf32>
    %202 = vector.shape_cast %201 : vector<32xf32> to vector<32x1xf32>
    %cst_77 = arith.constant 0.0322580636 : f32
    %203 = vector.broadcast %cst_77 : f32 to vector<32x1xf32>
    %204 = arith.mulf %202, %203 : vector<32x1xf32>
    %205 = math.sqrt %204 : vector<32x1xf32>
    %cst_78 = arith.constant 9.99999997E-7 : f32
    %206 = vector.broadcast %cst_78 : f32 to vector<32x1xf32>
    %207 = arith.addf %205, %206 : vector<32x1xf32>
    %208 = tpu.reciprocal %207 : vector<32x1xf32> -> vector<32x1xf32>
    %c0_79 = arith.constant 0 : index
    %c0_80 = arith.constant 0 : index
    %209 = vector.load %arg59[%c0_79, %c0_80] : memref<1x32xf32, #tpu.memory_space<vmem>>, vector<1x32xf32>
    %210 = vector.broadcast %208 : vector<32x1xf32> to vector<32x32xf32>
    %211 = arith.mulf %199, %210 : vector<32x32xf32>
    %212 = vector.broadcast %209 : vector<1x32xf32> to vector<32x32xf32>
    %213 = arith.mulf %212, %211 : vector<32x32xf32>
    %c0_81 = arith.constant 0 : index
    %c0_82 = arith.constant 0 : index
    %214 = vector.load %arg60[%c0_81, %c0_82] : memref<1x32xf32, #tpu.memory_space<vmem>>, vector<1x32xf32>
    %215 = vector.broadcast %214 : vector<1x32xf32> to vector<32x32xf32>
    %216 = arith.addf %213, %215 : vector<32x32xf32>
    %c0_83 = arith.constant 0 : index
    %c0_84 = arith.constant 0 : index
    %217 = vector.load %arg61[%c0_83, %c0_84] : memref<32x64xf32, #tpu.memory_space<vmem>>, vector<32x64xf32>
    %cst_85 = arith.constant dense<0.000000e+00> : vector<32x64xf32>
    %218 = tpu.matmul %216, %217, %cst_85 {dimension_numbers = #tpu.dot_dimension_numbers<[1], [0], [0], [1], [0, 0, 1, 1], [], []>} : vector<32x32xf32>, vector<32x64xf32>, vector<32x64xf32> -> vector<32x64xf32>
    %c0_86 = arith.constant 0 : index
    %c0_87 = arith.constant 0 : index
    %219 = vector.load %arg57[%c0_86, %c0_87] : memref<1x64xf32, #tpu.memory_space<vmem>>, vector<1x64xf32>
    %220 = vector.broadcast %219 : vector<1x64xf32> to vector<32x64xf32>
    %221 = arith.addf %218, %220 : vector<32x64xf32>
    %cst_88 = arith.constant 0.000000e+00 : f32
    %222 = vector.broadcast %cst_88 : f32 to vector<32x64xf32>
    %223 = arith.maximumf %221, %222 : vector<32x64xf32>
    %c0_89 = arith.constant 0 : index
    %c0_90 = arith.constant 0 : index
    %224 = vector.load %arg62[%c0_89, %c0_90] : memref<64x32xf32, #tpu.memory_space<vmem>>, vector<64x32xf32>
    %cst_91 = arith.constant dense<0.000000e+00> : vector<32x32xf32>
    %225 = tpu.matmul %223, %224, %cst_91 {dimension_numbers = #tpu.dot_dimension_numbers<[1], [0], [0], [1], [0, 0, 1, 1], [], []>} : vector<32x64xf32>, vector<64x32xf32>, vector<32x32xf32> -> vector<32x32xf32>
    %c0_92 = arith.constant 0 : index
    %c0_93 = arith.constant 0 : index
    %226 = vector.load %arg58[%c0_92, %c0_93] : memref<1x32xf32, #tpu.memory_space<vmem>>, vector<1x32xf32>
    %227 = vector.broadcast %226 : vector<1x32xf32> to vector<32x32xf32>
    %228 = arith.addf %225, %227 : vector<32x32xf32>
    %229 = arith.addf %193, %228 : vector<32x32xf32>
    %cst_94 = arith.constant dense<0.000000e+00> : vector<32xf32>
    %230 = vector.multi_reduction <add>, %229, %cst_94 [1] : vector<32x32xf32> to vector<32xf32>
    %231 = vector.shape_cast %230 : vector<32xf32> to vector<32x1xf32>
    %cst_95 = arith.constant 3.200000e+01 : f32
    %232 = vector.broadcast %cst_95 : f32 to vector<32x1xf32>
    %233 = arith.divf %231, %232 : vector<32x1xf32>
    %234 = vector.broadcast %233 : vector<32x1xf32> to vector<32x32xf32>
    %235 = arith.subf %229, %234 : vector<32x32xf32>
    %236 = arith.mulf %235, %235 : vector<32x32xf32>
    %cst_96 = arith.constant dense<0.000000e+00> : vector<32xf32>
    %237 = vector.multi_reduction <add>, %236, %cst_96 [1] : vector<32x32xf32> to vector<32xf32>
    %238 = vector.shape_cast %237 : vector<32xf32> to vector<32x1xf32>
    %cst_97 = arith.constant 0.0322580636 : f32
    %239 = vector.broadcast %cst_97 : f32 to vector<32x1xf32>
    %240 = arith.mulf %238, %239 : vector<32x1xf32>
    %241 = math.sqrt %240 : vector<32x1xf32>
    %cst_98 = arith.constant 9.99999997E-7 : f32
    %242 = vector.broadcast %cst_98 : f32 to vector<32x1xf32>
    %243 = arith.addf %241, %242 : vector<32x1xf32>
    %244 = tpu.reciprocal %243 : vector<32x1xf32> -> vector<32x1xf32>
    %c0_99 = arith.constant 0 : index
    %c0_100 = arith.constant 0 : index
    %245 = vector.load %arg69[%c0_99, %c0_100] : memref<1x32xf32, #tpu.memory_space<vmem>>, vector<1x32xf32>
    %246 = vector.broadcast %244 : vector<32x1xf32> to vector<32x32xf32>
    %247 = arith.mulf %235, %246 : vector<32x32xf32>
    %248 = vector.broadcast %245 : vector<1x32xf32> to vector<32x32xf32>
    %249 = arith.mulf %248, %247 : vector<32x32xf32>
    %c0_101 = arith.constant 0 : index
    %c0_102 = arith.constant 0 : index
    %250 = vector.load %arg70[%c0_101, %c0_102] : memref<1x32xf32, #tpu.memory_space<vmem>>, vector<1x32xf32>
    %251 = vector.broadcast %250 : vector<1x32xf32> to vector<32x32xf32>
    %252 = arith.addf %249, %251 : vector<32x32xf32>
    %cst_103 = arith.constant dense<0.000000e+00> : vector<32xf32>
    %253 = vector.multi_reduction <add>, %7, %cst_103 [1] : vector<32x32xf32> to vector<32xf32>
    %254 = vector.shape_cast %253 : vector<32xf32> to vector<32x1xf32>
    %cst_104 = arith.constant 3.200000e+01 : f32
    %255 = vector.broadcast %cst_104 : f32 to vector<32x1xf32>
    %256 = arith.divf %254, %255 : vector<32x1xf32>
    %257 = vector.broadcast %256 : vector<32x1xf32> to vector<32x32xf32>
    %258 = arith.subf %7, %257 : vector<32x32xf32>
    %259 = arith.mulf %258, %258 : vector<32x32xf32>
    %cst_105 = arith.constant dense<0.000000e+00> : vector<32xf32>
    %260 = vector.multi_reduction <add>, %259, %cst_105 [1] : vector<32x32xf32> to vector<32xf32>
    %261 = vector.shape_cast %260 : vector<32xf32> to vector<32x1xf32>
    %cst_106 = arith.constant 0.0322580636 : f32
    %262 = vector.broadcast %cst_106 : f32 to vector<32x1xf32>
    %263 = arith.mulf %261, %262 : vector<32x1xf32>
    %264 = math.sqrt %263 : vector<32x1xf32>
    %cst_107 = arith.constant 9.99999997E-7 : f32
    %265 = vector.broadcast %cst_107 : f32 to vector<32x1xf32>
    %266 = arith.addf %264, %265 : vector<32x1xf32>
    %267 = tpu.reciprocal %266 : vector<32x1xf32> -> vector<32x1xf32>
    %c0_108 = arith.constant 0 : index
    %c0_109 = arith.constant 0 : index
    %268 = vector.load %arg11[%c0_108, %c0_109] : memref<1x32xf32, #tpu.memory_space<vmem>>, vector<1x32xf32>
    %269 = vector.broadcast %267 : vector<32x1xf32> to vector<32x32xf32>
    %270 = arith.mulf %258, %269 : vector<32x32xf32>
    %271 = vector.broadcast %268 : vector<1x32xf32> to vector<32x32xf32>
    %272 = arith.mulf %271, %270 : vector<32x32xf32>
    %c0_110 = arith.constant 0 : index
    %c0_111 = arith.constant 0 : index
    %273 = vector.load %arg12[%c0_110, %c0_111] : memref<1x32xf32, #tpu.memory_space<vmem>>, vector<1x32xf32>
    %274 = vector.broadcast %273 : vector<1x32xf32> to vector<32x32xf32>
    %275 = arith.addf %272, %274 : vector<32x32xf32>
    %c0_112 = arith.constant 0 : index
    %c0_113 = arith.constant 0 : index
    %276 = vector.load %arg14[%c0_112, %c0_113] : memref<32x96xf32, #tpu.memory_space<vmem>>, vector<32x96xf32>
    %cst_114 = arith.constant dense<0.000000e+00> : vector<32x96xf32>
    %277 = tpu.matmul %275, %276, %cst_114 {dimension_numbers = #tpu.dot_dimension_numbers<[1], [0], [0], [1], [0, 0, 1, 1], [], []>} : vector<32x32xf32>, vector<32x96xf32>, vector<32x96xf32> -> vector<32x96xf32>
    %c0_115 = arith.constant 0 : index
    %c0_116 = arith.constant 0 : index
    %278 = vector.load %arg10[%c0_115, %c0_116] : memref<1x96xf32, #tpu.memory_space<vmem>>, vector<1x96xf32>
    %279 = vector.broadcast %278 : vector<1x96xf32> to vector<32x96xf32>
    %280 = arith.addf %277, %279 : vector<32x96xf32>
    %281 = vector.extract_strided_slice %280 {offsets = [0, 0], sizes = [32, 32], strides = [1, 1]} : vector<32x96xf32> to vector<32x32xf32>
    %282 = vector.extract_strided_slice %280 {offsets = [0, 32], sizes = [32, 32], strides = [1, 1]} : vector<32x96xf32> to vector<32x32xf32>
    %283 = vector.extract_strided_slice %280 {offsets = [0, 64], sizes = [32, 32], strides = [1, 1]} : vector<32x96xf32> to vector<32x32xf32>
    %284 = vector.shape_cast %281 : vector<32x32xf32> to vector<2x16x32xf32>
    %cst_117 = arith.constant 0.353553385 : f32
    %285 = vector.broadcast %cst_117 : f32 to vector<2x16x32xf32>
    %286 = arith.mulf %284, %285 : vector<2x16x32xf32>
    %287 = vector.shape_cast %282 : vector<32x32xf32> to vector<2x16x32xf32>
    %288 = vector.shape_cast %283 : vector<32x32xf32> to vector<2x16x32xf32>
    %289 = vector.extract_strided_slice %286 {offsets = [0, 0, 0], sizes = [2, 16, 8], strides = [1, 1, 1]} : vector<2x16x32xf32> to vector<2x16x8xf32>
    %290 = vector.extract_strided_slice %286 {offsets = [0, 0, 8], sizes = [2, 16, 8], strides = [1, 1, 1]} : vector<2x16x32xf32> to vector<2x16x8xf32>
    %291 = vector.extract_strided_slice %286 {offsets = [0, 0, 16], sizes = [2, 16, 8], strides = [1, 1, 1]} : vector<2x16x32xf32> to vector<2x16x8xf32>
    %292 = vector.extract_strided_slice %286 {offsets = [0, 0, 24], sizes = [2, 16, 8], strides = [1, 1, 1]} : vector<2x16x32xf32> to vector<2x16x8xf32>
    %293 = tpu.concatenate %289, %290, %291, %292 in 0 : vector<2x16x8xf32>, vector<2x16x8xf32>, vector<2x16x8xf32>, vector<2x16x8xf32> -> vector<8x16x8xf32>
    %294 = vector.extract_strided_slice %287 {offsets = [0, 0, 0], sizes = [2, 16, 8], strides = [1, 1, 1]} : vector<2x16x32xf32> to vector<2x16x8xf32>
    %295 = vector.extract_strided_slice %287 {offsets = [0, 0, 8], sizes = [2, 16, 8], strides = [1, 1, 1]} : vector<2x16x32xf32> to vector<2x16x8xf32>
    %296 = vector.extract_strided_slice %287 {offsets = [0, 0, 16], sizes = [2, 16, 8], strides = [1, 1, 1]} : vector<2x16x32xf32> to vector<2x16x8xf32>
    %297 = vector.extract_strided_slice %287 {offsets = [0, 0, 24], sizes = [2, 16, 8], strides = [1, 1, 1]} : vector<2x16x32xf32> to vector<2x16x8xf32>
    %298 = tpu.concatenate %294, %295, %296, %297 in 0 : vector<2x16x8xf32>, vector<2x16x8xf32>, vector<2x16x8xf32>, vector<2x16x8xf32> -> vector<8x16x8xf32>
    %299 = vector.extract_strided_slice %288 {offsets = [0, 0, 0], sizes = [2, 16, 8], strides = [1, 1, 1]} : vector<2x16x32xf32> to vector<2x16x8xf32>
    %300 = vector.extract_strided_slice %288 {offsets = [0, 0, 8], sizes = [2, 16, 8], strides = [1, 1, 1]} : vector<2x16x32xf32> to vector<2x16x8xf32>
    %301 = vector.extract_strided_slice %288 {offsets = [0, 0, 16], sizes = [2, 16, 8], strides = [1, 1, 1]} : vector<2x16x32xf32> to vector<2x16x8xf32>
    %302 = vector.extract_strided_slice %288 {offsets = [0, 0, 24], sizes = [2, 16, 8], strides = [1, 1, 1]} : vector<2x16x32xf32> to vector<2x16x8xf32>
    %303 = tpu.concatenate %299, %300, %301, %302 in 0 : vector<2x16x8xf32>, vector<2x16x8xf32>, vector<2x16x8xf32>, vector<2x16x8xf32> -> vector<8x16x8xf32>
    "tpu.trace_start"() <{level = 10 : i32, message = "bqd,bkd->bqk"}> : () -> ()
    %cst_118 = arith.constant dense<0.000000e+00> : vector<8x16x16xf32>
    %304 = tpu.matmul %293, %298, %cst_118 {dimension_numbers = #tpu.dot_dimension_numbers<[2], [2], [1], [1], [0, 0, 0, 1, 1, 1], [0], [0]>} : vector<8x16x8xf32>, vector<8x16x8xf32>, vector<8x16x16xf32> -> vector<8x16x16xf32>
    "tpu.trace_stop"() : () -> ()
    %cst_119 = arith.constant dense<0xFF800000> : vector<8x16xf32>
    %305 = vector.multi_reduction <maximumf>, %304, %cst_119 [2] : vector<8x16x16xf32> to vector<8x16xf32>
    %306 = vector.shape_cast %305 : vector<8x16xf32> to vector<8x16x1xf32>
    %307 = vector.broadcast %306 : vector<8x16x1xf32> to vector<8x16x16xf32>
    %308 = arith.subf %304, %307 : vector<8x16x16xf32>
    %309 = math.exp %308 : vector<8x16x16xf32>
    %cst_120 = arith.constant dense<0.000000e+00> : vector<8x16xf32>
    %310 = vector.multi_reduction <add>, %309, %cst_120 [2] : vector<8x16x16xf32> to vector<8x16xf32>
    %311 = vector.shape_cast %310 : vector<8x16xf32> to vector<8x16x1xf32>
    %312 = tpu.reciprocal %311 : vector<8x16x1xf32> -> vector<8x16x1xf32>
    %313 = vector.broadcast %312 : vector<8x16x1xf32> to vector<8x16x16xf32>
    %314 = arith.mulf %309, %313 : vector<8x16x16xf32>
    "tpu.trace_start"() <{level = 10 : i32, message = "bqk,bkd->bqd"}> : () -> ()
    %cst_121 = arith.constant dense<0.000000e+00> : vector<8x16x8xf32>
    %315 = tpu.matmul %314, %303, %cst_121 {dimension_numbers = #tpu.dot_dimension_numbers<[2], [1], [1], [2], [0, 0, 0, 1, 1, 2], [0], [0]>} : vector<8x16x16xf32>, vector<8x16x8xf32>, vector<8x16x8xf32> -> vector<8x16x8xf32>
    "tpu.trace_stop"() : () -> ()
    %316 = vector.extract_strided_slice %315 {offsets = [0, 0, 0], sizes = [2, 16, 8], strides = [1, 1, 1]} : vector<8x16x8xf32> to vector<2x16x8xf32>
    %317 = vector.extract_strided_slice %315 {offsets = [2, 0, 0], sizes = [2, 16, 8], strides = [1, 1, 1]} : vector<8x16x8xf32> to vector<2x16x8xf32>
    %318 = vector.extract_strided_slice %315 {offsets = [4, 0, 0], sizes = [2, 16, 8], strides = [1, 1, 1]} : vector<8x16x8xf32> to vector<2x16x8xf32>
    %319 = vector.extract_strided_slice %315 {offsets = [6, 0, 0], sizes = [2, 16, 8], strides = [1, 1, 1]} : vector<8x16x8xf32> to vector<2x16x8xf32>
    %320 = tpu.concatenate %316, %317, %318, %319 in 2 : vector<2x16x8xf32>, vector<2x16x8xf32>, vector<2x16x8xf32>, vector<2x16x8xf32> -> vector<2x16x32xf32>
    %321 = vector.shape_cast %320 : vector<2x16x32xf32> to vector<32x32xf32>
    %c0_122 = arith.constant 0 : index
    %c0_123 = arith.constant 0 : index
    %322 = vector.load %arg13[%c0_122, %c0_123] : memref<32x32xf32, #tpu.memory_space<vmem>>, vector<32x32xf32>
    %cst_124 = arith.constant dense<0.000000e+00> : vector<32x32xf32>
    %323 = tpu.matmul %321, %322, %cst_124 {dimension_numbers = #tpu.dot_dimension_numbers<[1], [0], [0], [1], [0, 0, 1, 1], [], []>} : vector<32x32xf32>, vector<32x32xf32>, vector<32x32xf32> -> vector<32x32xf32>
    %c0_125 = arith.constant 0 : index
    %c0_126 = arith.constant 0 : index
    %324 = vector.load %arg9[%c0_125, %c0_126] : memref<1x32xf32, #tpu.memory_space<vmem>>, vector<1x32xf32>
    %325 = vector.broadcast %324 : vector<1x32xf32> to vector<32x32xf32>
    %326 = arith.addf %323, %325 : vector<32x32xf32>
    %327 = arith.addf %7, %326 : vector<32x32xf32>
    %cst_127 = arith.constant dense<0.000000e+00> : vector<32xf32>
    %328 = vector.multi_reduction <add>, %327, %cst_127 [1] : vector<32x32xf32> to vector<32xf32>
    %329 = vector.shape_cast %328 : vector<32xf32> to vector<32x1xf32>
    %cst_128 = arith.constant 3.200000e+01 : f32
    %330 = vector.broadcast %cst_128 : f32 to vector<32x1xf32>
    %331 = arith.divf %329, %330 : vector<32x1xf32>
    %332 = vector.broadcast %331 : vector<32x1xf32> to vector<32x32xf32>
    %333 = arith.subf %327, %332 : vector<32x32xf32>
    %334 = arith.mulf %333, %333 : vector<32x32xf32>
    %cst_129 = arith.constant dense<0.000000e+00> : vector<32xf32>
    %335 = vector.multi_reduction <add>, %334, %cst_129 [1] : vector<32x32xf32> to vector<32xf32>
    %336 = vector.shape_cast %335 : vector<32xf32> to vector<32x1xf32>
    %cst_130 = arith.constant 0.0322580636 : f32
    %337 = vector.broadcast %cst_130 : f32 to vector<32x1xf32>
    %338 = arith.mulf %336, %337 : vector<32x1xf32>
    %339 = math.sqrt %338 : vector<32x1xf32>
    %cst_131 = arith.constant 9.99999997E-7 : f32
    %340 = vector.broadcast %cst_131 : f32 to vector<32x1xf32>
    %341 = arith.addf %339, %340 : vector<32x1xf32>
    %342 = tpu.reciprocal %341 : vector<32x1xf32> -> vector<32x1xf32>
    %c0_132 = arith.constant 0 : index
    %c0_133 = arith.constant 0 : index
    %343 = vector.load %arg18[%c0_132, %c0_133] : memref<1x32xf32, #tpu.memory_space<vmem>>, vector<1x32xf32>
    %344 = vector.broadcast %342 : vector<32x1xf32> to vector<32x32xf32>
    %345 = arith.mulf %333, %344 : vector<32x32xf32>
    %346 = vector.broadcast %343 : vector<1x32xf32> to vector<32x32xf32>
    %347 = arith.mulf %346, %345 : vector<32x32xf32>
    %c0_134 = arith.constant 0 : index
    %c0_135 = arith.constant 0 : index
    %348 = vector.load %arg19[%c0_134, %c0_135] : memref<1x32xf32, #tpu.memory_space<vmem>>, vector<1x32xf32>
    %349 = vector.broadcast %348 : vector<1x32xf32> to vector<32x32xf32>
    %350 = arith.addf %347, %349 : vector<32x32xf32>
    %c0_136 = arith.constant 0 : index
    %c0_137 = arith.constant 0 : index
    %351 = vector.load %arg22[%c0_136, %c0_137] : memref<32x32xf32, #tpu.memory_space<vmem>>, vector<32x32xf32>
    %cst_138 = arith.constant dense<0.000000e+00> : vector<32x32xf32>
    %352 = tpu.matmul %350, %351, %cst_138 {dimension_numbers = #tpu.dot_dimension_numbers<[1], [0], [0], [1], [0, 0, 1, 1], [], []>} : vector<32x32xf32>, vector<32x32xf32>, vector<32x32xf32> -> vector<32x32xf32>
    %c0_139 = arith.constant 0 : index
    %c0_140 = arith.constant 0 : index
    %353 = vector.load %arg17[%c0_139, %c0_140] : memref<1x32xf32, #tpu.memory_space<vmem>>, vector<1x32xf32>
    %354 = vector.broadcast %353 : vector<1x32xf32> to vector<32x32xf32>
    %355 = arith.addf %352, %354 : vector<32x32xf32>
    %c0_141 = arith.constant 0 : index
    %c0_142 = arith.constant 0 : index
    %356 = vector.load %arg20[%c0_141, %c0_142] : memref<32x64xf32, #tpu.memory_space<vmem>>, vector<32x64xf32>
    %cst_143 = arith.constant dense<0.000000e+00> : vector<32x64xf32>
    %357 = tpu.matmul %252, %356, %cst_143 {dimension_numbers = #tpu.dot_dimension_numbers<[1], [0], [0], [1], [0, 0, 1, 1], [], []>} : vector<32x32xf32>, vector<32x64xf32>, vector<32x64xf32> -> vector<32x64xf32>
    %c0_144 = arith.constant 0 : index
    %c0_145 = arith.constant 0 : index
    %358 = vector.load %arg15[%c0_144, %c0_145] : memref<1x64xf32, #tpu.memory_space<vmem>>, vector<1x64xf32>
    %359 = vector.broadcast %358 : vector<1x64xf32> to vector<32x64xf32>
    %360 = arith.addf %357, %359 : vector<32x64xf32>
    %361 = vector.extract_strided_slice %360 {offsets = [0, 0], sizes = [32, 32], strides = [1, 1]} : vector<32x64xf32> to vector<32x32xf32>
    %362 = vector.extract_strided_slice %360 {offsets = [0, 32], sizes = [32, 32], strides = [1, 1]} : vector<32x64xf32> to vector<32x32xf32>
    %363 = vector.shape_cast %355 : vector<32x32xf32> to vector<2x16x32xf32>
    %cst_146 = arith.constant 0.353553385 : f32
    %364 = vector.broadcast %cst_146 : f32 to vector<2x16x32xf32>
    %365 = arith.mulf %363, %364 : vector<2x16x32xf32>
    %366 = vector.shape_cast %361 : vector<32x32xf32> to vector<2x16x32xf32>
    %367 = vector.shape_cast %362 : vector<32x32xf32> to vector<2x16x32xf32>
    %368 = vector.extract_strided_slice %365 {offsets = [0, 0, 0], sizes = [2, 16, 8], strides = [1, 1, 1]} : vector<2x16x32xf32> to vector<2x16x8xf32>
    %369 = vector.extract_strided_slice %365 {offsets = [0, 0, 8], sizes = [2, 16, 8], strides = [1, 1, 1]} : vector<2x16x32xf32> to vector<2x16x8xf32>
    %370 = vector.extract_strided_slice %365 {offsets = [0, 0, 16], sizes = [2, 16, 8], strides = [1, 1, 1]} : vector<2x16x32xf32> to vector<2x16x8xf32>
    %371 = vector.extract_strided_slice %365 {offsets = [0, 0, 24], sizes = [2, 16, 8], strides = [1, 1, 1]} : vector<2x16x32xf32> to vector<2x16x8xf32>
    %372 = tpu.concatenate %368, %369, %370, %371 in 0 : vector<2x16x8xf32>, vector<2x16x8xf32>, vector<2x16x8xf32>, vector<2x16x8xf32> -> vector<8x16x8xf32>
    %373 = vector.extract_strided_slice %366 {offsets = [0, 0, 0], sizes = [2, 16, 8], strides = [1, 1, 1]} : vector<2x16x32xf32> to vector<2x16x8xf32>
    %374 = vector.extract_strided_slice %366 {offsets = [0, 0, 8], sizes = [2, 16, 8], strides = [1, 1, 1]} : vector<2x16x32xf32> to vector<2x16x8xf32>
    %375 = vector.extract_strided_slice %366 {offsets = [0, 0, 16], sizes = [2, 16, 8], strides = [1, 1, 1]} : vector<2x16x32xf32> to vector<2x16x8xf32>
    %376 = vector.extract_strided_slice %366 {offsets = [0, 0, 24], sizes = [2, 16, 8], strides = [1, 1, 1]} : vector<2x16x32xf32> to vector<2x16x8xf32>
    %377 = tpu.concatenate %373, %374, %375, %376 in 0 : vector<2x16x8xf32>, vector<2x16x8xf32>, vector<2x16x8xf32>, vector<2x16x8xf32> -> vector<8x16x8xf32>
    %378 = vector.extract_strided_slice %367 {offsets = [0, 0, 0], sizes = [2, 16, 8], strides = [1, 1, 1]} : vector<2x16x32xf32> to vector<2x16x8xf32>
    %379 = vector.extract_strided_slice %367 {offsets = [0, 0, 8], sizes = [2, 16, 8], strides = [1, 1, 1]} : vector<2x16x32xf32> to vector<2x16x8xf32>
    %380 = vector.extract_strided_slice %367 {offsets = [0, 0, 16], sizes = [2, 16, 8], strides = [1, 1, 1]} : vector<2x16x32xf32> to vector<2x16x8xf32>
    %381 = vector.extract_strided_slice %367 {offsets = [0, 0, 24], sizes = [2, 16, 8], strides = [1, 1, 1]} : vector<2x16x32xf32> to vector<2x16x8xf32>
    %382 = tpu.concatenate %378, %379, %380, %381 in 0 : vector<2x16x8xf32>, vector<2x16x8xf32>, vector<2x16x8xf32>, vector<2x16x8xf32> -> vector<8x16x8xf32>
    "tpu.trace_start"() <{level = 10 : i32, message = "bqd,bkd->bqk"}> : () -> ()
    %cst_147 = arith.constant dense<0.000000e+00> : vector<8x16x16xf32>
    %383 = tpu.matmul %372, %377, %cst_147 {dimension_numbers = #tpu.dot_dimension_numbers<[2], [2], [1], [1], [0, 0, 0, 1, 1, 1], [0], [0]>} : vector<8x16x8xf32>, vector<8x16x8xf32>, vector<8x16x16xf32> -> vector<8x16x16xf32>
    "tpu.trace_stop"() : () -> ()
    %cst_148 = arith.constant dense<0xFF800000> : vector<8x16xf32>
    %384 = vector.multi_reduction <maximumf>, %383, %cst_148 [2] : vector<8x16x16xf32> to vector<8x16xf32>
    %385 = vector.shape_cast %384 : vector<8x16xf32> to vector<8x16x1xf32>
    %386 = vector.broadcast %385 : vector<8x16x1xf32> to vector<8x16x16xf32>
    %387 = arith.subf %383, %386 : vector<8x16x16xf32>
    %388 = math.exp %387 : vector<8x16x16xf32>
    %cst_149 = arith.constant dense<0.000000e+00> : vector<8x16xf32>
    %389 = vector.multi_reduction <add>, %388, %cst_149 [2] : vector<8x16x16xf32> to vector<8x16xf32>
    %390 = vector.shape_cast %389 : vector<8x16xf32> to vector<8x16x1xf32>
    %391 = tpu.reciprocal %390 : vector<8x16x1xf32> -> vector<8x16x1xf32>
    %392 = vector.broadcast %391 : vector<8x16x1xf32> to vector<8x16x16xf32>
    %393 = arith.mulf %388, %392 : vector<8x16x16xf32>
    "tpu.trace_start"() <{level = 10 : i32, message = "bqk,bkd->bqd"}> : () -> ()
    %cst_150 = arith.constant dense<0.000000e+00> : vector<8x16x8xf32>
    %394 = tpu.matmul %393, %382, %cst_150 {dimension_numbers = #tpu.dot_dimension_numbers<[2], [1], [1], [2], [0, 0, 0, 1, 1, 2], [0], [0]>} : vector<8x16x16xf32>, vector<8x16x8xf32>, vector<8x16x8xf32> -> vector<8x16x8xf32>
    "tpu.trace_stop"() : () -> ()
    %395 = vector.extract_strided_slice %394 {offsets = [0, 0, 0], sizes = [2, 16, 8], strides = [1, 1, 1]} : vector<8x16x8xf32> to vector<2x16x8xf32>
    %396 = vector.extract_strided_slice %394 {offsets = [2, 0, 0], sizes = [2, 16, 8], strides = [1, 1, 1]} : vector<8x16x8xf32> to vector<2x16x8xf32>
    %397 = vector.extract_strided_slice %394 {offsets = [4, 0, 0], sizes = [2, 16, 8], strides = [1, 1, 1]} : vector<8x16x8xf32> to vector<2x16x8xf32>
    %398 = vector.extract_strided_slice %394 {offsets = [6, 0, 0], sizes = [2, 16, 8], strides = [1, 1, 1]} : vector<8x16x8xf32> to vector<2x16x8xf32>
    %399 = tpu.concatenate %395, %396, %397, %398 in 2 : vector<2x16x8xf32>, vector<2x16x8xf32>, vector<2x16x8xf32>, vector<2x16x8xf32> -> vector<2x16x32xf32>
    %400 = vector.shape_cast %399 : vector<2x16x32xf32> to vector<32x32xf32>
    %c0_151 = arith.constant 0 : index
    %c0_152 = arith.constant 0 : index
    %401 = vector.load %arg21[%c0_151, %c0_152] : memref<32x32xf32, #tpu.memory_space<vmem>>, vector<32x32xf32>
    %cst_153 = arith.constant dense<0.000000e+00> : vector<32x32xf32>
    %402 = tpu.matmul %400, %401, %cst_153 {dimension_numbers = #tpu.dot_dimension_numbers<[1], [0], [0], [1], [0, 0, 1, 1], [], []>} : vector<32x32xf32>, vector<32x32xf32>, vector<32x32xf32> -> vector<32x32xf32>
    %c0_154 = arith.constant 0 : index
    %c0_155 = arith.constant 0 : index
    %403 = vector.load %arg16[%c0_154, %c0_155] : memref<1x32xf32, #tpu.memory_space<vmem>>, vector<1x32xf32>
    %404 = vector.broadcast %403 : vector<1x32xf32> to vector<32x32xf32>
    %405 = arith.addf %402, %404 : vector<32x32xf32>
    %406 = arith.addf %327, %405 : vector<32x32xf32>
    %cst_156 = arith.constant dense<0.000000e+00> : vector<32xf32>
    %407 = vector.multi_reduction <add>, %406, %cst_156 [1] : vector<32x32xf32> to vector<32xf32>
    %408 = vector.shape_cast %407 : vector<32xf32> to vector<32x1xf32>
    %cst_157 = arith.constant 3.200000e+01 : f32
    %409 = vector.broadcast %cst_157 : f32 to vector<32x1xf32>
    %410 = arith.divf %408, %409 : vector<32x1xf32>
    %411 = vector.broadcast %410 : vector<32x1xf32> to vector<32x32xf32>
    %412 = arith.subf %406, %411 : vector<32x32xf32>
    %413 = arith.mulf %412, %412 : vector<32x32xf32>
    %cst_158 = arith.constant dense<0.000000e+00> : vector<32xf32>
    %414 = vector.multi_reduction <add>, %413, %cst_158 [1] : vector<32x32xf32> to vector<32xf32>
    %415 = vector.shape_cast %414 : vector<32xf32> to vector<32x1xf32>
    %cst_159 = arith.constant 0.0322580636 : f32
    %416 = vector.broadcast %cst_159 : f32 to vector<32x1xf32>
    %417 = arith.mulf %415, %416 : vector<32x1xf32>
    %418 = math.sqrt %417 : vector<32x1xf32>
    %cst_160 = arith.constant 9.99999997E-7 : f32
    %419 = vector.broadcast %cst_160 : f32 to vector<32x1xf32>
    %420 = arith.addf %418, %419 : vector<32x1xf32>
    %421 = tpu.reciprocal %420 : vector<32x1xf32> -> vector<32x1xf32>
    %c0_161 = arith.constant 0 : index
    %c0_162 = arith.constant 0 : index
    %422 = vector.load %arg5[%c0_161, %c0_162] : memref<1x32xf32, #tpu.memory_space<vmem>>, vector<1x32xf32>
    %423 = vector.broadcast %421 : vector<32x1xf32> to vector<32x32xf32>
    %424 = arith.mulf %412, %423 : vector<32x32xf32>
    %425 = vector.broadcast %422 : vector<1x32xf32> to vector<32x32xf32>
    %426 = arith.mulf %425, %424 : vector<32x32xf32>
    %c0_163 = arith.constant 0 : index
    %c0_164 = arith.constant 0 : index
    %427 = vector.load %arg6[%c0_163, %c0_164] : memref<1x32xf32, #tpu.memory_space<vmem>>, vector<1x32xf32>
    %428 = vector.broadcast %427 : vector<1x32xf32> to vector<32x32xf32>
    %429 = arith.addf %426, %428 : vector<32x32xf32>
    %c0_165 = arith.constant 0 : index
    %c0_166 = arith.constant 0 : index
    %430 = vector.load %arg7[%c0_165, %c0_166] : memref<32x64xf32, #tpu.memory_space<vmem>>, vector<32x64xf32>
    %cst_167 = arith.constant dense<0.000000e+00> : vector<32x64xf32>
    %431 = tpu.matmul %429, %430, %cst_167 {dimension_numbers = #tpu.dot_dimension_numbers<[1], [0], [0], [1], [0, 0, 1, 1], [], []>} : vector<32x32xf32>, vector<32x64xf32>, vector<32x64xf32> -> vector<32x64xf32>
    %c0_168 = arith.constant 0 : index
    %c0_169 = arith.constant 0 : index
    %432 = vector.load %arg3[%c0_168, %c0_169] : memref<1x64xf32, #tpu.memory_space<vmem>>, vector<1x64xf32>
    %433 = vector.broadcast %432 : vector<1x64xf32> to vector<32x64xf32>
    %434 = arith.addf %431, %433 : vector<32x64xf32>
    %cst_170 = arith.constant 0.000000e+00 : f32
    %435 = vector.broadcast %cst_170 : f32 to vector<32x64xf32>
    %436 = arith.maximumf %434, %435 : vector<32x64xf32>
    %c0_171 = arith.constant 0 : index
    %c0_172 = arith.constant 0 : index
    %437 = vector.load %arg8[%c0_171, %c0_172] : memref<64x32xf32, #tpu.memory_space<vmem>>, vector<64x32xf32>
    %cst_173 = arith.constant dense<0.000000e+00> : vector<32x32xf32>
    %438 = tpu.matmul %436, %437, %cst_173 {dimension_numbers = #tpu.dot_dimension_numbers<[1], [0], [0], [1], [0, 0, 1, 1], [], []>} : vector<32x64xf32>, vector<64x32xf32>, vector<32x32xf32> -> vector<32x32xf32>
    %c0_174 = arith.constant 0 : index
    %c0_175 = arith.constant 0 : index
    %439 = vector.load %arg4[%c0_174, %c0_175] : memref<1x32xf32, #tpu.memory_space<vmem>>, vector<1x32xf32>
    %440 = vector.broadcast %439 : vector<1x32xf32> to vector<32x32xf32>
    %441 = arith.addf %438, %440 : vector<32x32xf32>
    %442 = arith.addf %406, %441 : vector<32x32xf32>
    %cst_176 = arith.constant dense<0.000000e+00> : vector<32xf32>
    %443 = vector.multi_reduction <add>, %442, %cst_176 [1] : vector<32x32xf32> to vector<32xf32>
    %444 = vector.shape_cast %443 : vector<32xf32> to vector<32x1xf32>
    %cst_177 = arith.constant 3.200000e+01 : f32
    %445 = vector.broadcast %cst_177 : f32 to vector<32x1xf32>
    %446 = arith.divf %444, %445 : vector<32x1xf32>
    %447 = vector.broadcast %446 : vector<32x1xf32> to vector<32x32xf32>
    %448 = arith.subf %442, %447 : vector<32x32xf32>
    %449 = arith.mulf %448, %448 : vector<32x32xf32>
    %cst_178 = arith.constant dense<0.000000e+00> : vector<32xf32>
    %450 = vector.multi_reduction <add>, %449, %cst_178 [1] : vector<32x32xf32> to vector<32xf32>
    %451 = vector.shape_cast %450 : vector<32xf32> to vector<32x1xf32>
    %cst_179 = arith.constant 0.0322580636 : f32
    %452 = vector.broadcast %cst_179 : f32 to vector<32x1xf32>
    %453 = arith.mulf %451, %452 : vector<32x1xf32>
    %454 = math.sqrt %453 : vector<32x1xf32>
    %cst_180 = arith.constant 9.99999997E-7 : f32
    %455 = vector.broadcast %cst_180 : f32 to vector<32x1xf32>
    %456 = arith.addf %454, %455 : vector<32x1xf32>
    %457 = tpu.reciprocal %456 : vector<32x1xf32> -> vector<32x1xf32>
    %c0_181 = arith.constant 0 : index
    %c0_182 = arith.constant 0 : index
    %458 = vector.load %arg31[%c0_181, %c0_182] : memref<1x32xf32, #tpu.memory_space<vmem>>, vector<1x32xf32>
    %459 = vector.broadcast %457 : vector<32x1xf32> to vector<32x32xf32>
    %460 = arith.mulf %448, %459 : vector<32x32xf32>
    %461 = vector.broadcast %458 : vector<1x32xf32> to vector<32x32xf32>
    %462 = arith.mulf %461, %460 : vector<32x32xf32>
    %c0_183 = arith.constant 0 : index
    %c0_184 = arith.constant 0 : index
    %463 = vector.load %arg32[%c0_183, %c0_184] : memref<1x32xf32, #tpu.memory_space<vmem>>, vector<1x32xf32>
    %464 = vector.broadcast %463 : vector<1x32xf32> to vector<32x32xf32>
    %465 = arith.addf %462, %464 : vector<32x32xf32>
    %c0_185 = arith.constant 0 : index
    %c0_186 = arith.constant 0 : index
    %466 = vector.load %arg34[%c0_185, %c0_186] : memref<32x96xf32, #tpu.memory_space<vmem>>, vector<32x96xf32>
    %cst_187 = arith.constant dense<0.000000e+00> : vector<32x96xf32>
    %467 = tpu.matmul %465, %466, %cst_187 {dimension_numbers = #tpu.dot_dimension_numbers<[1], [0], [0], [1], [0, 0, 1, 1], [], []>} : vector<32x32xf32>, vector<32x96xf32>, vector<32x96xf32> -> vector<32x96xf32>
    %c0_188 = arith.constant 0 : index
    %c0_189 = arith.constant 0 : index
    %468 = vector.load %arg30[%c0_188, %c0_189] : memref<1x96xf32, #tpu.memory_space<vmem>>, vector<1x96xf32>
    %469 = vector.broadcast %468 : vector<1x96xf32> to vector<32x96xf32>
    %470 = arith.addf %467, %469 : vector<32x96xf32>
    %471 = vector.extract_strided_slice %470 {offsets = [0, 0], sizes = [32, 32], strides = [1, 1]} : vector<32x96xf32> to vector<32x32xf32>
    %472 = vector.extract_strided_slice %470 {offsets = [0, 32], sizes = [32, 32], strides = [1, 1]} : vector<32x96xf32> to vector<32x32xf32>
    %473 = vector.extract_strided_slice %470 {offsets = [0, 64], sizes = [32, 32], strides = [1, 1]} : vector<32x96xf32> to vector<32x32xf32>
    %474 = vector.shape_cast %471 : vector<32x32xf32> to vector<2x16x32xf32>
    %cst_190 = arith.constant 0.353553385 : f32
    %475 = vector.broadcast %cst_190 : f32 to vector<2x16x32xf32>
    %476 = arith.mulf %474, %475 : vector<2x16x32xf32>
    %477 = vector.shape_cast %472 : vector<32x32xf32> to vector<2x16x32xf32>
    %478 = vector.shape_cast %473 : vector<32x32xf32> to vector<2x16x32xf32>
    %479 = vector.extract_strided_slice %476 {offsets = [0, 0, 0], sizes = [2, 16, 8], strides = [1, 1, 1]} : vector<2x16x32xf32> to vector<2x16x8xf32>
    %480 = vector.extract_strided_slice %476 {offsets = [0, 0, 8], sizes = [2, 16, 8], strides = [1, 1, 1]} : vector<2x16x32xf32> to vector<2x16x8xf32>
    %481 = vector.extract_strided_slice %476 {offsets = [0, 0, 16], sizes = [2, 16, 8], strides = [1, 1, 1]} : vector<2x16x32xf32> to vector<2x16x8xf32>
    %482 = vector.extract_strided_slice %476 {offsets = [0, 0, 24], sizes = [2, 16, 8], strides = [1, 1, 1]} : vector<2x16x32xf32> to vector<2x16x8xf32>
    %483 = tpu.concatenate %479, %480, %481, %482 in 0 : vector<2x16x8xf32>, vector<2x16x8xf32>, vector<2x16x8xf32>, vector<2x16x8xf32> -> vector<8x16x8xf32>
    %484 = vector.extract_strided_slice %477 {offsets = [0, 0, 0], sizes = [2, 16, 8], strides = [1, 1, 1]} : vector<2x16x32xf32> to vector<2x16x8xf32>
    %485 = vector.extract_strided_slice %477 {offsets = [0, 0, 8], sizes = [2, 16, 8], strides = [1, 1, 1]} : vector<2x16x32xf32> to vector<2x16x8xf32>
    %486 = vector.extract_strided_slice %477 {offsets = [0, 0, 16], sizes = [2, 16, 8], strides = [1, 1, 1]} : vector<2x16x32xf32> to vector<2x16x8xf32>
    %487 = vector.extract_strided_slice %477 {offsets = [0, 0, 24], sizes = [2, 16, 8], strides = [1, 1, 1]} : vector<2x16x32xf32> to vector<2x16x8xf32>
    %488 = tpu.concatenate %484, %485, %486, %487 in 0 : vector<2x16x8xf32>, vector<2x16x8xf32>, vector<2x16x8xf32>, vector<2x16x8xf32> -> vector<8x16x8xf32>
    %489 = vector.extract_strided_slice %478 {offsets = [0, 0, 0], sizes = [2, 16, 8], strides = [1, 1, 1]} : vector<2x16x32xf32> to vector<2x16x8xf32>
    %490 = vector.extract_strided_slice %478 {offsets = [0, 0, 8], sizes = [2, 16, 8], strides = [1, 1, 1]} : vector<2x16x32xf32> to vector<2x16x8xf32>
    %491 = vector.extract_strided_slice %478 {offsets = [0, 0, 16], sizes = [2, 16, 8], strides = [1, 1, 1]} : vector<2x16x32xf32> to vector<2x16x8xf32>
    %492 = vector.extract_strided_slice %478 {offsets = [0, 0, 24], sizes = [2, 16, 8], strides = [1, 1, 1]} : vector<2x16x32xf32> to vector<2x16x8xf32>
    %493 = tpu.concatenate %489, %490, %491, %492 in 0 : vector<2x16x8xf32>, vector<2x16x8xf32>, vector<2x16x8xf32>, vector<2x16x8xf32> -> vector<8x16x8xf32>
    "tpu.trace_start"() <{level = 10 : i32, message = "bqd,bkd->bqk"}> : () -> ()
    %cst_191 = arith.constant dense<0.000000e+00> : vector<8x16x16xf32>
    %494 = tpu.matmul %483, %488, %cst_191 {dimension_numbers = #tpu.dot_dimension_numbers<[2], [2], [1], [1], [0, 0, 0, 1, 1, 1], [0], [0]>} : vector<8x16x8xf32>, vector<8x16x8xf32>, vector<8x16x16xf32> -> vector<8x16x16xf32>
    "tpu.trace_stop"() : () -> ()
    %cst_192 = arith.constant dense<0xFF800000> : vector<8x16xf32>
    %495 = vector.multi_reduction <maximumf>, %494, %cst_192 [2] : vector<8x16x16xf32> to vector<8x16xf32>
    %496 = vector.shape_cast %495 : vector<8x16xf32> to vector<8x16x1xf32>
    %497 = vector.broadcast %496 : vector<8x16x1xf32> to vector<8x16x16xf32>
    %498 = arith.subf %494, %497 : vector<8x16x16xf32>
    %499 = math.exp %498 : vector<8x16x16xf32>
    %cst_193 = arith.constant dense<0.000000e+00> : vector<8x16xf32>
    %500 = vector.multi_reduction <add>, %499, %cst_193 [2] : vector<8x16x16xf32> to vector<8x16xf32>
    %501 = vector.shape_cast %500 : vector<8x16xf32> to vector<8x16x1xf32>
    %502 = tpu.reciprocal %501 : vector<8x16x1xf32> -> vector<8x16x1xf32>
    %503 = vector.broadcast %502 : vector<8x16x1xf32> to vector<8x16x16xf32>
    %504 = arith.mulf %499, %503 : vector<8x16x16xf32>
    "tpu.trace_start"() <{level = 10 : i32, message = "bqk,bkd->bqd"}> : () -> ()
    %cst_194 = arith.constant dense<0.000000e+00> : vector<8x16x8xf32>
    %505 = tpu.matmul %504, %493, %cst_194 {dimension_numbers = #tpu.dot_dimension_numbers<[2], [1], [1], [2], [0, 0, 0, 1, 1, 2], [0], [0]>} : vector<8x16x16xf32>, vector<8x16x8xf32>, vector<8x16x8xf32> -> vector<8x16x8xf32>
    "tpu.trace_stop"() : () -> ()
    %506 = vector.extract_strided_slice %505 {offsets = [0, 0, 0], sizes = [2, 16, 8], strides = [1, 1, 1]} : vector<8x16x8xf32> to vector<2x16x8xf32>
    %507 = vector.extract_strided_slice %505 {offsets = [2, 0, 0], sizes = [2, 16, 8], strides = [1, 1, 1]} : vector<8x16x8xf32> to vector<2x16x8xf32>
    %508 = vector.extract_strided_slice %505 {offsets = [4, 0, 0], sizes = [2, 16, 8], strides = [1, 1, 1]} : vector<8x16x8xf32> to vector<2x16x8xf32>
    %509 = vector.extract_strided_slice %505 {offsets = [6, 0, 0], sizes = [2, 16, 8], strides = [1, 1, 1]} : vector<8x16x8xf32> to vector<2x16x8xf32>
    %510 = tpu.concatenate %506, %507, %508, %509 in 2 : vector<2x16x8xf32>, vector<2x16x8xf32>, vector<2x16x8xf32>, vector<2x16x8xf32> -> vector<2x16x32xf32>
    %511 = vector.shape_cast %510 : vector<2x16x32xf32> to vector<32x32xf32>
    %c0_195 = arith.constant 0 : index
    %c0_196 = arith.constant 0 : index
    %512 = vector.load %arg33[%c0_195, %c0_196] : memref<32x32xf32, #tpu.memory_space<vmem>>, vector<32x32xf32>
    %cst_197 = arith.constant dense<0.000000e+00> : vector<32x32xf32>
    %513 = tpu.matmul %511, %512, %cst_197 {dimension_numbers = #tpu.dot_dimension_numbers<[1], [0], [0], [1], [0, 0, 1, 1], [], []>} : vector<32x32xf32>, vector<32x32xf32>, vector<32x32xf32> -> vector<32x32xf32>
    %c0_198 = arith.constant 0 : index
    %c0_199 = arith.constant 0 : index
    %514 = vector.load %arg29[%c0_198, %c0_199] : memref<1x32xf32, #tpu.memory_space<vmem>>, vector<1x32xf32>
    %515 = vector.broadcast %514 : vector<1x32xf32> to vector<32x32xf32>
    %516 = arith.addf %513, %515 : vector<32x32xf32>
    %517 = arith.addf %442, %516 : vector<32x32xf32>
    %cst_200 = arith.constant dense<0.000000e+00> : vector<32xf32>
    %518 = vector.multi_reduction <add>, %517, %cst_200 [1] : vector<32x32xf32> to vector<32xf32>
    %519 = vector.shape_cast %518 : vector<32xf32> to vector<32x1xf32>
    %cst_201 = arith.constant 3.200000e+01 : f32
    %520 = vector.broadcast %cst_201 : f32 to vector<32x1xf32>
    %521 = arith.divf %519, %520 : vector<32x1xf32>
    %522 = vector.broadcast %521 : vector<32x1xf32> to vector<32x32xf32>
    %523 = arith.subf %517, %522 : vector<32x32xf32>
    %524 = arith.mulf %523, %523 : vector<32x32xf32>
    %cst_202 = arith.constant dense<0.000000e+00> : vector<32xf32>
    %525 = vector.multi_reduction <add>, %524, %cst_202 [1] : vector<32x32xf32> to vector<32xf32>
    %526 = vector.shape_cast %525 : vector<32xf32> to vector<32x1xf32>
    %cst_203 = arith.constant 0.0322580636 : f32
    %527 = vector.broadcast %cst_203 : f32 to vector<32x1xf32>
    %528 = arith.mulf %526, %527 : vector<32x1xf32>
    %529 = math.sqrt %528 : vector<32x1xf32>
    %cst_204 = arith.constant 9.99999997E-7 : f32
    %530 = vector.broadcast %cst_204 : f32 to vector<32x1xf32>
    %531 = arith.addf %529, %530 : vector<32x1xf32>
    %532 = tpu.reciprocal %531 : vector<32x1xf32> -> vector<32x1xf32>
    %c0_205 = arith.constant 0 : index
    %c0_206 = arith.constant 0 : index
    %533 = vector.load %arg38[%c0_205, %c0_206] : memref<1x32xf32, #tpu.memory_space<vmem>>, vector<1x32xf32>
    %534 = vector.broadcast %532 : vector<32x1xf32> to vector<32x32xf32>
    %535 = arith.mulf %523, %534 : vector<32x32xf32>
    %536 = vector.broadcast %533 : vector<1x32xf32> to vector<32x32xf32>
    %537 = arith.mulf %536, %535 : vector<32x32xf32>
    %c0_207 = arith.constant 0 : index
    %c0_208 = arith.constant 0 : index
    %538 = vector.load %arg39[%c0_207, %c0_208] : memref<1x32xf32, #tpu.memory_space<vmem>>, vector<1x32xf32>
    %539 = vector.broadcast %538 : vector<1x32xf32> to vector<32x32xf32>
    %540 = arith.addf %537, %539 : vector<32x32xf32>
    %c0_209 = arith.constant 0 : index
    %c0_210 = arith.constant 0 : index
    %541 = vector.load %arg42[%c0_209, %c0_210] : memref<32x32xf32, #tpu.memory_space<vmem>>, vector<32x32xf32>
    %cst_211 = arith.constant dense<0.000000e+00> : vector<32x32xf32>
    %542 = tpu.matmul %540, %541, %cst_211 {dimension_numbers = #tpu.dot_dimension_numbers<[1], [0], [0], [1], [0, 0, 1, 1], [], []>} : vector<32x32xf32>, vector<32x32xf32>, vector<32x32xf32> -> vector<32x32xf32>
    %c0_212 = arith.constant 0 : index
    %c0_213 = arith.constant 0 : index
    %543 = vector.load %arg37[%c0_212, %c0_213] : memref<1x32xf32, #tpu.memory_space<vmem>>, vector<1x32xf32>
    %544 = vector.broadcast %543 : vector<1x32xf32> to vector<32x32xf32>
    %545 = arith.addf %542, %544 : vector<32x32xf32>
    %c0_214 = arith.constant 0 : index
    %c0_215 = arith.constant 0 : index
    %546 = vector.load %arg40[%c0_214, %c0_215] : memref<32x64xf32, #tpu.memory_space<vmem>>, vector<32x64xf32>
    %cst_216 = arith.constant dense<0.000000e+00> : vector<32x64xf32>
    %547 = tpu.matmul %252, %546, %cst_216 {dimension_numbers = #tpu.dot_dimension_numbers<[1], [0], [0], [1], [0, 0, 1, 1], [], []>} : vector<32x32xf32>, vector<32x64xf32>, vector<32x64xf32> -> vector<32x64xf32>
    %c0_217 = arith.constant 0 : index
    %c0_218 = arith.constant 0 : index
    %548 = vector.load %arg35[%c0_217, %c0_218] : memref<1x64xf32, #tpu.memory_space<vmem>>, vector<1x64xf32>
    %549 = vector.broadcast %548 : vector<1x64xf32> to vector<32x64xf32>
    %550 = arith.addf %547, %549 : vector<32x64xf32>
    %551 = vector.extract_strided_slice %550 {offsets = [0, 0], sizes = [32, 32], strides = [1, 1]} : vector<32x64xf32> to vector<32x32xf32>
    %552 = vector.extract_strided_slice %550 {offsets = [0, 32], sizes = [32, 32], strides = [1, 1]} : vector<32x64xf32> to vector<32x32xf32>
    %553 = vector.shape_cast %545 : vector<32x32xf32> to vector<2x16x32xf32>
    %cst_219 = arith.constant 0.353553385 : f32
    %554 = vector.broadcast %cst_219 : f32 to vector<2x16x32xf32>
    %555 = arith.mulf %553, %554 : vector<2x16x32xf32>
    %556 = vector.shape_cast %551 : vector<32x32xf32> to vector<2x16x32xf32>
    %557 = vector.shape_cast %552 : vector<32x32xf32> to vector<2x16x32xf32>
    %558 = vector.extract_strided_slice %555 {offsets = [0, 0, 0], sizes = [2, 16, 8], strides = [1, 1, 1]} : vector<2x16x32xf32> to vector<2x16x8xf32>
    %559 = vector.extract_strided_slice %555 {offsets = [0, 0, 8], sizes = [2, 16, 8], strides = [1, 1, 1]} : vector<2x16x32xf32> to vector<2x16x8xf32>
    %560 = vector.extract_strided_slice %555 {offsets = [0, 0, 16], sizes = [2, 16, 8], strides = [1, 1, 1]} : vector<2x16x32xf32> to vector<2x16x8xf32>
    %561 = vector.extract_strided_slice %555 {offsets = [0, 0, 24], sizes = [2, 16, 8], strides = [1, 1, 1]} : vector<2x16x32xf32> to vector<2x16x8xf32>
    %562 = tpu.concatenate %558, %559, %560, %561 in 0 : vector<2x16x8xf32>, vector<2x16x8xf32>, vector<2x16x8xf32>, vector<2x16x8xf32> -> vector<8x16x8xf32>
    %563 = vector.extract_strided_slice %556 {offsets = [0, 0, 0], sizes = [2, 16, 8], strides = [1, 1, 1]} : vector<2x16x32xf32> to vector<2x16x8xf32>
    %564 = vector.extract_strided_slice %556 {offsets = [0, 0, 8], sizes = [2, 16, 8], strides = [1, 1, 1]} : vector<2x16x32xf32> to vector<2x16x8xf32>
    %565 = vector.extract_strided_slice %556 {offsets = [0, 0, 16], sizes = [2, 16, 8], strides = [1, 1, 1]} : vector<2x16x32xf32> to vector<2x16x8xf32>
    %566 = vector.extract_strided_slice %556 {offsets = [0, 0, 24], sizes = [2, 16, 8], strides = [1, 1, 1]} : vector<2x16x32xf32> to vector<2x16x8xf32>
    %567 = tpu.concatenate %563, %564, %565, %566 in 0 : vector<2x16x8xf32>, vector<2x16x8xf32>, vector<2x16x8xf32>, vector<2x16x8xf32> -> vector<8x16x8xf32>
    %568 = vector.extract_strided_slice %557 {offsets = [0, 0, 0], sizes = [2, 16, 8], strides = [1, 1, 1]} : vector<2x16x32xf32> to vector<2x16x8xf32>
    %569 = vector.extract_strided_slice %557 {offsets = [0, 0, 8], sizes = [2, 16, 8], strides = [1, 1, 1]} : vector<2x16x32xf32> to vector<2x16x8xf32>
    %570 = vector.extract_strided_slice %557 {offsets = [0, 0, 16], sizes = [2, 16, 8], strides = [1, 1, 1]} : vector<2x16x32xf32> to vector<2x16x8xf32>
    %571 = vector.extract_strided_slice %557 {offsets = [0, 0, 24], sizes = [2, 16, 8], strides = [1, 1, 1]} : vector<2x16x32xf32> to vector<2x16x8xf32>
    %572 = tpu.concatenate %568, %569, %570, %571 in 0 : vector<2x16x8xf32>, vector<2x16x8xf32>, vector<2x16x8xf32>, vector<2x16x8xf32> -> vector<8x16x8xf32>
    "tpu.trace_start"() <{level = 10 : i32, message = "bqd,bkd->bqk"}> : () -> ()
    %cst_220 = arith.constant dense<0.000000e+00> : vector<8x16x16xf32>
    %573 = tpu.matmul %562, %567, %cst_220 {dimension_numbers = #tpu.dot_dimension_numbers<[2], [2], [1], [1], [0, 0, 0, 1, 1, 1], [0], [0]>} : vector<8x16x8xf32>, vector<8x16x8xf32>, vector<8x16x16xf32> -> vector<8x16x16xf32>
    "tpu.trace_stop"() : () -> ()
    %cst_221 = arith.constant dense<0xFF800000> : vector<8x16xf32>
    %574 = vector.multi_reduction <maximumf>, %573, %cst_221 [2] : vector<8x16x16xf32> to vector<8x16xf32>
    %575 = vector.shape_cast %574 : vector<8x16xf32> to vector<8x16x1xf32>
    %576 = vector.broadcast %575 : vector<8x16x1xf32> to vector<8x16x16xf32>
    %577 = arith.subf %573, %576 : vector<8x16x16xf32>
    %578 = math.exp %577 : vector<8x16x16xf32>
    %cst_222 = arith.constant dense<0.000000e+00> : vector<8x16xf32>
    %579 = vector.multi_reduction <add>, %578, %cst_222 [2] : vector<8x16x16xf32> to vector<8x16xf32>
    %580 = vector.shape_cast %579 : vector<8x16xf32> to vector<8x16x1xf32>
    %581 = tpu.reciprocal %580 : vector<8x16x1xf32> -> vector<8x16x1xf32>
    %582 = vector.broadcast %581 : vector<8x16x1xf32> to vector<8x16x16xf32>
    %583 = arith.mulf %578, %582 : vector<8x16x16xf32>
    "tpu.trace_start"() <{level = 10 : i32, message = "bqk,bkd->bqd"}> : () -> ()
    %cst_223 = arith.constant dense<0.000000e+00> : vector<8x16x8xf32>
    %584 = tpu.matmul %583, %572, %cst_223 {dimension_numbers = #tpu.dot_dimension_numbers<[2], [1], [1], [2], [0, 0, 0, 1, 1, 2], [0], [0]>} : vector<8x16x16xf32>, vector<8x16x8xf32>, vector<8x16x8xf32> -> vector<8x16x8xf32>
    "tpu.trace_stop"() : () -> ()
    %585 = vector.extract_strided_slice %584 {offsets = [0, 0, 0], sizes = [2, 16, 8], strides = [1, 1, 1]} : vector<8x16x8xf32> to vector<2x16x8xf32>
    %586 = vector.extract_strided_slice %584 {offsets = [2, 0, 0], sizes = [2, 16, 8], strides = [1, 1, 1]} : vector<8x16x8xf32> to vector<2x16x8xf32>
    %587 = vector.extract_strided_slice %584 {offsets = [4, 0, 0], sizes = [2, 16, 8], strides = [1, 1, 1]} : vector<8x16x8xf32> to vector<2x16x8xf32>
    %588 = vector.extract_strided_slice %584 {offsets = [6, 0, 0], sizes = [2, 16, 8], strides = [1, 1, 1]} : vector<8x16x8xf32> to vector<2x16x8xf32>
    %589 = tpu.concatenate %585, %586, %587, %588 in 2 : vector<2x16x8xf32>, vector<2x16x8xf32>, vector<2x16x8xf32>, vector<2x16x8xf32> -> vector<2x16x32xf32>
    %590 = vector.shape_cast %589 : vector<2x16x32xf32> to vector<32x32xf32>
    %c0_224 = arith.constant 0 : index
    %c0_225 = arith.constant 0 : index
    %591 = vector.load %arg41[%c0_224, %c0_225] : memref<32x32xf32, #tpu.memory_space<vmem>>, vector<32x32xf32>
    %cst_226 = arith.constant dense<0.000000e+00> : vector<32x32xf32>
    %592 = tpu.matmul %590, %591, %cst_226 {dimension_numbers = #tpu.dot_dimension_numbers<[1], [0], [0], [1], [0, 0, 1, 1], [], []>} : vector<32x32xf32>, vector<32x32xf32>, vector<32x32xf32> -> vector<32x32xf32>
    %c0_227 = arith.constant 0 : index
    %c0_228 = arith.constant 0 : index
    %593 = vector.load %arg36[%c0_227, %c0_228] : memref<1x32xf32, #tpu.memory_space<vmem>>, vector<1x32xf32>
    %594 = vector.broadcast %593 : vector<1x32xf32> to vector<32x32xf32>
    %595 = arith.addf %592, %594 : vector<32x32xf32>
    %596 = arith.addf %517, %595 : vector<32x32xf32>
    %cst_229 = arith.constant dense<0.000000e+00> : vector<32xf32>
    %597 = vector.multi_reduction <add>, %596, %cst_229 [1] : vector<32x32xf32> to vector<32xf32>
    %598 = vector.shape_cast %597 : vector<32xf32> to vector<32x1xf32>
    %cst_230 = arith.constant 3.200000e+01 : f32
    %599 = vector.broadcast %cst_230 : f32 to vector<32x1xf32>
    %600 = arith.divf %598, %599 : vector<32x1xf32>
    %601 = vector.broadcast %600 : vector<32x1xf32> to vector<32x32xf32>
    %602 = arith.subf %596, %601 : vector<32x32xf32>
    %603 = arith.mulf %602, %602 : vector<32x32xf32>
    %cst_231 = arith.constant dense<0.000000e+00> : vector<32xf32>
    %604 = vector.multi_reduction <add>, %603, %cst_231 [1] : vector<32x32xf32> to vector<32xf32>
    %605 = vector.shape_cast %604 : vector<32xf32> to vector<32x1xf32>
    %cst_232 = arith.constant 0.0322580636 : f32
    %606 = vector.broadcast %cst_232 : f32 to vector<32x1xf32>
    %607 = arith.mulf %605, %606 : vector<32x1xf32>
    %608 = math.sqrt %607 : vector<32x1xf32>
    %cst_233 = arith.constant 9.99999997E-7 : f32
    %609 = vector.broadcast %cst_233 : f32 to vector<32x1xf32>
    %610 = arith.addf %608, %609 : vector<32x1xf32>
    %611 = tpu.reciprocal %610 : vector<32x1xf32> -> vector<32x1xf32>
    %c0_234 = arith.constant 0 : index
    %c0_235 = arith.constant 0 : index
    %612 = vector.load %arg25[%c0_234, %c0_235] : memref<1x32xf32, #tpu.memory_space<vmem>>, vector<1x32xf32>
    %613 = vector.broadcast %611 : vector<32x1xf32> to vector<32x32xf32>
    %614 = arith.mulf %602, %613 : vector<32x32xf32>
    %615 = vector.broadcast %612 : vector<1x32xf32> to vector<32x32xf32>
    %616 = arith.mulf %615, %614 : vector<32x32xf32>
    %c0_236 = arith.constant 0 : index
    %c0_237 = arith.constant 0 : index
    %617 = vector.load %arg26[%c0_236, %c0_237] : memref<1x32xf32, #tpu.memory_space<vmem>>, vector<1x32xf32>
    %618 = vector.broadcast %617 : vector<1x32xf32> to vector<32x32xf32>
    %619 = arith.addf %616, %618 : vector<32x32xf32>
    %c0_238 = arith.constant 0 : index
    %c0_239 = arith.constant 0 : index
    %620 = vector.load %arg27[%c0_238, %c0_239] : memref<32x64xf32, #tpu.memory_space<vmem>>, vector<32x64xf32>
    %cst_240 = arith.constant dense<0.000000e+00> : vector<32x64xf32>
    %621 = tpu.matmul %619, %620, %cst_240 {dimension_numbers = #tpu.dot_dimension_numbers<[1], [0], [0], [1], [0, 0, 1, 1], [], []>} : vector<32x32xf32>, vector<32x64xf32>, vector<32x64xf32> -> vector<32x64xf32>
    %c0_241 = arith.constant 0 : index
    %c0_242 = arith.constant 0 : index
    %622 = vector.load %arg23[%c0_241, %c0_242] : memref<1x64xf32, #tpu.memory_space<vmem>>, vector<1x64xf32>
    %623 = vector.broadcast %622 : vector<1x64xf32> to vector<32x64xf32>
    %624 = arith.addf %621, %623 : vector<32x64xf32>
    %cst_243 = arith.constant 0.000000e+00 : f32
    %625 = vector.broadcast %cst_243 : f32 to vector<32x64xf32>
    %626 = arith.maximumf %624, %625 : vector<32x64xf32>
    %c0_244 = arith.constant 0 : index
    %c0_245 = arith.constant 0 : index
    %627 = vector.load %arg28[%c0_244, %c0_245] : memref<64x32xf32, #tpu.memory_space<vmem>>, vector<64x32xf32>
    %cst_246 = arith.constant dense<0.000000e+00> : vector<32x32xf32>
    %628 = tpu.matmul %626, %627, %cst_246 {dimension_numbers = #tpu.dot_dimension_numbers<[1], [0], [0], [1], [0, 0, 1, 1], [], []>} : vector<32x64xf32>, vector<64x32xf32>, vector<32x32xf32> -> vector<32x32xf32>
    %c0_247 = arith.constant 0 : index
    %c0_248 = arith.constant 0 : index
    %629 = vector.load %arg24[%c0_247, %c0_248] : memref<1x32xf32, #tpu.memory_space<vmem>>, vector<1x32xf32>
    %630 = vector.broadcast %629 : vector<1x32xf32> to vector<32x32xf32>
    %631 = arith.addf %628, %630 : vector<32x32xf32>
    %632 = arith.addf %596, %631 : vector<32x32xf32>
    %cst_249 = arith.constant dense<0.000000e+00> : vector<32xf32>
    %633 = vector.multi_reduction <add>, %632, %cst_249 [1] : vector<32x32xf32> to vector<32xf32>
    %634 = vector.shape_cast %633 : vector<32xf32> to vector<32x1xf32>
    %cst_250 = arith.constant 3.200000e+01 : f32
    %635 = vector.broadcast %cst_250 : f32 to vector<32x1xf32>
    %636 = arith.divf %634, %635 : vector<32x1xf32>
    %637 = vector.broadcast %636 : vector<32x1xf32> to vector<32x32xf32>
    %638 = arith.subf %632, %637 : vector<32x32xf32>
    %639 = arith.mulf %638, %638 : vector<32x32xf32>
    %cst_251 = arith.constant dense<0.000000e+00> : vector<32xf32>
    %640 = vector.multi_reduction <add>, %639, %cst_251 [1] : vector<32x32xf32> to vector<32xf32>
    %641 = vector.shape_cast %640 : vector<32xf32> to vector<32x1xf32>
    %cst_252 = arith.constant 0.0322580636 : f32
    %642 = vector.broadcast %cst_252 : f32 to vector<32x1xf32>
    %643 = arith.mulf %641, %642 : vector<32x1xf32>
    %644 = math.sqrt %643 : vector<32x1xf32>
    %cst_253 = arith.constant 9.99999997E-7 : f32
    %645 = vector.broadcast %cst_253 : f32 to vector<32x1xf32>
    %646 = arith.addf %644, %645 : vector<32x1xf32>
    %647 = tpu.reciprocal %646 : vector<32x1xf32> -> vector<32x1xf32>
    %c0_254 = arith.constant 0 : index
    %c0_255 = arith.constant 0 : index
    %648 = vector.load %arg43[%c0_254, %c0_255] : memref<1x32xf32, #tpu.memory_space<vmem>>, vector<1x32xf32>
    %649 = vector.broadcast %647 : vector<32x1xf32> to vector<32x32xf32>
    %650 = arith.mulf %638, %649 : vector<32x32xf32>
    %651 = vector.broadcast %648 : vector<1x32xf32> to vector<32x32xf32>
    %652 = arith.mulf %651, %650 : vector<32x32xf32>
    %c0_256 = arith.constant 0 : index
    %c0_257 = arith.constant 0 : index
    %653 = vector.load %arg44[%c0_256, %c0_257] : memref<1x32xf32, #tpu.memory_space<vmem>>, vector<1x32xf32>
    %654 = vector.broadcast %653 : vector<1x32xf32> to vector<32x32xf32>
    %655 = arith.addf %652, %654 : vector<32x32xf32>
    %656 = vector.shape_cast %655 : vector<32x32xf32> to vector<2x16x32xf32>
    %657 = tpu.transpose %656, [0, 2, 1] : vector<2x16x32xf32> -> vector<2x32x16xf32>
    %c0_258 = arith.constant 0 : index
    %c0_259 = arith.constant 0 : index
    %c0_260 = arith.constant 0 : index
    %c0_261 = arith.constant 0 : index
    %658 = vector.load %arg71[%c0_258, %c0_259, %c0_260, %c0_261] : memref<1x2x32x16xf32, #tpu.memory_space<vmem>>, vector<1x2x32x16xf32>
    %659 = vector.shape_cast %658 : vector<1x2x32x16xf32> to vector<2x32x16xf32>
    %660 = vector.shape_cast %657 : vector<2x32x16xf32> to vector<1x2x32x16xf32>
    tpu.vector_store %arg71[%c0_258, %c0_259, %c0_260, %c0_261], %660 {strides = array<i32>} : memref<1x2x32x16xf32, #tpu.memory_space<vmem>>, vector<1x2x32x16xf32>,
    return
  }
  func.func @transform_0(%arg0: i32) -> (i32, i32, i32, i32) {
    %c0_i32 = arith.constant 0 : i32
    %c0_i32_0 = arith.constant 0 : i32
    %c0_i32_1 = arith.constant 0 : i32
    %c0_i32_2 = arith.constant 0 : i32
    return %arg0, %c0_i32, %c0_i32_0, %c0_i32_1 : i32, i32, i32, i32
  }
  func.func @transform_1(%arg0: i32) -> (i32, i32, i32, i32) {
    %c0_i32 = arith.constant 0 : i32
    %c0_i32_0 = arith.constant 0 : i32
    %c0_i32_1 = arith.constant 0 : i32
    %c0_i32_2 = arith.constant 0 : i32
    return %arg0, %c0_i32, %c0_i32_0, %c0_i32_1 : i32, i32, i32, i32
  }
  func.func @transform_2(%arg0: i32) -> (i32, i32) {
    %c0_i32 = arith.constant 0 : i32
    %c0_i32_0 = arith.constant 0 : i32
    %c0_i32_1 = arith.constant 0 : i32
    return %c0_i32, %c0_i32_0 : i32, i32
  }
  func.func @transform_3(%arg0: i32) -> (i32, i32) {
    %c0_i32 = arith.constant 0 : i32
    %c0_i32_0 = arith.constant 0 : i32
    %c0_i32_1 = arith.constant 0 : i32
    return %c0_i32, %c0_i32_0 : i32, i32
  }
  func.func @transform_4(%arg0: i32) -> (i32, i32) {
    %c0_i32 = arith.constant 0 : i32
    %c0_i32_0 = arith.constant 0 : i32
    %c0_i32_1 = arith.constant 0 : i32
    return %c0_i32, %c0_i32_0 : i32, i32
  }
  func.func @transform_5(%arg0: i32) -> (i32, i32) {
    %c0_i32 = arith.constant 0 : i32
    %c0_i32_0 = arith.constant 0 : i32
    %c0_i32_1 = arith.constant 0 : i32
    return %c0_i32, %c0_i32_0 : i32, i32
  }
  func.func @transform_6(%arg0: i32) -> (i32, i32) {
    %c0_i32 = arith.constant 0 : i32
    %c0_i32_0 = arith.constant 0 : i32
    %c0_i32_1 = arith.constant 0 : i32
    return %c0_i32, %c0_i32_0 : i32, i32
  }
  func.func @transform_7(%arg0: i32) -> (i32, i32) {
    %c0_i32 = arith.constant 0 : i32
    %c0_i32_0 = arith.constant 0 : i32
    %c0_i32_1 = arith.constant 0 : i32
    return %c0_i32, %c0_i32_0 : i32, i32
  }
  func.func @transform_8(%arg0: i32) -> (i32, i32) {
    %c0_i32 = arith.constant 0 : i32
    %c0_i32_0 = arith.constant 0 : i32
    %c0_i32_1 = arith.constant 0 : i32
    return %c0_i32, %c0_i32_0 : i32, i32
  }
  func.func @transform_9(%arg0: i32) -> (i32, i32) {
    %c0_i32 = arith.constant 0 : i32
    %c0_i32_0 = arith.constant 0 : i32
    %c0_i32_1 = arith.constant 0 : i32
    return %c0_i32, %c0_i32_0 : i32, i32
  }
  func.func @transform_10(%arg0: i32) -> (i32, i32) {
    %c0_i32 = arith.constant 0 : i32
    %c0_i32_0 = arith.constant 0 : i32
    %c0_i32_1 = arith.constant 0 : i32
    return %c0_i32, %c0_i32_0 : i32, i32
  }
  func.func @transform_11(%arg0: i32) -> (i32, i32) {
    %c0_i32 = arith.constant 0 : i32
    %c0_i32_0 = arith.constant 0 : i32
    %c0_i32_1 = arith.constant 0 : i32
    return %c0_i32, %c0_i32_0 : i32, i32
  }
  func.func @transform_12(%arg0: i32) -> (i32, i32) {
    %c0_i32 = arith.constant 0 : i32
    %c0_i32_0 = arith.constant 0 : i32
    %c0_i32_1 = arith.constant 0 : i32
    return %c0_i32, %c0_i32_0 : i32, i32
  }
  func.func @transform_13(%arg0: i32) -> (i32, i32) {
    %c0_i32 = arith.constant 0 : i32
    %c0_i32_0 = arith.constant 0 : i32
    %c0_i32_1 = arith.constant 0 : i32
    return %c0_i32, %c0_i32_0 : i32, i32
  }
  func.func @transform_14(%arg0: i32) -> (i32, i32) {
    %c0_i32 = arith.constant 0 : i32
    %c0_i32_0 = arith.constant 0 : i32
    %c0_i32_1 = arith.constant 0 : i32
    return %c0_i32, %c0_i32_0 : i32, i32
  }
  func.func @transform_15(%arg0: i32) -> (i32, i32) {
    %c0_i32 = arith.constant 0 : i32
    %c0_i32_0 = arith.constant 0 : i32
    %c0_i32_1 = arith.constant 0 : i32
    return %c0_i32, %c0_i32_0 : i32, i32
  }
  func.func @transform_16(%arg0: i32) -> (i32, i32) {
    %c0_i32 = arith.constant 0 : i32
    %c0_i32_0 = arith.constant 0 : i32
    %c0_i32_1 = arith.constant 0 : i32
    return %c0_i32, %c0_i32_0 : i32, i32
  }
  func.func @transform_17(%arg0: i32) -> (i32, i32) {
    %c0_i32 = arith.constant 0 : i32
    %c0_i32_0 = arith.constant 0 : i32
    %c0_i32_1 = arith.constant 0 : i32
    return %c0_i32, %c0_i32_0 : i32, i32
  }
  func.func @transform_18(%arg0: i32) -> (i32, i32) {
    %c0_i32 = arith.constant 0 : i32
    %c0_i32_0 = arith.constant 0 : i32
    %c0_i32_1 = arith.constant 0 : i32
    return %c0_i32, %c0_i32_0 : i32, i32
  }
  func.func @transform_19(%arg0: i32) -> (i32, i32) {
    %c0_i32 = arith.constant 0 : i32
    %c0_i32_0 = arith.constant 0 : i32
    %c0_i32_1 = arith.constant 0 : i32
    return %c0_i32, %c0_i32_0 : i32, i32
  }
  func.func @transform_20(%arg0: i32) -> (i32, i32) {
    %c0_i32 = arith.constant 0 : i32
    %c0_i32_0 = arith.constant 0 : i32
    %c0_i32_1 = arith.constant 0 : i32
    return %c0_i32, %c0_i32_0 : i32, i32
  }
  func.func @transform_21(%arg0: i32) -> (i32, i32) {
    %c0_i32 = arith.constant 0 : i32
    %c0_i32_0 = arith.constant 0 : i32
    %c0_i32_1 = arith.constant 0 : i32
    return %c0_i32, %c0_i32_0 : i32, i32
  }
  func.func @transform_22(%arg0: i32) -> (i32, i32) {
    %c0_i32 = arith.constant 0 : i32
    %c0_i32_0 = arith.constant 0 : i32
    %c0_i32_1 = arith.constant 0 : i32
    return %c0_i32, %c0_i32_0 : i32, i32
  }
  func.func @transform_23(%arg0: i32) -> (i32, i32) {
    %c0_i32 = arith.constant 0 : i32
    %c0_i32_0 = arith.constant 0 : i32
    %c0_i32_1 = arith.constant 0 : i32
    return %c0_i32, %c0_i32_0 : i32, i32
  }
  func.func @transform_24(%arg0: i32) -> (i32, i32) {
    %c0_i32 = arith.constant 0 : i32
    %c0_i32_0 = arith.constant 0 : i32
    %c0_i32_1 = arith.constant 0 : i32
    return %c0_i32, %c0_i32_0 : i32, i32
  }
  func.func @transform_25(%arg0: i32) -> (i32, i32) {
    %c0_i32 = arith.constant 0 : i32
    %c0_i32_0 = arith.constant 0 : i32
    %c0_i32_1 = arith.constant 0 : i32
    return %c0_i32, %c0_i32_0 : i32, i32
  }
  func.func @transform_26(%arg0: i32) -> (i32, i32) {
    %c0_i32 = arith.constant 0 : i32
    %c0_i32_0 = arith.constant 0 : i32
    %c0_i32_1 = arith.constant 0 : i32
    return %c0_i32, %c0_i32_0 : i32, i32
  }
  func.func @transform_27(%arg0: i32) -> (i32, i32) {
    %c0_i32 = arith.constant 0 : i32
    %c0_i32_0 = arith.constant 0 : i32
    %c0_i32_1 = arith.constant 0 : i32
    return %c0_i32, %c0_i32_0 : i32, i32
  }
  func.func @transform_28(%arg0: i32) -> (i32, i32) {
    %c0_i32 = arith.constant 0 : i32
    %c0_i32_0 = arith.constant 0 : i32
    %c0_i32_1 = arith.constant 0 : i32
    return %c0_i32, %c0_i32_0 : i32, i32
  }
  func.func @transform_29(%arg0: i32) -> (i32, i32) {
    %c0_i32 = arith.constant 0 : i32
    %c0_i32_0 = arith.constant 0 : i32
    %c0_i32_1 = arith.constant 0 : i32
    return %c0_i32, %c0_i32_0 : i32, i32
  }
  func.func @transform_30(%arg0: i32) -> (i32, i32) {
    %c0_i32 = arith.constant 0 : i32
    %c0_i32_0 = arith.constant 0 : i32
    %c0_i32_1 = arith.constant 0 : i32
    return %c0_i32, %c0_i32_0 : i32, i32
  }
  func.func @transform_31(%arg0: i32) -> (i32, i32) {
    %c0_i32 = arith.constant 0 : i32
    %c0_i32_0 = arith.constant 0 : i32
    %c0_i32_1 = arith.constant 0 : i32
    return %c0_i32, %c0_i32_0 : i32, i32
  }
  func.func @transform_32(%arg0: i32) -> (i32, i32) {
    %c0_i32 = arith.constant 0 : i32
    %c0_i32_0 = arith.constant 0 : i32
    %c0_i32_1 = arith.constant 0 : i32
    return %c0_i32, %c0_i32_0 : i32, i32
  }
  func.func @transform_33(%arg0: i32) -> (i32, i32) {
    %c0_i32 = arith.constant 0 : i32
    %c0_i32_0 = arith.constant 0 : i32
    %c0_i32_1 = arith.constant 0 : i32
    return %c0_i32, %c0_i32_0 : i32, i32
  }
  func.func @transform_34(%arg0: i32) -> (i32, i32) {
    %c0_i32 = arith.constant 0 : i32
    %c0_i32_0 = arith.constant 0 : i32
    %c0_i32_1 = arith.constant 0 : i32
    return %c0_i32, %c0_i32_0 : i32, i32
  }
  func.func @transform_35(%arg0: i32) -> (i32, i32) {
    %c0_i32 = arith.constant 0 : i32
    %c0_i32_0 = arith.constant 0 : i32
    %c0_i32_1 = arith.constant 0 : i32
    return %c0_i32, %c0_i32_0 : i32, i32
  }
  func.func @transform_36(%arg0: i32) -> (i32, i32) {
    %c0_i32 = arith.constant 0 : i32
    %c0_i32_0 = arith.constant 0 : i32
    %c0_i32_1 = arith.constant 0 : i32
    return %c0_i32, %c0_i32_0 : i32, i32
  }
  func.func @transform_37(%arg0: i32) -> (i32, i32) {
    %c0_i32 = arith.constant 0 : i32
    %c0_i32_0 = arith.constant 0 : i32
    %c0_i32_1 = arith.constant 0 : i32
    return %c0_i32, %c0_i32_0 : i32, i32
  }
  func.func @transform_38(%arg0: i32) -> (i32, i32) {
    %c0_i32 = arith.constant 0 : i32
    %c0_i32_0 = arith.constant 0 : i32
    %c0_i32_1 = arith.constant 0 : i32
    return %c0_i32, %c0_i32_0 : i32, i32
  }
  func.func @transform_39(%arg0: i32) -> (i32, i32) {
    %c0_i32 = arith.constant 0 : i32
    %c0_i32_0 = arith.constant 0 : i32
    %c0_i32_1 = arith.constant 0 : i32
    return %c0_i32, %c0_i32_0 : i32, i32
  }
  func.func @transform_40(%arg0: i32) -> (i32, i32) {
    %c0_i32 = arith.constant 0 : i32
    %c0_i32_0 = arith.constant 0 : i32
    %c0_i32_1 = arith.constant 0 : i32
    return %c0_i32, %c0_i32_0 : i32, i32
  }
  func.func @transform_41(%arg0: i32) -> (i32, i32) {
    %c0_i32 = arith.constant 0 : i32
    %c0_i32_0 = arith.constant 0 : i32
    %c0_i32_1 = arith.constant 0 : i32
    return %c0_i32, %c0_i32_0 : i32, i32
  }
  func.func @transform_42(%arg0: i32) -> (i32, i32) {
    %c0_i32 = arith.constant 0 : i32
    %c0_i32_0 = arith.constant 0 : i32
    %c0_i32_1 = arith.constant 0 : i32
    return %c0_i32, %c0_i32_0 : i32, i32
  }
  func.func @transform_43(%arg0: i32) -> (i32, i32) {
    %c0_i32 = arith.constant 0 : i32
    %c0_i32_0 = arith.constant 0 : i32
    %c0_i32_1 = arith.constant 0 : i32
    return %c0_i32, %c0_i32_0 : i32, i32
  }
  func.func @transform_44(%arg0: i32) -> (i32, i32) {
    %c0_i32 = arith.constant 0 : i32
    %c0_i32_0 = arith.constant 0 : i32
    %c0_i32_1 = arith.constant 0 : i32
    return %c0_i32, %c0_i32_0 : i32, i32
  }
  func.func @transform_45(%arg0: i32) -> (i32, i32) {
    %c0_i32 = arith.constant 0 : i32
    %c0_i32_0 = arith.constant 0 : i32
    %c0_i32_1 = arith.constant 0 : i32
    return %c0_i32, %c0_i32_0 : i32, i32
  }
  func.func @transform_46(%arg0: i32) -> (i32, i32) {
    %c0_i32 = arith.constant 0 : i32
    %c0_i32_0 = arith.constant 0 : i32
    %c0_i32_1 = arith.constant 0 : i32
    return %c0_i32, %c0_i32_0 : i32, i32
  }
  func.func @transform_47(%arg0: i32) -> (i32, i32) {
    %c0_i32 = arith.constant 0 : i32
    %c0_i32_0 = arith.constant 0 : i32
    %c0_i32_1 = arith.constant 0 : i32
    return %c0_i32, %c0_i32_0 : i32, i32
  }
  func.func @transform_48(%arg0: i32) -> (i32, i32) {
    %c0_i32 = arith.constant 0 : i32
    %c0_i32_0 = arith.constant 0 : i32
    %c0_i32_1 = arith.constant 0 : i32
    return %c0_i32, %c0_i32_0 : i32, i32
  }
  func.func @transform_49(%arg0: i32) -> (i32, i32) {
    %c0_i32 = arith.constant 0 : i32
    %c0_i32_0 = arith.constant 0 : i32
    %c0_i32_1 = arith.constant 0 : i32
    return %c0_i32, %c0_i32_0 : i32, i32
  }
  func.func @transform_50(%arg0: i32) -> (i32, i32) {
    %c0_i32 = arith.constant 0 : i32
    %c0_i32_0 = arith.constant 0 : i32
    %c0_i32_1 = arith.constant 0 : i32
    return %c0_i32, %c0_i32_0 : i32, i32
  }
  func.func @transform_51(%arg0: i32) -> (i32, i32) {
    %c0_i32 = arith.constant 0 : i32
    %c0_i32_0 = arith.constant 0 : i32
    %c0_i32_1 = arith.constant 0 : i32
    return %c0_i32, %c0_i32_0 : i32, i32
  }
  func.func @transform_52(%arg0: i32) -> (i32, i32) {
    %c0_i32 = arith.constant 0 : i32
    %c0_i32_0 = arith.constant 0 : i32
    %c0_i32_1 = arith.constant 0 : i32
    return %c0_i32, %c0_i32_0 : i32, i32
  }
  func.func @transform_53(%arg0: i32) -> (i32, i32) {
    %c0_i32 = arith.constant 0 : i32
    %c0_i32_0 = arith.constant 0 : i32
    %c0_i32_1 = arith.constant 0 : i32
    return %c0_i32, %c0_i32_0 : i32, i32
  }
  func.func @transform_54(%arg0: i32) -> (i32, i32) {
    %c0_i32 = arith.constant 0 : i32
    %c0_i32_0 = arith.constant 0 : i32
    %c0_i32_1 = arith.constant 0 : i32
    return %c0_i32, %c0_i32_0 : i32, i32
  }
  func.func @transform_55(%arg0: i32) -> (i32, i32) {
    %c0_i32 = arith.constant 0 : i32
    %c0_i32_0 = arith.constant 0 : i32
    %c0_i32_1 = arith.constant 0 : i32
    return %c0_i32, %c0_i32_0 : i32, i32
  }
  func.func @transform_56(%arg0: i32) -> (i32, i32) {
    %c0_i32 = arith.constant 0 : i32
    %c0_i32_0 = arith.constant 0 : i32
    %c0_i32_1 = arith.constant 0 : i32
    return %c0_i32, %c0_i32_0 : i32, i32
  }
  func.func @transform_57(%arg0: i32) -> (i32, i32) {
    %c0_i32 = arith.constant 0 : i32
    %c0_i32_0 = arith.constant 0 : i32
    %c0_i32_1 = arith.constant 0 : i32
    return %c0_i32, %c0_i32_0 : i32, i32
  }
  func.func @transform_58(%arg0: i32) -> (i32, i32) {
    %c0_i32 = arith.constant 0 : i32
    %c0_i32_0 = arith.constant 0 : i32
    %c0_i32_1 = arith.constant 0 : i32
    return %c0_i32, %c0_i32_0 : i32, i32
  }
  func.func @transform_59(%arg0: i32) -> (i32, i32) {
    %c0_i32 = arith.constant 0 : i32
    %c0_i32_0 = arith.constant 0 : i32
    %c0_i32_1 = arith.constant 0 : i32
    return %c0_i32, %c0_i32_0 : i32, i32
  }
  func.func @transform_60(%arg0: i32) -> (i32, i32) {
    %c0_i32 = arith.constant 0 : i32
    %c0_i32_0 = arith.constant 0 : i32
    %c0_i32_1 = arith.constant 0 : i32
    return %c0_i32, %c0_i32_0 : i32, i32
  }
  func.func @transform_61(%arg0: i32) -> (i32, i32) {
    %c0_i32 = arith.constant 0 : i32
    %c0_i32_0 = arith.constant 0 : i32
    %c0_i32_1 = arith.constant 0 : i32
    return %c0_i32, %c0_i32_0 : i32, i32
  }
  func.func @transform_62(%arg0: i32) -> (i32, i32) {
    %c0_i32 = arith.constant 0 : i32
    %c0_i32_0 = arith.constant 0 : i32
    %c0_i32_1 = arith.constant 0 : i32
    return %c0_i32, %c0_i32_0 : i32, i32
  }
  func.func @transform_63(%arg0: i32) -> (i32, i32) {
    %c0_i32 = arith.constant 0 : i32
    %c0_i32_0 = arith.constant 0 : i32
    %c0_i32_1 = arith.constant 0 : i32
    return %c0_i32, %c0_i32_0 : i32, i32
  }
  func.func @transform_64(%arg0: i32) -> (i32, i32) {
    %c0_i32 = arith.constant 0 : i32
    %c0_i32_0 = arith.constant 0 : i32
    %c0_i32_1 = arith.constant 0 : i32
    return %c0_i32, %c0_i32_0 : i32, i32
  }
  func.func @transform_65(%arg0: i32) -> (i32, i32) {
    %c0_i32 = arith.constant 0 : i32
    %c0_i32_0 = arith.constant 0 : i32
    %c0_i32_1 = arith.constant 0 : i32
    return %c0_i32, %c0_i32_0 : i32, i32
  }
  func.func @transform_66(%arg0: i32) -> (i32, i32) {
    %c0_i32 = arith.constant 0 : i32
    %c0_i32_0 = arith.constant 0 : i32
    %c0_i32_1 = arith.constant 0 : i32
    return %c0_i32, %c0_i32_0 : i32, i32
  }
  func.func @transform_67(%arg0: i32) -> (i32, i32) {
    %c0_i32 = arith.constant 0 : i32
    %c0_i32_0 = arith.constant 0 : i32
    %c0_i32_1 = arith.constant 0 : i32
    return %c0_i32, %c0_i32_0 : i32, i32
  }
  func.func @transform_68(%arg0: i32) -> (i32, i32) {
    %c0_i32 = arith.constant 0 : i32
    %c0_i32_0 = arith.constant 0 : i32
    %c0_i32_1 = arith.constant 0 : i32
    return %c0_i32, %c0_i32_0 : i32, i32
  }
  func.func @transform_69(%arg0: i32) -> (i32, i32) {
    %c0_i32 = arith.constant 0 : i32
    %c0_i32_0 = arith.constant 0 : i32
    %c0_i32_1 = arith.constant 0 : i32
    return %c0_i32, %c0_i32_0 : i32, i32
  }
  func.func @transform_70(%arg0: i32) -> (i32, i32, i32, i32) {
    %c0_i32 = arith.constant 0 : i32
    %c0_i32_0 = arith.constant 0 : i32
    %c0_i32_1 = arith.constant 0 : i32
    %c0_i32_2 = arith.constant 0 : i32
    return %arg0, %c0_i32, %c0_i32_0, %c0_i32_1 : i32, i32, i32, i32
  }
}

</mosaic_0001>

<bundles_post_ra>
// kernel: transformer_forward.1
= control target key start
LH: loop header
LB: loop body
LE: loop exit
PB: predicated region body
PF: predicated region fallthrough
CT: control target
= control target key end

     0   :  { %s21920_s6 = smov 1   ;;  %s21921_s10 = smov 2   ;;  %s25480_s0 = inlined_call_operand.smem [shape: u32[71], index: -1, kind: input, shape index: {}] }
   0x1   :  { %s22034_s5 = sld [smem:[%s25480_s0]]   ;;  %s21922_s14 = smov 3  }
   0x2   :  { %s22039_s9 = sld [smem:[%s25480_s0 + %s21920_s6]]   ;;  %s21923_s18 = smov 4  }
   0x3   :  { %s22044_s13 = sld [smem:[%s25480_s0 + %s21921_s10]]   ;;  %s21924_s22 = smov 5  }
   0x4   :  { %s22049_s17 = sld [smem:[%s25480_s0 + %s21922_s14]]   ;;  %s21925_s26 = smov 6  }
   0x5   :  { %s22054_s21 = sld [smem:[%s25480_s0 + %s21923_s18]]   ;;  %s21926_s30 = smov 7  }
   0x6   :  { %s22059_s25 = sld [smem:[%s25480_s0 + %s21924_s22]]   ;;  %s21927_s4 = smov 8  }
   0x7   :  { %25559 = sst [smem:[#allocation60_spill]] %s22034_s5  ;;  %s21928_s10 = smov 9  }
   0x8   :  { %25560 = sst [smem:[#allocation61_spill]] %s22039_s9  ;;  %s21929_s15 = smov 10  }
   0x9   :  { %25561 = sst [smem:[#allocation62_spill]] %s22044_s13  ;;  %s21930_s20 = smov 11  }
   0xa   :  { %25562 = sst [smem:[#allocation63_spill]] %s22049_s17  ;;  %s21932_s1 = smov 13  }
   0xb   :  { %25563 = sst [smem:[#allocation64_spill]] %s22054_s21  ;;  %s21933_s7 = smov 14  }
   0xc   :  { %25564 = sst [smem:[#allocation65_spill]] %s22059_s25  ;;  %s21935_s22 = smov 16  }
   0xd   :  { %s22064_s29 = sld [smem:[%s25480_s0 + %s21925_s26]]   ;;  %s21931_s26 = smov 12  }
   0xe   :  { %s22069_s3 = sld [smem:[%s25480_s0 + %s21926_s30]]   ;;  %s21936_s28 = smov 17  }
   0xf   :  { %s22074_s8 = sld [smem:[%s25480_s0 + %s21927_s4]]  }
  0x10   :  { %s22079_s14 = sld [smem:[%s25480_s0 + %s21928_s10]]  }
  0x11   :  { %s22084_s19 = sld [smem:[%s25480_s0 + %s21929_s15]]   ;;  %s21934_s15 = smov 15  }
  0x12   :  { %s22089_s24 = sld [smem:[%s25480_s0 + %s21930_s20]]  }
  0x13   :  { %25565 = sst [smem:[#allocation66_spill]] %s22064_s29 }
  0x14   :  { %25566 = sst [smem:[#allocation67_spill]] %s22069_s3 }
  0x15   :  { %25567 = sst [smem:[#allocation68_spill]] %s22074_s8 }
  0x16   :  { %25568 = sst [smem:[#allocation69_spill]] %s22079_s14 }
  0x17   :  { %25569 = sst [smem:[#allocation70_spill]] %s22084_s19 }
  0x18   :  { %25570 = sst [smem:[#allocation71_spill]] %s22089_s24 }
  0x19   :  { %s22094_s30 = sld [smem:[%s25480_s0 + %s21931_s26]]  }
  0x1a   :  { %s22099_s6 = sld [smem:[%s25480_s0 + %s21932_s1]]  }
  0x1b   :  { %s22104_s12 = sld [smem:[%s25480_s0 + %s21933_s7]]   ;;  %s21937_s7 = smov 18  }
  0x1c   :  { %s22109_s20 = sld [smem:[%s25480_s0 + %s21934_s15]]   ;;  %s21938_s15 = smov 19  }
  0x1d   :  { %s22114_s27 = sld [smem:[%s25480_s0 + %s21935_s22]]   ;;  %s21939_s22 = smov 20  }
  0x1e   :  { %s22119_s4 = sld [smem:[%s25480_s0 + %s21936_s28]]   ;;  %s21940_s28 = smov 21  }
  0x1f   :  { %25571 = sst [smem:[#allocation72_spill]] %s22094_s30 }
  0x20   :  { %25572 = sst [smem:[#allocation73_spill]] %s22099_s6 }
  0x21   :  { %25573 = sst [smem:[#allocation74_spill]] %s22104_s12 }
  0x22   :  { %25574 = sst [smem:[#allocation75_spill]] %s22109_s20 }
  0x23   :  { %25575 = sst [smem:[#allocation76_spill]] %s22114_s27 }
  0x24   :  { %25576 = sst [smem:[#allocation77_spill]] %s22119_s4 }
  0x25   :  { %s22124_s17 = sld [smem:[%s25480_s0 + %s21937_s7]]   ;;  %s21941_s7 = smov 22  }
  0x26   :  { %s22129_s13 = sld [smem:[%s25480_s0 + %s21938_s15]]   ;;  %s21942_s15 = smov 23  }
  0x27   :  { %s22134_s25 = sld [smem:[%s25480_s0 + %s21939_s22]]   ;;  %s21943_s22 = smov 24  }
  0x28   :  { %s22139_s21 = sld [smem:[%s25480_s0 + %s21940_s28]]   ;;  %s21944_s28 = smov 25  }
  0x29   :  { %s22144_s3 = sld [smem:[%s25480_s0 + %s21941_s7]]   ;;  %s21945_s7 = smov 26  }
  0x2a   :  { %s22149_s29 = sld [smem:[%s25480_s0 + %s21942_s15]]   ;;  %s21946_s15 = smov 27  }
  0x2b   :  { %25577 = sst [smem:[#allocation78_spill]] %s22124_s17 }
  0x2c   :  { %25578 = sst [smem:[#allocation79_spill]] %s22129_s13 }
  0x2d   :  { %25579 = sst [smem:[#allocation80_spill]] %s22134_s25 }
  0x2e   :  { %25580 = sst [smem:[#allocation81_spill]] %s22139_s21 }
  0x2f   :  { %25581 = sst [smem:[#allocation82_spill]] %s22144_s3 }
  0x30   :  { %25582 = sst [smem:[#allocation83_spill]] %s22149_s29 }
  0x31   :  { %s22154_s20 = sld [smem:[%s25480_s0 + %s21943_s22]]   ;;  %s21947_s22 = smov 28  }
  0x32   :  { %s22159_s25 = sld [smem:[%s25480_s0 + %s21944_s28]]   ;;  %s21948_s28 = smov 29  }
  0x33   :  { %s22164_s3 = sld [smem:[%s25480_s0 + %s21945_s7]]   ;;  %s21949_s7 = smov 30  }
  0x34   :  { %s22169_s29 = sld [smem:[%s25480_s0 + %s21946_s15]]   ;;  %s21950_s15 = smov 31  }
  0x37   :  { %25583 = sst [smem:[#allocation84_spill]] %s22154_s20 }
  0x38   :  { %25584 = sst [smem:[#allocation85_spill]] %s22159_s25 }
  0x39   :  { %25585 = sst [smem:[#allocation86_spill]] %s22164_s3 }
  0x3a   :  { %25586 = sst [smem:[#allocation87_spill]] %s22169_s29 }
  0x3b   :  { %s22174_s20 = sld [smem:[%s25480_s0 + %s21947_s22]]   ;;  %s21951_s22 = smov 32  }
  0x3c   :  { %s22179_s25 = sld [smem:[%s25480_s0 + %s21948_s28]]   ;;  %s21952_s28 = smov 33  }
  0x3d   :  { %s22184_s3 = sld [smem:[%s25480_s0 + %s21949_s7]]   ;;  %s21953_s7 = smov 34  }
  0x3e   :  { %s22189_s29 = sld [smem:[%s25480_s0 + %s21950_s15]]   ;;  %s21954_s15 = smov 35  }
  0x3f   :  { %s22199_s27 = sld [smem:[%s25480_s0 + %s21952_s28]]   ;;  %s21956_s28 = smov 37  }
  0x40   :  { %s22204_s12 = sld [smem:[%s25480_s0 + %s21953_s7]]   ;;  %s21957_s7 = smov 38  }
  0x41   :  { %25587 = sst [smem:[#allocation88_spill]] %s22174_s20 }
  0x42   :  { %s22194_s20 = sld [smem:[%s25480_s0 + %s21951_s22]]   ;;  %s21955_s22 = smov 36  }
  0x43   :  { %25588 = sst [smem:[#allocation89_spill]] %s22184_s3 }
  0x44   :  { %25589 = sst [smem:[#allocation90_spill]] %s22189_s29 }
  0x45   :  { %25591 = sst [smem:[#allocation92_spill]] %s22199_s27 }
  0x46   :  { %25592 = sst [smem:[#allocation93_spill]] %s22204_s12 }
  0x47   :  { %s22209_s17 = sld [smem:[%s25480_s0 + %s21954_s15]]   ;;  %s21958_s15 = smov 39  }
  0x48   :  { %25590 = sst [smem:[#allocation91_spill]] %s22194_s20 }
  0x49   :  { %s22214_s20 = sld [smem:[%s25480_s0 + %s21955_s22]]   ;;  %s21959_s22 = smov 40  }
  0x4a   :  { %s22219_s27 = sld [smem:[%s25480_s0 + %s21956_s28]]   ;;  %s21960_s28 = smov 41  }
  0x4b   :  { %s22224_s4 = sld [smem:[%s25480_s0 + %s21957_s7]]   ;;  %s21961_s7 = smov 42  }
  0x4c   :  { %s22229_s21 = sld [smem:[%s25480_s0 + %s21958_s15]]   ;;  %s21962_s15 = smov 43  }
  0x4d   :  { %25593 = sst [smem:[#allocation94_spill]] %s22209_s17 }
  0x4e   :  { %s22234_s13 = sld [smem:[%s25480_s0 + %s21959_s22]]   ;;  %s21963_s22 = smov 44  }
  0x4f   :  { %s22239_s8 = sld [smem:[%s25480_s0 + %s21960_s28]]   ;;  %s21964_s28 = smov 45  }
  0x50   :  { %25594 = sst [smem:[#allocation95_spill]] %s22219_s27 }
  0x51   :  { %25595 = sst [smem:[#allocation96_spill]] %s22224_s4 }
  0x52   :  { %25596 = sst [smem:[#allocation97_spill]] %s22229_s21 }
  0x53   :  { %s22244_s30 = sld [smem:[%s25480_s0 + %s21961_s7]]   ;;  %s21965_s7 = smov 46  }
  0x54   :  { %25597 = sst [smem:[#allocation98_spill]] %s22234_s13 }
  0x55   :  { %25598 = sst [smem:[#allocation99_spill]] %s22239_s8 }
  0x56   :  { %s22249_s21 = sld [smem:[%s25480_s0 + %s21962_s15]]   ;;  %s21966_s15 = smov 47  }
  0x57   :  { %s22254_s13 = sld [smem:[%s25480_s0 + %s21963_s22]]   ;;  %s21967_s22 = smov 48  }
  0x58   :  { %s22259_s8 = sld [smem:[%s25480_s0 + %s21964_s28]]   ;;  %s21968_s28 = smov 49  }
  0x59   :  { %25599 = sst [smem:[#allocation100_spill]] %s22244_s30 }
  0x5a   :  { %s22264_s14 = sld [smem:[%s25480_s0 + %s21965_s7]]   ;;  %s21969_s7 = smov 50  }
  0x5b   :  { %s22269_s24 = sld [smem:[%s25480_s0 + %s21966_s15]]   ;;  %s21970_s15 = smov 51  }
  0x5c   :  { %s22274_s19 = sld [smem:[%s25480_s0 + %s21967_s22]]   ;;  %s21971_s22 = smov 52  }
  0x5d   :  { %25600 = sst [smem:[#allocation101_spill]] %s22254_s13 }
  0x5e   :  { %25601 = sst [smem:[#allocation102_spill]] %s22259_s8 }
  0x5f   :  { %s22279_s6 = sld [smem:[%s25480_s0 + %s21968_s28]]   ;;  %s21972_s28 = smov 53  }
  0x60   :  { %25602 = sst [smem:[#allocation103_spill]] %s22264_s14 }
  0x61   :  { %s22284_s9 = sld [smem:[%s25480_s0 + %s21969_s7]]   ;;  %s21973_s7 = smov 54  }
  0x62   :  { %25603 = sst [smem:[#allocation104_spill]] %s22274_s19 }
  0x63   :  { %s22289_s5 = sld [smem:[%s25480_s0 + %s21970_s15]]   ;;  %s21974_s15 = smov 55  }
  0x64   :  { %s22294_s19 = sld [smem:[%s25480_s0 + %s21971_s22]]   ;;  %s21975_s22 = smov 56  }
  0x65   :  { %25604 = sst [smem:[#allocation105_spill]] %s22279_s6 }
  0x66   :  { %s22299_s6 = sld [smem:[%s25480_s0 + %s21972_s28]]   ;;  %s21976_s28 = smov 57  }
  0x67   :  { %25605 = sst [smem:[#allocation106_spill]] %s22284_s9 }
  0x68   :  { %s22304_s9 = sld [smem:[%s25480_s0 + %s21973_s7]]   ;;  %s21977_s7 = smov 58  }
  0x69   :  { %25606 = sst [smem:[#allocation107_spill]] %s22289_s5 }
  0x6a   :  { %25607 = sst [smem:[#allocation108_spill]] %s22294_s19 }
  0x6b   :  { %s22309_s14 = sld [smem:[%s25480_s0 + %s21974_s15]]   ;;  %s21978_s15 = smov 59  }
  0x6c   :  { %25608 = sst [smem:[#allocation109_spill]] %s22299_s6 }
  0x6d   :  { %s22314_s19 = sld [smem:[%s25480_s0 + %s21975_s22]]   ;;  %s21979_s22 = smov 60  }
  0x6e   :  { %25609 = sst [smem:[#allocation110_spill]] %s22304_s9 }
  0x6f   :  { %s22319_s13 = sld [smem:[%s25480_s0 + %s21976_s28]]   ;;  %s21980_s28 = smov 61  }
  0x70   :  { %s22324_s9 = sld [smem:[%s25480_s0 + %s21977_s7]]   ;;  %s21981_s7 = smov 62  }
  0x71   :  { %25610 = sst [smem:[#allocation111_spill]] %s22309_s14 }
  0x72   :  { %s22329_s14 = sld [smem:[%s25480_s0 + %s21978_s15]]   ;;  %s21982_s15 = smov 63  }
  0x73   :  { %25611 = sst [smem:[#allocation112_spill]] %s22314_s19 }
  0x74   :  { %s22334_s19 = sld [smem:[%s25480_s0 + %s21979_s22]]   ;;  %s21983_s22 = smov 64  }
  0x75   :  { %25612 = sst [smem:[#allocation113_spill]] %s22319_s13 }
  0x76   :  { %25613 = sst [smem:[#allocation114_spill]] %s22324_s9 }
  0x77   :  { %s22339_s30 = sld [smem:[%s25480_s0 + %s21980_s28]]   ;;  %s21984_s28 = smov 65  }
  0x78   :  { %s22344_s9 = sld [smem:[%s25480_s0 + %s21981_s7]]   ;;  %s21985_s7 = smov 66  }
  0x79   :  { %s22349_s27 = sld [smem:[%s25480_s0 + %s21982_s15]]   ;;  %s21986_s15 = smov 67  }
  0x7a   :  { %25614 = sst [smem:[#allocation115_spill]] %s22334_s19 }
  0x7b   :  { %s22354_s19 = sld [smem:[%s25480_s0 + %s21983_s22]]   ;;  %s21987_s22 = smov 68  }
  0x7c   :  { %s22369_s17 = sld [smem:[%s25480_s0 + %s21986_s15]]  }
  0x7d   :  { %25615 = sst [smem:[#allocation116_spill]] %s22339_s30 }
  0x7e   :  { %25616 = sst [smem:[#allocation117_spill]] %s22344_s9 }
  0x7f   :  { %s22359_s30 = sld [smem:[%s25480_s0 + %s21984_s28]]   ;;  %s21988_s28 = smov 69  }
  0x80   :  { %s22364_s9 = sld [smem:[%s25480_s0 + %s21985_s7]]   ;;  %s21989_s7 = smov 70  }
  0x81   :  { %25617 = sst [smem:[#allocation118_spill]] %s22354_s19 }
  0x82   :  { %s22374_s19 = sld [smem:[%s25480_s0 + %s21987_s22]]  }
  0x83   :  { %s22379_s29 = sld [smem:[%s25480_s0 + %s21988_s28]]  }
  0x86   :  { %25618 = sst [smem:[#allocation119_spill]] %s22364_s9 }
  0x87   :  { %s22384_s9 = sld [smem:[%s25480_s0 + %s21989_s7]]  }
  0x88   :  { %146 = vsyncpa [#allocation3], 0 }
  0x89   :  { %147 = vsyncpa [#allocation5], 0 }
  0x8a   :  { %148 = vsyncpa [#allocation8], 0 }
  0x8b   :  { %149 = vsyncpa [#allocation11], 0 }
  0x8c   :  { %150 = vsyncpa [#allocation14], 0 }
  0x8d   :  { %151 = vsyncpa [#allocation17], 0 }
  0x8e   :  { %152 = vsyncpa [#allocation20], 0 }
  0x8f   :  { %153 = vsyncpa [#allocation23], 0 }
  0x90   :  { %154 = vsyncpa [#allocation26], 0 }
  0x91   :  { %155 = vsyncpa [#allocation29], 0 }
  0x92   :  { %156 = vsyncpa [#allocation32], 0 }
  0x93   :  { %157 = vsyncpa [#allocation35], 0 }
  0x94   :  { %158 = vsyncpa [#allocation38], 0 }
  0x95   :  { %159 = vsyncpa [#allocation41], 0 }
  0x96   :  { %160 = vsyncpa [#allocation44], 0  ;;  %s22386_s15 = smov 0  }
  0x97 LB: > { %s25619_s13 = sld [smem:[#allocation113_spill]]  ;;  %s25620_s12 = sld [smem:[#allocation93_spill]]  ;;  %s21918_s15 = sphi %s22386_s15, %s166_s15  }
  0x98   : > { %s25621_s8 = sld [smem:[#allocation102_spill]]  ;;  %s25622_s6 = sld [smem:[#allocation109_spill]] }
  0x99   : > { %s25623_s5 = sld [smem:[#allocation107_spill]]  ;;  %s25624_s4 = sld [smem:[#allocation96_spill]] }
  0x9a   : > { %s25625_s3 = sld [smem:[#allocation89_spill]]  ;;  %s21990_s0 = smov [#allocation4]  }
  0x9b   : > { %s1782_s16 = sshll.u32 %s21990_s0, 4  ;;  %s22392_s18 = sadd.s32 4294967295, %s21918_s15   ;;  %s22397_s16 = int_to_ptr.vmem [resolvable:$true] %s1782_s16 }
  0x9c   : > { %p16776_p0 = scmp.ge.s32.totalorder %s21918_s15, 1  ;;  %p1677_p1 = scmp.lt.s32.totalorder %s21918_s15, 3 }
  0x9d   : > { %p25514_p2 = scmp.eq.s32.totalorder %s22392_s18, 0  ;;  %s21991_s23 = smov [#allocation7]  }
  0x9e   : > { %p22399_p3 = pnand %p16776_p0, %p1677_p1  ;;  %s1810_s26 = sshll.u32 %s21991_s23, 4  ;;  %s22405_s26 = int_to_ptr.vmem [resolvable:$true] %s1810_s26 }
  0x9f   : > { %s21992_s28 = smov [#allocation10]   ;;  %s21993_s7 = smov [#allocation13]  }
  0xa0   : > { %s25626_s22 = scalar_select %p22399_p3, 1, 0 }
  0xa1   : > { %p19656_p4 = pneg %p22399_p3  ;;  %s1832_s1 = sshll.u32 %s21992_s28, 4  ;;  %s22413_s1 = int_to_ptr.vmem [resolvable:$true] %s1832_s1 }
  0xa2   : > { %s1854_s10 = sshll.u32 %s21993_s7, 4  ;;  %s21068_s11 = scalar_lea.hbm %s25625_s3, 16  ;;  %s22415_s10 = int_to_ptr.vmem [resolvable:$true] %s1854_s10 }
  0xa3   : > { %p22409_p5 = pnand %p25514_p2, %p19656_p4  ;;  %p21069_p6 = scmp.ne.s32.totalorder %s25625_s3, %s21068_s11 }
  0xa4   : > { %p21075_p10 = scmp.lt.u32.totalorder %s21068_s11, %s25625_s3 }
  0xa5   : > { %p22421_p7 = pneg %p22409_p5 }
  0xa7   : > { %p21071_p8 = pnand %p22421_p7, %p21069_p6 }
  0xa9   : > { %p21072_p9 = pneg %p21071_p8 }
  0xab   : > { %p21077_p11 = pnand %p21075_p10, %p21072_p9 }
  0xad   : > { %21080 = shalt.err (!%p21077_p11)
}
  0xae   : > { %s21081_s23 = scalar_lea.vmem %s22397_s16, 16  ;;  %s21088_s28 = scalar_lea.vmem %s22397_s16, 32 }
  0xaf   : > { %p21082_p12 = scmp.ne.s32.totalorder %s22397_s16, %s21081_s23  ;;  %p21089_p1 = scmp.lt.s32.totalorder %s22397_s16, %s22397_s16 }
  0xb0   : > { %p21090_p4 = scmp.lt.s32.totalorder %s21088_s28, %s21081_s23 }
  0xb1   : > { %p21084_p13 = pnand %p21082_p12, %p22421_p7 }
  0xb2   : > { %p21091_p2 = por %p21090_p4, %p21089_p1 }
  0xb3   : > { %p21085_p0 = pneg %p21084_p13 }
  0xb5   : > { %p21092_p6 = pnand %p21091_p2, %p21085_p0 }
  0xb7   : > { %21095 = shalt.err (!%p21092_p6)
}
  0xb8   : > { %19662 = dma.hbm_to_vmem [thread:$0]  (!%p22409_p5), %s25625_s3, 16, %s22397_s16, [#allocation5]  }
  0xb9   : > { %s21096_s7 = scalar_lea.hbm %s25620_s12, 16 }
  0xba   : > { %p21097_p8 = scmp.ne.s32.totalorder %s25620_s12, %s21096_s7  ;;  %p21103_p11 = scmp.lt.u32.totalorder %s21096_s7, %s25620_s12 }
  0xbc   : > { %p21099_p9 = pnand %p21097_p8, %p22421_p7 }
  0xbe   : > { %p21100_p10 = pneg %p21099_p9 }
  0xc0   : > { %p21105_p12 = pnand %p21103_p11, %p21100_p10 }
  0xc2   : > { %21108 = shalt.err (!%p21105_p12)
}
  0xc3   : > { %s21109_s11 = scalar_lea.vmem %s22405_s26, 16  ;;  %s21116_s23 = scalar_lea.vmem %s22405_s26, 32 }
  0xc4   : > { %p21110_p2 = scmp.ne.s32.totalorder %s22405_s26, %s21109_s11  ;;  %p21117_p1 = scmp.lt.s32.totalorder %s22405_s26, %s22405_s26 }
  0xc5   : > { %p21118_p4 = scmp.lt.s32.totalorder %s21116_s23, %s21109_s11 }
  0xc6   : > { %p21112_p13 = pnand %p21110_p2, %p22421_p7 }
  0xc7   : > { %p21119_p6 = por %p21118_p4, %p21117_p1 }
  0xc8   : > { %p21113_p0 = pneg %p21112_p13 }
  0xca   : > { %p21120_p8 = pnand %p21119_p6, %p21113_p0 }
  0xcc   : > { %21123 = shalt.err (!%p21120_p8)
}
  0xcd   : > { %19668 = dma.hbm_to_vmem [thread:$0]  (!%p22409_p5), %s25620_s12, 16, %s22405_s26, [#allocation8]  }
  0xce   : > { %s21124_s16 = scalar_lea.hbm %s22214_s20, 16 }
  0xcf   : > { %p21125_p9 = scmp.ne.s32.totalorder %s22214_s20, %s21124_s16  ;;  %p21131_p12 = scmp.lt.u32.totalorder %s21124_s16, %s22214_s20 }
  0xd1   : > { %p21127_p10 = pnand %p21125_p9, %p22421_p7 }
  0xd3   : > { %p21128_p11 = pneg %p21127_p10 }
  0xd5   : > { %p21133_p2 = pnand %p21131_p12, %p21128_p11 }
  0xd7   : > { %21136 = shalt.err (!%p21133_p2)
}
  0xd8   : > { %s21137_s28 = scalar_lea.vmem %s22413_s1, 16  ;;  %s21144_s7 = scalar_lea.vmem %s22413_s1, 32 }
  0xd9   : > { %p21138_p13 = scmp.ne.s32.totalorder %s22413_s1, %s21137_s28  ;;  %p21145_p4 = scmp.lt.s32.totalorder %s22413_s1, %s22413_s1 }
  0xda   : > { %p21146_p6 = scmp.lt.s32.totalorder %s21144_s7, %s21137_s28 }
  0xdb   : > { %p21140_p0 = pnand %p21138_p13, %p22421_p7 }
  0xdc   : > { %p21147_p8 = por %p21146_p6, %p21145_p4 }
  0xdd   : > { %p21141_p1 = pneg %p21140_p0 }
  0xdf   : > { %p21148_p9 = pnand %p21147_p8, %p21141_p1 }
  0xe1   : > { %21151 = shalt.err (!%p21148_p9)
}
  0xe2   : > { %19674 = dma.hbm_to_vmem [thread:$0]  (!%p22409_p5), %s22214_s20, 16, %s22413_s1, [#allocation11]  }
  0xe3   : > { %s21152_s26 = scalar_lea.hbm %s25624_s4, 16 }
  0xe4   : > { %p21153_p10 = scmp.ne.s32.totalorder %s25624_s4, %s21152_s26  ;;  %p21159_p2 = scmp.lt.u32.totalorder %s21152_s26, %s25624_s4 }
  0xe6   : > { %p21155_p11 = pnand %p21153_p10, %p22421_p7 }
  0xe8   : > { %p21156_p12 = pneg %p21155_p11 }
  0xea   : > { %p21161_p13 = pnand %p21159_p2, %p21156_p12 }
  0xec   : > { %21164 = shalt.err (!%p21161_p13)
}
  0xed   : > { %s21165_s11 = scalar_lea.vmem %s22415_s10, 16  ;;  %s21172_s23 = scalar_lea.vmem %s22415_s10, 32 }
  0xee   : > { %p21166_p0 = scmp.ne.s32.totalorder %s22415_s10, %s21165_s11  ;;  %p21173_p6 = scmp.lt.s32.totalorder %s22415_s10, %s22415_s10 }
  0xef   : > { %p21174_p8 = scmp.lt.s32.totalorder %s21172_s23, %s21165_s11 }
  0xf0   : > { %p21168_p1 = pnand %p21166_p0, %p22421_p7 }
  0xf1   : > { %p21175_p9 = por %p21174_p8, %p21173_p6 }
  0xf2   : > { %p21169_p4 = pneg %p21168_p1 }
  0xf4   : > { %p21176_p10 = pnand %p21175_p9, %p21169_p4 }
  0xf6   : > { %21179 = shalt.err (!%p21176_p10)
}
  0xf7   : > { %19680 = dma.hbm_to_vmem [thread:$0]  (!%p22409_p5), %s25624_s4, 16, %s22415_s10, [#allocation14]  }
  0xf8   : > { %s21994_s1 = smov [#allocation16]   ;;  %s21995_s28 = smov [#allocation19]  }
  0xf9   : > { %s1885_s16 = sshll.u32 %s21994_s1, 4  ;;  %s1907_s7 = sshll.u32 %s21995_s28, 4  ;;  %s1886_s16 = int_to_ptr.vmem [resolvable:$true] %s1885_s16  ;;  %s1908_s7 = int_to_ptr.vmem [resolvable:$true] %s1907_s7 }
  0xfa   : > { %s21180_s26 = scalar_lea.hbm %s22249_s21, 16 }
  0xfb   : > { %p21181_p11 = scmp.ne.s32.totalorder %s22249_s21, %s21180_s26  ;;  %p21187_p13 = scmp.lt.u32.totalorder %s21180_s26, %s22249_s21 }
  0xfd   : > { %p21183_p12 = pnand %p21181_p11, %p22421_p7 }
  0xff   : > { %p21184_p2 = pneg %p21183_p12 }
 0x101   : > { %p21189_p0 = pnand %p21187_p13, %p21184_p2 }
 0x103   : > { %21192 = shalt.err (!%p21189_p0)
}
 0x104   : > { %s21193_s11 = scalar_lea.vmem %s1886_s16, 16  ;;  %s21200_s10 = scalar_lea.vmem %s1886_s16, 32 }
 0x105   : > { %p21194_p1 = scmp.ne.s32.totalorder %s1886_s16, %s21193_s11  ;;  %p21201_p8 = scmp.lt.s32.totalorder %s1886_s16, %s1886_s16 }
 0x106   : > { %p21202_p9 = scmp.lt.s32.totalorder %s21200_s10, %s21193_s11 }
 0x107   : > { %p21196_p4 = pnand %p21194_p1, %p22421_p7 }
 0x108   : > { %p21203_p10 = por %p21202_p9, %p21201_p8 }
 0x109   : > { %p21197_p6 = pneg %p21196_p4 }
 0x10b   : > { %p21204_p3 = pnand %p21203_p10, %p21197_p6 }
 0x10d   : > { %21207 = shalt.err (!%p21204_p3)
}
 0x10e   : > { %19686 = dma.hbm_to_vmem [thread:$0]  (!%p22409_p5), %s22249_s21, 16, %s1886_s16, [#allocation17]  }
 0x10f   : > { %s21208_s23 = scalar_lea.hbm %s25621_s8, 16 }
 0x110   : > { %p21209_p11 = scmp.ne.s32.totalorder %s25621_s8, %s21208_s23  ;;  %p21215_p13 = scmp.lt.u32.totalorder %s21208_s23, %s25621_s8 }
 0x112   : > { %p21211_p12 = pnand %p21209_p11, %p22421_p7 }
 0x114   : > { %p21212_p2 = pneg %p21211_p12 }
 0x116   : > { %p21217_p0 = pnand %p21215_p13, %p21212_p2 }
 0x118   : > { %21220 = shalt.err (!%p21217_p0)
}
 0x119   : > { %s21221_s1 = scalar_lea.vmem %s1908_s7, 16  ;;  %s21228_s28 = scalar_lea.vmem %s1908_s7, 32 }
 0x11a   : > { %p21222_p3 = scmp.ne.s32.totalorder %s1908_s7, %s21221_s1  ;;  %p21229_p6 = scmp.lt.s32.totalorder %s1908_s7, %s1908_s7 }
 0x11b   : > { %p21230_p8 = scmp.lt.s32.totalorder %s21228_s28, %s21221_s1 }
 0x11c   : > { %p21224_p1 = pnand %p21222_p3, %p22421_p7 }
 0x11d   : > { %p21231_p9 = por %p21230_p8, %p21229_p6 }
 0x11e   : > { %p21225_p4 = pneg %p21224_p1 }
 0x120   : > { %p21232_p10 = pnand %p21231_p9, %p21225_p4 }
 0x122   : > { %21235 = shalt.err (!%p21232_p10)
}
 0x123   : > { %19692 = dma.hbm_to_vmem [thread:$0]  (!%p22409_p5), %s25621_s8, 16, %s1908_s7, [#allocation20]  }
 0x124   : > { %s21996_s16 = smov [#allocation22]   ;;  %s21997_s11 = smov [#allocation25]  }
 0x125   : > { %s1929_s26 = sshll.u32 %s21996_s16, 4  ;;  %s1957_s10 = sshll.u32 %s21997_s11, 4  ;;  %s1930_s26 = int_to_ptr.vmem [resolvable:$true] %s1929_s26  ;;  %s1958_s10 = int_to_ptr.vmem [resolvable:$true] %s1957_s10 }
 0x126   : > { %s21236_s23 = scalar_lea.hbm %s22269_s24, 16 }
 0x127   : > { %p21237_p11 = scmp.ne.s32.totalorder %s22269_s24, %s21236_s23  ;;  %p21243_p13 = scmp.lt.u32.totalorder %s21236_s23, %s22269_s24 }
 0x129   : > { %p21239_p12 = pnand %p21237_p11, %p22421_p7 }
 0x12b   : > { %p21240_p2 = pneg %p21239_p12 }
 0x12d   : > { %p21245_p0 = pnand %p21243_p13, %p21240_p2 }
 0x12f   : > { %21248 = shalt.err (!%p21245_p0)
}
 0x130   : > { %s21249_s1 = scalar_lea.vmem %s1930_s26, 16  ;;  %s21256_s7 = scalar_lea.vmem %s1930_s26, 32 }
 0x131   : > { %p21250_p3 = scmp.ne.s32.totalorder %s1930_s26, %s21249_s1  ;;  %p21257_p6 = scmp.lt.s32.totalorder %s1930_s26, %s1930_s26 }
 0x132   : > { %p21258_p8 = scmp.lt.s32.totalorder %s21256_s7, %s21249_s1 }
 0x133   : > { %p21252_p1 = pnand %p21250_p3, %p22421_p7 }
 0x134   : > { %p21259_p9 = por %p21258_p8, %p21257_p6 }
 0x135   : > { %p21253_p4 = pneg %p21252_p1 }
 0x137   : > { %p21260_p10 = pnand %p21259_p9, %p21253_p4 }
 0x139   : > { %21263 = shalt.err (!%p21260_p10)
}
 0x13a   : > { %19698 = dma.hbm_to_vmem [thread:$0]  (!%p22409_p5), %s22269_s24, 16, %s1930_s26, [#allocation23]  }
 0x13b   : > { %s21264_s28 = scalar_lea.hbm %s25623_s5, 16 }
 0x13c   : > { %p21265_p11 = scmp.ne.s32.totalorder %s25623_s5, %s21264_s28  ;;  %p21271_p13 = scmp.lt.u32.totalorder %s21264_s28, %s25623_s5 }
 0x13e   : > { %p21267_p12 = pnand %p21265_p11, %p22421_p7 }
 0x140   : > { %p21268_p2 = pneg %p21267_p12 }
 0x142   : > { %p21273_p0 = pnand %p21271_p13, %p21268_p2 }
 0x144   : > { %21276 = shalt.err (!%p21273_p0)
}
 0x145   : > { %s21277_s16 = scalar_lea.vmem %s1958_s10, 16  ;;  %s21284_s11 = scalar_lea.vmem %s1958_s10, 32 }
 0x146   : > { %p21278_p3 = scmp.ne.s32.totalorder %s1958_s10, %s21277_s16  ;;  %p21285_p6 = scmp.lt.s32.totalorder %s1958_s10, %s1958_s10 }
 0x147   : > { %p21286_p8 = scmp.lt.s32.totalorder %s21284_s11, %s21277_s16 }
 0x148   : > { %p21280_p1 = pnand %p21278_p3, %p22421_p7 }
 0x149   : > { %p21287_p9 = por %p21286_p8, %p21285_p6 }
 0x14a   : > { %p21281_p4 = pneg %p21280_p1 }
 0x14c   : > { %p21288_p10 = pnand %p21287_p9, %p21281_p4 }
 0x14e   : > { %21291 = shalt.err (!%p21288_p10)
}
 0x14f   : > { %19704 = dma.hbm_to_vmem [thread:$0]  (!%p22409_p5), %s25623_s5, 16, %s1958_s10, [#allocation26]  }
 0x150   : > { %s21998_s26 = smov [#allocation28]   ;;  %s21999_s1 = smov [#allocation31]  }
 0x151   : > { %s1979_s23 = sshll.u32 %s21998_s26, 4  ;;  %s2007_s7 = sshll.u32 %s21999_s1, 4  ;;  %s1980_s23 = int_to_ptr.vmem [resolvable:$true] %s1979_s23  ;;  %s2008_s7 = int_to_ptr.vmem [resolvable:$true] %s2007_s7 }
 0x152   : > { %s21292_s28 = scalar_lea.hbm %s25622_s6, 16 }
 0x153   : > { %p21293_p11 = scmp.ne.s32.totalorder %s25622_s6, %s21292_s28  ;;  %p21299_p13 = scmp.lt.u32.totalorder %s21292_s28, %s25622_s6 }
 0x155   : > { %p21295_p12 = pnand %p21293_p11, %p22421_p7 }
 0x157   : > { %p21296_p2 = pneg %p21295_p12 }
 0x159   : > { %p21301_p0 = pnand %p21299_p13, %p21296_p2 }
 0x15b   : > { %21304 = shalt.err (!%p21301_p0)
}
 0x15c   : > { %s21305_s16 = scalar_lea.vmem %s1980_s23, 16  ;;  %s21312_s10 = scalar_lea.vmem %s1980_s23, 32 }
 0x15d   : > { %p21306_p3 = scmp.ne.s32.totalorder %s1980_s23, %s21305_s16  ;;  %p21313_p6 = scmp.lt.s32.totalorder %s1980_s23, %s1980_s23 }
 0x15e   : > { %p21314_p8 = scmp.lt.s32.totalorder %s21312_s10, %s21305_s16 }
 0x15f   : > { %p21308_p1 = pnand %p21306_p3, %p22421_p7 }
 0x160   : > { %p21315_p9 = por %p21314_p8, %p21313_p6 }
 0x161   : > { %p21309_p4 = pneg %p21308_p1 }
 0x163   : > { %p21316_p10 = pnand %p21315_p9, %p21309_p4 }
 0x165   : > { %21319 = shalt.err (!%p21316_p10)
}
 0x166   : > { %19710 = dma.hbm_to_vmem [thread:$0]  (!%p22409_p5), %s25622_s6, 16, %s1980_s23, [#allocation29]  }
 0x167   : > { %s21320_s11 = scalar_lea.hbm %s25619_s13, 16 }
 0x168   : > { %p21321_p11 = scmp.ne.s32.totalorder %s25619_s13, %s21320_s11  ;;  %p21327_p13 = scmp.lt.u32.totalorder %s21320_s11, %s25619_s13 }
 0x16a   : > { %p21323_p12 = pnand %p21321_p11, %p22421_p7 }
 0x16c   : > { %p21324_p2 = pneg %p21323_p12 }
 0x16e   : > { %p21329_p0 = pnand %p21327_p13, %p21324_p2 }
 0x170   : > { %21332 = shalt.err (!%p21329_p0)
}
 0x171   : > { %s21333_s26 = scalar_lea.vmem %s2008_s7, 16  ;;  %s21340_s1 = scalar_lea.vmem %s2008_s7, 32 }
 0x172   : > { %p21334_p3 = scmp.ne.s32.totalorder %s2008_s7, %s21333_s26  ;;  %p21341_p6 = scmp.lt.s32.totalorder %s2008_s7, %s2008_s7 }
 0x173   : > { %p21342_p8 = scmp.lt.s32.totalorder %s21340_s1, %s21333_s26 }
 0x174   : > { %p21336_p1 = pnand %p21334_p3, %p22421_p7 }
 0x175   : > { %p21343_p9 = por %p21342_p8, %p21341_p6 }
 0x176   : > { %p21337_p4 = pneg %p21336_p1 }
 0x178   : > { %p21344_p10 = pnand %p21343_p9, %p21337_p4 }
 0x17a   : > { %21347 = shalt.err (!%p21344_p10)
}
 0x17b   : > { %19716 = dma.hbm_to_vmem [thread:$0]  (!%p22409_p5), %s25619_s13, 16, %s2008_s7, [#allocation32]  }
 0x17c   : > { %s22000_s23 = smov [#allocation34]   ;;  %s22001_s16 = smov [#allocation37]  }
 0x17d   : > { %s2029_s28 = sshll.u32 %s22000_s23, 4  ;;  %s2057_s10 = sshll.u32 %s22001_s16, 4  ;;  %s2030_s28 = int_to_ptr.vmem [resolvable:$true] %s2029_s28  ;;  %s2058_s10 = int_to_ptr.vmem [resolvable:$true] %s2057_s10 }
 0x17e   : > { %s21348_s11 = scalar_lea.hbm %s22329_s14, 16 }
 0x17f   : > { %p21349_p11 = scmp.ne.s32.totalorder %s22329_s14, %s21348_s11  ;;  %p21355_p13 = scmp.lt.u32.totalorder %s21348_s11, %s22329_s14 }
 0x181   : > { %p21351_p12 = pnand %p21349_p11, %p22421_p7 }
 0x183   : > { %p21352_p2 = pneg %p21351_p12 }
 0x185   : > { %p21357_p0 = pnand %p21355_p13, %p21352_p2 }
 0x187   : > { %21360 = shalt.err (!%p21357_p0)
}
 0x188   : > { %s21361_s26 = scalar_lea.vmem %s2030_s28, 16  ;;  %s21368_s7 = scalar_lea.vmem %s2030_s28, 32 }
 0x189   : > { %p21362_p3 = scmp.ne.s32.totalorder %s2030_s28, %s21361_s26  ;;  %p21369_p6 = scmp.lt.s32.totalorder %s2030_s28, %s2030_s28 }
 0x18a   : > { %p21370_p8 = scmp.lt.s32.totalorder %s21368_s7, %s21361_s26 }
 0x18b   : > { %p21364_p1 = pnand %p21362_p3, %p22421_p7 }
 0x18c   : > { %p21371_p9 = por %p21370_p8, %p21369_p6 }
 0x18d   : > { %p21365_p4 = pneg %p21364_p1 }
 0x18f   : > { %p21372_p10 = pnand %p21371_p9, %p21365_p4 }
 0x191   : > { %21375 = shalt.err (!%p21372_p10)
}
 0x192   : > { %19722 = dma.hbm_to_vmem [thread:$0]  (!%p22409_p5), %s22329_s14, 16, %s2030_s28, [#allocation35]  }
 0x193   : > { %s21376_s1 = scalar_lea.hbm %s22349_s27, 16 }
 0x194   : > { %p21377_p11 = scmp.ne.s32.totalorder %s22349_s27, %s21376_s1  ;;  %p21383_p13 = scmp.lt.u32.totalorder %s21376_s1, %s22349_s27 }
 0x196   : > { %p21379_p12 = pnand %p21377_p11, %p22421_p7 }
 0x198   : > { %p21380_p2 = pneg %p21379_p12 }
 0x19a   : > { %p21385_p0 = pnand %p21383_p13, %p21380_p2 }
 0x19c   : > { %21388 = shalt.err (!%p21385_p0)
}
 0x19d   : > { %s21389_s23 = scalar_lea.vmem %s2058_s10, 16  ;;  %s21396_s16 = scalar_lea.vmem %s2058_s10, 32 }
 0x19e   : > { %p21390_p3 = scmp.ne.s32.totalorder %s2058_s10, %s21389_s23  ;;  %p21397_p6 = scmp.lt.s32.totalorder %s2058_s10, %s2058_s10 }
 0x19f   : > { %p21398_p8 = scmp.lt.s32.totalorder %s21396_s16, %s21389_s23 }
 0x1a0   : > { %p21392_p1 = pnand %p21390_p3, %p22421_p7 }
 0x1a1   : > { %p21399_p9 = por %p21398_p8, %p21397_p6 }
 0x1a2   : > { %p21393_p4 = pneg %p21392_p1 }
 0x1a4   : > { %p21400_p10 = pnand %p21399_p9, %p21393_p4 }
 0x1a6   : > { %21403 = shalt.err (!%p21400_p10)
}
 0x1a7   : > { %19728 = dma.hbm_to_vmem [thread:$0]  (!%p22409_p5), %s22349_s27, 16, %s2058_s10, [#allocation38]  }
 0x1a8   : > { %s22002_s28 = smov [#allocation40]   ;;  %s22003_s26 = smov [#allocation2]  }
 0x1a9   : > { %s2079_s11 = sshll.u32 %s22002_s28, 4  ;;  %s1771_s7 = sshll.u32 %s22003_s26, 4  ;;  %s2080_s11 = int_to_ptr.vmem [resolvable:$true] %s2079_s11  ;;  %s1772_s7 = int_to_ptr.vmem [resolvable:$true] %s1771_s7 }
 0x1aa   : > { %s21404_s1 = scalar_lea.hbm %s22359_s30, 16 }
 0x1ab   : > { %p21405_p11 = scmp.ne.s32.totalorder %s22359_s30, %s21404_s1  ;;  %p21411_p13 = scmp.lt.u32.totalorder %s21404_s1, %s22359_s30 }
 0x1ad   : > { %p21407_p12 = pnand %p21405_p11, %p22421_p7 }
 0x1af   : > { %p21408_p2 = pneg %p21407_p12 }
 0x1b1   : > { %p21413_p0 = pnand %p21411_p13, %p21408_p2 }
 0x1b3   : > { %21416 = shalt.err (!%p21413_p0)
}
 0x1b4   : > { %s21417_s23 = scalar_lea.vmem %s2080_s11, 16  ;;  %s21424_s10 = scalar_lea.vmem %s2080_s11, 32 }
 0x1b5   : > { %p21418_p3 = scmp.ne.s32.totalorder %s2080_s11, %s21417_s23  ;;  %p21425_p6 = scmp.lt.s32.totalorder %s2080_s11, %s2080_s11 }
 0x1b6   : > { %p21426_p8 = scmp.lt.s32.totalorder %s21424_s10, %s21417_s23 }
 0x1b7   : > { %p21420_p1 = pnand %p21418_p3, %p22421_p7 }
 0x1b8   : > { %p21427_p9 = por %p21426_p8, %p21425_p6 }
 0x1b9   : > { %p21421_p4 = pneg %p21420_p1 }
 0x1bb   : > { %p21428_p10 = pnand %p21427_p9, %p21421_p4 }
 0x1bd   : > { %21431 = shalt.err (!%p21428_p10)
}
 0x1be   : > { %19734 = dma.hbm_to_vmem [thread:$0]  (!%p22409_p5), %s22359_s30, 16, %s2080_s11, [#allocation41]  }
 0x1bf   : > { %s21432_s16 = scalar_lea.hbm %s22179_s25, 16 }
 0x1c0   : > { %p21433_p11 = scmp.ne.s32.totalorder %s22179_s25, %s21432_s16  ;;  %p21439_p13 = scmp.lt.u32.totalorder %s21432_s16, %s22179_s25 }
 0x1c2   : > { %p21435_p12 = pnand %p21433_p11, %p22421_p7 }
 0x1c4   : > { %p21436_p2 = pneg %p21435_p12 }
 0x1c6   : > { %p21441_p0 = pnand %p21439_p13, %p21436_p2 }
 0x1c8   : > { %21444 = shalt.err (!%p21441_p0)
}
 0x1c9   : > { %s21445_s28 = scalar_lea.vmem %s1772_s7, 16  ;;  %s21452_s26 = scalar_lea.vmem %s1772_s7, 32 }
 0x1ca   : > { %p21446_p3 = scmp.ne.s32.totalorder %s1772_s7, %s21445_s28  ;;  %p21453_p6 = scmp.lt.s32.totalorder %s1772_s7, %s1772_s7 }
 0x1cb   : > { %p21454_p8 = scmp.lt.s32.totalorder %s21452_s26, %s21445_s28 }
 0x1cc   : > { %p21448_p1 = pnand %p21446_p3, %p22421_p7 }
 0x1cd   : > { %p21455_p9 = por %p21454_p8, %p21453_p6 }
 0x1ce   : > { %p21449_p4 = pneg %p21448_p1 }
 0x1d0   : > { %p21456_p10 = pnand %p21455_p9, %p21449_p4 }
 0x1d2   : > { %21459 = shalt.err (!%p21456_p10)
}
 0x1d3   : > { %s25629_s11 = sld [smem:[#allocation90_spill]]  ;;  %s22004_s1 = smov [#allocation6]  }
 0x1d4   : > { %19659 = dma.hbm_to_vmem [thread:$0]  (!%p22409_p5), %s22179_s25, 16, %s1772_s7, [#allocation3]  }
 0x1d5   : > { %s1793_s23 = sshll.u32 %s22004_s1, 4  ;;  %s22005_s10 = smov [#allocation9]   ;;  %s1794_s23 = int_to_ptr.vmem [resolvable:$true] %s1793_s23 }
 0x1d6   : > { %s1821_s16 = sshll.u32 %s22005_s10, 4  ;;  %s1822_s16 = int_to_ptr.vmem [resolvable:$true] %s1821_s16 }
 0x1d9   : > { %s21460_s3 = scalar_lea.hbm %s25629_s11, 16 }
 0x1da   : > { %p21461_p11 = scmp.ne.s32.totalorder %s25629_s11, %s21460_s3  ;;  %p21467_p13 = scmp.lt.u32.totalorder %s21460_s3, %s25629_s11 }
 0x1dc   : > { %p21463_p12 = pnand %p21461_p11, %p22421_p7 }
 0x1de   : > { %p21464_p2 = pneg %p21463_p12 }
 0x1e0   : > { %p21469_p0 = pnand %p21467_p13, %p21464_p2 }
 0x1e2   : > { %21472 = shalt.err (!%p21469_p0)
}
 0x1e3   : > { %s21473_s28 = scalar_lea.vmem %s1794_s23, 16  ;;  %s21480_s7 = scalar_lea.vmem %s1794_s23, 32 }
 0x1e4   : > { %p21474_p3 = scmp.ne.s32.totalorder %s1794_s23, %s21473_s28  ;;  %p21481_p6 = scmp.lt.s32.totalorder %s1794_s23, %s1794_s23 }
 0x1e5   : > { %p21482_p8 = scmp.lt.s32.totalorder %s21480_s7, %s21473_s28 }
 0x1e6   : > { %p21476_p1 = pnand %p21474_p3, %p22421_p7 }
 0x1e7   : > { %p21483_p9 = por %p21482_p8, %p21481_p6 }
 0x1e8   : > { %p21477_p4 = pneg %p21476_p1 }
 0x1ea   : > { %p21484_p10 = pnand %p21483_p9, %p21477_p4 }
 0x1ec   : > { %21487 = shalt.err (!%p21484_p10)
}
 0x1ed   : > { %s25630_s26 = sld [smem:[#allocation94_spill]] }
 0x1ee   : > { %19665 = dma.hbm_to_vmem [thread:$0]  (!%p22409_p5), %s25629_s11, 16, %s1794_s23, [#allocation5]  }
 0x1f3   : > { %s21488_s3 = scalar_lea.hbm %s25630_s26, 16 }
 0x1f4   : > { %p21489_p11 = scmp.ne.s32.totalorder %s25630_s26, %s21488_s3  ;;  %p21495_p13 = scmp.lt.u32.totalorder %s21488_s3, %s25630_s26 }
 0x1f6   : > { %p21491_p12 = pnand %p21489_p11, %p22421_p7 }
 0x1f8   : > { %p21492_p2 = pneg %p21491_p12 }
 0x1fa   : > { %p21497_p0 = pnand %p21495_p13, %p21492_p2 }
 0x1fc   : > { %21500 = shalt.err (!%p21497_p0)
}
 0x1fd   : > { %s21501_s1 = scalar_lea.vmem %s1822_s16, 16  ;;  %s21508_s10 = scalar_lea.vmem %s1822_s16, 32 }
 0x1fe   : > { %p21502_p3 = scmp.ne.s32.totalorder %s1822_s16, %s21501_s1  ;;  %p21509_p6 = scmp.lt.s32.totalorder %s1822_s16, %s1822_s16 }
 0x1ff   : > { %p21510_p8 = scmp.lt.s32.totalorder %s21508_s10, %s21501_s1 }
 0x200   : > { %p21504_p1 = pnand %p21502_p3, %p22421_p7 }
 0x201   : > { %p21511_p9 = por %p21510_p8, %p21509_p6 }
 0x202   : > { %p21505_p4 = pneg %p21504_p1 }
 0x204   : > { %p21512_p10 = pnand %p21511_p9, %p21505_p4 }
 0x206   : > { %21515 = shalt.err (!%p21512_p10)
}
 0x207   : > { %s25631_s23 = sld [smem:[#allocation95_spill]]  ;;  %s22006_s28 = smov [#allocation12]  }
 0x208   : > { %19671 = dma.hbm_to_vmem [thread:$0]  (!%p22409_p5), %s25630_s26, 16, %s1822_s16, [#allocation8]  }
 0x209   : > { %s1843_s7 = sshll.u32 %s22006_s28, 4  ;;  %s22007_s3 = smov [#allocation15]   ;;  %s1844_s7 = int_to_ptr.vmem [resolvable:$true] %s1843_s7 }
 0x20a   : > { %s1874_s4 = sshll.u32 %s22007_s3, 4  ;;  %s1875_s4 = int_to_ptr.vmem [resolvable:$true] %s1874_s4 }
 0x20d   : > { %s21516_s5 = scalar_lea.hbm %s25631_s23, 16 }
 0x20e   : > { %p21517_p11 = scmp.ne.s32.totalorder %s25631_s23, %s21516_s5  ;;  %p21523_p13 = scmp.lt.u32.totalorder %s21516_s5, %s25631_s23 }
 0x210   : > { %p21519_p12 = pnand %p21517_p11, %p22421_p7 }
 0x212   : > { %p21520_p2 = pneg %p21519_p12 }
 0x214   : > { %p21525_p0 = pnand %p21523_p13, %p21520_p2 }
 0x216   : > { %21528 = shalt.err (!%p21525_p0)
}
 0x217   : > { %s21529_s1 = scalar_lea.vmem %s1844_s7, 16  ;;  %s21536_s16 = scalar_lea.vmem %s1844_s7, 32 }
 0x218   : > { %p21530_p3 = scmp.ne.s32.totalorder %s1844_s7, %s21529_s1  ;;  %p21537_p6 = scmp.lt.s32.totalorder %s1844_s7, %s1844_s7 }
 0x219   : > { %p21538_p8 = scmp.lt.s32.totalorder %s21536_s16, %s21529_s1 }
 0x21a   : > { %p21532_p1 = pnand %p21530_p3, %p22421_p7 }
 0x21b   : > { %p21539_p9 = por %p21538_p8, %p21537_p6 }
 0x21c   : > { %p21533_p4 = pneg %p21532_p1 }
 0x21e   : > { %p21540_p10 = pnand %p21539_p9, %p21533_p4 }
 0x220   : > { %21543 = shalt.err (!%p21540_p10)
}
 0x221   : > { %s25632_s10 = sld [smem:[#allocation100_spill]] }
 0x222   : > { %19677 = dma.hbm_to_vmem [thread:$0]  (!%p22409_p5), %s25631_s23, 16, %s1844_s7, [#allocation11]  }
 0x227   : > { %s21544_s5 = scalar_lea.hbm %s25632_s10, 16 }
 0x228   : > { %p21545_p11 = scmp.ne.s32.totalorder %s25632_s10, %s21544_s5  ;;  %p21551_p13 = scmp.lt.u32.totalorder %s21544_s5, %s25632_s10 }
 0x22a   : > { %p21547_p12 = pnand %p21545_p11, %p22421_p7 }
 0x22c   : > { %p21548_p2 = pneg %p21547_p12 }
 0x22e   : > { %p21553_p0 = pnand %p21551_p13, %p21548_p2 }
 0x230   : > { %21556 = shalt.err (!%p21553_p0)
}
 0x231   : > { %s21557_s28 = scalar_lea.vmem %s1875_s4, 16  ;;  %s21564_s3 = scalar_lea.vmem %s1875_s4, 32 }
 0x232   : > { %p21558_p3 = scmp.ne.s32.totalorder %s1875_s4, %s21557_s28  ;;  %p21565_p6 = scmp.lt.s32.totalorder %s1875_s4, %s1875_s4 }
 0x233   : > { %p21566_p8 = scmp.lt.s32.totalorder %s21564_s3, %s21557_s28 }
 0x234   : > { %p21560_p1 = pnand %p21558_p3, %p22421_p7 }
 0x235   : > { %p21567_p9 = por %p21566_p8, %p21565_p6 }
 0x236   : > { %p21561_p4 = pneg %p21560_p1 }
 0x238   : > { %p21568_p10 = pnand %p21567_p9, %p21561_p4 }
 0x23a   : > { %21571 = shalt.err (!%p21568_p10)
}
 0x23b   : > { %s25633_s7 = sld [smem:[#allocation101_spill]]  ;;  %s22008_s1 = smov [#allocation18]  }
 0x23c   : > { %19683 = dma.hbm_to_vmem [thread:$0]  (!%p22409_p5), %s25632_s10, 16, %s1875_s4, [#allocation14]  }
 0x23d   : > { %s1896_s16 = sshll.u32 %s22008_s1, 4  ;;  %s22009_s5 = smov [#allocation21]   ;;  %s1897_s16 = int_to_ptr.vmem [resolvable:$true] %s1896_s16 }
 0x23e   : > { %s1918_s6 = sshll.u32 %s22009_s5, 4  ;;  %s1919_s6 = int_to_ptr.vmem [resolvable:$true] %s1918_s6 }
 0x241   : > { %s21572_s8 = scalar_lea.hbm %s25633_s7, 16 }
 0x242   : > { %p21573_p11 = scmp.ne.s32.totalorder %s25633_s7, %s21572_s8  ;;  %p21579_p13 = scmp.lt.u32.totalorder %s21572_s8, %s25633_s7 }
 0x244   : > { %p21575_p12 = pnand %p21573_p11, %p22421_p7 }
 0x246   : > { %p21576_p2 = pneg %p21575_p12 }
 0x248   : > { %p21581_p0 = pnand %p21579_p13, %p21576_p2 }
 0x24a   : > { %21584 = shalt.err (!%p21581_p0)
}
 0x24b   : > { %s21585_s28 = scalar_lea.vmem %s1897_s16, 16  ;;  %s21592_s4 = scalar_lea.vmem %s1897_s16, 32 }
 0x24c   : > { %p21586_p3 = scmp.ne.s32.totalorder %s1897_s16, %s21585_s28  ;;  %p21593_p6 = scmp.lt.s32.totalorder %s1897_s16, %s1897_s16 }
 0x24d   : > { %p21594_p8 = scmp.lt.s32.totalorder %s21592_s4, %s21585_s28 }
 0x24e   : > { %p21588_p1 = pnand %p21586_p3, %p22421_p7 }
 0x24f   : > { %p21595_p9 = por %p21594_p8, %p21593_p6 }
 0x250   : > { %p21589_p4 = pneg %p21588_p1 }
 0x252   : > { %p21596_p10 = pnand %p21595_p9, %p21589_p4 }
 0x254   : > { %21599 = shalt.err (!%p21596_p10)
}
 0x255   : > { %s25634_s3 = sld [smem:[#allocation103_spill]] }
 0x256   : > { %19689 = dma.hbm_to_vmem [thread:$0]  (!%p22409_p5), %s25633_s7, 16, %s1897_s16, [#allocation17]  }
 0x25b   : > { %s21600_s8 = scalar_lea.hbm %s25634_s3, 16 }
 0x25c   : > { %p21601_p11 = scmp.ne.s32.totalorder %s25634_s3, %s21600_s8  ;;  %p21607_p13 = scmp.lt.u32.totalorder %s21600_s8, %s25634_s3 }
 0x25e   : > { %p21603_p12 = pnand %p21601_p11, %p22421_p7 }
 0x260   : > { %p21604_p2 = pneg %p21603_p12 }
 0x262   : > { %p21609_p0 = pnand %p21607_p13, %p21604_p2 }
 0x264   : > { %21612 = shalt.err (!%p21609_p0)
}
 0x265   : > { %s21613_s1 = scalar_lea.vmem %s1919_s6, 16  ;;  %s21620_s5 = scalar_lea.vmem %s1919_s6, 32 }
 0x266   : > { %p21614_p3 = scmp.ne.s32.totalorder %s1919_s6, %s21613_s1  ;;  %p21621_p6 = scmp.lt.s32.totalorder %s1919_s6, %s1919_s6 }
 0x267   : > { %p21622_p8 = scmp.lt.s32.totalorder %s21620_s5, %s21613_s1 }
 0x268   : > { %p21616_p1 = pnand %p21614_p3, %p22421_p7 }
 0x269   : > { %p21623_p9 = por %p21622_p8, %p21621_p6 }
 0x26a   : > { %p21617_p4 = pneg %p21616_p1 }
 0x26c   : > { %p21624_p10 = pnand %p21623_p9, %p21617_p4 }
 0x26e   : > { %21627 = shalt.err (!%p21624_p10)
}
 0x26f   : > { %s25635_s16 = sld [smem:[#allocation106_spill]]  ;;  %s22010_s28 = smov [#allocation24]  }
 0x270   : > { %19695 = dma.hbm_to_vmem [thread:$0]  (!%p22409_p5), %s25634_s3, 16, %s1919_s6, [#allocation20]  }
 0x271   : > { %s1946_s4 = sshll.u32 %s22010_s28, 4  ;;  %s22011_s8 = smov [#allocation27]   ;;  %s1947_s4 = int_to_ptr.vmem [resolvable:$true] %s1946_s4 }
 0x272   : > { %s1968_s7 = sshll.u32 %s22011_s8, 4  ;;  %s1969_s7 = int_to_ptr.vmem [resolvable:$true] %s1968_s7 }
 0x275   : > { %s21628_s10 = scalar_lea.hbm %s25635_s16, 16 }
 0x276   : > { %p21629_p11 = scmp.ne.s32.totalorder %s25635_s16, %s21628_s10  ;;  %p21635_p13 = scmp.lt.u32.totalorder %s21628_s10, %s25635_s16 }
 0x278   : > { %p21631_p12 = pnand %p21629_p11, %p22421_p7 }
 0x27a   : > { %p21632_p2 = pneg %p21631_p12 }
 0x27c   : > { %p21637_p0 = pnand %p21635_p13, %p21632_p2 }
 0x27e   : > { %21640 = shalt.err (!%p21637_p0)
}
 0x27f   : > { %s21641_s1 = scalar_lea.vmem %s1947_s4, 16  ;;  %s21648_s6 = scalar_lea.vmem %s1947_s4, 32 }
 0x280   : > { %p21642_p3 = scmp.ne.s32.totalorder %s1947_s4, %s21641_s1  ;;  %p21649_p6 = scmp.lt.s32.totalorder %s1947_s4, %s1947_s4 }
 0x281   : > { %p21650_p8 = scmp.lt.s32.totalorder %s21648_s6, %s21641_s1 }
 0x282   : > { %p21644_p1 = pnand %p21642_p3, %p22421_p7 }
 0x283   : > { %p21651_p9 = por %p21650_p8, %p21649_p6 }
 0x284   : > { %p21645_p4 = pneg %p21644_p1 }
 0x286   : > { %p21652_p10 = pnand %p21651_p9, %p21645_p4 }
 0x288   : > { %21655 = shalt.err (!%p21652_p10)
}
 0x289   : > { %s25636_s5 = sld [smem:[#allocation108_spill]] }
 0x28a   : > { %19701 = dma.hbm_to_vmem [thread:$0]  (!%p22409_p5), %s25635_s16, 16, %s1947_s4, [#allocation23]  }
 0x28f   : > { %s21656_s10 = scalar_lea.hbm %s25636_s5, 16 }
 0x290   : > { %p21657_p11 = scmp.ne.s32.totalorder %s25636_s5, %s21656_s10  ;;  %p21663_p13 = scmp.lt.u32.totalorder %s21656_s10, %s25636_s5 }
 0x292   : > { %p21659_p12 = pnand %p21657_p11, %p22421_p7 }
 0x294   : > { %p21660_p2 = pneg %p21659_p12 }
 0x296   : > { %p21665_p0 = pnand %p21663_p13, %p21660_p2 }
 0x298   : > { %21668 = shalt.err (!%p21665_p0)
}
 0x299   : > { %s21669_s28 = scalar_lea.vmem %s1969_s7, 16  ;;  %s21676_s8 = scalar_lea.vmem %s1969_s7, 32 }
 0x29a   : > { %p21670_p3 = scmp.ne.s32.totalorder %s1969_s7, %s21669_s28  ;;  %p21677_p6 = scmp.lt.s32.totalorder %s1969_s7, %s1969_s7 }
 0x29b   : > { %p21678_p8 = scmp.lt.s32.totalorder %s21676_s8, %s21669_s28 }
 0x29c   : > { %p21672_p1 = pnand %p21670_p3, %p22421_p7 }
 0x29d   : > { %p21679_p9 = por %p21678_p8, %p21677_p6 }
 0x29e   : > { %p21673_p4 = pneg %p21672_p1 }
 0x2a0   : > { %p21680_p10 = pnand %p21679_p9, %p21673_p4 }
 0x2a2   : > { %21683 = shalt.err (!%p21680_p10)
}
 0x2a3   : > { %s25637_s4 = sld [smem:[#allocation112_spill]]  ;;  %s22012_s1 = smov [#allocation30]  }
 0x2a4   : > { %19707 = dma.hbm_to_vmem [thread:$0]  (!%p22409_p5), %s25636_s5, 16, %s1969_s7, [#allocation26]  }
 0x2a5   : > { %s1996_s6 = sshll.u32 %s22012_s1, 4  ;;  %s22013_s10 = smov [#allocation33]   ;;  %s1997_s6 = int_to_ptr.vmem [resolvable:$true] %s1996_s6 }
 0x2a6   : > { %s2018_s3 = sshll.u32 %s22013_s10, 4  ;;  %s2019_s3 = int_to_ptr.vmem [resolvable:$true] %s2018_s3 }
 0x2a9   : > { %s21684_s11 = scalar_lea.hbm %s25637_s4, 16 }
 0x2aa   : > { %p21685_p11 = scmp.ne.s32.totalorder %s25637_s4, %s21684_s11  ;;  %p21691_p13 = scmp.lt.u32.totalorder %s21684_s11, %s25637_s4 }
 0x2ac   : > { %p21687_p12 = pnand %p21685_p11, %p22421_p7 }
 0x2ae   : > { %p21688_p2 = pneg %p21687_p12 }
 0x2b0   : > { %p21693_p0 = pnand %p21691_p13, %p21688_p2 }
 0x2b2   : > { %21696 = shalt.err (!%p21693_p0)
}
 0x2b3   : > { %s21697_s28 = scalar_lea.vmem %s1997_s6, 16  ;;  %s21704_s7 = scalar_lea.vmem %s1997_s6, 32 }
 0x2b4   : > { %p21698_p3 = scmp.ne.s32.totalorder %s1997_s6, %s21697_s28  ;;  %p21705_p6 = scmp.lt.s32.totalorder %s1997_s6, %s1997_s6 }
 0x2b5   : > { %p21706_p8 = scmp.lt.s32.totalorder %s21704_s7, %s21697_s28 }
 0x2b6   : > { %p21700_p1 = pnand %p21698_p3, %p22421_p7 }
 0x2b7   : > { %p21707_p9 = por %p21706_p8, %p21705_p6 }
 0x2b8   : > { %p21701_p4 = pneg %p21700_p1 }
 0x2ba   : > { %p21708_p10 = pnand %p21707_p9, %p21701_p4 }
 0x2bc   : > { %21711 = shalt.err (!%p21708_p10)
}
 0x2bd   : > { %s25638_s8 = sld [smem:[#allocation114_spill]] }
 0x2be   : > { %19713 = dma.hbm_to_vmem [thread:$0]  (!%p22409_p5), %s25637_s4, 16, %s1997_s6, [#allocation29]  }
 0x2c3   : > { %s21712_s11 = scalar_lea.hbm %s25638_s8, 16 }
 0x2c4   : > { %p21713_p11 = scmp.ne.s32.totalorder %s25638_s8, %s21712_s11  ;;  %p21719_p13 = scmp.lt.u32.totalorder %s21712_s11, %s25638_s8 }
 0x2c6   : > { %p21715_p12 = pnand %p21713_p11, %p22421_p7 }
 0x2c8   : > { %p21716_p2 = pneg %p21715_p12 }
 0x2ca   : > { %p21721_p0 = pnand %p21719_p13, %p21716_p2 }
 0x2cc   : > { %21724 = shalt.err (!%p21721_p0)
}
 0x2cd   : > { %s21725_s1 = scalar_lea.vmem %s2019_s3, 16  ;;  %s21732_s10 = scalar_lea.vmem %s2019_s3, 32 }
 0x2ce   : > { %p21726_p3 = scmp.ne.s32.totalorder %s2019_s3, %s21725_s1  ;;  %p21733_p6 = scmp.lt.s32.totalorder %s2019_s3, %s2019_s3 }
 0x2cf   : > { %p21734_p8 = scmp.lt.s32.totalorder %s21732_s10, %s21725_s1 }
 0x2d0   : > { %p21728_p1 = pnand %p21726_p3, %p22421_p7 }
 0x2d1   : > { %p21735_p9 = por %p21734_p8, %p21733_p6 }
 0x2d2   : > { %p21729_p4 = pneg %p21728_p1 }
 0x2d4   : > { %p21736_p10 = pnand %p21735_p9, %p21729_p4 }
 0x2d6   : > { %21739 = shalt.err (!%p21736_p10)
}
 0x2d7   : > { %s25639_s6 = sld [smem:[#allocation117_spill]]  ;;  %s22014_s28 = smov [#allocation36]  }
 0x2d8   : > { %19719 = dma.hbm_to_vmem [thread:$0]  (!%p22409_p5), %s25638_s8, 16, %s2019_s3, [#allocation32]  }
 0x2d9   : > { %s2046_s7 = sshll.u32 %s22014_s28, 4  ;;  %s22015_s11 = smov [#allocation39]   ;;  %s2047_s7 = int_to_ptr.vmem [resolvable:$true] %s2046_s7 }
 0x2da   : > { %s2068_s4 = sshll.u32 %s22015_s11, 4  ;;  %s2069_s4 = int_to_ptr.vmem [resolvable:$true] %s2068_s4 }
 0x2dd   : > { %s21740_s5 = scalar_lea.hbm %s25639_s6, 16 }
 0x2de   : > { %p21741_p11 = scmp.ne.s32.totalorder %s25639_s6, %s21740_s5  ;;  %p21747_p13 = scmp.lt.u32.totalorder %s21740_s5, %s25639_s6 }
 0x2e0   : > { %p21743_p12 = pnand %p21741_p11, %p22421_p7 }
 0x2e2   : > { %p21744_p2 = pneg %p21743_p12 }
 0x2e4   : > { %p21749_p0 = pnand %p21747_p13, %p21744_p2 }
 0x2e6   : > { %21752 = shalt.err (!%p21749_p0)
}
 0x2e7   : > { %s21753_s1 = scalar_lea.vmem %s2047_s7, 16  ;;  %s21760_s3 = scalar_lea.vmem %s2047_s7, 32 }
 0x2e8   : > { %p21754_p3 = scmp.ne.s32.totalorder %s2047_s7, %s21753_s1  ;;  %p21761_p6 = scmp.lt.s32.totalorder %s2047_s7, %s2047_s7 }
 0x2e9   : > { %p21762_p8 = scmp.lt.s32.totalorder %s21760_s3, %s21753_s1 }
 0x2ea   : > { %p21756_p1 = pnand %p21754_p3, %p22421_p7 }
 0x2eb   : > { %p21763_p9 = por %p21762_p8, %p21761_p6 }
 0x2ec   : > { %p21757_p4 = pneg %p21756_p1 }
 0x2ee   : > { %p21764_p10 = pnand %p21763_p9, %p21757_p4 }
 0x2f0   : > { %21767 = shalt.err (!%p21764_p10)
}
 0x2f1   : > { %s25640_s10 = sld [smem:[#allocation118_spill]] }
 0x2f2   : > { %19725 = dma.hbm_to_vmem [thread:$0]  (!%p22409_p5), %s25639_s6, 16, %s2047_s7, [#allocation35]  }
 0x2f7   : > { %s21768_s5 = scalar_lea.hbm %s25640_s10, 16 }
 0x2f8   : > { %p21769_p11 = scmp.ne.s32.totalorder %s25640_s10, %s21768_s5  ;;  %p21775_p13 = scmp.lt.u32.totalorder %s21768_s5, %s25640_s10 }
 0x2fa   : > { %p21771_p12 = pnand %p21769_p11, %p22421_p7 }
 0x2fc   : > { %p21772_p2 = pneg %p21771_p12 }
 0x2fe   : > { %p21777_p0 = pnand %p21775_p13, %p21772_p2 }
 0x300   : > { %21780 = shalt.err (!%p21777_p0)
}
 0x301   : > { %s21781_s28 = scalar_lea.vmem %s2069_s4, 16  ;;  %s21788_s11 = scalar_lea.vmem %s2069_s4, 32 }
 0x302   : > { %p21782_p3 = scmp.ne.s32.totalorder %s2069_s4, %s21781_s28  ;;  %p21789_p6 = scmp.lt.s32.totalorder %s2069_s4, %s2069_s4 }
 0x303   : > { %p21790_p8 = scmp.lt.s32.totalorder %s21788_s11, %s21781_s28 }
 0x304   : > { %p21784_p1 = pnand %p21782_p3, %p22421_p7 }
 0x305   : > { %p21791_p9 = por %p21790_p8, %p21789_p6 }
 0x306   : > { %p21785_p4 = pneg %p21784_p1 }
 0x308   : > { %p21792_p10 = pnand %p21791_p9, %p21785_p4 }
 0x30a   : > { %21795 = shalt.err (!%p21792_p10)
}
 0x30b   : > { %19731 = dma.hbm_to_vmem [thread:$0]  (!%p22409_p5), %s25640_s10, 16, %s2069_s4, [#allocation38]  }
 0x30c   : > { %s22016_s7 = smov [#allocation42]   ;;  %s22017_s3 = smov [#allocation43]  }
 0x30d   : > { %s2096_s1 = sshll.u32 %s22016_s7, 4  ;;  %s2107_s5 = sshll.u32 %s22017_s3, 4  ;;  %s2097_s1 = int_to_ptr.vmem [resolvable:$true] %s2096_s1  ;;  %s2108_s5 = int_to_ptr.vmem [resolvable:$true] %s2107_s5 }
 0x30e   : > { %s21796_s6 = scalar_lea.hbm %s22374_s19, 16 }
 0x30f   : > { %p21797_p11 = scmp.ne.s32.totalorder %s22374_s19, %s21796_s6  ;;  %p21803_p13 = scmp.lt.u32.totalorder %s21796_s6, %s22374_s19 }
 0x311   : > { %p21799_p12 = pnand %p21797_p11, %p22421_p7 }
 0x313   : > { %p21800_p2 = pneg %p21799_p12 }
 0x315   : > { %p21805_p0 = pnand %p21803_p13, %p21800_p2 }
 0x317   : > { %21808 = shalt.err (!%p21805_p0)
}
 0x318   : > { %s21809_s28 = scalar_lea.vmem %s2097_s1, 16  ;;  %s21816_s4 = scalar_lea.vmem %s2097_s1, 32 }
 0x319   : > { %p21810_p3 = scmp.ne.s32.totalorder %s2097_s1, %s21809_s28  ;;  %p21817_p6 = scmp.lt.s32.totalorder %s2097_s1, %s2097_s1 }
 0x31a   : > { %p21818_p8 = scmp.lt.s32.totalorder %s21816_s4, %s21809_s28 }
 0x31b   : > { %p21812_p1 = pnand %p21810_p3, %p22421_p7 }
 0x31c   : > { %p21819_p9 = por %p21818_p8, %p21817_p6 }
 0x31d   : > { %p21813_p4 = pneg %p21812_p1 }
 0x31f   : > { %p21820_p10 = pnand %p21819_p9, %p21813_p4 }
 0x321   : > { %21823 = shalt.err (!%p21820_p10)
}
 0x322   : > { %19737 = dma.hbm_to_vmem [thread:$0]  (!%p22409_p5), %s22374_s19, 16, %s2097_s1, [#allocation41]  }
 0x323   : > { %s21824_s6 = scalar_lea.hbm %s22379_s29, 16 }
 0x324   : > { %p21825_p11 = scmp.ne.s32.totalorder %s22379_s29, %s21824_s6  ;;  %p21831_p13 = scmp.lt.u32.totalorder %s21824_s6, %s22379_s29 }
 0x326   : > { %p21827_p12 = pnand %p21825_p11, %p22421_p7 }
 0x328   : > { %p21828_p2 = pneg %p21827_p12 }
 0x32a   : > { %p21833_p0 = pnand %p21831_p13, %p21828_p2 }
 0x32c   : > { %21836 = shalt.err (!%p21833_p0)
}
 0x32d   : > { %s21837_s11 = scalar_lea.vmem %s2108_s5, 16  ;;  %s21844_s7 = scalar_lea.vmem %s2108_s5, 32 }
 0x32e   : > { %p21838_p3 = scmp.ne.s32.totalorder %s2108_s5, %s21837_s11  ;;  %p21845_p6 = scmp.lt.s32.totalorder %s2108_s5, %s2108_s5 }
 0x32f   : > { %p21846_p8 = scmp.lt.s32.totalorder %s21844_s7, %s21837_s11 }
 0x330   : > { %p21840_p1 = pnand %p21838_p3, %p22421_p7 }
 0x331   : > { %p21847_p9 = por %p21846_p8, %p21845_p6 }
 0x332   : > { %p21841_p4 = pneg %p21840_p1 }
 0x334   : > { %p21848_p10 = pnand %p21847_p9, %p21841_p4 }
 0x336   : > { %21851 = shalt.err (!%p21848_p10)
}
 0x337   : > { %19740 = dma.hbm_to_vmem [thread:$0]  (!%p22409_p5), %s22379_s29, 16, %s2108_s5, [#allocation44]  }
 0x338   : > { %p25641_p11 = scmp.ne.s32.totalorder %s25626_s22, 0 }
 0x339   : > { %p25642_p12 = scmp.eq.s32.totalorder (!%p25641_p11), %s22392_s18, 0 }
 0x33a   : > { %2136 = sbr.rel (%p25641_p11) target bundleno = 14860 (0x3a0c), region = 300 }
 0x341   : > { %21857 = dma.done.wait (%p25642_p12), [#allocation3], 16   ;;  %p25643_p2 = pmov %p25642_p12 }
 0x343   : > { %21859 = vsyncadd (%p25643_p2), [#allocation3], 4294967280  ;;  %p25644_p7 = pmov %p25643_p2 }
 0x344   : > { %p25645_p13 = pmov %p25643_p2 }
 0x345   : > { %21861 = dma.done.wait (%p25644_p7), [#allocation5], 32  }
 0x346   : > { %21863 = vsyncadd (%p25645_p13), [#allocation5], 4294967264  ;;  %p25646_p0 = pmov %p25643_p2 }
 0x348   : > { %21865 = dma.done.wait (%p25646_p0), [#allocation8], 32   ;;  %p25647_p5 = pmov %p25646_p0 }
 0x349   : > { %p25648_p3 = pmov %p25646_p0 }
 0x34a   : > { %21867 = vsyncadd (%p25647_p5), [#allocation8], 4294967264 }
 0x34b   : > { %21869 = dma.done.wait (%p25648_p3), [#allocation11], 32   ;;  %p25649_p1 = pmov %p25646_p0 }
 0x34c   : > { %p25650_p4 = pmov %p25646_p0 }
 0x34d   : > { %21871 = vsyncadd (%p25649_p1), [#allocation11], 4294967264 }
 0x34e   : > { %21873 = dma.done.wait (%p25650_p4), [#allocation14], 32   ;;  %p25651_p6 = pmov %p25646_p0 }
 0x34f   : > { %p25652_p8 = pmov %p25646_p0 }
 0x350   : > { %21875 = vsyncadd (%p25651_p6), [#allocation14], 4294967264 }
 0x351   : > { %21877 = dma.done.wait (%p25652_p8), [#allocation17], 32   ;;  %p25653_p9 = pmov %p25646_p0 }
 0x352   : > { %p25654_p10 = pmov %p25646_p0 }
 0x353   : > { %21879 = vsyncadd (%p25653_p9), [#allocation17], 4294967264 }
 0x354   : > { %21881 = dma.done.wait (%p25654_p10), [#allocation20], 32   ;;  %p25655_p11 = pmov %p25646_p0 }
 0x355   : > { %p25656_p12 = pmov %p25646_p0 }
 0x356   : > { %21883 = vsyncadd (%p25655_p11), [#allocation20], 4294967264 }
 0x357   : > { %21885 = dma.done.wait (%p25656_p12), [#allocation23], 32   ;;  %p25657_p2 = pmov %p25646_p0 }
 0x358   : > { %p25658_p7 = pmov %p25646_p0 }
 0x359   : > { %21887 = vsyncadd (%p25657_p2), [#allocation23], 4294967264 }
 0x35a   : > { %21889 = dma.done.wait (%p25658_p7), [#allocation26], 32   ;;  %p25659_p13 = pmov %p25646_p0 }
 0x35c   : > { %21891 = vsyncadd (%p25659_p13), [#allocation26], 4294967264 }
 0x35d   : > { %21893 = dma.done.wait (%p25646_p0), [#allocation29], 32   ;;  %p25660_p5 = pmov %p25646_p0 }
 0x35e   : > { %p25661_p3 = pmov %p25646_p0 }
 0x35f   : > { %21895 = vsyncadd (%p25660_p5), [#allocation29], 4294967264 }
 0x360   : > { %21897 = dma.done.wait (%p25661_p3), [#allocation32], 32   ;;  %p25662_p1 = pmov %p25646_p0 }
 0x361   : > { %p25663_p4 = pmov %p25646_p0 }
 0x362   : > { %21899 = vsyncadd (%p25662_p1), [#allocation32], 4294967264 }
 0x363   : > { %21901 = dma.done.wait (%p25663_p4), [#allocation35], 32   ;;  %p25664_p6 = pmov %p25646_p0 }
 0x364   : > { %p25665_p8 = pmov %p25646_p0 }
 0x365   : > { %21903 = vsyncadd (%p25664_p6), [#allocation35], 4294967264 }
 0x366   : > { %21905 = dma.done.wait (%p25665_p8), [#allocation38], 32   ;;  %p25666_p9 = pmov %p25646_p0 }
 0x367   : > { %p25667_p10 = pmov %p25646_p0 }
 0x368   : > { %21907 = vsyncadd (%p25666_p9), [#allocation38], 4294967264 }
 0x369   : > { %21909 = dma.done.wait (%p25667_p10), [#allocation41], 32   ;;  %p25668_p11 = pmov %p25646_p0 }
 0x36a   : > { %p25669_p12 = pmov %p25646_p0 }
 0x36b   : > { %21911 = vsyncadd (%p25668_p11), [#allocation41], 4294967264 }
 0x36c   : > { %21913 = dma.done.wait (%p25669_p12), [#allocation44], 16   ;;  %p25670_p2 = pmov %p25646_p0 }
 0x36d   : > { %s25671_s22 = sld [smem:[#allocation60_spill]]  ;;  %p2407_p7 = scmp.lt.s32.totalorder %s22392_s18, 1  ;;  %vm2566_vm0 = vcmask 261120   ;;  %vm2842_vm9 = vcmask 64512   ;;  %vm3535_vm11 = vcmask 130048   ;;  %vm4464_vm12 = vcmask 195584  }
 0x36e   : > { %21915 = vsyncadd (%p25670_p2), [#allocation44], 4294967280  ;;  %s25542_s1 = smov 120   ;;  %s25540_s3 = smov 112  }
 0x36f   : > { %s25723_s18 = smov (!%p2407_p7, %s22392_s18), 1  ;;  %s25534_s5 = smov 104   ;;  %vm22880_vm10 = vmpackc.low %vm2842_vm9, %vm2842_vm9 }
 0x370   : > { %s22791_s2 = sshll.u32 %s25723_s18, 6  ;;  %s25672_s18 = sld [smem:[#allocation111_spill]] }
 0x371   : > { %s25532_s28 = smov 96   ;;  %s25530_s4 = smov 64  }
 0x372   : > { %s25675_s6 = sld [smem:[#allocation110_spill]]  ;;  %s25536_s11 = smov 8  }
 0x373   : > { %s2411_s0 = scalar_lea.vmem %s25671_s22, %s22791_s2  ;;  %s25538_s7 = smov 16  }
 0x374   : > { %v2426_v0 = vld [vmem:[%s2411_s0 + $0x20] sm:$0xff]  ;;  %v2427_v2 = vld [vmem:[%s2411_s0 + $0x28] sm:$0xff]  ;;  %v2428_v4 = vld [vmem:[%s2411_s0 + $0x30] sm:$0xff]  ;;  %s25528_s22 = smov 24   ;;  %s25693_s8 = smov 8  }
 0x375   : > { %v2422_v1 = vld [vmem:[%s2411_s0] sm:$0xff]  ;;  %2462 = vxpose.xlu1.b32.start [1/4] (short) (narrow) %v2426_v0, 16  ;;  %v2423_v3 = vld [vmem:[%s2411_s0 + $0x8] sm:$0xff]  ;;  %v2424_v5 = vld [vmem:[%s2411_s0 + $0x10] sm:$0xff]  ;;  %s25694_s10 = smov 16   ;;  %s25700_s12 = sld [smem:[#allocation74_spill]] }
 0x376   : > { %2430 = vxpose.xlu0.b32.start [1/4] (short) (narrow) %v2422_v1, 16  ;;  %v2429_v6 = vld [vmem:[%s2411_s0 + $0x38] sm:$0xff]  ;;  %v2670_v36 = vld [vmem:[%s25672_s18] sm:$0xff]  ;;  %v2671_v37 = vld [vmem:[%s25672_s18 + $0x8] sm:$0xff]  ;;  %s25708_s13 = sld [smem:[#allocation62_spill]] }
 0x377   : > { %v2425_v7 = vld [vmem:[%s2411_s0 + $0x18] sm:$0xff]  ;;  %v2672_v38 = vld [vmem:[%s25672_s18 + $0x10] sm:$0xff]  ;;  %v18856_v39 = vpack.c.bf16 %v2671_v37, %v2670_v36  ;;  %s25676_s0 = sld [smem:[#allocation104_spill]] }
 0x378   : > { %v2673_v40 = vld [vmem:[%s25672_s18 + $0x18] sm:$0xff] }
 0x379   : > { %2463 = vxpose.xlu1.b32.cont [2/4] (short) (narrow) %v2427_v2, 16  ;;  %v18860_v41 = vpack.c.bf16 %v2673_v40, %v2672_v38  ;;  %18857 = vmatprep.subr.bf16.mxu1 %v18856_v39 }
 0x37a   : > { %2431 = vxpose.xlu0.b32.cont [2/4] (short) (narrow) %v2423_v3, 16  ;;  %18859 = vmatpush3.bf16.msra.mxu1 %v18856_v39 }
 0x37b   : > { %18861 = vmatprep.subr.bf16.mxu1 %v18860_v41 }
 0x37d   : > { %2464 = vxpose.xlu1.b32.cont [3/4] (short) (narrow) %v2428_v4, 16 }
 0x37e   : > { %2432 = vxpose.xlu0.b32.cont [3/4] (short) (narrow) %v2424_v5, 16  ;;  %18863 = vmatpush3.bf16.msra.mxu1 %v18860_v41 }
 0x381   : > { %2465 = vxpose.xlu1.b32.end [4/4] (short) (narrow) %v2429_v6, 16 }
 0x382   : > { %2433 = vxpose.xlu0.b32.end [4/4] (short) (narrow) %v2425_v7, 16 }
 0x3f5   : > { %v22795_v8 = vpop.trf.xlu1 }
 0x3f6   : > { %v22797_v9 = vpop.trf.xlu0  ;;  %v2573_v10 = vsel %vm2566_vm0, %v22795_v8, 0.0 }
 0x3f7   : > { %v2567_v11 = vsel %vm2566_vm0, %v22797_v9, 0.0  ;;  %2574 = vadd.xlane.f32.xlu1 %v2573_v10 }
 0x3f8   : > { %2568 = vadd.xlane.f32.xlu0 %v2567_v11 }
 0x3f9   : > { %v22805_v13 = vpop.trf.xlu1 }
 0x3fa   : > { %v22803_v12 = vpop.trf.xlu0  ;;  %v2576_v15 = vsel %vm2566_vm0, %v22805_v13, 0.0 }
 0x3fb   : > { %v2570_v14 = vsel %vm2566_vm0, %v22803_v12, 0.0 }
 0x3fc   : > { %2571 = vadd.xlane.f32.xlu1 %v2570_v14 }
 0x400   : > { %2577 = vadd.xlane.f32.xlu1 %v2576_v15  ;;  %v16841_v15 = vld [vmem:[#allocation27] ss:$0 sm:$0xff] }
 0x484   : > { %v2575_v16 = vpop.xlane.xlu1 %2574 }
 0x485   : > { %v2569_v17 = vpop.xlane.xlu0 %2568  ;;  %v2582_v18 = vmul.f32 0.03125, %v2575_v16 }
 0x486   : > { %v2580_v19 = vmul.f32 0.03125, %v2569_v17  ;;  %v16842_v17 = vld [vmem:[#allocation28] ss:$0 sm:$0xff] }
 0x487   : > { %v22812_v20 = vsub.f32 %v22795_v8, %v2582_v18 }
 0x488   : > { %v22815_v21 = vsub.f32 %v22797_v9, %v2580_v19 }
 0x489   : > { %v2572_v22 = vpop.xlane.xlu1 %2571  ;;  %v2590_v27 = vmul.f32 %v22812_v20, %v22812_v20 }
 0x48a   : > { %v2581_v23 = vmul.f32 0.03125, %v2572_v22  ;;  %v2588_v24 = vmul.f32 %v22815_v21, %v22815_v21 }
 0x48b   : > { %v2598_v33 = vsel %vm2566_vm0, %v2590_v27, 0.0 }
 0x48c   : > { %v22820_v25 = vsub.f32 %v22803_v12, %v2581_v23  ;;  %v2592_v26 = vsel %vm2566_vm0, %v2588_v24, 0.0 }
 0x48d   : > { %v2578_v28 = vpop.xlane.xlu1 %2577  ;;  %2593 = vadd.xlane.f32.xlu0 %v2592_v26 }
 0x48e   : > { %v2583_v29 = vmul.f32 0.03125, %v2578_v28  ;;  %v2589_v30 = vmul.f32 %v22820_v25, %v22820_v25 }
 0x490   : > { %v22828_v31 = vsub.f32 %v22805_v13, %v2583_v29  ;;  %v2595_v32 = vsel %vm2566_vm0, %v2589_v30, 0.0 }
 0x491   : > { %2596 = vadd.xlane.f32.xlu1 %v2595_v32  ;;  %2599 = vadd.xlane.f32.xlu0 %v2598_v33 }
 0x492   : > { %v2591_v34 = vmul.f32 %v22828_v31, %v22828_v31 }
 0x494   : > { %v2601_v35 = vsel %vm2566_vm0, %v2591_v34, 0.0 }
 0x495   : > { %2602 = vadd.xlane.f32.xlu1 %v2601_v35 }
 0x51a   : > { %v2594_v42 = vpop.xlane.xlu0 %2593 }
 0x51b   : > { %v2604_v43 = vmul.f32 0.032258064, %v2594_v42 }
 0x51d   : > { %20492 = vrsqrt.f32 %v2604_v43  ;;  %vm2610_vm1 = vcmp.eq.f32.partialorder %v2604_v43, inf  ;;  %v2613_v52 = vand.u32 2147483648, %v2604_v43  ;;  %vm2612_vm2 = vcmp.eq.f32.partialorder %v2604_v43, 0.0 }
 0x51e   : > { %v2597_v44 = vpop.xlane.xlu1 %2596  ;;  %v2600_v45 = vpop.xlane.xlu0 %2599 }
 0x51f   : > { %v2605_v46 = vmul.f32 0.032258064, %v2597_v44  ;;  %v2606_v47 = vmul.f32 0.032258064, %v2600_v45 }
 0x521   : > { %20494 = vrsqrt.f32 %v2605_v46  ;;  %vm2617_vm3 = vcmp.eq.f32.partialorder %v2605_v46, inf  ;;  %vm2619_vm4 = vcmp.eq.f32.partialorder %v2605_v46, 0.0  ;;  %v2620_v59 = vand.u32 2147483648, %v2605_v46 }
 0x522   : > { %20496 = vrsqrt.f32 %v2606_v47  ;;  %v2603_v48 = vpop.xlane.xlu1 %2602  ;;  %vm2624_vm5 = vcmp.eq.f32.partialorder %v2606_v47, inf  ;;  %v2627_v62 = vand.u32 2147483648, %v2606_v47  ;;  %vm2626_vm6 = vcmp.eq.f32.partialorder %v2606_v47, 0.0 }
 0x523   : > { %v2607_v49 = vmul.f32 0.032258064, %v2603_v48 }
 0x525   : > { %20498 = vrsqrt.f32 %v2607_v49  ;;  %vm2631_vm7 = vcmp.eq.f32.partialorder %v2607_v49, inf  ;;  %v2634_v6 = vand.u32 2147483648, %v2607_v49  ;;  %vm2633_vm8 = vcmp.eq.f32.partialorder %v2607_v49, 0.0 }
 0x527   : > { %v20493_v50 = vpop.eup %20492 }
 0x528   : > { %v2609_v51 = vmul.f32 %v20493_v50, %v2604_v43 }
 0x52a   : > { %v2611_v53 = vsel %vm2610_vm1, %v2604_v43, %v2609_v51 }
 0x52b   : > { %v20495_v54 = vpop.eup %20494  ;;  %v2614_v55 = vsel %vm2612_vm2, %v2613_v52, %v2611_v53 }
 0x52c   : > { %v20497_v56 = vpop.eup %20496  ;;  %v2616_v57 = vmul.f32 %v20495_v54, %v2605_v46  ;;  %v2636_v58 = vadd.f32 1e-06, %v2614_v55 }
 0x52d   : > { %v2623_v60 = vmul.f32 %v20497_v56, %v2606_v47 }
 0x52e   : > { %v2618_v61 = vsel %vm2617_vm3, %v2605_v46, %v2616_v57  ;;  %20500 = vrcp.f32 %v2636_v58 }
 0x52f   : > { %v20499_v63 = vpop.eup %20498  ;;  %v2621_v0 = vsel %vm2619_vm4, %v2620_v59, %v2618_v61  ;;  %v2625_v1 = vsel %vm2624_vm5, %v2606_v47, %v2623_v60 }
 0x530   : > { %v2637_v2 = vadd.f32 1e-06, %v2621_v0  ;;  %v2628_v3 = vsel %vm2626_vm6, %v2627_v62, %v2625_v1  ;;  %v2630_v4 = vmul.f32 %v20499_v63, %v2607_v49  ;;  %vm4810_vm6 = vcmask 523264  }
 0x531   : > { %v2638_v5 = vadd.f32 1e-06, %v2628_v3 }
 0x532   : > { %v2632_v7 = vsel %vm2631_vm7, %v2607_v49, %v2630_v4  ;;  %20502 = vrcp.f32 %v2637_v2 }
 0x533   : > { %v2635_v10 = vsel %vm2633_vm8, %v2634_v6, %v2632_v7  ;;  %20504 = vrcp.f32 %v2638_v5 }
 0x534   : > { %v2639_v11 = vadd.f32 1e-06, %v2635_v10 }
 0x536   : > { %20506 = vrcp.f32 %v2639_v11 }
 0x538   : > { %v20501_v14 = vpop.eup %20500 }
 0x539   : > { %v2645_v16 = vmul.f32 %v20501_v14, %v22815_v21 }
 0x53b   : > { %v2655_v18 = vmul.f32 %v16841_v15, %v2645_v16 }
 0x53c   : > { %v20503_v19 = vpop.eup %20502 }
 0x53d   : > { %v20505_v22 = vpop.eup %20504  ;;  %v2666_v23 = vadd.f32 %v16842_v17, %v2655_v18  ;;  %v2646_v24 = vmul.f32 %v20503_v19, %v22820_v25  ;;  %v16843_v25 = vld [vmem:[#allocation25] ss:$0 sm:$0xff] }
 0x53e   : > { %v2647_v26 = vmul.f32 %v20505_v22, %v22812_v20 }
 0x53f   : > { %17852 = vmatprep.mubr.msk.f32.mxu1 %vm2566_vm0, %v2666_v23  ;;  %v2656_v27 = vmul.f32 %v16841_v15, %v2646_v24 }
 0x540   : > { %v20507_v28 = vpop.eup %20506  ;;  %v2657_v29 = vmul.f32 %v16841_v15, %v2647_v26 }
 0x541   : > { %v2667_v30 = vadd.f32 %v16842_v17, %v2656_v27  ;;  %v2648_v32 = vmul.f32 %v20507_v28, %v22828_v31 }
 0x542   : > { %v2668_v33 = vadd.f32 %v16842_v17, %v2657_v29 }
 0x543   : > { %17853 = vmatmul.mubr.msk.f32.vlgmr.msra.gmra.mrb[0].mxu1 %vm2566_vm0, %v2667_v30  ;;  %v2658_v21 = vmul.f32 %v16841_v15, %v2648_v32 }
 0x544   : > { %17855 = vmatprep.mubr.msk.f32.mxu1 %vm2566_vm0, %v2668_v33 }
 0x545   : > { %v2669_v34 = vadd.f32 %v16842_v17, %v2658_v21 }
 0x547   : > { %17856 = vmatmul.mubr.msk.f32.gmra.mrb[2].mxu1 %vm2566_vm0, %v2669_v34 }
 0x616   : > { %v17854_v35 = vpop.f32.mrb[0].mxu1 }
 0x617   : > { %v2765_v20 = vadd.f32 %v17854_v35, %v16843_v25  ;;  %v2759_v36 = vpop.f32.mrb[1].mxu1 }
 0x618   : > { %v2760_v37 = vadd.f32 %v16843_v25, %v2759_v36 }
 0x619   : > { %v2779_v48 = vmul.f32 0.35355338, %v2765_v20 }
 0x61a   : > { %v17857_v38 = vpop.f32.mrb[2].mxu1  ;;  %v22847_v39 = vpack.i.bf16 %v2765_v20, %v2760_v37  ;;  %v2778_v40 = vmul.f32 0.35355338, %v2760_v37 }
 0x61b   : > { %v2775_v31 = vadd.f32 %v17857_v38, %v16843_v25  ;;  %v2769_v41 = vpop.f32.mrb[3].mxu1 }
 0x61c   : > { %v2770_v42 = vadd.f32 %v16843_v25, %v2769_v41  ;;  %19913 = vrot.lane.b32.xlu0 %v22847_v39, %s25542_s1  ;;  %17862 = vmatprep.mubr.msk.f32.mxu1 %vm2842_vm9, %v2778_v40 }
 0x61d   : > { %v2781_v51 = vmul.f32 0.35355338, %v2775_v31 }
 0x61e   : > { %v19927_v43 = vpack.i.bf16 %v2775_v31, %v2770_v42  ;;  %v2780_v44 = vmul.f32 0.35355338, %v2770_v42 }
 0x620   : > { %19928 = vrot.lane.b32.xlu0 %v19927_v43, %s25540_s3  ;;  %19918 = vrot.lane.b32.xlu1 %v19927_v43, %s25542_s1 }
 0x621   : > { %17869 = vmatprep.mubr.msk.f32.mxu0 %vm2842_vm9, %v2780_v44 }
 0x624   : > { %19938 = vrot.lane.b32.xlu0 %v19927_v43, %s25534_s5  ;;  %19923 = vrot.lane.b32.xlu1 %v22847_v39, %s25540_s3 }
 0x628   : > { %19948 = vrot.lane.b32.xlu0 %v19927_v43, %s25532_s28  ;;  %19933 = vrot.lane.b32.xlu1 %v22847_v39, %s25534_s5 }
 0x62c   : > { %2786 = vrot.lane.b32.xlu0 %v2778_v40, %s25542_s1  ;;  %19943 = vrot.lane.b32.xlu1 %v22847_v39, %s25532_s28 }
 0x68e   : > { %v19914_v45 = vpop.permute.xlu0 %19913 }
 0x68f   : > { %19953 = vrot.lane.b32.xlu1 %v19914_v45, %s25532_s28 }
 0x692   : > { %v19919_v46 = vpop.permute.xlu1 %19918  ;;  %v22864_v47 = vpop.permute.xlu0 %19928 }
 0x693   : > { %19963 = vrot.lane.b32.xlu0 %v19919_v46, %s25532_s28  ;;  %2788 = vrot.lane.b32.xlu1 %v2779_v48, %s25542_s1 }
 0x696   : > { %v22867_v49 = vpop.permute.xlu1 %19923  ;;  %v22869_v50 = vpop.permute.xlu0 %19938 }
 0x697   : > { %2792 = vrot.lane.b32.xlu0 %v2781_v51, %s25542_s1  ;;  %19958 = vrot.lane.b32.xlu1 %v22867_v49, %s25532_s28 }
 0x69a   : > { %v22873_v52 = vpop.permute.xlu1 %19933  ;;  %v19949_v53 = vpop.permute.xlu0 %19948 }
 0x69b   : > { %v19951_v54 = vunpack.i.h.bf16 %v19949_v53  ;;  %v19950_v55 = vunpack.i.l.bf16 %v19949_v53  ;;  %19973 = vrot.lane.b32.xlu0 %v22864_v47, %s25532_s28  ;;  %2790 = vrot.lane.b32.xlu1 %v2780_v44, %s25542_s1 }
 0x69d   : > { %v18870_v57 = vpack.c.bf16 %v19951_v54, %v19950_v55 }
 0x69e   : > { %v19944_v58 = vpop.permute.xlu1 %19943  ;;  %v2787_v62 = vpop.permute.xlu0 %2786 }
 0x69f   : > { %v19946_v59 = vunpack.i.h.bf16 %v19944_v58  ;;  %v19945_v60 = vunpack.i.l.bf16 %v19944_v58  ;;  %18872 = vmatprep.subr.msk.bf16.mxu0 %vm22880_vm10, %v18870_v57  ;;  %2794 = vrot.lane.b32.xlu0 %v2778_v40, %s25540_s3 }
 0x6a0   : > { %18875 = vmatpush3.bf16.xpose.msk.msra.mxu0 %vm22880_vm10, %v18870_v57  ;;  %19968 = vrot.lane.b32.xlu1 %v22873_v52, %s25532_s28 }
 0x6a1   : > { %v18864_v61 = vpack.c.bf16 %v19946_v59, %v19945_v60 }
 0x6a3   : > { %18866 = vmatprep.subr.msk.bf16.mxu1 %vm22880_vm10, %v18864_v61  ;;  %19978 = vrot.lane.b32.xlu0 %v22869_v50, %s25532_s28 }
 0x6a4   : > { %18869 = vmatpush3.bf16.xpose.msk.msra.mxu1 %vm22880_vm10, %v18864_v61  ;;  %2796 = vrot.lane.b32.xlu1 %v2779_v48, %s25540_s3 }
 0x6a7   : > { %17870 = vmatmul.mubr.msk.f32.vlgmr.msra.gmra.mrb[0].mxu0 %vm2842_vm9, %v2781_v51  ;;  %2800 = vrot.lane.b32.xlu0 %v2781_v51, %s25540_s3 }
 0x6a8   : > { %2798 = vrot.lane.b32.xlu1 %v2780_v44, %s25540_s3 }
 0x6ab   : > { %17863 = vmatmul.mubr.msk.f32.vlgmr.msra.gmra.mrb[4].mxu1 %vm2842_vm9, %v2779_v48  ;;  %2804 = vrot.lane.b32.xlu0 %v2779_v48, %s25534_s5 }
 0x6ac   : > { %17876 = vmatprep.mubr.msk.f32.mxu1 %vm2842_vm9, %v2787_v62  ;;  %2802 = vrot.lane.b32.xlu1 %v2778_v40, %s25534_s5 }
 0x6af   : > { %2808 = vrot.lane.b32.xlu0 %v2781_v51, %s25534_s5 }
 0x6b0   : > { %2806 = vrot.lane.b32.xlu1 %v2780_v44, %s25534_s5 }
 0x6b3   : > { %19983 = vrot.lane.b32.xlu0 %v22847_v39, %s25530_s4 }
 0x6b4   : > { %19988 = vrot.lane.b32.xlu1 %v19927_v43, %s25530_s4 }
 0x6b7   : > { %19998 = vrot.lane.b32.xlu0 %v19919_v46, %s25530_s4 }
 0x6b8   : > { %19993 = vrot.lane.b32.xlu1 %v19914_v45, %s25530_s4 }
 0x701   : > { %v19954_v63 = vpop.permute.xlu1 %19953 }
 0x702   : > { %v19956_v0 = vunpack.i.h.bf16 %v19954_v63  ;;  %v19955_v1 = vunpack.i.l.bf16 %v19954_v63 }
 0x704   : > { %v18876_v2 = vpack.c.bf16 %v19956_v0, %v19955_v1 }
 0x705   : > { %v19964_v3 = vpop.permute.xlu0 %19963  ;;  %v2789_v4 = vpop.permute.xlu1 %2788 }
 0x706   : > { %v19966_v5 = vunpack.i.h.bf16 %v19964_v3  ;;  %v19965_v6 = vunpack.i.l.bf16 %v19964_v3  ;;  %18878 = vmatprep.subr.msk.bf16.mxu1 %vm22880_vm10, %v18876_v2 }
 0x707   : > { %18881 = vmatpush3.bf16.xpose.msk.msra.mxu1 %vm22880_vm10, %v18876_v2 }
 0x708   : > { %v18882_v7 = vpack.c.bf16 %v19966_v5, %v19965_v6 }
 0x709   : > { %v2793_v10 = vpop.permute.xlu0 %2792  ;;  %v19959_v11 = vpop.permute.xlu1 %19958 }
 0x70a   : > { %v19961_v14 = vunpack.i.h.bf16 %v19959_v11  ;;  %v19960_v15 = vunpack.i.l.bf16 %v19959_v11  ;;  %18884 = vmatprep.subr.msk.bf16.mxu0 %vm22880_vm10, %v18882_v7 }
 0x70b   : > { %18887 = vmatpush3.bf16.xpose.msk.msra.mxu0 %vm22880_vm10, %v18882_v7 }
 0x70c   : > { %v18888_v16 = vpack.c.bf16 %v19961_v14, %v19960_v15 }
 0x70d   : > { %v19974_v17 = vpop.permute.xlu0 %19973  ;;  %v2791_v22 = vpop.permute.xlu1 %2790 }
 0x70e   : > { %v19976_v18 = vunpack.i.h.bf16 %v19974_v17  ;;  %v19975_v19 = vunpack.i.l.bf16 %v19974_v17  ;;  %17877 = vmatmul.mubr.msk.f32.vlgmr.msra.gmra.mrb[6].mxu1 %vm2842_vm9, %v2789_v4  ;;  %18890 = vmatprep.subr.msk.bf16.mxu1 %vm22880_vm10, %v18888_v16 }
 0x70f   : > { %17883 = vmatprep.mubr.msk.f32.mxu0 %vm2842_vm9, %v2791_v22  ;;  %18893 = vmatpush3.bf16.xpose.msk.msra.mxu1 %vm22880_vm10, %v18888_v16 }
 0x710   : > { %v18894_v23 = vpack.c.bf16 %v19976_v18, %v19975_v19 }
 0x711   : > { %v2795_v24 = vpop.permute.xlu0 %2794 }
 0x712   : > { %v19969_v26 = vpop.permute.xlu1 %19968  ;;  %17884 = vmatmul.mubr.msk.f32.vlgmr.msra.gmra.mrb[2].mxu0 %vm2842_vm9, %v2793_v10  ;;  %17890 = vmatprep.mubr.msk.f32.mxu1 %vm2842_vm9, %v2795_v24 }
 0x713   : > { %v19971_v27 = vunpack.i.h.bf16 %v19969_v26  ;;  %v19970_v28 = vunpack.i.l.bf16 %v19969_v26  ;;  %18896 = vmatprep.subr.msk.bf16.mxu0 %vm22880_vm10, %v18894_v23 }
 0x714   : > { %18899 = vmatpush3.bf16.xpose.msk.msra.mxu0 %vm22880_vm10, %v18894_v23 }
 0x715   : > { %v18900_v29 = vpack.c.bf16 %v19971_v27, %v19970_v28  ;;  %v19979_v30 = vpop.permute.xlu0 %19978 }
 0x716   : > { %v19981_v32 = vunpack.i.h.bf16 %v19979_v30  ;;  %v19980_v33 = vunpack.i.l.bf16 %v19979_v30  ;;  %v2797_v21 = vpop.permute.xlu1 %2796 }
 0x717   : > { %17891 = vmatmul.mubr.msk.f32.vlgmr.msra.gmra.mrb[8].mxu1 %vm2842_vm9, %v2797_v21  ;;  %18902 = vmatprep.subr.msk.bf16.mxu1 %vm22880_vm10, %v18900_v29 }
 0x718   : > { %v18906_v34 = vpack.c.bf16 %v19981_v32, %v19980_v33  ;;  %18905 = vmatpush3.bf16.xpose.msk.msra.mxu1 %vm22880_vm10, %v18900_v29 }
 0x719   : > { %v2801_v25 = vpop.permute.xlu0 %2800 }
 0x71a   : > { %v2799_v35 = vpop.permute.xlu1 %2798  ;;  %18908 = vmatprep.subr.msk.bf16.mxu0 %vm22880_vm10, %v18906_v34 }
 0x71b   : > { %17897 = vmatprep.mubr.msk.f32.mxu0 %vm2842_vm9, %v2799_v35 }
 0x71c   : > { %17898 = vmatmul.mubr.msk.f32.vlgmr.msra.gmra.mrb[4].mxu0 %vm2842_vm9, %v2801_v25 }
 0x71d   : > { %18911 = vmatpush3.bf16.xpose.msk.msra.mxu0 %vm22880_vm10, %v18906_v34  ;;  %v2805_v20 = vpop.permute.xlu0 %2804 }
 0x71e   : > { %v2803_v36 = vpop.permute.xlu1 %2802 }
 0x71f   : > { %17904 = vmatprep.mubr.msk.f32.mxu1 %vm2842_vm9, %v2803_v36 }
 0x720   : > { %17905 = vmatmul.mubr.msk.f32.vlgmr.msra.gmra.mrb[10].mxu1 %vm2842_vm9, %v2805_v20 }
 0x721   : > { %v2809_v37 = vpop.permute.xlu0 %2808 }
 0x722   : > { %v2807_v38 = vpop.permute.xlu1 %2806 }
 0x723   : > { %17911 = vmatprep.mubr.msk.f32.mxu0 %vm2842_vm9, %v2807_v38 }
 0x724   : > { %17912 = vmatmul.mubr.msk.f32.vlgmr.msra.gmra.mrb[6].mxu0 %vm2842_vm9, %v2809_v37 }
 0x725   : > { %v19984_v39 = vpop.permute.xlu0 %19983 }
 0x726   : > { %v19986_v40 = vunpack.i.h.bf16 %v19984_v39  ;;  %v19985_v31 = vunpack.i.l.bf16 %v19984_v39  ;;  %v19989_v41 = vpop.permute.xlu1 %19988 }
 0x727   : > { %v19991_v42 = vunpack.i.h.bf16 %v19989_v41  ;;  %v19990_v43 = vunpack.i.l.bf16 %v19989_v41 }
 0x728   : > { %v18912_v44 = vpack.c.bf16 %v19986_v40, %v19985_v31 }
 0x729   : > { %v22950_v46 = vpack.c.bf16 %v19991_v42, %v19990_v43  ;;  %v23008_v30 = vpop.permute.xlu0 %19998 }
 0x72a   : > { %v19994_v45 = vpop.permute.xlu1 %19993  ;;  %18913 = vmatprep.subr.bf16.mxu1 %v18912_v44 }
 0x72b   : > { %v19996_v48 = vunpack.i.h.bf16 %v19994_v45  ;;  %v19995_v51 = vunpack.i.l.bf16 %v19994_v45  ;;  %18915 = vmatpush3.bf16.msra.mxu1 %v18912_v44 }
 0x72c   : > { %18917 = vmatprep.subr.bf16.mxu1 %v22950_v46 }
 0x72d   : > { %v18920_v53 = vpack.c.bf16 %v19996_v48, %v19995_v51 }
 0x72f   : > { %18921 = vmatprep.subr.bf16.mxu0 %v18920_v53 }
 0x730   : > { %18923 = vmatpush3.bf16.msra.mxu0 %v18920_v53 }
 0x77a   : > { %v17871_v54 = vpop.f32.mrb[0].mxu0 }
 0x77b   : > { %v22953_v55 = vpop.f32.mrb[1].mxu0  ;;  %v3545_v61 = vsel %vm3535_vm11, %v17871_v54, -inf }
 0x77c   : > { %v3542_v62 = vsel %vm3535_vm11, %v22953_v55, -inf }
 0x77e   : > { %v17864_v57 = vpop.f32.mrb[4].mxu1 }
 0x77f   : > { %v2917_v58 = vpop.f32.mrb[5].mxu1  ;;  %v3539_v59 = vsel %vm3535_vm11, %v17864_v57, -inf }
 0x780   : > { %3540 = vmax.xlane.f32.xlu0 %v3539_v59  ;;  %v3536_v60 = vsel %vm3535_vm11, %v2917_v58, -inf }
 0x781   : > { %3537 = vmax.xlane.f32.xlu1 %v3536_v60 }
 0x784   : > { %3546 = vmax.xlane.f32.xlu0 %v3545_v61 }
 0x788   : > { %3543 = vmax.xlane.f32.xlu0 %v3542_v62 }
 0x7e1   : > { %v22960_v63 = vpop.f32.mrb[6].mxu1 }
 0x7e2   : > { %v22962_v0 = vpop.f32.mrb[7].mxu1  ;;  %v3551_v1 = vsel %vm3535_vm11, %v22960_v63, -inf }
 0x7e3   : > { %3552 = vmax.xlane.f32.xlu1 %v3551_v1  ;;  %v3548_v5 = vsel %vm3535_vm11, %v22962_v0, -inf }
 0x7e5   : > { %v22966_v2 = vpop.f32.mrb[2].mxu0 }
 0x7e6   : > { %v22968_v3 = vpop.f32.mrb[3].mxu0  ;;  %v3557_v4 = vsel %vm3535_vm11, %v22966_v2, -inf }
 0x7e7   : > { %3558 = vmax.xlane.f32.xlu0 %v3557_v4  ;;  %3549 = vmax.xlane.f32.xlu1 %v3548_v5  ;;  %v3554_v7 = vsel %vm3535_vm11, %v22968_v3, -inf }
 0x7ea   : > { %v22974_v6 = vpop.f32.mrb[8].mxu1 }
 0x7eb   : > { %v22978_v10 = vpop.f32.mrb[9].mxu1  ;;  %3555 = vmax.xlane.f32.xlu0 %v3554_v7  ;;  %v3563_v11 = vsel %vm3535_vm11, %v22974_v6, -inf }
 0x7ec   : > { %3564 = vmax.xlane.f32.xlu1 %v3563_v11  ;;  %v3560_v15 = vsel %vm3535_vm11, %v22978_v10, -inf }
 0x7ef   : > { %v22982_v14 = vpop.f32.mrb[4].mxu0 }
 0x7f0   : > { %v22986_v16 = vpop.f32.mrb[5].mxu0  ;;  %3561 = vmax.xlane.f32.xlu1 %v3560_v15  ;;  %v3569_v17 = vsel %vm3535_vm11, %v22982_v14, -inf }
 0x7f1   : > { %3570 = vmax.xlane.f32.xlu0 %v3569_v17  ;;  %v3566_v22 = vsel %vm3535_vm11, %v22986_v16, -inf }
 0x7f3   : > { %v22990_v18 = vpop.f32.mrb[10].mxu1 }
 0x7f4   : > { %v22992_v19 = vpop.f32.mrb[11].mxu1  ;;  %v3575_v23 = vsel %vm3535_vm11, %v22990_v18, -inf }
 0x7f5   : > { %3567 = vmax.xlane.f32.xlu0 %v3566_v22  ;;  %3576 = vmax.xlane.f32.xlu1 %v3575_v23  ;;  %v3572_v27 = vsel %vm3535_vm11, %v22992_v19, -inf }
 0x7f7   : > { %v22998_v24 = vpop.f32.mrb[6].mxu0 }
 0x7f8   : > { %v23000_v26 = vpop.f32.mrb[7].mxu0  ;;  %v3581_v29 = vsel %vm3535_vm11, %v22998_v24, -inf }
 0x7f9   : > { %3573 = vmax.xlane.f32.xlu1 %v3572_v27  ;;  %v3578_v28 = vsel %vm3535_vm11, %v23000_v26, -inf }
 0x7fa   : > { %3579 = vmax.xlane.f32.xlu0 %v3578_v28 }
 0x7fd   : > { %3582 = vmax.xlane.f32.xlu1 %v3581_v29 }
 0x80d   : > { %v3541_v32 = vpop.xlane.xlu0 %3540 }
 0x80e   : > { %20003 = vrot.lane.b32.xlu1 %v22867_v49, %s25530_s4  ;;  %v3538_v33 = vpop.xlane.xlu1 %3537  ;;  %v3585_v25 = vsub.f32 %v17864_v57, %v3541_v32 }
 0x80f   : > { %v3584_v34 = vsub.f32 %v2917_v58, %v3538_v33 }
 0x810   : > { %20008 = vrot.lane.b32.xlu0 %v22864_v47, %s25530_s4  ;;  %v3602_v37 = vmul.f32 1.442695, %v3585_v25 }
 0x811   : > { %v3547_v21 = vpop.xlane.xlu0 %3546  ;;  %v3600_v35 = vmul.f32 1.442695, %v3584_v34 }
 0x812   : > { %v3587_v20 = vsub.f32 %v17871_v54, %v3547_v21 }
 0x813   : > { %20508 = vpow2.f32 %v3600_v35 }
 0x814   : > { %v3606_v38 = vmul.f32 1.442695, %v3587_v20  ;;  %20510 = vpow2.f32 %v3602_v37 }
 0x815   : > { %v3544_v36 = vpop.xlane.xlu0 %3543 }
 0x816   : > { %v3586_v39 = vsub.f32 %v22953_v55, %v3544_v36  ;;  %20512 = vpow2.f32 %v3606_v38 }
 0x818   : > { %v3604_v40 = vmul.f32 1.442695, %v3586_v39 }
 0x81a   : > { %20514 = vpow2.f32 %v3604_v40 }
 0x81d   : > { %v23015_v49 = vpop.eup %20508 }
 0x81e   : > { %v23017_v47 = vpop.eup %20510  ;;  %v3632_v31 = vsel %vm3535_vm11, %v23015_v49, 0.0 }
 0x81f   : > { %v3635_v42 = vsel %vm3535_vm11, %v23017_v47, 0.0 }
 0x820   : > { %v23021_v41 = vpop.eup %20512 }
 0x821   : > { %v3641_v43 = vsel %vm3535_vm11, %v23021_v41, 0.0 }
 0x824   : > { %v23027_v44 = vpop.eup %20514 }
 0x825   : > { %v3638_v45 = vsel %vm3535_vm11, %v23027_v44, 0.0 }
 0x82f   : > { %3633 = vadd.xlane.f32.xlu0 %v3632_v31 }
 0x832   : > { %3636 = vadd.xlane.f32.xlu1 %v3635_v42 }
 0x833   : > { %3642 = vadd.xlane.f32.xlu0 %v3641_v43 }
 0x837   : > { %3639 = vadd.xlane.f32.xlu0 %v3638_v45 }
 0x870   : > { %v3553_v48 = vpop.xlane.xlu1 %3552 }
 0x871   : > { %v3589_v51 = vsub.f32 %v22960_v63, %v3553_v48 }
 0x873   : > { %v3610_v53 = vmul.f32 1.442695, %v3589_v51 }
 0x874   : > { %v3559_v54 = vpop.xlane.xlu0 %3558  ;;  %v3550_v55 = vpop.xlane.xlu1 %3549 }
 0x875   : > { %20516 = vpow2.f32 %v3610_v53  ;;  %v3591_v57 = vsub.f32 %v22966_v2, %v3559_v54  ;;  %v3588_v58 = vsub.f32 %v22962_v0, %v3550_v55 }
 0x877   : > { %v3614_v59 = vmul.f32 1.442695, %v3591_v57  ;;  %v3608_v60 = vmul.f32 1.442695, %v3588_v58 }
 0x878   : > { %v3556_v61 = vpop.xlane.xlu0 %3555 }
 0x879   : > { %20518 = vpow2.f32 %v3614_v59  ;;  %v3590_v62 = vsub.f32 %v22968_v3, %v3556_v61  ;;  %v3565_v1 = vpop.xlane.xlu1 %3564 }
 0x87a   : > { %20520 = vpow2.f32 %v3608_v60  ;;  %v3593_v4 = vsub.f32 %v22974_v6, %v3565_v1 }
 0x87b   : > { %v3612_v5 = vmul.f32 1.442695, %v3590_v62 }
 0x87c   : > { %v3618_v63 = vmul.f32 1.442695, %v3593_v4 }
 0x87d   : > { %20522 = vpow2.f32 %v3612_v5  ;;  %v3562_v7 = vpop.xlane.xlu1 %3561 }
 0x87e   : > { %20524 = vpow2.f32 %v3618_v63  ;;  %v3592_v11 = vsub.f32 %v22978_v10, %v3562_v7  ;;  %v3571_v2 = vpop.xlane.xlu0 %3570 }
 0x87f   : > { %v23037_v15 = vpop.eup %20516  ;;  %v3595_v0 = vsub.f32 %v22982_v14, %v3571_v2 }
 0x880   : > { %v3616_v17 = vmul.f32 1.442695, %v3592_v11  ;;  %v3647_v3 = vsel %vm3535_vm11, %v23037_v15, 0.0 }
 0x881   : > { %v3622_v22 = vmul.f32 1.442695, %v3595_v0  ;;  %3648 = vadd.xlane.f32.xlu1 %v3647_v3  ;;  %v20001_v3 = vunpack.i.h.bf16 %v23008_v30 }
 0x882   : > { %20526 = vpow2.f32 %v3616_v17  ;;  %v3568_v6 = vpop.xlane.xlu0 %3567  ;;  %v3577_v23 = vpop.xlane.xlu1 %3576 }
 0x883   : > { %v23042_v27 = vpop.eup %20518  ;;  %20528 = vpow2.f32 %v3622_v22  ;;  %v3594_v28 = vsub.f32 %v22986_v16, %v3568_v6  ;;  %v3597_v10 = vsub.f32 %v22990_v18, %v3577_v23  ;;  %v20000_v22 = vunpack.i.l.bf16 %v23008_v30 }
 0x884   : > { %v23046_v29 = vpop.eup %20520  ;;  %v3653_v14 = vsel %vm3535_vm11, %v23042_v27, 0.0 }
 0x885   : > { %v3620_v32 = vmul.f32 1.442695, %v3594_v28  ;;  %v3626_v33 = vmul.f32 1.442695, %v3597_v10  ;;  %3654 = vadd.xlane.f32.xlu0 %v3653_v14  ;;  %v3644_v21 = vsel %vm3535_vm11, %v23046_v29, 0.0  ;;  %v18924_v6 = vpack.c.bf16 %v20001_v3, %v20000_v22 }
 0x886   : > { %3645 = vadd.xlane.f32.xlu1 %v3644_v21  ;;  %v3574_v34 = vpop.xlane.xlu1 %3573 }
 0x887   : > { %v23052_v25 = vpop.eup %20522  ;;  %20530 = vpow2.f32 %v3620_v32  ;;  %v3596_v16 = vsub.f32 %v22992_v19, %v3574_v34  ;;  %v3580_v35 = vpop.xlane.xlu0 %3579 }
 0x888   : > { %v23055_v18 = vpop.eup %20524  ;;  %20532 = vpow2.f32 %v3626_v33  ;;  %v3598_v20 = vsub.f32 %v23000_v26, %v3580_v35  ;;  %v3650_v36 = vsel %vm3535_vm11, %v23052_v25, 0.0 }
 0x889   : > { %v3624_v37 = vmul.f32 1.442695, %v3596_v16  ;;  %3651 = vadd.xlane.f32.xlu0 %v3650_v36  ;;  %v3659_v38 = vsel %vm3535_vm11, %v23055_v18, 0.0 }
 0x88a   : > { %v3628_v39 = vmul.f32 1.442695, %v3598_v20  ;;  %3660 = vadd.xlane.f32.xlu1 %v3659_v38  ;;  %v3583_v40 = vpop.xlane.xlu1 %3582 }
 0x88b   : > { %20534 = vpow2.f32 %v3624_v37  ;;  %v3599_v19 = vsub.f32 %v22998_v24, %v3583_v40  ;;  %v20009_v5 = vpop.permute.xlu0 %20008 }
 0x88c   : > { %v23063_v31 = vpop.eup %20526  ;;  %20536 = vpow2.f32 %v3628_v39  ;;  %v20011_v10 = vunpack.i.h.bf16 %v20009_v5  ;;  %v20010_v14 = vunpack.i.l.bf16 %v20009_v5 }
 0x88d   : > { %v23065_v42 = vpop.eup %20528  ;;  %v3630_v26 = vmul.f32 1.442695, %v3599_v19  ;;  %v3656_v43 = vsel %vm3535_vm11, %v23063_v31, 0.0 }
 0x88e   : > { %3657 = vadd.xlane.f32.xlu1 %v3656_v43  ;;  %v20004_v45 = vpop.permute.xlu1 %20003  ;;  %v3665_v48 = vsel %vm3535_vm11, %v23065_v42, 0.0  ;;  %v18932_v30 = vpack.c.bf16 %v20011_v10, %v20010_v14  ;;  %v4472_v10 = vld [vmem:[%s25675_s6 + $0x18] sm:$0xff] }
 0x88f   : > { %20538 = vpow2.f32 %v3630_v26  ;;  %v20006_v51 = vunpack.i.h.bf16 %v20004_v45  ;;  %v20005_v53 = vunpack.i.l.bf16 %v20004_v45  ;;  %3666 = vadd.xlane.f32.xlu0 %v3665_v48 }
 0x891   : > { %v23071_v54 = vpop.eup %20530  ;;  %v23073_v24 = vpack.c.bf16 %v20006_v51, %v20005_v53 }
 0x892   : > { %v23075_v55 = vpop.eup %20532  ;;  %v3662_v57 = vsel %vm3535_vm11, %v23071_v54, 0.0 }
 0x893   : > { %3663 = vadd.xlane.f32.xlu0 %v3662_v57  ;;  %v3671_v58 = vsel %vm3535_vm11, %v23075_v55, 0.0  ;;  %18929 = vmatprep.subr.bf16.mxu0 %v23073_v24 }
 0x894   : > { %3672 = vadd.xlane.f32.xlu1 %v3671_v58 }
 0x895   : > { %v23082_v59 = vpop.eup %20534 }
 0x896   : > { %v23084_v60 = vpop.eup %20536  ;;  %v3668_v61 = vsel %vm3535_vm11, %v23082_v59, 0.0 }
 0x897   : > { %v3674_v62 = vsel %vm3535_vm11, %v23084_v60, 0.0 }
 0x898   : > { %3669 = vadd.xlane.f32.xlu1 %v3668_v61  ;;  %3675 = vadd.xlane.f32.xlu0 %v3674_v62 }
 0x899   : > { %v23090_v1 = vpop.eup %20538 }
 0x89a   : > { %v3677_v4 = vsel %vm3535_vm11, %v23090_v1, 0.0 }
 0x89c   : > { %3678 = vadd.xlane.f32.xlu1 %v3677_v4 }
 0x8ad   : > { %20013 = vrot.lane.b32.xlu1 %v22873_v52, %s25530_s4 }
 0x8ae   : > { %20018 = vrot.lane.b32.xlu0 %v22869_v50, %s25530_s4 }
 0x8bc   : > { %v3634_v63 = vpop.xlane.xlu0 %3633 }
 0x8bd   : > { %20540 = vrcp.f32 %v3634_v63 }
 0x8bf   : > { %v3637_v7 = vpop.xlane.xlu1 %3636 }
 0x8c0   : > { %20542 = vrcp.f32 %v3637_v7  ;;  %v3643_v11 = vpop.xlane.xlu0 %3642 }
 0x8c1   : > { %20544 = vrcp.f32 %v3643_v11 }
 0x8c4   : > { %v3640_v2 = vpop.xlane.xlu0 %3639 }
 0x8c5   : > { %20546 = vrcp.f32 %v3640_v2 }
 0x8c7   : > { %v20541_v0 = vpop.eup %20540 }
 0x8c8   : > { %v3696_v17 = vmul.f32 %v20541_v0, %v23015_v49 }
 0x8ca   : > { %v20543_v52 = vpop.eup %20542  ;;  %17918 = vmatprep.mubr.msk.f32.mxu1 %vm3535_vm11, %v3696_v17 }
 0x8cb   : > { %v3697_v50 = vmul.f32 %v20543_v52, %v23017_v47  ;;  %v20545_v23 = vpop.eup %20544 }
 0x8cc   : > { %v3699_v32 = vmul.f32 %v20545_v23, %v23021_v41  ;;  %v4470_v23 = vld [vmem:[%s25675_s6 + $0x8] sm:$0xff] }
 0x8cd   : > { %17919 = vmatmul.mubr.msk.f32.vlgmr.msra.gmra.mrb[12].mxu1 %vm3535_vm11, %v3697_v50 }
 0x8ce   : > { %18919 = vmatpush3.bf16.msra.mxu1 %v22950_v46 }
 0x8cf   : > { %v20547_v28 = vpop.eup %20546  ;;  %18925 = vmatprep.subr.bf16.mxu1 %v18924_v6 }
 0x8d0   : > { %v3698_v49 = vmul.f32 %v20547_v28, %v23027_v44 }
 0x8d2   : > { %17925 = vmatprep.mubr.msk.f32.mxu1 %vm3535_vm11, %v3698_v49 }
 0x8d3   : > { %17926 = vmatmul.mubr.msk.f32.vlgmr.msra.gmra.mrb[14].mxu1 %vm3535_vm11, %v3699_v32 }
 0x8d4   : > { %18927 = vmatpush3.bf16.msra.mxu1 %v18924_v6  ;;  %v4469_v6 = vld [vmem:[%s25675_s6] sm:$0xff] }
 0x8d5   : > { %18933 = vmatprep.subr.bf16.mxu1 %v18932_v30 }
 0x90e   : > { %v3649_v47 = vpop.xlane.xlu1 %3648 }
 0x90f   : > { %20548 = vrcp.f32 %v3649_v47 }
 0x912   : > { %v3655_v33 = vpop.xlane.xlu0 %3654 }
 0x913   : > { %v3646_v21 = vpop.xlane.xlu1 %3645 }
 0x914   : > { %20550 = vrcp.f32 %v3646_v21 }
 0x915   : > { %20552 = vrcp.f32 %v3655_v33 }
 0x916   : > { %v3652_v46 = vpop.xlane.xlu0 %3651 }
 0x917   : > { %20554 = vrcp.f32 %v3652_v46  ;;  %v3661_v34 = vpop.xlane.xlu1 %3660 }
 0x918   : > { %20556 = vrcp.f32 %v3661_v34 }
 0x919   : > { %v20549_v16 = vpop.eup %20548 }
 0x91a   : > { %v3701_v38 = vmul.f32 %v20549_v16, %v23037_v15 }
 0x91b   : > { %v3658_v44 = vpop.xlane.xlu1 %3657 }
 0x91c   : > { %20558 = vrcp.f32 %v3658_v44  ;;  %v3667_v41 = vpop.xlane.xlu0 %3666 }
 0x91d   : > { %20560 = vrcp.f32 %v3667_v41 }
 0x91e   : > { %v20551_v35 = vpop.eup %20550 }
 0x91f   : > { %v3700_v20 = vmul.f32 %v20551_v35, %v23046_v29  ;;  %v20553_v36 = vpop.eup %20552 }
 0x920   : > { %v3664_v37 = vpop.xlane.xlu0 %3663  ;;  %v3703_v26 = vmul.f32 %v20553_v36, %v23042_v27 }
 0x921   : > { %v20555_v39 = vpop.eup %20554  ;;  %20562 = vrcp.f32 %v3664_v37  ;;  %v3673_v40 = vpop.xlane.xlu1 %3672  ;;  %17932 = vmatprep.mubr.msk.f32.mxu0 %vm3535_vm11, %v3700_v20 }
 0x922   : > { %17933 = vmatmul.mubr.msk.f32.vlgmr.msra.gmra.mrb[8].mxu0 %vm3535_vm11, %v3701_v38  ;;  %v3702_v19 = vmul.f32 %v20555_v39, %v23052_v25  ;;  %v20557_v29 = vpop.eup %20556  ;;  %20564 = vrcp.f32 %v3673_v40 }
 0x923   : > { %18931 = vmatpush3.bf16.msra.mxu0 %v23073_v24  ;;  %v3705_v25 = vmul.f32 %v20557_v29, %v23055_v18 }
 0x924   : > { %17939 = vmatprep.mubr.msk.f32.mxu1 %vm3535_vm11, %v3702_v19 }
 0x925   : > { %v3670_v43 = vpop.xlane.xlu1 %3669  ;;  %v3676_v45 = vpop.xlane.xlu0 %3675  ;;  %17940 = vmatmul.mubr.msk.f32.vlgmr.msra.gmra.mrb[16].mxu1 %vm3535_vm11, %v3703_v26 }
 0x926   : > { %v20559_v15 = vpop.eup %20558  ;;  %20566 = vrcp.f32 %v3670_v43  ;;  %18935 = vmatpush3.bf16.msra.mxu1 %v18932_v30 }
 0x927   : > { %20568 = vrcp.f32 %v3676_v45  ;;  %v3704_v48 = vmul.f32 %v20559_v15, %v23063_v31  ;;  %v20561_v27 = vpop.eup %20560 }
 0x928   : > { %v3707_v5 = vmul.f32 %v20561_v27, %v23065_v42 }
 0x929   : > { %v3679_v51 = vpop.xlane.xlu1 %3678  ;;  %v20019_v53 = vpop.permute.xlu0 %20018  ;;  %17946 = vmatprep.mubr.msk.f32.mxu0 %vm3535_vm11, %v3704_v48 }
 0x92a   : > { %20570 = vrcp.f32 %v3679_v51  ;;  %v20021_v24 = vunpack.i.h.bf16 %v20019_v53  ;;  %v20020_v57 = vunpack.i.l.bf16 %v20019_v53  ;;  %17947 = vmatmul.mubr.msk.f32.vlgmr.msra.gmra.mrb[10].mxu0 %vm3535_vm11, %v3705_v25 }
 0x92b   : > { %v20563_v58 = vpop.eup %20562 }
 0x92c   : > { %v3706_v61 = vmul.f32 %v20563_v58, %v23071_v54  ;;  %v18940_v62 = vpack.c.bf16 %v20021_v24, %v20020_v57  ;;  %v20565_v18 = vpop.eup %20564 }
 0x92d   : > { %v20014_v4 = vpop.permute.xlu1 %20013  ;;  %v3709_v17 = vmul.f32 %v20565_v18, %v23075_v55  ;;  %v18944_v55 = vpack.c.bf16 %v4470_v23, %v4469_v6 }
 0x92e   : > { %v20016_v31 = vunpack.i.h.bf16 %v20014_v4  ;;  %v20015_v63 = vunpack.i.l.bf16 %v20014_v4  ;;  %17953 = vmatprep.mubr.msk.f32.mxu1 %vm3535_vm11, %v3706_v61  ;;  %18941 = vmatprep.subr.bf16.mxu1 %v18940_v62  ;;  %v16896_v4 = vld [vmem:[#allocation24] ss:$0 sm:$0xff] }
 0x92f   : > { %17954 = vmatmul.mubr.msk.f32.vlgmr.msra.gmra.mrb[18].mxu1 %vm3535_vm11, %v3707_v5 }
 0x930   : > { %v20567_v7 = vpop.eup %20566  ;;  %18943 = vmatpush3.bf16.msra.mxu1 %v18940_v62  ;;  %v18936_v11 = vpack.c.bf16 %v20016_v31, %v20015_v63 }
 0x931   : > { %v20569_v2 = vpop.eup %20568  ;;  %v3708_v0 = vmul.f32 %v20567_v7, %v23082_v59 }
 0x932   : > { %18937 = vmatprep.subr.bf16.mxu0 %v18936_v11  ;;  %v3710_v54 = vmul.f32 %v20569_v2, %v23084_v60 }
 0x933   : > { %18939 = vmatpush3.bf16.msra.mxu0 %v18936_v11  ;;  %17960 = vmatprep.mubr.msk.f32.mxu0 %vm3535_vm11, %v3708_v0 }
 0x934   : > { %v20571_v42 = vpop.eup %20570  ;;  %17967 = vmatprep.mubr.msk.f32.mxu1 %vm3535_vm11, %v3710_v54  ;;  %18945 = vmatprep.subr.bf16.mxu0 %v18944_v55 }
 0x935   : > { %v3711_v3 = vmul.f32 %v20571_v42, %v23090_v1  ;;  %v4471_v1 = vld [vmem:[%s25675_s6 + $0x10] sm:$0xff]  ;;  %s25691_s6 = smov 64  }
 0x936   : > { %17961 = vmatmul.mubr.msk.f32.vlgmr.msra.gmra.mrb[12].mxu0 %vm3535_vm11, %v3709_v17  ;;  %v18948_v49 = vpack.c.bf16 %v4472_v10, %v4471_v1 }
 0x937   : > { %17968 = vmatmul.mubr.msk.f32.vlgmr.msra.gmra.mrb[20].mxu1 %vm3535_vm11, %v3711_v3  ;;  %18947 = vmatpush3.bf16.msra.mxu0 %v18944_v55 }
 0x938   : > { %18949 = vmatprep.subr.bf16.mxu0 %v18948_v49 }
 0x93b   : > { %18951 = vmatpush3.bf16.msra.mxu0 %v18948_v49 }
 0x9a0   : > { %v17920_v59 = vpop.f32.mrb[12].mxu1 }
 0x9a1   : > { %v3790_v22 = vpop.f32.mrb[13].mxu1 }
 0x9a6   : > { %v17927_v52 = vpop.f32.mrb[14].mxu1 }
 0x9a7   : > { %v3877_v60 = vpop.f32.mrb[15].mxu1 }
 0x9f5   : > { %v17934_v50 = vpop.f32.mrb[8].mxu0 }
 0x9f6   : > { %4414 = vrot.lane.b32.xlu0 %v17934_v50, %s25536_s11  ;;  %v3964_v28 = vpop.f32.mrb[9].mxu0 }
 0x9f7   : > { %4412 = vrot.lane.b32.xlu1 %v3964_v28, %s25536_s11 }
 0x9f8   : > { %v17941_v14 = vpop.f32.mrb[16].mxu1 }
 0x9f9   : > { %v4051_v32 = vpop.f32.mrb[17].mxu1 }
 0x9fa   : > { %4418 = vrot.lane.b32.xlu0 %v17941_v14, %s25536_s11 }
 0x9fb   : > { %4416 = vrot.lane.b32.xlu1 %v4051_v32, %s25536_s11 }
 0x9fd   : > { %v17948_v30 = vpop.f32.mrb[10].mxu0 }
 0x9fe   : > { %4430 = vrot.lane.b32.xlu0 %v17948_v30, %s25538_s7  ;;  %v4138_v47 = vpop.f32.mrb[11].mxu0 }
 0x9ff   : > { %4428 = vrot.lane.b32.xlu1 %v4138_v47, %s25538_s7 }
 0xa02   : > { %v17955_v33 = vpop.f32.mrb[18].mxu1 }
 0xa03   : > { %v4225_v21 = vpop.f32.mrb[19].mxu1  ;;  %4434 = vrot.lane.b32.xlu0 %v17955_v33, %s25538_s7 }
 0xa04   : > { %4432 = vrot.lane.b32.xlu1 %v4225_v21, %s25538_s7 }
 0xa09   : > { %v17962_v46 = vpop.f32.mrb[12].mxu0 }
 0xa0a   : > { %v17969_v34 = vpop.f32.mrb[20].mxu1  ;;  %4446 = vrot.lane.b32.xlu0 %v17962_v46, %s25528_s22  ;;  %v4312_v44 = vpop.f32.mrb[13].mxu0 }
 0xa0b   : > { %v4399_v41 = vpop.f32.mrb[21].mxu1  ;;  %4444 = vrot.lane.b32.xlu1 %v4312_v44, %s25528_s22  ;;  %v4683_v44 = vld [vmem:[%s25676_s0] sm:$0xff] }
 0xa0e   : > { %4450 = vrot.lane.b32.xlu0 %v17969_v34, %s25528_s22 }
 0xa0f   : > { %4448 = vrot.lane.b32.xlu1 %v4399_v41, %s25528_s22  ;;  %s25677_s22 = sld [smem:[#allocation105_spill]]  ;;  %v4684_v41 = vld [vmem:[%s25676_s0 + $0x8] sm:$0xff] }
 0xa68   : > { %v4415_v16 = vpop.permute.xlu0 %4414 }
 0xa69   : > { %v4413_v35 = vpop.permute.xlu1 %4412  ;;  %v4457_v29 = vsel %vm2842_vm9, %v17920_v59, %v4415_v16  ;;  %v4685_v16 = vld [vmem:[%s25676_s0 + $0x10] sm:$0xff] }
 0xa6a   : > { %v4456_v19 = vsel %vm2842_vm9, %v3790_v22, %v4413_v35  ;;  %v18952_v35 = vpack.c.bf16 %v4684_v41, %v4683_v44 }
 0xa6c   : > { %v4419_v20 = vpop.permute.xlu0 %4418  ;;  %18953 = vmatprep.subr.bf16.mxu1 %v18952_v35 }
 0xa6d   : > { %v4417_v36 = vpop.permute.xlu1 %4416  ;;  %v4459_v27 = vsel %vm2842_vm9, %v17927_v52, %v4419_v20  ;;  %v4686_v20 = vld [vmem:[%s25676_s0 + $0x18] sm:$0xff]  ;;  %18955 = vmatpush3.bf16.msra.mxu1 %v18952_v35  ;;  %s25689_s0 = smov 104  }
 0xa6e   : > { %v4458_v51 = vsel %vm2842_vm9, %v3877_v60, %v4417_v36  ;;  %v18956_v36 = vpack.c.bf16 %v4686_v20, %v4685_v16 }
 0xa70   : > { %v4431_v37 = vpop.permute.xlu0 %4430  ;;  %18957 = vmatprep.subr.bf16.mxu1 %v18956_v36 }
 0xa71   : > { %v4429_v38 = vpop.permute.xlu1 %4428  ;;  %v4461_v15 = vsel %vm3535_vm11, %v4457_v29, %v4431_v37  ;;  %18959 = vmatpush3.bf16.msra.mxu1 %v18956_v36  ;;  %v4795_v37 = vld [vmem:[%s25677_s22] sm:$0xff] }
 0xa72   : > { %v4460_v43 = vsel %vm3535_vm11, %v4456_v19, %v4429_v38  ;;  %v4796_v38 = vld [vmem:[%s25677_s22 + $0x8] sm:$0xff]  ;;  %v4798_v19 = vld [vmem:[%s25677_s22 + $0x18] sm:$0xff]  ;;  %v4799_v29 = vld [vmem:[%s25677_s22 + $0x20] sm:$0xff] }
 0xa75   : > { %v4435_v39 = vpop.permute.xlu0 %4434 }
 0xa76   : > { %v4433_v40 = vpop.permute.xlu1 %4432  ;;  %v4463_v58 = vsel %vm3535_vm11, %v4459_v27, %v4435_v39  ;;  %v4797_v39 = vld [vmem:[%s25677_s22 + $0x10] sm:$0xff] }
 0xa77   : > { %v4462_v24 = vsel %vm3535_vm11, %v4458_v51, %v4433_v40  ;;  %v18960_v40 = vpack.c.bf16 %v4796_v38, %v4795_v37 }
 0xa79   : > { %18961 = vmatprep.subr.bf16.mxu0 %v18960_v40 }
 0xa7c   : > { %v4447_v26 = vpop.permute.xlu0 %4446 }
 0xa7d   : > { %v4445_v45 = vpop.permute.xlu1 %4444  ;;  %v4466_v25 = vsel %vm4464_vm12, %v4461_v15, %v4447_v26  ;;  %v18964_v26 = vpack.c.bf16 %v4798_v19, %v4797_v39  ;;  %v4801_v39 = vld [vmem:[%s25677_s22 + $0x30] sm:$0xff] }
 0xa7e   : > { %v4465_v48 = vsel %vm4464_vm12, %v4460_v43, %v4445_v45  ;;  %v4800_v43 = vld [vmem:[%s25677_s22 + $0x28] sm:$0xff] }
 0xa7f   : > { %17978 = vmatprep.mubr.msk.f32.mxu0 %vm2566_vm0, %v4465_v48  ;;  %v18968_v45 = vpack.c.bf16 %v4800_v43, %v4799_v29 }
 0xa80   : > { %v4451_v53 = vpop.permute.xlu0 %4450  ;;  %17979 = vmatmul.mubr.msk.f32.vlgmr.msra.gmra.mrb[14].mxu0 %vm2566_vm0, %v4466_v25 }
 0xa81   : > { %v4449_v57 = vpop.permute.xlu1 %4448  ;;  %v4468_v62 = vsel %vm4464_vm12, %v4463_v58, %v4451_v53  ;;  %18963 = vmatpush3.bf16.msra.mxu0 %v18960_v40  ;;  %v4802_v40 = vld [vmem:[%s25677_s22 + $0x38] sm:$0xff] }
 0xa82   : > { %v4467_v61 = vsel %vm4464_vm12, %v4462_v24, %v4449_v57  ;;  %18965 = vmatprep.subr.bf16.mxu0 %v18964_v26  ;;  %v18972_v19 = vpack.c.bf16 %v4802_v40, %v4801_v39 }
 0xa83   : > { %17981 = vmatprep.mubr.msk.f32.mxu0 %vm2566_vm0, %v4467_v61 }
 0xa84   : > { %17982 = vmatmul.mubr.msk.f32.gmra.mrb[16].mxu0 %vm2566_vm0, %v4468_v62 }
 0xa85   : > { %18967 = vmatpush3.bf16.msra.mxu0 %v18964_v26 }
 0xa86   : > { %18969 = vmatprep.subr.bf16.mxu0 %v18968_v45 }
 0xa89   : > { %18971 = vmatpush3.bf16.msra.mxu0 %v18968_v45 }
 0xa8a   : > { %18973 = vmatprep.subr.bf16.mxu0 %v18972_v19 }
 0xa8d   : > { %18975 = vmatpush3.bf16.msra.mxu0 %v18972_v19 }
 0xb53   : > { %v17980_v5 = vpop.f32.mrb[14].mxu0 }
 0xb54   : > { %v4564_v31 = vadd.f32 %v17980_v5, %v16896_v4  ;;  %v4558_v63 = vpop.f32.mrb[15].mxu0 }
 0xb55   : > { %v4559_v18 = vadd.f32 %v16896_v4, %v4558_v63 }
 0xb56   : > { %v23167_v7 = vadd.f32 %v4564_v31, %v22803_v12 }
 0xb57   : > { %v23170_v11 = vadd.f32 %v4559_v18, %v22797_v9  ;;  %v17983_v2 = vpop.f32.mrb[16].mxu0 }
 0xb58   : > { %v4574_v0 = vadd.f32 %v17983_v2, %v16896_v4  ;;  %v4568_v54 = vpop.f32.mrb[17].mxu0  ;;  %v4584_v42 = vsel %vm2566_vm0, %v23167_v7, 0.0 }
 0xb59   : > { %v4569_v17 = vadd.f32 %v16896_v4, %v4568_v54  ;;  %4585 = vadd.xlane.f32.xlu0 %v4584_v42  ;;  %v4581_v3 = vsel %vm2566_vm0, %v23170_v11, 0.0 }
 0xb5a   : > { %v23177_v59 = vadd.f32 %v4574_v0, %v22805_v13  ;;  %4582 = vadd.xlane.f32.xlu1 %v4581_v3 }
 0xb5b   : > { %v23180_v12 = vadd.f32 %v4569_v17, %v22795_v8 }
 0xb5c   : > { %v4590_v9 = vsel %vm2566_vm0, %v23177_v59, 0.0 }
 0xb5d   : > { %v4587_v22 = vsel %vm2566_vm0, %v23180_v12, 0.0 }
 0xb5e   : > { %4591 = vadd.xlane.f32.xlu1 %v4590_v9  ;;  %4588 = vadd.xlane.f32.xlu0 %v4587_v22 }
 0xbe6   : > { %v4586_v52 = vpop.xlane.xlu0 %4585 }
 0xbe7   : > { %v4594_v60 = vmul.f32 0.03125, %v4586_v52  ;;  %v4583_v50 = vpop.xlane.xlu1 %4582 }
 0xbe8   : > { %v4593_v6 = vmul.f32 0.03125, %v4583_v50 }
 0xbe9   : > { %v23187_v23 = vsub.f32 %v23167_v7, %v4594_v60 }
 0xbea   : > { %v23190_v13 = vsub.f32 %v23170_v11, %v4593_v6 }
 0xbeb   : > { %v4589_v8 = vpop.xlane.xlu0 %4588  ;;  %v4592_v28 = vpop.xlane.xlu1 %4591  ;;  %v4602_v55 = vmul.f32 %v23187_v23, %v23187_v23 }
 0xbec   : > { %v4595_v1 = vmul.f32 0.03125, %v4589_v8  ;;  %v4596_v10 = vmul.f32 0.03125, %v4592_v28  ;;  %v4601_v14 = vmul.f32 %v23190_v13, %v23190_v13 }
 0xbed   : > { %v4608_v49 = vsel %vm2566_vm0, %v4602_v55, 0.0 }
 0xbee   : > { %v23198_v32 = vsub.f32 %v23180_v12, %v4595_v1  ;;  %v23201_v30 = vsub.f32 %v23177_v59, %v4596_v10  ;;  %4609 = vadd.xlane.f32.xlu1 %v4608_v49  ;;  %v4605_v47 = vsel %vm2566_vm0, %v4601_v14, 0.0  ;;  %v16901_v14 = vld [vmem:[#allocation21] ss:$0 sm:$0xff] }
 0xbef   : > { %4606 = vadd.xlane.f32.xlu0 %v4605_v47 }
 0xbf0   : > { %v4603_v33 = vmul.f32 %v23198_v32, %v23198_v32  ;;  %v4604_v21 = vmul.f32 %v23201_v30, %v23201_v30 }
 0xbf2   : > { %v4611_v46 = vsel %vm2566_vm0, %v4603_v33, 0.0  ;;  %v4614_v34 = vsel %vm2566_vm0, %v4604_v21, 0.0  ;;  %v16902_v21 = vld [vmem:[#allocation22] ss:$0 sm:$0xff] }
 0xbf3   : > { %4612 = vadd.xlane.f32.xlu0 %v4611_v46  ;;  %4615 = vadd.xlane.f32.xlu1 %v4614_v34 }
 0xc7b   : > { %v4610_v15 = vpop.xlane.xlu1 %4609 }
 0xc7c   : > { %v4618_v48 = vmul.f32 0.032258064, %v4610_v15  ;;  %v4607_v25 = vpop.xlane.xlu0 %4606 }
 0xc7d   : > { %v4617_v51 = vmul.f32 0.032258064, %v4607_v25 }
 0xc7e   : > { %20572 = vrsqrt.f32 %v4618_v48  ;;  %vm4630_vm13 = vcmp.eq.f32.partialorder %v4618_v48, inf  ;;  %v4633_v4 = vand.u32 2147483648, %v4618_v48  ;;  %vm4632_vm14 = vcmp.eq.f32.partialorder %v4618_v48, 0.0 }
 0xc7f   : > { %20574 = vrsqrt.f32 %v4617_v51  ;;  %vm4623_vm15 = vcmp.eq.f32.partialorder %v4617_v51, inf  ;;  %v4626_v63 = vand.u32 2147483648, %v4617_v51  ;;  %vm4625_vm1 = vcmp.eq.f32.partialorder %v4617_v51, 0.0 }
 0xc80   : > { %v4613_v53 = vpop.xlane.xlu0 %4612  ;;  %v4616_v27 = vpop.xlane.xlu1 %4615 }
 0xc81   : > { %v4619_v24 = vmul.f32 0.032258064, %v4613_v53  ;;  %v4620_v57 = vmul.f32 0.032258064, %v4616_v27 }
 0xc83   : > { %20576 = vrsqrt.f32 %v4619_v24  ;;  %vm4637_vm2 = vcmp.eq.f32.partialorder %v4619_v24, inf  ;;  %vm4639_vm3 = vcmp.eq.f32.partialorder %v4619_v24, 0.0  ;;  %v4640_v22 = vand.u32 2147483648, %v4619_v24 }
 0xc84   : > { %20578 = vrsqrt.f32 %v4620_v57  ;;  %vm4644_vm4 = vcmp.eq.f32.partialorder %v4620_v57, inf  ;;  %v4647_v50 = vand.u32 2147483648, %v4620_v57  ;;  %vm4646_vm5 = vcmp.eq.f32.partialorder %v4620_v57, 0.0 }
 0xc88   : > { %v20573_v58 = vpop.eup %20572 }
 0xc89   : > { %v20575_v61 = vpop.eup %20574  ;;  %v4629_v62 = vmul.f32 %v20573_v58, %v4618_v48 }
 0xc8a   : > { %v4622_v5 = vmul.f32 %v20575_v61, %v4617_v51 }
 0xc8b   : > { %v4631_v31 = vsel %vm4630_vm13, %v4618_v48, %v4629_v62 }
 0xc8c   : > { %v4634_v18 = vsel %vm4632_vm14, %v4633_v4, %v4631_v31  ;;  %v4624_v2 = vsel %vm4623_vm15, %v4617_v51, %v4622_v5 }
 0xc8d   : > { %v20577_v0 = vpop.eup %20576  ;;  %v4650_v54 = vadd.f32 1e-06, %v4634_v18  ;;  %v4627_v42 = vsel %vm4625_vm1, %v4626_v63, %v4624_v2 }
 0xc8e   : > { %v20579_v17 = vpop.eup %20578  ;;  %v4649_v3 = vadd.f32 1e-06, %v4627_v42  ;;  %v4636_v9 = vmul.f32 %v20577_v0, %v4619_v24 }
 0xc8f   : > { %20580 = vrcp.f32 %v4650_v54  ;;  %v4643_v52 = vmul.f32 %v20579_v17, %v4620_v57 }
 0xc90   : > { %v4638_v60 = vsel %vm4637_vm2, %v4619_v24, %v4636_v9  ;;  %20582 = vrcp.f32 %v4649_v3 }
 0xc91   : > { %v4641_v6 = vsel %vm4639_vm3, %v4640_v22, %v4638_v60  ;;  %v4645_v8 = vsel %vm4644_vm4, %v4620_v57, %v4643_v52  ;;  %v16908_v57 = vld [vmem:[#allocation19] ss:$0 sm:$0xff] }
 0xc92   : > { %v4651_v28 = vadd.f32 1e-06, %v4641_v6  ;;  %v4648_v55 = vsel %vm4646_vm5, %v4647_v50, %v4645_v8 }
 0xc93   : > { %v4652_v1 = vadd.f32 1e-06, %v4648_v55 }
 0xc94   : > { %20584 = vrcp.f32 %v4651_v28 }
 0xc95   : > { %20586 = vrcp.f32 %v4652_v1 }
 0xc99   : > { %v20581_v10 = vpop.eup %20580 }
 0xc9a   : > { %v20583_v49 = vpop.eup %20582  ;;  %v4659_v47 = vmul.f32 %v20581_v10, %v23187_v23 }
 0xc9b   : > { %v4658_v33 = vmul.f32 %v20583_v49, %v23190_v13 }
 0xc9c   : > { %v4669_v46 = vmul.f32 %v16901_v14, %v4659_v47 }
 0xc9d   : > { %v4668_v34 = vmul.f32 %v16901_v14, %v4658_v33 }
 0xc9e   : > { %v20585_v44 = vpop.eup %20584  ;;  %v4680_v20 = vadd.f32 %v16902_v21, %v4669_v46 }
 0xc9f   : > { %v20587_v41 = vpop.eup %20586  ;;  %v4679_v16 = vadd.f32 %v16902_v21, %v4668_v34  ;;  %v4660_v35 = vmul.f32 %v20585_v44, %v23198_v32  ;;  %v16903_v32 = vld [vmem:[#allocation18] ss:$0 sm:$0xff]  ;;  %v5014_v44 = vld [vmem:[%s22369_s17] sm:$0xff] }
 0xca0   : > { %v4661_v36 = vmul.f32 %v20587_v41, %v23201_v30  ;;  %v5015_v41 = vld [vmem:[%s22369_s17 + $0x8] sm:$0xff] }
 0xca1   : > { %17992 = vmatprep.mubr.msk.f32.mxu1 %vm2566_vm0, %v4679_v16  ;;  %v4670_v37 = vmul.f32 %v16901_v14, %v4660_v35  ;;  %v5016_v16 = vld [vmem:[%s22369_s17 + $0x10] sm:$0xff]  ;;  %v18976_v35 = vpack.c.bf16 %v5015_v41, %v5014_v44 }
 0xca2   : > { %17993 = vmatmul.mubr.msk.f32.vlgmr.msra.gmra.mrb[22].mxu1 %vm2566_vm0, %v4680_v20  ;;  %v4671_v23 = vmul.f32 %v16901_v14, %v4661_v36  ;;  %v5017_v20 = vld [vmem:[%s22369_s17 + $0x18] sm:$0xff] }
 0xca3   : > { %v4681_v13 = vadd.f32 %v16902_v21, %v4670_v37  ;;  %v18980_v36 = vpack.c.bf16 %v5017_v20, %v5016_v16  ;;  %18977 = vmatprep.subr.bf16.mxu1 %v18976_v35 }
 0xca4   : > { %v4682_v38 = vadd.f32 %v16902_v21, %v4671_v23  ;;  %18979 = vmatpush3.bf16.msra.mxu1 %v18976_v35 }
 0xca5   : > { %17995 = vmatprep.mubr.msk.f32.mxu1 %vm2566_vm0, %v4681_v13  ;;  %18981 = vmatprep.subr.bf16.mxu1 %v18980_v36 }
 0xca6   : > { %17996 = vmatmul.mubr.msk.f32.gmra.mrb[24].mxu1 %vm2566_vm0, %v4682_v38 }
 0xca8   : > { %18983 = vmatpush3.bf16.msra.mxu1 %v18980_v36 }
 0xd75   : > { %v17994_v26 = vpop.f32.mrb[22].mxu1 }
 0xd76   : > { %v4778_v30 = vadd.f32 %v17994_v26, %v16903_v32  ;;  %v4772_v29 = vpop.f32.mrb[23].mxu1 }
 0xd77   : > { %v4773_v43 = vadd.f32 %v16903_v32, %v4772_v29 }
 0xd78   : > { %v4792_v48 = vmax.f32 %v4778_v30, 0.0 }
 0xd79   : > { %v4791_v45 = vmax.f32 %v4773_v43, 0.0  ;;  %v17997_v15 = vpop.f32.mrb[24].mxu1 }
 0xd7a   : > { %v4788_v25 = vadd.f32 %v17997_v15, %v16903_v32  ;;  %v4782_v51 = vpop.f32.mrb[25].mxu1 }
 0xd7b   : > { %v4783_v53 = vadd.f32 %v16903_v32, %v4782_v51  ;;  %18014 = vmatprep.mubr.msk.f32.mxu0 %vm4810_vm6, %v4791_v45 }
 0xd7c   : > { %18015 = vmatmul.mubr.msk.f32.vlgmr.msra.gmra.mrb[18].mxu0 %vm4810_vm6, %v4792_v48  ;;  %v4794_v24 = vmax.f32 %v4788_v25, 0.0 }
 0xd7d   : > { %v4793_v27 = vmax.f32 %v4783_v53, 0.0 }
 0xd7f   : > { %18017 = vmatprep.mubr.msk.f32.mxu0 %vm4810_vm6, %v4793_v27 }
 0xd80   : > { %18018 = vmatmul.mubr.msk.f32.gmra.mrb[20].mxu0 %vm4810_vm6, %v4794_v24 }
 0xe4f   : > { %v18016_v58 = vpop.f32.mrb[18].mxu0 }
 0xe50   : > { %v4895_v61 = vadd.f32 %v18016_v58, %v16908_v57  ;;  %v4889_v62 = vpop.f32.mrb[19].mxu0 }
 0xe51   : > { %v4890_v4 = vadd.f32 %v16908_v57, %v4889_v62 }
 0xe52   : > { %v23235_v5 = vadd.f32 %v4895_v61, %v23167_v7 }
 0xe53   : > { %v23238_v31 = vadd.f32 %v4890_v4, %v23170_v11  ;;  %v18019_v63 = vpop.f32.mrb[20].mxu0 }
 0xe54   : > { %v4905_v18 = vadd.f32 %v18019_v63, %v16908_v57  ;;  %v4899_v2 = vpop.f32.mrb[21].mxu0  ;;  %v4915_v0 = vsel %vm2566_vm0, %v23235_v5, 0.0 }
 0xe55   : > { %v4900_v54 = vadd.f32 %v16908_v57, %v4899_v2  ;;  %4916 = vadd.xlane.f32.xlu1 %v4915_v0  ;;  %v4912_v42 = vsel %vm2566_vm0, %v23238_v31, 0.0 }
 0xe56   : > { %v23245_v17 = vadd.f32 %v4905_v18, %v23177_v59  ;;  %4913 = vadd.xlane.f32.xlu0 %v4912_v42 }
 0xe57   : > { %v23248_v7 = vadd.f32 %v4900_v54, %v23180_v12 }
 0xe58   : > { %v4921_v11 = vsel %vm2566_vm0, %v23245_v17, 0.0 }
 0xe59   : > { %4922 = vadd.xlane.f32.xlu1 %v4921_v11  ;;  %v4918_v3 = vsel %vm2566_vm0, %v23248_v7, 0.0 }
 0xe5a   : > { %4919 = vadd.xlane.f32.xlu0 %v4918_v3 }
 0xee2   : > { %v4917_v9 = vpop.xlane.xlu1 %4916 }
 0xee3   : > { %v4925_v22 = vmul.f32 0.03125, %v4917_v9  ;;  %v4914_v52 = vpop.xlane.xlu0 %4913  ;;  %v16913_v9 = vld [vmem:[#allocation39] ss:$0 sm:$0xff] }
 0xee4   : > { %v4924_v60 = vmul.f32 0.03125, %v4914_v52 }
 0xee5   : > { %v23255_v50 = vsub.f32 %v23235_v5, %v4925_v22 }
 0xee6   : > { %v23258_v59 = vsub.f32 %v23238_v31, %v4924_v60  ;;  %v4923_v12 = vpop.xlane.xlu1 %4922 }
 0xee7   : > { %v4927_v6 = vmul.f32 0.03125, %v4923_v12  ;;  %v4920_v8 = vpop.xlane.xlu0 %4919  ;;  %v4933_v28 = vmul.f32 %v23255_v50, %v23255_v50 }
 0xee8   : > { %v4926_v55 = vmul.f32 0.03125, %v4920_v8  ;;  %v4932_v1 = vmul.f32 %v23258_v59, %v23258_v59 }
 0xee9   : > { %v23265_v10 = vsub.f32 %v23245_v17, %v4927_v6  ;;  %v4939_v14 = vsel %vm2566_vm0, %v4933_v28, 0.0  ;;  %v16914_v6 = vld [vmem:[#allocation40] ss:$0 sm:$0xff] }
 0xeea   : > { %v23269_v49 = vsub.f32 %v23248_v7, %v4926_v55  ;;  %4940 = vadd.xlane.f32.xlu1 %v4939_v14  ;;  %v4936_v47 = vsel %vm2566_vm0, %v4932_v1, 0.0 }
 0xeeb   : > { %4937 = vadd.xlane.f32.xlu0 %v4936_v47  ;;  %v4935_v33 = vmul.f32 %v23265_v10, %v23265_v10 }
 0xeec   : > { %v4934_v21 = vmul.f32 %v23269_v49, %v23269_v49 }
 0xeed   : > { %v4945_v46 = vsel %vm2566_vm0, %v4935_v33, 0.0 }
 0xeee   : > { %4946 = vadd.xlane.f32.xlu1 %v4945_v46  ;;  %v4942_v34 = vsel %vm2566_vm0, %v4934_v21, 0.0 }
 0xeef   : > { %4943 = vadd.xlane.f32.xlu0 %v4942_v34 }
 0xf77   : > { %v4941_v37 = vpop.xlane.xlu1 %4940 }
 0xf78   : > { %v4949_v23 = vmul.f32 0.032258064, %v4941_v37  ;;  %v4938_v13 = vpop.xlane.xlu0 %4937 }
 0xf79   : > { %v4948_v38 = vmul.f32 0.032258064, %v4938_v13 }
 0xf7a   : > { %20588 = vrsqrt.f32 %v4949_v23  ;;  %vm4961_vm7 = vcmp.eq.f32.partialorder %v4949_v23, inf  ;;  %v4964_v43 = vand.u32 2147483648, %v4949_v23  ;;  %vm4963_vm8 = vcmp.eq.f32.partialorder %v4949_v23, 0.0 }
 0xf7b   : > { %20590 = vrsqrt.f32 %v4948_v38  ;;  %v4947_v39 = vpop.xlane.xlu1 %4946  ;;  %vm4954_vm13 = vcmp.eq.f32.partialorder %v4948_v38, inf  ;;  %v4957_v48 = vand.u32 2147483648, %v4948_v38  ;;  %vm4956_vm14 = vcmp.eq.f32.partialorder %v4948_v38, 0.0 }
 0xf7c   : > { %v4951_v40 = vmul.f32 0.032258064, %v4947_v39  ;;  %v4944_v19 = vpop.xlane.xlu0 %4943 }
 0xf7d   : > { %v4950_v32 = vmul.f32 0.032258064, %v4944_v19 }
 0xf7e   : > { %20592 = vrsqrt.f32 %v4951_v40  ;;  %vm4975_vm15 = vcmp.eq.f32.partialorder %v4951_v40, inf  ;;  %vm4977_vm1 = vcmp.eq.f32.partialorder %v4951_v40, 0.0  ;;  %v4978_v62 = vand.u32 2147483648, %v4951_v40 }
 0xf7f   : > { %20594 = vrsqrt.f32 %v4950_v32  ;;  %vm4968_vm2 = vcmp.eq.f32.partialorder %v4950_v32, inf  ;;  %v4971_v18 = vand.u32 2147483648, %v4950_v32  ;;  %vm4970_vm3 = vcmp.eq.f32.partialorder %v4950_v32, 0.0 }
 0xf84   : > { %v20589_v26 = vpop.eup %20588 }
 0xf85   : > { %v20591_v30 = vpop.eup %20590  ;;  %v4960_v29 = vmul.f32 %v20589_v26, %v4949_v23 }
 0xf86   : > { %v4953_v45 = vmul.f32 %v20591_v30, %v4948_v38 }
 0xf87   : > { %v4962_v15 = vsel %vm4961_vm7, %v4949_v23, %v4960_v29 }
 0xf88   : > { %v20593_v25 = vpop.eup %20592  ;;  %v4965_v51 = vsel %vm4963_vm8, %v4964_v43, %v4962_v15  ;;  %v4955_v53 = vsel %vm4954_vm13, %v4948_v38, %v4953_v45 }
 0xf89   : > { %v20595_v27 = vpop.eup %20594  ;;  %v4981_v24 = vadd.f32 1e-06, %v4965_v51  ;;  %v4958_v57 = vsel %vm4956_vm14, %v4957_v48, %v4955_v53  ;;  %v4974_v58 = vmul.f32 %v20593_v25, %v4951_v40 }
 0xf8a   : > { %v4980_v61 = vadd.f32 1e-06, %v4958_v57  ;;  %v4967_v4 = vmul.f32 %v20595_v27, %v4950_v32 }
 0xf8b   : > { %20596 = vrcp.f32 %v4981_v24  ;;  %v4976_v63 = vsel %vm4975_vm15, %v4951_v40, %v4974_v58 }
 0xf8c   : > { %v4979_v2 = vsel %vm4977_vm1, %v4978_v62, %v4976_v63  ;;  %v4969_v0 = vsel %vm4968_vm2, %v4950_v32, %v4967_v4  ;;  %20598 = vrcp.f32 %v4980_v61 }
 0xf8d   : > { %v4983_v54 = vadd.f32 1e-06, %v4979_v2  ;;  %v4972_v42 = vsel %vm4970_vm3, %v4971_v18, %v4969_v0 }
 0xf8e   : > { %v4982_v11 = vadd.f32 1e-06, %v4972_v42 }
 0xf8f   : > { %20600 = vrcp.f32 %v4983_v54 }
 0xf90   : > { %20602 = vrcp.f32 %v4982_v11 }
 0xf95   : > { %v20597_v3 = vpop.eup %20596 }
 0xf96   : > { %v20599_v22 = vpop.eup %20598  ;;  %v4990_v52 = vmul.f32 %v20597_v3, %v23255_v50 }
 0xf97   : > { %v4989_v60 = vmul.f32 %v20599_v22, %v23258_v59  ;;  %v16915_v59 = vld [vmem:[#allocation37] ss:$0 sm:$0xff] }
 0xf98   : > { %v5000_v12 = vmul.f32 %v16913_v9, %v4990_v52 }
 0xf99   : > { %v20601_v8 = vpop.eup %20600  ;;  %v4999_v28 = vmul.f32 %v16913_v9, %v4989_v60 }
 0xf9a   : > { %v20603_v55 = vpop.eup %20602  ;;  %v4992_v1 = vmul.f32 %v20601_v8, %v23265_v10  ;;  %v5011_v33 = vadd.f32 %v16914_v6, %v5000_v12 }
 0xf9b   : > { %v5010_v14 = vadd.f32 %v16914_v6, %v4999_v28  ;;  %v4991_v47 = vmul.f32 %v20603_v55, %v23269_v49 }
 0xf9c   : > { %v5002_v21 = vmul.f32 %v16913_v9, %v4992_v1 }
 0xf9d   : > { %18028 = vmatprep.mubr.msk.f32.mxu1 %vm2566_vm0, %v5010_v14  ;;  %v5001_v46 = vmul.f32 %v16913_v9, %v4991_v47 }
 0xf9e   : > { %18029 = vmatmul.mubr.msk.f32.vlgmr.msra.gmra.mrb[26].mxu1 %vm2566_vm0, %v5011_v33  ;;  %v5013_v34 = vadd.f32 %v16914_v6, %v5002_v21 }
 0xf9f   : > { %v5012_v50 = vadd.f32 %v16914_v6, %v5001_v46 }
 0xfa1   : > { %18031 = vmatprep.mubr.msk.f32.mxu1 %vm2566_vm0, %v5012_v50 }
 0xfa2   : > { %18032 = vmatmul.mubr.msk.f32.gmra.mrb[28].mxu1 %vm2566_vm0, %v5013_v34 }
0x1071   : > { %v18030_v44 = vpop.f32.mrb[26].mxu1 }
0x1072   : > { %v5109_v41 = vadd.f32 %v18030_v44, %v16915_v59  ;;  %v5103_v10 = vpop.f32.mrb[27].mxu1 }
0x1073   : > { %v5104_v16 = vadd.f32 %v16915_v59, %v5103_v10 }
0x1074   : > { %v5123_v32 = vmul.f32 0.35355338, %v5109_v41 }
0x1075   : > { %v18033_v35 = vpop.f32.mrb[28].mxu1  ;;  %v20022_v49 = vpack.i.bf16 %v5109_v41, %v5104_v16  ;;  %v5122_v20 = vmul.f32 0.35355338, %v5104_v16 }
0x1076   : > { %v5119_v36 = vadd.f32 %v18033_v35, %v16915_v59  ;;  %v5113_v37 = vpop.f32.mrb[29].mxu1 }
0x1077   : > { %v5114_v23 = vadd.f32 %v16915_v59, %v5113_v37  ;;  %20023 = vrot.lane.b32.xlu0 %v20022_v49, %s25542_s1  ;;  %18038 = vmatprep.mubr.msk.f32.mxu1 %vm2842_vm9, %v5122_v20 }
0x1078   : > { %v5125_v29 = vmul.f32 0.35355338, %v5119_v36 }
0x1079   : > { %v20037_v13 = vpack.i.bf16 %v5119_v36, %v5114_v23  ;;  %v5124_v38 = vmul.f32 0.35355338, %v5114_v23 }
0x107b   : > { %20038 = vrot.lane.b32.xlu0 %v20037_v13, %s25540_s3  ;;  %20028 = vrot.lane.b32.xlu1 %v20037_v13, %s25542_s1 }
0x107c   : > { %18045 = vmatprep.mubr.msk.f32.mxu0 %vm2842_vm9, %v5124_v38 }
0x107f   : > { %20048 = vrot.lane.b32.xlu0 %v20037_v13, %s25534_s5  ;;  %20033 = vrot.lane.b32.xlu1 %v20022_v49, %s25540_s3 }
0x1083   : > { %20058 = vrot.lane.b32.xlu0 %v20037_v13, %s25532_s28  ;;  %20043 = vrot.lane.b32.xlu1 %v20022_v49, %s25534_s5 }
0x1087   : > { %5130 = vrot.lane.b32.xlu0 %v5122_v20, %s25542_s1  ;;  %20053 = vrot.lane.b32.xlu1 %v20022_v49, %s25532_s28 }
0x10e9   : > { %v20024_v39 = vpop.permute.xlu0 %20023 }
0x10ea   : > { %20063 = vrot.lane.b32.xlu1 %v20024_v39, %s25532_s28 }
0x10ed   : > { %v23301_v40 = vpop.permute.xlu0 %20038  ;;  %v20029_v19 = vpop.permute.xlu1 %20028 }
0x10ee   : > { %5132 = vrot.lane.b32.xlu1 %v5123_v32, %s25542_s1  ;;  %20073 = vrot.lane.b32.xlu0 %v20029_v19, %s25532_s28 }
0x10f1   : > { %v23304_v26 = vpop.permute.xlu0 %20048  ;;  %v23306_v30 = vpop.permute.xlu1 %20033 }
0x10f2   : > { %20068 = vrot.lane.b32.xlu1 %v23306_v30, %s25532_s28  ;;  %5136 = vrot.lane.b32.xlu0 %v5125_v29, %s25542_s1 }
0x10f5   : > { %v20059_v43 = vpop.permute.xlu0 %20058  ;;  %v23310_v45 = vpop.permute.xlu1 %20043 }
0x10f6   : > { %v20061_v15 = vunpack.i.h.bf16 %v20059_v43  ;;  %v20060_v48 = vunpack.i.l.bf16 %v20059_v43  ;;  %20083 = vrot.lane.b32.xlu0 %v23301_v40, %s25532_s28  ;;  %5134 = vrot.lane.b32.xlu1 %v5124_v38, %s25542_s1  ;;  %s25685_s1 = sld [smem:[#allocation71_spill]] }
0x10f8   : > { %v18990_v25 = vpack.c.bf16 %v20061_v15, %v20060_v48 }
0x10f9   : > { %v20054_v51 = vpop.permute.xlu1 %20053  ;;  %v5131_v57 = vpop.permute.xlu0 %5130 }
0x10fa   : > { %v20056_v53 = vunpack.i.h.bf16 %v20054_v51  ;;  %v20055_v27 = vunpack.i.l.bf16 %v20054_v51  ;;  %18992 = vmatprep.subr.msk.bf16.mxu0 %vm22880_vm10, %v18990_v25  ;;  %5138 = vrot.lane.b32.xlu0 %v5122_v20, %s25540_s3 }
0x10fb   : > { %18995 = vmatpush3.bf16.xpose.msk.msra.mxu0 %vm22880_vm10, %v18990_v25  ;;  %20078 = vrot.lane.b32.xlu1 %v23310_v45, %s25532_s28 }
0x10fc   : > { %v18984_v24 = vpack.c.bf16 %v20056_v53, %v20055_v27 }
0x10fe   : > { %18986 = vmatprep.subr.msk.bf16.mxu1 %vm22880_vm10, %v18984_v24  ;;  %20088 = vrot.lane.b32.xlu0 %v23304_v26, %s25532_s28  ;;  %s25679_s28 = sld [smem:[#allocation61_spill]] }
0x10ff   : > { %18989 = vmatpush3.bf16.xpose.msk.msra.mxu1 %vm22880_vm10, %v18984_v24  ;;  %5140 = vrot.lane.b32.xlu1 %v5123_v32, %s25540_s3 }
0x1102   : > { %18046 = vmatmul.mubr.msk.f32.vlgmr.msra.gmra.mrb[22].mxu0 %vm2842_vm9, %v5125_v29  ;;  %5144 = vrot.lane.b32.xlu0 %v5125_v29, %s25540_s3 }
0x1103   : > { %5142 = vrot.lane.b32.xlu1 %v5124_v38, %s25540_s3  ;;  %s25684_s3 = sld [smem:[#allocation70_spill]] }
0x1106   : > { %18039 = vmatmul.mubr.msk.f32.vlgmr.msra.gmra.mrb[30].mxu1 %vm2842_vm9, %v5123_v32  ;;  %5148 = vrot.lane.b32.xlu0 %v5123_v32, %s25534_s5 }
0x1107   : > { %18052 = vmatprep.mubr.msk.f32.mxu1 %vm2842_vm9, %v5131_v57  ;;  %5146 = vrot.lane.b32.xlu1 %v5122_v20, %s25534_s5 }
0x110a   : > { %5152 = vrot.lane.b32.xlu0 %v5125_v29, %s25534_s5 }
0x110b   : > { %5150 = vrot.lane.b32.xlu1 %v5124_v38, %s25534_s5  ;;  %s25680_s5 = smov 24  }
0x110e   : > { %20093 = vrot.lane.b32.xlu0 %v20022_v49, %s25530_s4 }
0x110f   : > { %20098 = vrot.lane.b32.xlu1 %v20037_v13, %s25530_s4 }
0x1112   : > { %20108 = vrot.lane.b32.xlu0 %v20029_v19, %s25530_s4 }
0x1113   : > { %20103 = vrot.lane.b32.xlu1 %v20024_v39, %s25530_s4 }
0x115c   : > { %v20064_v58 = vpop.permute.xlu1 %20063 }
0x115d   : > { %v20066_v61 = vunpack.i.h.bf16 %v20064_v58  ;;  %v20065_v62 = vunpack.i.l.bf16 %v20064_v58 }
0x115f   : > { %v18996_v4 = vpack.c.bf16 %v20066_v61, %v20065_v62 }
0x1160   : > { %v5133_v63 = vpop.permute.xlu1 %5132  ;;  %v20074_v18 = vpop.permute.xlu0 %20073 }
0x1161   : > { %v20076_v2 = vunpack.i.h.bf16 %v20074_v18  ;;  %v20075_v0 = vunpack.i.l.bf16 %v20074_v18  ;;  %18998 = vmatprep.subr.msk.bf16.mxu1 %vm22880_vm10, %v18996_v4 }
0x1162   : > { %19001 = vmatpush3.bf16.xpose.msk.msra.mxu1 %vm22880_vm10, %v18996_v4 }
0x1163   : > { %v19002_v54 = vpack.c.bf16 %v20076_v2, %v20075_v0 }
0x1164   : > { %v20069_v42 = vpop.permute.xlu1 %20068  ;;  %v5137_v11 = vpop.permute.xlu0 %5136 }
0x1165   : > { %v20071_v3 = vunpack.i.h.bf16 %v20069_v42  ;;  %v20070_v9 = vunpack.i.l.bf16 %v20069_v42  ;;  %19004 = vmatprep.subr.msk.bf16.mxu0 %vm22880_vm10, %v19002_v54 }
0x1166   : > { %19007 = vmatpush3.bf16.xpose.msk.msra.mxu0 %vm22880_vm10, %v19002_v54 }
0x1167   : > { %v19008_v22 = vpack.c.bf16 %v20071_v3, %v20070_v9 }
0x1168   : > { %v20084_v52 = vpop.permute.xlu0 %20083  ;;  %v5135_v6 = vpop.permute.xlu1 %5134 }
0x1169   : > { %v20086_v60 = vunpack.i.h.bf16 %v20084_v52  ;;  %v20085_v12 = vunpack.i.l.bf16 %v20084_v52  ;;  %18053 = vmatmul.mubr.msk.f32.vlgmr.msra.gmra.mrb[32].mxu1 %vm2842_vm9, %v5133_v63  ;;  %19010 = vmatprep.subr.msk.bf16.mxu1 %vm22880_vm10, %v19008_v22 }
0x116a   : > { %18059 = vmatprep.mubr.msk.f32.mxu0 %vm2842_vm9, %v5135_v6  ;;  %19013 = vmatpush3.bf16.xpose.msk.msra.mxu1 %vm22880_vm10, %v19008_v22 }
0x116b   : > { %v19014_v8 = vpack.c.bf16 %v20086_v60, %v20085_v12 }
0x116c   : > { %v5139_v28 = vpop.permute.xlu0 %5138 }
0x116d   : > { %v20079_v55 = vpop.permute.xlu1 %20078  ;;  %18060 = vmatmul.mubr.msk.f32.vlgmr.msra.gmra.mrb[24].mxu0 %vm2842_vm9, %v5137_v11  ;;  %18066 = vmatprep.mubr.msk.f32.mxu1 %vm2842_vm9, %v5139_v28 }
0x116e   : > { %v20081_v1 = vunpack.i.h.bf16 %v20079_v55  ;;  %v20080_v14 = vunpack.i.l.bf16 %v20079_v55  ;;  %19016 = vmatprep.subr.msk.bf16.mxu0 %vm22880_vm10, %v19014_v8 }
0x116f   : > { %19019 = vmatpush3.bf16.xpose.msk.msra.mxu0 %vm22880_vm10, %v19014_v8 }
0x1170   : > { %v19020_v47 = vpack.c.bf16 %v20081_v1, %v20080_v14  ;;  %v20089_v33 = vpop.permute.xlu0 %20088 }
0x1171   : > { %v20091_v21 = vunpack.i.h.bf16 %v20089_v33  ;;  %v20090_v46 = vunpack.i.l.bf16 %v20089_v33  ;;  %v5141_v50 = vpop.permute.xlu1 %5140 }
0x1172   : > { %18067 = vmatmul.mubr.msk.f32.vlgmr.msra.gmra.mrb[34].mxu1 %vm2842_vm9, %v5141_v50  ;;  %19022 = vmatprep.subr.msk.bf16.mxu1 %vm22880_vm10, %v19020_v47 }
0x1173   : > { %v19026_v34 = vpack.c.bf16 %v20091_v21, %v20090_v46  ;;  %19025 = vmatpush3.bf16.xpose.msk.msra.mxu1 %vm22880_vm10, %v19020_v47 }
0x1174   : > { %v5145_v59 = vpop.permute.xlu0 %5144 }
0x1175   : > { %v5143_v44 = vpop.permute.xlu1 %5142  ;;  %19028 = vmatprep.subr.msk.bf16.mxu0 %vm22880_vm10, %v19026_v34 }
0x1176   : > { %18073 = vmatprep.mubr.msk.f32.mxu0 %vm2842_vm9, %v5143_v44 }
0x1177   : > { %18074 = vmatmul.mubr.msk.f32.vlgmr.msra.gmra.mrb[26].mxu0 %vm2842_vm9, %v5145_v59 }
0x1178   : > { %19031 = vmatpush3.bf16.xpose.msk.msra.mxu0 %vm22880_vm10, %v19026_v34  ;;  %v5149_v41 = vpop.permute.xlu0 %5148 }
0x1179   : > { %v5147_v10 = vpop.permute.xlu1 %5146 }
0x117a   : > { %18080 = vmatprep.mubr.msk.f32.mxu1 %vm2842_vm9, %v5147_v10 }
0x117b   : > { %18081 = vmatmul.mubr.msk.f32.vlgmr.msra.gmra.mrb[36].mxu1 %vm2842_vm9, %v5149_v41 }
0x117c   : > { %v5153_v16 = vpop.permute.xlu0 %5152 }
0x117d   : > { %v5151_v35 = vpop.permute.xlu1 %5150 }
0x117e   : > { %18087 = vmatprep.mubr.msk.f32.mxu0 %vm2842_vm9, %v5151_v35 }
0x117f   : > { %18088 = vmatmul.mubr.msk.f32.vlgmr.msra.gmra.mrb[28].mxu0 %vm2842_vm9, %v5153_v16 }
0x1180   : > { %v20094_v49 = vpop.permute.xlu0 %20093 }
0x1181   : > { %v20096_v20 = vunpack.i.h.bf16 %v20094_v49  ;;  %v20095_v36 = vunpack.i.l.bf16 %v20094_v49  ;;  %v20099_v37 = vpop.permute.xlu1 %20098 }
0x1182   : > { %v20101_v23 = vunpack.i.h.bf16 %v20099_v37  ;;  %v20100_v13 = vunpack.i.l.bf16 %v20099_v37 }
0x1183   : > { %v19032_v38 = vpack.c.bf16 %v20096_v20, %v20095_v36 }
0x1184   : > { %v23380_v19 = vpack.c.bf16 %v20101_v23, %v20100_v13  ;;  %v23438_v33 = vpop.permute.xlu0 %20108 }
0x1185   : > { %v20104_v39 = vpop.permute.xlu1 %20103  ;;  %19033 = vmatprep.subr.bf16.mxu1 %v19032_v38 }
0x1186   : > { %v20106_v32 = vunpack.i.h.bf16 %v20104_v39  ;;  %v20105_v29 = vunpack.i.l.bf16 %v20104_v39  ;;  %19035 = vmatpush3.bf16.msra.mxu1 %v19032_v38 }
0x1187   : > { %19037 = vmatprep.subr.bf16.mxu1 %v23380_v19 }
0x1188   : > { %v19040_v43 = vpack.c.bf16 %v20106_v32, %v20105_v29 }
0x118a   : > { %19041 = vmatprep.subr.bf16.mxu0 %v19040_v43 }
0x118b   : > { %19043 = vmatpush3.bf16.msra.mxu0 %v19040_v43 }
0x11d5   : > { %v18047_v15 = vpop.f32.mrb[22].mxu0 }
0x11d6   : > { %v23383_v48 = vpop.f32.mrb[23].mxu0  ;;  %v5887_v24 = vsel %vm3535_vm11, %v18047_v15, -inf }
0x11d7   : > { %v5884_v57 = vsel %vm3535_vm11, %v23383_v48, -inf }
0x11d9   : > { %v18040_v25 = vpop.f32.mrb[30].mxu1 }
0x11da   : > { %v5260_v51 = vpop.f32.mrb[31].mxu1  ;;  %v5881_v53 = vsel %vm3535_vm11, %v18040_v25, -inf }
0x11db   : > { %5882 = vmax.xlane.f32.xlu0 %v5881_v53  ;;  %v5878_v27 = vsel %vm3535_vm11, %v5260_v51, -inf }
0x11dc   : > { %5879 = vmax.xlane.f32.xlu1 %v5878_v27 }
0x11df   : > { %5888 = vmax.xlane.f32.xlu0 %v5887_v24 }
0x11e3   : > { %5885 = vmax.xlane.f32.xlu0 %v5884_v57 }
0x123c   : > { %v23390_v58 = vpop.f32.mrb[32].mxu1 }
0x123d   : > { %v23392_v61 = vpop.f32.mrb[33].mxu1  ;;  %v5893_v62 = vsel %vm3535_vm11, %v23390_v58, -inf }
0x123e   : > { %5894 = vmax.xlane.f32.xlu1 %v5893_v62  ;;  %v5890_v18 = vsel %vm3535_vm11, %v23392_v61, -inf }
0x1240   : > { %v23396_v4 = vpop.f32.mrb[24].mxu0 }
0x1241   : > { %v23398_v63 = vpop.f32.mrb[25].mxu0  ;;  %v5899_v2 = vsel %vm3535_vm11, %v23396_v4, -inf }
0x1242   : > { %5891 = vmax.xlane.f32.xlu1 %v5890_v18  ;;  %5900 = vmax.xlane.f32.xlu0 %v5899_v2  ;;  %v5896_v54 = vsel %vm3535_vm11, %v23398_v63, -inf }
0x1245   : > { %v23404_v0 = vpop.f32.mrb[34].mxu1 }
0x1246   : > { %v23408_v42 = vpop.f32.mrb[35].mxu1  ;;  %v5905_v11 = vsel %vm3535_vm11, %v23404_v0, -inf  ;;  %5897 = vmax.xlane.f32.xlu0 %v5896_v54 }
0x1247   : > { %5906 = vmax.xlane.f32.xlu1 %v5905_v11  ;;  %v5902_v9 = vsel %vm3535_vm11, %v23408_v42, -inf }
0x124a   : > { %v23412_v3 = vpop.f32.mrb[26].mxu0 }
0x124b   : > { %5903 = vmax.xlane.f32.xlu1 %v5902_v9  ;;  %v23416_v22 = vpop.f32.mrb[27].mxu0  ;;  %v5911_v52 = vsel %vm3535_vm11, %v23412_v3, -inf }
0x124c   : > { %5912 = vmax.xlane.f32.xlu0 %v5911_v52  ;;  %v5908_v8 = vsel %vm3535_vm11, %v23416_v22, -inf }
0x124e   : > { %v23420_v60 = vpop.f32.mrb[36].mxu1 }
0x124f   : > { %v23422_v12 = vpop.f32.mrb[37].mxu1  ;;  %v5917_v6 = vsel %vm3535_vm11, %v23420_v60, -inf }
0x1250   : > { %5918 = vmax.xlane.f32.xlu1 %v5917_v6  ;;  %5909 = vmax.xlane.f32.xlu0 %v5908_v8  ;;  %v5914_v1 = vsel %vm3535_vm11, %v23422_v12, -inf }
0x1252   : > { %v23428_v28 = vpop.f32.mrb[28].mxu0 }
0x1253   : > { %v23430_v55 = vpop.f32.mrb[29].mxu0  ;;  %v5923_v47 = vsel %vm3535_vm11, %v23428_v28, -inf }
0x1254   : > { %5915 = vmax.xlane.f32.xlu1 %v5914_v1  ;;  %v5920_v14 = vsel %vm3535_vm11, %v23430_v55, -inf }
0x1255   : > { %5921 = vmax.xlane.f32.xlu0 %v5920_v14 }
0x1258   : > { %5924 = vmax.xlane.f32.xlu1 %v5923_v47 }
0x1268   : > { %v5883_v21 = vpop.xlane.xlu0 %5882 }
0x1269   : > { %20113 = vrot.lane.b32.xlu1 %v23306_v30, %s25530_s4  ;;  %v5880_v46 = vpop.xlane.xlu1 %5879  ;;  %v5927_v59 = vsub.f32 %v18040_v25, %v5883_v21 }
0x126a   : > { %v5926_v34 = vsub.f32 %v5260_v51, %v5880_v46 }
0x126b   : > { %20118 = vrot.lane.b32.xlu0 %v23301_v40, %s25530_s4  ;;  %v5944_v16 = vmul.f32 1.442695, %v5927_v59 }
0x126c   : > { %v5889_v50 = vpop.xlane.xlu0 %5888  ;;  %v5942_v44 = vmul.f32 1.442695, %v5926_v34 }
0x126d   : > { %v5929_v41 = vsub.f32 %v18047_v15, %v5889_v50 }
0x126e   : > { %20604 = vpow2.f32 %v5942_v44 }
0x126f   : > { %v5948_v35 = vmul.f32 1.442695, %v5929_v41  ;;  %20606 = vpow2.f32 %v5944_v16 }
0x1270   : > { %v5886_v10 = vpop.xlane.xlu0 %5885 }
0x1271   : > { %v5928_v49 = vsub.f32 %v23383_v48, %v5886_v10  ;;  %20608 = vpow2.f32 %v5948_v35 }
0x1273   : > { %v5946_v20 = vmul.f32 1.442695, %v5928_v49 }
0x1275   : > { %20610 = vpow2.f32 %v5946_v20 }
0x1278   : > { %v23445_v30 = vpop.eup %20604 }
0x1279   : > { %v23447_v40 = vpop.eup %20606  ;;  %v5974_v36 = vsel %vm3535_vm11, %v23445_v30, 0.0 }
0x127a   : > { %v5977_v23 = vsel %vm3535_vm11, %v23447_v40, 0.0 }
0x127b   : > { %v23451_v37 = vpop.eup %20608 }
0x127c   : > { %v5983_v13 = vsel %vm3535_vm11, %v23451_v37, 0.0 }
0x127f   : > { %v23457_v38 = vpop.eup %20610 }
0x1280   : > { %v5980_v39 = vsel %vm3535_vm11, %v23457_v38, 0.0 }
0x128a   : > { %5975 = vadd.xlane.f32.xlu0 %v5974_v36 }
0x128d   : > { %5978 = vadd.xlane.f32.xlu1 %v5977_v23 }
0x128e   : > { %5984 = vadd.xlane.f32.xlu0 %v5983_v13 }
0x1292   : > { %5981 = vadd.xlane.f32.xlu0 %v5980_v39 }
0x12cb   : > { %v5895_v32 = vpop.xlane.xlu1 %5894 }
0x12cc   : > { %v5931_v29 = vsub.f32 %v23390_v58, %v5895_v32 }
0x12ce   : > { %v5952_v43 = vmul.f32 1.442695, %v5931_v29 }
0x12cf   : > { %v5892_v15 = vpop.xlane.xlu1 %5891  ;;  %v5901_v48 = vpop.xlane.xlu0 %5900 }
0x12d0   : > { %20612 = vpow2.f32 %v5952_v43  ;;  %v5930_v25 = vsub.f32 %v23392_v61, %v5892_v15  ;;  %v5933_v51 = vsub.f32 %v23396_v4, %v5901_v48 }
0x12d2   : > { %v5950_v53 = vmul.f32 1.442695, %v5930_v25  ;;  %v5956_v27 = vmul.f32 1.442695, %v5933_v51 }
0x12d3   : > { %v5898_v24 = vpop.xlane.xlu0 %5897 }
0x12d4   : > { %20614 = vpow2.f32 %v5950_v53  ;;  %v5907_v57 = vpop.xlane.xlu1 %5906  ;;  %v5932_v62 = vsub.f32 %v23398_v63, %v5898_v24 }
0x12d5   : > { %20616 = vpow2.f32 %v5956_v27  ;;  %v5935_v18 = vsub.f32 %v23404_v0, %v5907_v57 }
0x12d6   : > { %v5954_v2 = vmul.f32 1.442695, %v5932_v62 }
0x12d7   : > { %v5960_v58 = vmul.f32 1.442695, %v5935_v18 }
0x12d8   : > { %20618 = vpow2.f32 %v5954_v2  ;;  %v5904_v54 = vpop.xlane.xlu1 %5903 }
0x12d9   : > { %20620 = vpow2.f32 %v5960_v58  ;;  %v5934_v11 = vsub.f32 %v23408_v42, %v5904_v54  ;;  %v5913_v61 = vpop.xlane.xlu0 %5912 }
0x12da   : > { %v23467_v9 = vpop.eup %20612  ;;  %v5937_v4 = vsub.f32 %v23412_v3, %v5913_v61 }
0x12db   : > { %v5958_v52 = vmul.f32 1.442695, %v5934_v11  ;;  %v5989_v6 = vsel %vm3535_vm11, %v23467_v9, 0.0 }
0x12dc   : > { %v5964_v63 = vmul.f32 1.442695, %v5937_v4  ;;  %5990 = vadd.xlane.f32.xlu1 %v5989_v6  ;;  %v20111_v6 = vunpack.i.h.bf16 %v23438_v33 }
0x12dd   : > { %20622 = vpow2.f32 %v5958_v52  ;;  %v5919_v0 = vpop.xlane.xlu1 %5918  ;;  %v5910_v8 = vpop.xlane.xlu0 %5909 }
0x12de   : > { %v23472_v1 = vpop.eup %20614  ;;  %20624 = vpow2.f32 %v5964_v63  ;;  %v5939_v14 = vsub.f32 %v23420_v60, %v5919_v0  ;;  %v5936_v42 = vsub.f32 %v23416_v22, %v5910_v8  ;;  %v20110_v63 = vunpack.i.l.bf16 %v23438_v33 }
0x12df   : > { %v23476_v47 = vpop.eup %20616  ;;  %v5986_v3 = vsel %vm3535_vm11, %v23472_v1, 0.0 }
0x12e0   : > { %v5968_v21 = vmul.f32 1.442695, %v5939_v14  ;;  %v5962_v46 = vmul.f32 1.442695, %v5936_v42  ;;  %5987 = vadd.xlane.f32.xlu1 %v5986_v3  ;;  %v5995_v50 = vsel %vm3535_vm11, %v23476_v47, 0.0  ;;  %v19044_v0 = vpack.c.bf16 %v20111_v6, %v20110_v63 }
0x12e1   : > { %v5916_v34 = vpop.xlane.xlu1 %5915  ;;  %5996 = vadd.xlane.f32.xlu0 %v5995_v50 }
0x12e2   : > { %v23482_v59 = vpop.eup %20618  ;;  %20626 = vpow2.f32 %v5968_v21  ;;  %v5938_v60 = vsub.f32 %v23422_v12, %v5916_v34  ;;  %v5922_v44 = vpop.xlane.xlu0 %5921 }
0x12e3   : > { %v23485_v22 = vpop.eup %20620  ;;  %20628 = vpow2.f32 %v5962_v46  ;;  %v5940_v41 = vsub.f32 %v23430_v55, %v5922_v44  ;;  %v5992_v10 = vsel %vm3535_vm11, %v23482_v59, 0.0 }
0x12e4   : > { %v5966_v16 = vmul.f32 1.442695, %v5938_v60  ;;  %v6001_v35 = vsel %vm3535_vm11, %v23485_v22, 0.0 }
0x12e5   : > { %v5970_v49 = vmul.f32 1.442695, %v5940_v41  ;;  %6002 = vadd.xlane.f32.xlu1 %v6001_v35  ;;  %v5925_v20 = vpop.xlane.xlu1 %5924  ;;  %5993 = vadd.xlane.f32.xlu0 %v5992_v10 }
0x12e6   : > { %20630 = vpow2.f32 %v5966_v16  ;;  %v5941_v12 = vsub.f32 %v23428_v28, %v5925_v20  ;;  %v20119_v2 = vpop.permute.xlu0 %20118 }
0x12e7   : > { %v23493_v36 = vpop.eup %20622  ;;  %20632 = vpow2.f32 %v5970_v49  ;;  %v20121_v42 = vunpack.i.h.bf16 %v20119_v2  ;;  %v20120_v3 = vunpack.i.l.bf16 %v20119_v2 }
0x12e8   : > { %v23495_v23 = vpop.eup %20624  ;;  %v5972_v55 = vmul.f32 1.442695, %v5941_v12  ;;  %v5998_v13 = vsel %vm3535_vm11, %v23493_v36, 0.0 }
0x12e9   : > { %5999 = vadd.xlane.f32.xlu1 %v5998_v13  ;;  %v20114_v39 = vpop.permute.xlu1 %20113  ;;  %v6007_v32 = vsel %vm3535_vm11, %v23495_v23, 0.0  ;;  %v19052_v33 = vpack.c.bf16 %v20121_v42, %v20120_v3 }
0x12ea   : > { %20634 = vpow2.f32 %v5972_v55  ;;  %v20116_v29 = vunpack.i.h.bf16 %v20114_v39  ;;  %v20115_v43 = vunpack.i.l.bf16 %v20114_v39  ;;  %6008 = vadd.xlane.f32.xlu0 %v6007_v32 }
0x12ec   : > { %v23501_v15 = vpop.eup %20626  ;;  %v23503_v28 = vpack.c.bf16 %v20116_v29, %v20115_v43 }
0x12ed   : > { %v23505_v48 = vpop.eup %20628  ;;  %v6013_v25 = vsel %vm3535_vm11, %v23501_v15, 0.0 }
0x12ee   : > { %6014 = vadd.xlane.f32.xlu1 %v6013_v25  ;;  %19049 = vmatprep.subr.bf16.mxu0 %v23503_v28  ;;  %v6004_v51 = vsel %vm3535_vm11, %v23505_v48, 0.0 }
0x12ef   : > { %6005 = vadd.xlane.f32.xlu0 %v6004_v51 }
0x12f0   : > { %v23512_v53 = vpop.eup %20630 }
0x12f1   : > { %v23514_v27 = vpop.eup %20632  ;;  %v6010_v24 = vsel %vm3535_vm11, %v23512_v53, 0.0 }
0x12f2   : > { %6011 = vadd.xlane.f32.xlu1 %v6010_v24  ;;  %v6016_v57 = vsel %vm3535_vm11, %v23514_v27, 0.0 }
0x12f3   : > { %6017 = vadd.xlane.f32.xlu0 %v6016_v57 }
0x12f4   : > { %v23520_v62 = vpop.eup %20634 }
0x12f5   : > { %v6019_v18 = vsel %vm3535_vm11, %v23520_v62, 0.0 }
0x12f6   : > { %6020 = vadd.xlane.f32.xlu1 %v6019_v18 }
0x1307   : > { %20123 = vrot.lane.b32.xlu1 %v23310_v45, %s25530_s4 }
0x1309   : > { %20128 = vrot.lane.b32.xlu0 %v23304_v26, %s25530_s4  ;;  %s25678_s4 = sld [smem:[#allocation119_spill]] }
0x130f   : > { %v6813_v42 = vld [vmem:[%s25678_s4 + $0x18] sm:$0xff] }
0x1317   : > { %v5976_v58 = vpop.xlane.xlu0 %5975 }
0x1318   : > { %20636 = vrcp.f32 %v5976_v58 }
0x131a   : > { %v5979_v54 = vpop.xlane.xlu1 %5978 }
0x131b   : > { %20638 = vrcp.f32 %v5979_v54  ;;  %v5985_v11 = vpop.xlane.xlu0 %5984 }
0x131c   : > { %20640 = vrcp.f32 %v5985_v11 }
0x131f   : > { %v5982_v61 = vpop.xlane.xlu0 %5981 }
0x1320   : > { %20642 = vrcp.f32 %v5982_v61 }
0x1322   : > { %v20637_v4 = vpop.eup %20636 }
0x1323   : > { %v6038_v52 = vmul.f32 %v20637_v4, %v23445_v30 }
0x1325   : > { %v20639_v45 = vpop.eup %20638  ;;  %18094 = vmatprep.mubr.msk.f32.mxu1 %vm3535_vm11, %v6038_v52 }
0x1326   : > { %v6039_v26 = vmul.f32 %v20639_v45, %v23447_v40  ;;  %v20641_v8 = vpop.eup %20640 }
0x1327   : > { %v6041_v21 = vmul.f32 %v20641_v8, %v23451_v37 }
0x1328   : > { %18095 = vmatmul.mubr.msk.f32.vlgmr.msra.gmra.mrb[38].mxu1 %vm3535_vm11, %v6039_v26 }
0x1329   : > { %19039 = vmatpush3.bf16.msra.mxu1 %v23380_v19 }
0x132a   : > { %v20643_v14 = vpop.eup %20642  ;;  %19045 = vmatprep.subr.bf16.mxu1 %v19044_v0 }
0x132b   : > { %v6040_v30 = vmul.f32 %v20643_v14, %v23457_v38  ;;  %v6812_v14 = vld [vmem:[%s25678_s4 + $0x10] sm:$0xff] }
0x132c   : > { %v19068_v3 = vpack.c.bf16 %v6813_v42, %v6812_v14 }
0x132d   : > { %18101 = vmatprep.mubr.msk.f32.mxu1 %vm3535_vm11, %v6040_v30 }
0x132e   : > { %18102 = vmatmul.mubr.msk.f32.vlgmr.msra.gmra.mrb[40].mxu1 %vm3535_vm11, %v6041_v21 }
0x132f   : > { %19047 = vmatpush3.bf16.msra.mxu1 %v19044_v0 }
0x1330   : > { %19053 = vmatprep.subr.bf16.mxu1 %v19052_v33 }
0x1369   : > { %v5991_v40 = vpop.xlane.xlu1 %5990 }
0x136a   : > { %20644 = vrcp.f32 %v5991_v40 }
0x136d   : > { %v5988_v46 = vpop.xlane.xlu1 %5987 }
0x136e   : > { %20646 = vrcp.f32 %v5988_v46  ;;  %v5997_v19 = vpop.xlane.xlu0 %5996 }
0x136f   : > { %20648 = vrcp.f32 %v5997_v19 }
0x1372   : > { %v6003_v50 = vpop.xlane.xlu1 %6002  ;;  %v5994_v34 = vpop.xlane.xlu0 %5993 }
0x1373   : > { %20650 = vrcp.f32 %v5994_v34 }
0x1374   : > { %20652 = vrcp.f32 %v6003_v50  ;;  %v20645_v60 = vpop.eup %20644 }
0x1375   : > { %v6043_v10 = vmul.f32 %v20645_v60, %v23467_v9 }
0x1376   : > { %v6000_v38 = vpop.xlane.xlu1 %5999 }
0x1377   : > { %20654 = vrcp.f32 %v6000_v38  ;;  %v6009_v37 = vpop.xlane.xlu0 %6008 }
0x1378   : > { %v20647_v44 = vpop.eup %20646  ;;  %20656 = vrcp.f32 %v6009_v37 }
0x1379   : > { %v6042_v41 = vmul.f32 %v20647_v44, %v23472_v1  ;;  %v20649_v49 = vpop.eup %20648 }
0x137a   : > { %v6045_v9 = vmul.f32 %v20649_v49, %v23476_v47 }
0x137b   : > { %v6015_v16 = vpop.xlane.xlu1 %6014  ;;  %18108 = vmatprep.mubr.msk.f32.mxu0 %vm3535_vm11, %v6042_v41 }
0x137c   : > { %v6006_v35 = vpop.xlane.xlu0 %6005  ;;  %18109 = vmatmul.mubr.msk.f32.vlgmr.msra.gmra.mrb[30].mxu0 %vm3535_vm11, %v6043_v10 }
0x137d   : > { %20658 = vrcp.f32 %v6006_v35  ;;  %19051 = vmatpush3.bf16.msra.mxu0 %v23503_v28  ;;  %v20651_v20 = vpop.eup %20650 }
0x137e   : > { %20660 = vrcp.f32 %v6015_v16  ;;  %v6044_v55 = vmul.f32 %v20651_v20, %v23482_v59  ;;  %v20653_v13 = vpop.eup %20652 }
0x137f   : > { %v6012_v12 = vpop.xlane.xlu1 %6011  ;;  %v6047_v43 = vmul.f32 %v20653_v13, %v23485_v22 }
0x1380   : > { %20662 = vrcp.f32 %v6012_v12  ;;  %v6018_v1 = vpop.xlane.xlu0 %6017  ;;  %18115 = vmatprep.mubr.msk.f32.mxu1 %vm3535_vm11, %v6044_v55 }
0x1381   : > { %v20655_v39 = vpop.eup %20654  ;;  %20664 = vrcp.f32 %v6018_v1  ;;  %18116 = vmatmul.mubr.msk.f32.vlgmr.msra.gmra.mrb[42].mxu1 %vm3535_vm11, %v6045_v9 }
0x1382   : > { %v6046_v32 = vmul.f32 %v20655_v39, %v23493_v36  ;;  %19055 = vmatpush3.bf16.msra.mxu1 %v19052_v33  ;;  %v20657_v47 = vpop.eup %20656 }
0x1383   : > { %v6021_v29 = vpop.xlane.xlu1 %6020  ;;  %v6049_v22 = vmul.f32 %v20657_v47, %v23495_v23 }
0x1384   : > { %20666 = vrcp.f32 %v6021_v29  ;;  %18122 = vmatprep.mubr.msk.f32.mxu0 %vm3535_vm11, %v6046_v32  ;;  %v20129_v59 = vpop.permute.xlu0 %20128 }
0x1385   : > { %v20131_v28 = vunpack.i.h.bf16 %v20129_v59  ;;  %v20130_v25 = vunpack.i.l.bf16 %v20129_v59  ;;  %18123 = vmatmul.mubr.msk.f32.vlgmr.msra.gmra.mrb[32].mxu0 %vm3535_vm11, %v6047_v43 }
0x1387   : > { %v20659_v51 = vpop.eup %20658  ;;  %v20124_v24 = vpop.permute.xlu1 %20123  ;;  %v19060_v57 = vpack.c.bf16 %v20131_v28, %v20130_v25 }
0x1388   : > { %v20126_v18 = vunpack.i.h.bf16 %v20124_v24  ;;  %v20125_v2 = vunpack.i.l.bf16 %v20124_v24  ;;  %v6048_v36 = vmul.f32 %v20659_v51, %v23505_v48  ;;  %v20661_v58 = vpop.eup %20660 }
0x1389   : > { %19061 = vmatprep.subr.bf16.mxu1 %v19060_v57  ;;  %v6051_v23 = vmul.f32 %v20661_v58, %v23501_v15  ;;  %v6810_v15 = vld [vmem:[%s25678_s4] sm:$0xff] }
0x138a   : > { %v20663_v54 = vpop.eup %20662  ;;  %18129 = vmatprep.mubr.msk.f32.mxu1 %vm3535_vm11, %v6048_v36  ;;  %v19056_v11 = vpack.c.bf16 %v20126_v18, %v20125_v2 }
0x138b   : > { %v20665_v61 = vpop.eup %20664  ;;  %18130 = vmatmul.mubr.msk.f32.vlgmr.msra.gmra.mrb[44].mxu1 %vm3535_vm11, %v6049_v22  ;;  %v6050_v4 = vmul.f32 %v20663_v54, %v23512_v53 }
0x138c   : > { %19063 = vmatpush3.bf16.msra.mxu1 %v19060_v57  ;;  %19057 = vmatprep.subr.bf16.mxu0 %v19056_v11  ;;  %v6052_v52 = vmul.f32 %v20665_v61, %v23514_v27 }
0x138d   : > { %19059 = vmatpush3.bf16.msra.mxu0 %v19056_v11  ;;  %18136 = vmatprep.mubr.msk.f32.mxu0 %vm3535_vm11, %v6050_v4  ;;  %v16968_v4 = vld [vmem:[#allocation36] ss:$0 sm:$0xff] }
0x138e   : > { %v20667_v48 = vpop.eup %20666  ;;  %18143 = vmatprep.mubr.msk.f32.mxu1 %vm3535_vm11, %v6052_v52 }
0x138f   : > { %v6053_v6 = vmul.f32 %v20667_v48, %v23520_v62  ;;  %v6811_v62 = vld [vmem:[%s25678_s4 + $0x8] sm:$0xff]  ;;  %s25690_s4 = smov 96  }
0x1390   : > { %18137 = vmatmul.mubr.msk.f32.vlgmr.msra.gmra.mrb[34].mxu0 %vm3535_vm11, %v6051_v23  ;;  %v19064_v8 = vpack.c.bf16 %v6811_v62, %v6810_v15 }
0x1391   : > { %18144 = vmatmul.mubr.msk.f32.vlgmr.msra.gmra.mrb[46].mxu1 %vm3535_vm11, %v6053_v6 }
0x1392   : > { %19065 = vmatprep.subr.bf16.mxu0 %v19064_v8 }
0x1393   : > { %19067 = vmatpush3.bf16.msra.mxu0 %v19064_v8 }
0x1394   : > { %19069 = vmatprep.subr.bf16.mxu0 %v19068_v3 }
0x1397   : > { %19071 = vmatpush3.bf16.msra.mxu0 %v19068_v3 }
0x13fb   : > { %v23564_v53 = vpop.f32.mrb[38].mxu1 }
0x13fc   : > { %v23566_v27 = vpop.f32.mrb[39].mxu1 }
0x1401   : > { %v23568_v63 = vpop.f32.mrb[40].mxu1 }
0x1402   : > { %v23570_v45 = vpop.f32.mrb[41].mxu1 }
0x144f   : > { %v18110_v26 = vpop.f32.mrb[30].mxu0 }
0x1450   : > { %v6306_v0 = vpop.f32.mrb[31].mxu0  ;;  %6756 = vrot.lane.b32.xlu0 %v18110_v26, %s25536_s11 }
0x1451   : > { %6754 = vrot.lane.b32.xlu1 %v6306_v0, %s25536_s11 }
0x1454   : > { %v18117_v30 = vpop.f32.mrb[42].mxu1 }
0x1455   : > { %6760 = vrot.lane.b32.xlu0 %v18117_v30, %s25536_s11  ;;  %v6393_v21 = vpop.f32.mrb[43].mxu1 }
0x1456   : > { %6758 = vrot.lane.b32.xlu1 %v6393_v21, %s25536_s11  ;;  %s2416_s11 = scalar_lea.vmem %s25679_s28, %s22791_s2  ;;  %s25681_s28 = sld [smem:[#allocation115_spill]] }
0x1457   : > { %v2498_v37 = vld [vmem:[%s2416_s11 + $0x20] sm:$0xff]  ;;  %v2499_v44 = vld [vmem:[%s2416_s11 + $0x28] sm:$0xff]  ;;  %v2500_v41 = vld [vmem:[%s2416_s11 + $0x30] sm:$0xff] }
0x1458   : > { %v18124_v33 = vpop.f32.mrb[32].mxu0  ;;  %v2494_v10 = vld [vmem:[%s2416_s11] sm:$0xff]  ;;  %v2501_v16 = vld [vmem:[%s2416_s11 + $0x38] sm:$0xff]  ;;  %v2495_v35 = vld [vmem:[%s2416_s11 + $0x8] sm:$0xff] }
0x1459   : > { %v6480_v40 = vpop.f32.mrb[33].mxu0  ;;  %6772 = vrot.lane.b32.xlu0 %v18124_v33, %s25538_s7  ;;  %v2496_v49 = vld [vmem:[%s2416_s11 + $0x10] sm:$0xff]  ;;  %v2497_v20 = vld [vmem:[%s2416_s11 + $0x18] sm:$0xff]  ;;  %s25682_s11 = sld [smem:[#allocation73_spill]] }
0x145a   : > { %6770 = vrot.lane.b32.xlu1 %v6480_v40, %s25538_s7 }
0x145e   : > { %v18131_v46 = vpop.f32.mrb[44].mxu1 }
0x145f   : > { %6776 = vrot.lane.b32.xlu0 %v18131_v46, %s25538_s7  ;;  %v6567_v19 = vpop.f32.mrb[45].mxu1 }
0x1460   : > { %6774 = vrot.lane.b32.xlu1 %v6567_v19, %s25538_s7  ;;  %s25683_s7 = sld [smem:[#allocation116_spill]] }
0x1463   : > { %v18138_v50 = vpop.f32.mrb[34].mxu0 }
0x1464   : > { %v6654_v34 = vpop.f32.mrb[35].mxu0  ;;  %6788 = vrot.lane.b32.xlu0 %v18138_v50, %s25680_s5  ;;  %v18145_v38 = vpop.f32.mrb[46].mxu1 }
0x1465   : > { %6786 = vrot.lane.b32.xlu1 %v6654_v34, %s25680_s5  ;;  %v6741_v60 = vpop.f32.mrb[47].mxu1 }
0x1468   : > { %6792 = vrot.lane.b32.xlu0 %v18145_v38, %s25680_s5 }
0x1469   : > { %6790 = vrot.lane.b32.xlu1 %v6741_v60, %s25680_s5 }
0x1486   : > { %2534 = vxpose.xlu0.b32.start [1/4] (short) (narrow) %v2498_v37, 16 }
0x148a   : > { %2535 = vxpose.xlu0.b32.cont [2/4] (short) (narrow) %v2499_v44, 16 }
0x148e   : > { %2536 = vxpose.xlu0.b32.cont [3/4] (short) (narrow) %v2500_v41, 16 }
0x1492   : > { %2502 = vxpose.xlu1.b32.start [1/4] (short) (narrow) %v2494_v10, 16  ;;  %2537 = vxpose.xlu0.b32.end [4/4] (short) (narrow) %v2501_v16, 16 }
0x1496   : > { %2503 = vxpose.xlu1.b32.cont [2/4] (short) (narrow) %v2495_v35, 16 }
0x149a   : > { %2504 = vxpose.xlu1.b32.cont [3/4] (short) (narrow) %v2496_v49, 16 }
0x149e   : > { %2505 = vxpose.xlu1.b32.end [4/4] (short) (narrow) %v2497_v20, 16 }
0x14c2   : > { %v6757_v12 = vpop.permute.xlu0 %6756 }
0x14c3   : > { %v6755_v55 = vpop.permute.xlu1 %6754  ;;  %v6799_v28 = vsel %vm2842_vm9, %v23564_v53, %v6757_v12 }
0x14c4   : > { %v6798_v43 = vsel %vm2842_vm9, %v23566_v27, %v6755_v55 }
0x14c7   : > { %v6761_v13 = vpop.permute.xlu0 %6760 }
0x14c8   : > { %v6759_v1 = vpop.permute.xlu1 %6758  ;;  %v6801_v36 = vsel %vm2842_vm9, %v23568_v63, %v6761_v13 }
0x14c9   : > { %v6800_v18 = vsel %vm2842_vm9, %v23570_v45, %v6759_v1 }
0x14cb   : > { %v6773_v9 = vpop.permute.xlu0 %6772 }
0x14cc   : > { %v6771_v39 = vpop.permute.xlu1 %6770  ;;  %v6803_v51 = vsel %vm3535_vm11, %v6799_v28, %v6773_v9 }
0x14cd   : > { %v6802_v25 = vsel %vm3535_vm11, %v6798_v43, %v6771_v39 }
0x14d1   : > { %v6777_v32 = vpop.permute.xlu0 %6776 }
0x14d2   : > { %v6775_v29 = vpop.permute.xlu1 %6774  ;;  %v6805_v54 = vsel %vm3535_vm11, %v6801_v36, %v6777_v32 }
0x14d3   : > { %v6804_v58 = vsel %vm3535_vm11, %v6800_v18, %v6775_v29 }
0x14d6   : > { %v6789_v59 = vpop.permute.xlu0 %6788 }
0x14d7   : > { %v6787_v47 = vpop.permute.xlu1 %6786  ;;  %v6807_v57 = vsel %vm4464_vm12, %v6803_v51, %v6789_v59 }
0x14d8   : > { %v6806_v24 = vsel %vm4464_vm12, %v6802_v25, %v6787_v47 }
0x14d9   : > { %18154 = vmatprep.mubr.msk.f32.mxu0 %vm2566_vm0, %v6806_v24 }
0x14da   : > { %18155 = vmatmul.mubr.msk.f32.vlgmr.msra.gmra.mrb[36].mxu0 %vm2566_vm0, %v6807_v57  ;;  %v6793_v2 = vpop.permute.xlu0 %6792 }
0x14db   : > { %v6791_v22 = vpop.permute.xlu1 %6790  ;;  %v6809_v61 = vsel %vm4464_vm12, %v6805_v54, %v6793_v2 }
0x14dc   : > { %v6808_v11 = vsel %vm4464_vm12, %v6804_v58, %v6791_v22 }
0x14dd   : > { %18157 = vmatprep.mubr.msk.f32.mxu0 %vm2566_vm0, %v6808_v11 }
0x14de   : > { %18158 = vmatmul.mubr.msk.f32.gmra.mrb[38].mxu0 %vm2566_vm0, %v6809_v61 }
0x1506   : > { %v23622_v14 = vpop.trf.xlu0 }
0x1507   : > { %v7360_v40 = vsel %vm2566_vm0, %v23622_v14, 0.0 }
0x150a   : > { %v23638_v33 = vpop.trf.xlu0 }
0x1512   : > { %v23610_v53 = vpop.trf.xlu1 }
0x15ad   : > { %v18156_v52 = vpop.f32.mrb[36].mxu0 }
0x15ae   : > { %v6905_v48 = vadd.f32 %v18156_v52, %v16968_v4  ;;  %v6899_v23 = vpop.f32.mrb[37].mxu0 }
0x15af   : > { %v6900_v6 = vadd.f32 %v16968_v4, %v6899_v23  ;;  %v7025_v23 = vld [vmem:[%s25681_s28 + $0x8] sm:$0xff] }
0x15b0   : > { %v23613_v27 = vadd.f32 %v6905_v48, %v23235_v5  ;;  %v7024_v48 = vld [vmem:[%s25681_s28] sm:$0xff] }
0x15b1   : > { %v23616_v63 = vadd.f32 %v6900_v6, %v23238_v31  ;;  %v18159_v45 = vpop.f32.mrb[38].mxu0  ;;  %v23630_v31 = vpop.trf.xlu1  ;;  %v19072_v6 = vpack.c.bf16 %v7025_v23, %v7024_v48 }
0x15b2   : > { %v6915_v26 = vadd.f32 %v18159_v45, %v16968_v4  ;;  %v6909_v0 = vpop.f32.mrb[39].mxu0  ;;  %v6925_v15 = vsel %vm2566_vm0, %v23613_v27, 0.0  ;;  %v7357_v21 = vsel %vm2566_vm0, %v23630_v31, 0.0  ;;  %v7026_v45 = vld [vmem:[%s25681_s28 + $0x10] sm:$0xff] }
0x15b3   : > { %v6910_v62 = vadd.f32 %v16968_v4, %v6909_v0  ;;  %6926 = vadd.xlane.f32.xlu1 %v6925_v15  ;;  %v6922_v8 = vsel %vm2566_vm0, %v23616_v63, 0.0  ;;  %19073 = vmatprep.subr.bf16.mxu1 %v19072_v6  ;;  %v7456_v15 = vld [vmem:[%s25682_s11] sm:$0xff] }
0x15b4   : > { %v23625_v42 = vadd.f32 %v6915_v26, %v23245_v17  ;;  %6923 = vadd.xlane.f32.xlu0 %v6922_v8  ;;  %v7354_v17 = vsel %vm2566_vm0, %v23610_v53, 0.0  ;;  %v7027_v26 = vld [vmem:[%s25681_s28 + $0x18] sm:$0xff]  ;;  %19075 = vmatpush3.bf16.msra.mxu1 %v19072_v6 }
0x15b5   : > { %v23628_v5 = vadd.f32 %v6910_v62, %v23248_v7  ;;  %v7363_v7 = vsel %vm2566_vm0, %v23638_v33, 0.0  ;;  %v19076_v0 = vpack.c.bf16 %v7027_v26, %v7026_v45  ;;  %v7457_v62 = vld [vmem:[%s25682_s11 + $0x8] sm:$0xff] }
0x15b6   : > { %v6931_v3 = vsel %vm2566_vm0, %v23625_v42, 0.0  ;;  %v23700_v8 = vpack.c.bf16 %v7457_v62, %v7456_v15 }
0x15b7   : > { %6932 = vadd.xlane.f32.xlu1 %v6931_v3  ;;  %v6928_v30 = vsel %vm2566_vm0, %v23628_v5, 0.0  ;;  %19077 = vmatprep.subr.bf16.mxu1 %v19076_v0  ;;  %v7136_v3 = vld [vmem:[%s25683_s7] sm:$0xff] }
0x15b8   : > { %6929 = vadd.xlane.f32.xlu0 %v6928_v30  ;;  %19079 = vmatpush3.bf16.msra.mxu1 %v19076_v0  ;;  %v7137_v30 = vld [vmem:[%s25683_s7 + $0x8] sm:$0xff] }
0x15b9   : > { %19097 = vmatprep.subr.bf16.mxu1 %v23700_v8 }
0x15bb   : > { %7358 = vadd.xlane.f32.xlu1 %v7357_v21  ;;  %v7138_v21 = vld [vmem:[%s25683_s7 + $0x10] sm:$0xff] }
0x15bc   : > { %7355 = vadd.xlane.f32.xlu0 %v7354_v17  ;;  %v19080_v17 = vpack.c.bf16 %v7137_v30, %v7136_v3 }
0x15be   : > { %19081 = vmatprep.subr.bf16.mxu0 %v19080_v17 }
0x15bf   : > { %7364 = vadd.xlane.f32.xlu1 %v7363_v7  ;;  %v7139_v7 = vld [vmem:[%s25683_s7 + $0x18] sm:$0xff]  ;;  %19083 = vmatpush3.bf16.msra.mxu0 %v19080_v17 }
0x15c0   : > { %7361 = vadd.xlane.f32.xlu0 %v7360_v40  ;;  %v19084_v40 = vpack.c.bf16 %v7139_v7, %v7138_v21 }
0x15c2   : > { %19085 = vmatprep.subr.bf16.mxu0 %v19084_v40 }
0x15c3   : > { %19087 = vmatpush3.bf16.msra.mxu0 %v19084_v40 }
0x1640   : > { %v6927_v46 = vpop.xlane.xlu1 %6926 }
0x1641   : > { %v6935_v19 = vmul.f32 0.03125, %v6927_v46  ;;  %v6924_v50 = vpop.xlane.xlu0 %6923  ;;  %v7140_v46 = vld [vmem:[%s25683_s7 + $0x20] sm:$0xff] }
0x1642   : > { %v6934_v34 = vmul.f32 0.03125, %v6924_v50 }
0x1643   : > { %v23647_v38 = vsub.f32 %v23613_v27, %v6935_v19  ;;  %v7141_v19 = vld [vmem:[%s25683_s7 + $0x28] sm:$0xff] }
0x1644   : > { %v23650_v60 = vsub.f32 %v23616_v63, %v6934_v34  ;;  %v6933_v37 = vpop.xlane.xlu1 %6932  ;;  %v19088_v50 = vpack.c.bf16 %v7141_v19, %v7140_v46 }
0x1645   : > { %v6937_v44 = vmul.f32 0.03125, %v6933_v37  ;;  %v6930_v41 = vpop.xlane.xlu0 %6929  ;;  %v6943_v10 = vmul.f32 %v23647_v38, %v23647_v38 }
0x1646   : > { %v6936_v16 = vmul.f32 0.03125, %v6930_v41  ;;  %v6942_v35 = vmul.f32 %v23650_v60, %v23650_v60  ;;  %19089 = vmatprep.subr.bf16.mxu0 %v19088_v50 }
0x1647   : > { %v23657_v49 = vsub.f32 %v23625_v42, %v6937_v44  ;;  %v6949_v20 = vsel %vm2566_vm0, %v6943_v10, 0.0  ;;  %19091 = vmatpush3.bf16.msra.mxu0 %v19088_v50 }
0x1648   : > { %v23661_v12 = vsub.f32 %v23628_v5, %v6936_v16  ;;  %6950 = vadd.xlane.f32.xlu1 %v6949_v20  ;;  %v7359_v55 = vpop.xlane.xlu1 %7358  ;;  %v6946_v13 = vsel %vm2566_vm0, %v6942_v35, 0.0 }
0x1649   : > { %v7367_v1 = vmul.f32 0.03125, %v7359_v55  ;;  %6947 = vadd.xlane.f32.xlu0 %v6946_v13  ;;  %v7356_v9 = vpop.xlane.xlu0 %7355  ;;  %v6945_v39 = vmul.f32 %v23657_v49, %v23657_v49 }
0x164a   : > { %v7366_v32 = vmul.f32 0.03125, %v7356_v9  ;;  %v6944_v29 = vmul.f32 %v23661_v12, %v23661_v12 }
0x164b   : > { %v23669_v43 = vsub.f32 %v23630_v31, %v7367_v1  ;;  %v6955_v59 = vsel %vm2566_vm0, %v6945_v39, 0.0 }
0x164c   : > { %v23673_v28 = vsub.f32 %v23610_v53, %v7366_v32  ;;  %6956 = vadd.xlane.f32.xlu1 %v6955_v59  ;;  %v7365_v25 = vpop.xlane.xlu1 %7364  ;;  %v6952_v47 = vsel %vm2566_vm0, %v6944_v29, 0.0 }
0x164d   : > { %v7369_v51 = vmul.f32 0.03125, %v7365_v25  ;;  %6953 = vadd.xlane.f32.xlu0 %v6952_v47  ;;  %v7362_v24 = vpop.xlane.xlu0 %7361  ;;  %v7375_v57 = vmul.f32 %v23669_v43, %v23669_v43 }
0x164e   : > { %v7368_v18 = vmul.f32 0.03125, %v7362_v24  ;;  %v7374_v2 = vmul.f32 %v23673_v28, %v23673_v28 }
0x164f   : > { %v23681_v36 = vsub.f32 %v23638_v33, %v7369_v51  ;;  %v7381_v58 = vsel %vm2566_vm0, %v7375_v57, 0.0 }
0x1650   : > { %v23685_v22 = vsub.f32 %v23622_v14, %v7368_v18  ;;  %7382 = vadd.xlane.f32.xlu1 %v7381_v58  ;;  %v7378_v54 = vsel %vm2566_vm0, %v7374_v2, 0.0 }
0x1651   : > { %7379 = vadd.xlane.f32.xlu0 %v7378_v54  ;;  %v7377_v11 = vmul.f32 %v23681_v36, %v23681_v36 }
0x1652   : > { %v7376_v61 = vmul.f32 %v23685_v22, %v23685_v22 }
0x1653   : > { %v7387_v4 = vsel %vm2566_vm0, %v7377_v11, 0.0 }
0x1654   : > { %7388 = vadd.xlane.f32.xlu1 %v7387_v4  ;;  %v7384_v52 = vsel %vm2566_vm0, %v7376_v61, 0.0 }
0x1655   : > { %7385 = vadd.xlane.f32.xlu0 %v7384_v52 }
0x16d5   : > { %v6951_v34 = vpop.xlane.xlu1 %6950 }
0x16d6   : > { %v6959_v37 = vmul.f32 0.032258064, %v6951_v34  ;;  %v6948_v44 = vpop.xlane.xlu0 %6947 }
0x16d7   : > { %v6958_v41 = vmul.f32 0.032258064, %v6948_v44 }
0x16d8   : > { %20668 = vrsqrt.f32 %v6959_v37  ;;  %vm6971_vm4 = vcmp.eq.f32.partialorder %v6959_v37, inf  ;;  %vm6973_vm5 = vcmp.eq.f32.partialorder %v6959_v37, 0.0  ;;  %v6974_v24 = vand.u32 2147483648, %v6959_v37 }
0x16d9   : > { %20670 = vrsqrt.f32 %v6958_v41  ;;  %v6957_v10 = vpop.xlane.xlu1 %6956  ;;  %vm6964_vm7 = vcmp.eq.f32.partialorder %v6958_v41, inf  ;;  %v6967_v2 = vand.u32 2147483648, %v6958_v41  ;;  %vm6966_vm8 = vcmp.eq.f32.partialorder %v6958_v41, 0.0 }
0x16da   : > { %v6961_v16 = vmul.f32 0.032258064, %v6957_v10  ;;  %v6954_v35 = vpop.xlane.xlu0 %6953 }
0x16db   : > { %v6960_v20 = vmul.f32 0.032258064, %v6954_v35 }
0x16dc   : > { %20672 = vrsqrt.f32 %v6961_v16  ;;  %vm6985_vm13 = vcmp.eq.f32.partialorder %v6961_v16, inf  ;;  %vm6987_vm14 = vcmp.eq.f32.partialorder %v6961_v16, 0.0  ;;  %v6988_v6 = vand.u32 2147483648, %v6961_v16 }
0x16dd   : > { %20674 = vrsqrt.f32 %v6960_v20  ;;  %v7383_v55 = vpop.xlane.xlu1 %7382  ;;  %vm6978_vm15 = vcmp.eq.f32.partialorder %v6960_v20, inf  ;;  %v6981_v0 = vand.u32 2147483648, %v6960_v20  ;;  %vm6980_vm1 = vcmp.eq.f32.partialorder %v6960_v20, 0.0 }
0x16de   : > { %v7391_v13 = vmul.f32 0.032258064, %v7383_v55  ;;  %v7380_v1 = vpop.xlane.xlu0 %7379 }
0x16df   : > { %v23709_v9 = vmul.f32 0.032258064, %v7380_v1 }
0x16e0   : > { %20676 = vrsqrt.f32 %v7391_v13  ;;  %vm7403_vm2 = vcmp.eq.f32.partialorder %v7391_v13, inf  ;;  %vm7405_vm3 = vcmp.eq.f32.partialorder %v7391_v13, 0.0  ;;  %v7406_v46 = vand.u32 2147483648, %v7391_v13 }
0x16e1   : > { %20678 = vrsqrt.f32 %v23709_v9  ;;  %v7389_v39 = vpop.xlane.xlu1 %7388  ;;  %v7399_v34 = vand.u32 2147483648, %v23709_v9 }
0x16e2   : > { %v20669_v32 = vpop.eup %20668  ;;  %v23712_v29 = vmul.f32 0.032258064, %v7389_v39  ;;  %v7386_v59 = vpop.xlane.xlu0 %7385 }
0x16e3   : > { %v20671_v25 = vpop.eup %20670  ;;  %v6970_v47 = vmul.f32 %v20669_v32, %v6959_v37  ;;  %v23714_v51 = vmul.f32 0.032258064, %v7386_v59 }
0x16e4   : > { %v6963_v57 = vmul.f32 %v20671_v25, %v6958_v41  ;;  %20680 = vrsqrt.f32 %v23712_v29 }
0x16e5   : > { %v6972_v18 = vsel %vm6971_vm4, %v6959_v37, %v6970_v47  ;;  %20682 = vrsqrt.f32 %v23714_v51  ;;  %vm7396_vm4 = vcmp.eq.f32.partialorder %v23709_v9, inf }
0x16e6   : > { %v20673_v58 = vpop.eup %20672  ;;  %v6975_v54 = vsel %vm6973_vm5, %v6974_v24, %v6972_v18  ;;  %v6965_v11 = vsel %vm6964_vm7, %v6958_v41, %v6963_v57  ;;  %vm7398_vm5 = vcmp.eq.f32.partialorder %v23709_v9, 0.0  ;;  %vm7417_vm7 = vcmp.eq.f32.partialorder %v23712_v29, inf  ;;  %v16973_v57 = vld [vmem:[#allocation33] ss:$0 sm:$0xff] }
0x16e7   : > { %v20675_v61 = vpop.eup %20674  ;;  %v6991_v4 = vadd.f32 1e-06, %v6975_v54  ;;  %v6968_v52 = vsel %vm6966_vm8, %v6967_v2, %v6965_v11  ;;  %v6984_v48 = vmul.f32 %v20673_v58, %v6961_v16  ;;  %vm7419_vm8 = vcmp.eq.f32.partialorder %v23712_v29, 0.0  ;;  %v16974_v54 = vld [vmem:[#allocation34] ss:$0 sm:$0xff] }
0x16e8   : > { %v6990_v23 = vadd.f32 1e-06, %v6968_v52  ;;  %v6977_v45 = vmul.f32 %v20675_v61, %v6960_v20  ;;  %v7459_v52 = vld [vmem:[%s25682_s11 + $0x18] sm:$0xff] }
0x16e9   : > { %20684 = vrcp.f32 %v6991_v4  ;;  %v6986_v26 = vsel %vm6985_vm13, %v6961_v16, %v6984_v48  ;;  %vm7410_vm13 = vcmp.eq.f32.partialorder %v23714_v51, inf  ;;  %v7458_v4 = vld [vmem:[%s25682_s11 + $0x10] sm:$0xff]  ;;  %s25699_s11 = sld [smem:[#allocation78_spill]] }
0x16ea   : > { %v20677_v15 = vpop.eup %20676  ;;  %v6989_v62 = vsel %vm6987_vm14, %v6988_v6, %v6986_v26  ;;  %v6979_v3 = vsel %vm6978_vm15, %v6960_v20, %v6977_v45  ;;  %20686 = vrcp.f32 %v6990_v23  ;;  %vm7412_vm14 = vcmp.eq.f32.partialorder %v23714_v51, 0.0 }
0x16eb   : > { %v20679_v30 = vpop.eup %20678  ;;  %v6993_v21 = vadd.f32 1e-06, %v6989_v62  ;;  %v6982_v17 = vsel %vm6980_vm1, %v6981_v0, %v6979_v3  ;;  %v7402_v7 = vmul.f32 %v20677_v15, %v7391_v13  ;;  %v19100_v0 = vpack.c.bf16 %v7459_v52, %v7458_v4  ;;  %v16987_v62 = vld [vmem:[%s25684_s3] ss:$0 sm:$0xff]  ;;  %s25687_s3 = smov 120  }
0x16ec   : > { %v6992_v40 = vadd.f32 1e-06, %v6982_v17  ;;  %v7395_v19 = vmul.f32 %v20679_v30, %v23709_v9 }
0x16ed   : > { %v7404_v50 = vsel %vm7403_vm2, %v7391_v13, %v7402_v7  ;;  %20688 = vrcp.f32 %v6993_v21  ;;  %v7420_v13 = vand.u32 2147483648, %v23712_v29  ;;  %v16988_v7 = vld [vmem:[%s25685_s1] ss:$0 sm:$0xff]  ;;  %s25686_s1 = sld [smem:[#allocation69_spill]] }
0x16ee   : > { %v20681_v37 = vpop.eup %20680  ;;  %v7407_v44 = vsel %vm7405_vm3, %v7406_v46, %v7404_v50  ;;  %v7397_v41 = vsel %vm7396_vm4, %v23709_v9, %v7395_v19  ;;  %20690 = vrcp.f32 %v6992_v40  ;;  %v7413_v9 = vand.u32 2147483648, %v23714_v51 }
0x16ef   : > { %v20683_v10 = vpop.eup %20682  ;;  %v7423_v16 = vadd.f32 1e-06, %v7407_v44  ;;  %v7400_v35 = vsel %vm7398_vm5, %v7399_v34, %v7397_v41  ;;  %v7416_v20 = vmul.f32 %v20681_v37, %v23712_v29 }
0x16f0   : > { %v7422_v55 = vadd.f32 1e-06, %v7400_v35  ;;  %v7409_v1 = vmul.f32 %v20683_v10, %v23714_v51  ;;  %v7142_v10 = vld [vmem:[%s25683_s7 + $0x30] sm:$0xff] }
0x16f1   : > { %20692 = vrcp.f32 %v7423_v16  ;;  %v7418_v39 = vsel %vm7417_vm7, %v23712_v29, %v7416_v20  ;;  %v7143_v16 = vld [vmem:[%s25683_s7 + $0x38] sm:$0xff]  ;;  %s25692_s7 = sld [smem:[#allocation72_spill]] }
0x16f2   : > { %v7421_v32 = vsel %vm7419_vm8, %v7420_v13, %v7418_v39  ;;  %v7411_v59 = vsel %vm7410_vm13, %v23714_v51, %v7409_v1  ;;  %20694 = vrcp.f32 %v7422_v55 }
0x16f3   : > { %v20685_v25 = vpop.eup %20684  ;;  %v7425_v47 = vadd.f32 1e-06, %v7421_v32  ;;  %v7414_v24 = vsel %vm7412_vm14, %v7413_v9, %v7411_v59 }
0x16f4   : > { %v20687_v18 = vpop.eup %20686  ;;  %v7424_v2 = vadd.f32 1e-06, %v7414_v24  ;;  %v7000_v29 = vmul.f32 %v20685_v25, %v23647_v38 }
0x16f5   : > { %v6999_v58 = vmul.f32 %v20687_v18, %v23650_v60  ;;  %20696 = vrcp.f32 %v7425_v47  ;;  %v16989_v47 = vld [vmem:[%s25686_s1] ss:$0 sm:$0xff]  ;;  %s25688_s1 = smov 112  }
0x16f6   : > { %v7010_v11 = vmul.f32 %v16973_v57, %v7000_v29  ;;  %20698 = vrcp.f32 %v7424_v2 }
0x16f7   : > { %v20689_v61 = vpop.eup %20688  ;;  %v7009_v51 = vmul.f32 %v16973_v57, %v6999_v58 }
0x16f8   : > { %v20691_v48 = vpop.eup %20690  ;;  %v7002_v23 = vmul.f32 %v20689_v61, %v23657_v49  ;;  %v7021_v26 = vadd.f32 %v16974_v54, %v7010_v11 }
0x16f9   : > { %v7020_v6 = vadd.f32 %v16974_v54, %v7009_v51  ;;  %v7001_v45 = vmul.f32 %v20691_v48, %v23661_v12 }
0x16fa   : > { %v7012_v38 = vmul.f32 %v16973_v57, %v7002_v23 }
0x16fb   : > { %v20693_v60 = vpop.eup %20692  ;;  %18168 = vmatprep.mubr.msk.f32.mxu1 %vm2566_vm0, %v7020_v6  ;;  %v7011_v15 = vmul.f32 %v16973_v57, %v7001_v45 }
0x16fc   : > { %v20695_v3 = vpop.eup %20694  ;;  %18169 = vmatmul.mubr.msk.f32.vlgmr.msra.gmra.mrb[48].mxu1 %vm2566_vm0, %v7021_v26  ;;  %v7432_v30 = vmul.f32 %v20693_v60, %v23669_v43  ;;  %v7023_v12 = vadd.f32 %v16974_v54, %v7012_v38 }
0x16fd   : > { %19099 = vmatpush3.bf16.msra.mxu1 %v23700_v8  ;;  %v7022_v49 = vadd.f32 %v16974_v54, %v7011_v15  ;;  %v7431_v21 = vmul.f32 %v20695_v3, %v23673_v28 }
0x16fe   : > { %19101 = vmatprep.subr.bf16.mxu1 %v19100_v0  ;;  %v7442_v17 = vmul.f32 %v16987_v62, %v7432_v30 }
0x16ff   : > { %v20697_v40 = vpop.eup %20696  ;;  %18171 = vmatprep.mubr.msk.f32.mxu1 %vm2566_vm0, %v7022_v49  ;;  %v7441_v46 = vmul.f32 %v16987_v62, %v7431_v21 }
0x1700   : > { %v20699_v19 = vpop.eup %20698  ;;  %18172 = vmatmul.mubr.msk.f32.gmra.mrb[50].mxu1 %vm2566_vm0, %v7023_v12  ;;  %v7434_v43 = vmul.f32 %v20697_v40, %v23681_v36  ;;  %v7453_v28 = vadd.f32 %v16988_v7, %v7442_v17  ;;  %v19092_v36 = vpack.c.bf16 %v7143_v16, %v7142_v10 }
0x1701   : > { %19103 = vmatpush3.bf16.msra.mxu1 %v19100_v0  ;;  %v7452_v8 = vadd.f32 %v16988_v7, %v7441_v46  ;;  %v7433_v50 = vmul.f32 %v20699_v19, %v23685_v22  ;;  %v16975_v22 = vld [vmem:[#allocation30] ss:$0 sm:$0xff] }
0x1702   : > { %v7444_v34 = vmul.f32 %v16987_v62, %v7434_v43  ;;  %19093 = vmatprep.subr.bf16.mxu0 %v19092_v36 }
0x1703   : > { %18204 = vmatprep.mubr.msk.f32.mxu1 %vm2566_vm0, %v7452_v8  ;;  %v7443_v37 = vmul.f32 %v16987_v62, %v7433_v50  ;;  %19095 = vmatpush3.bf16.msra.mxu0 %v19092_v36 }
0x1704   : > { %18205 = vmatmul.mubr.msk.f32.vlgmr.msra.gmra.mrb[52].mxu1 %vm2566_vm0, %v7453_v28  ;;  %v7455_v41 = vadd.f32 %v16988_v7, %v7444_v34 }
0x1705   : > { %v7454_v44 = vadd.f32 %v16988_v7, %v7443_v37 }
0x1707   : > { %18207 = vmatprep.mubr.msk.f32.mxu1 %vm2566_vm0, %v7454_v44 }
0x1708   : > { %18208 = vmatmul.mubr.msk.f32.gmra.mrb[54].mxu1 %vm2566_vm0, %v7455_v41 }
0x17cf   : > { %v18170_v35 = vpop.f32.mrb[48].mxu1 }
0x17d0   : > { %v7119_v20 = vadd.f32 %v18170_v35, %v16975_v22  ;;  %v7113_v55 = vpop.f32.mrb[49].mxu1 }
0x17d1   : > { %v7114_v13 = vadd.f32 %v16975_v22, %v7113_v55 }
0x17d2   : > { %v7133_v9 = vmax.f32 %v7119_v20, 0.0 }
0x17d3   : > { %v7132_v1 = vmax.f32 %v7114_v13, 0.0  ;;  %v18173_v39 = vpop.f32.mrb[50].mxu1 }
0x17d4   : > { %v7129_v32 = vadd.f32 %v18173_v39, %v16975_v22  ;;  %v7123_v59 = vpop.f32.mrb[51].mxu1 }
0x17d5   : > { %v7124_v25 = vadd.f32 %v16975_v22, %v7123_v59  ;;  %18190 = vmatprep.mubr.msk.f32.mxu0 %vm4810_vm6, %v7132_v1 }
0x17d6   : > { %18191 = vmatmul.mubr.msk.f32.vlgmr.msra.gmra.mrb[40].mxu0 %vm4810_vm6, %v7133_v9  ;;  %v7135_v18 = vmax.f32 %v7129_v32, 0.0 }
0x17d7   : > { %v7134_v24 = vmax.f32 %v7124_v25, 0.0  ;;  %v18206_v57 = vpop.f32.mrb[52].mxu1 }
0x17d8   : > { %v7551_v2 = vadd.f32 %v18206_v57, %v16989_v47  ;;  %v7545_v29 = vpop.f32.mrb[53].mxu1 }
0x17d9   : > { %v7546_v58 = vadd.f32 %v16989_v47, %v7545_v29  ;;  %18193 = vmatprep.mubr.msk.f32.mxu0 %vm4810_vm6, %v7134_v24 }
0x17da   : > { %18194 = vmatmul.mubr.msk.f32.gmra.mrb[42].mxu0 %vm4810_vm6, %v7135_v18  ;;  %v7565_v38 = vmul.f32 0.35355338, %v7551_v2 }
0x17db   : > { %v18209_v54 = vpop.f32.mrb[54].mxu1  ;;  %v20132_v11 = vpack.i.bf16 %v7551_v2, %v7546_v58  ;;  %v7564_v61 = vmul.f32 0.35355338, %v7546_v58 }
0x17dc   : > { %v7561_v51 = vadd.f32 %v18209_v54, %v16989_v47  ;;  %v7555_v4 = vpop.f32.mrb[55].mxu1 }
0x17dd   : > { %v7556_v52 = vadd.f32 %v16989_v47, %v7555_v4  ;;  %20133 = vrot.lane.b32.xlu0 %v20132_v11, %s25687_s3  ;;  %18214 = vmatprep.mubr.msk.f32.mxu1 %vm2842_vm9, %v7564_v61 }
0x17de   : > { %v7567_v15 = vmul.f32 0.35355338, %v7561_v51 }
0x17df   : > { %v20147_v48 = vpack.i.bf16 %v7561_v51, %v7556_v52  ;;  %v7566_v23 = vmul.f32 0.35355338, %v7556_v52 }
0x17e1   : > { %20148 = vrot.lane.b32.xlu0 %v20147_v48, %s25688_s1  ;;  %20138 = vrot.lane.b32.xlu1 %v20147_v48, %s25687_s3 }
0x17e2   : > { %18221 = vmatprep.mubr.msk.f32.mxu0 %vm2842_vm9, %v7566_v23 }
0x17e5   : > { %20158 = vrot.lane.b32.xlu0 %v20147_v48, %s25689_s0  ;;  %20143 = vrot.lane.b32.xlu1 %v20132_v11, %s25688_s1 }
0x17e9   : > { %20168 = vrot.lane.b32.xlu0 %v20147_v48, %s25690_s4  ;;  %20153 = vrot.lane.b32.xlu1 %v20132_v11, %s25689_s0 }
0x17ed   : > { %7572 = vrot.lane.b32.xlu0 %v7564_v61, %s25687_s3  ;;  %20163 = vrot.lane.b32.xlu1 %v20132_v11, %s25690_s4 }
0x184f   : > { %v20134_v6 = vpop.permute.xlu0 %20133 }
0x1850   : > { %20173 = vrot.lane.b32.xlu1 %v20134_v6, %s25690_s4 }
0x1853   : > { %v23772_v45 = vpop.permute.xlu0 %20148  ;;  %v20139_v26 = vpop.permute.xlu1 %20138 }
0x1854   : > { %7574 = vrot.lane.b32.xlu1 %v7565_v38, %s25687_s3  ;;  %20183 = vrot.lane.b32.xlu0 %v20139_v26, %s25690_s4 }
0x1857   : > { %v23775_v0 = vpop.permute.xlu0 %20158  ;;  %v23777_v60 = vpop.permute.xlu1 %20143 }
0x1858   : > { %20178 = vrot.lane.b32.xlu1 %v23777_v60, %s25690_s4  ;;  %7578 = vrot.lane.b32.xlu0 %v7567_v15, %s25687_s3 }
0x185b   : > { %v20169_v62 = vpop.permute.xlu0 %20168  ;;  %v23781_v3 = vpop.permute.xlu1 %20153 }
0x185c   : > { %v20171_v30 = vunpack.i.h.bf16 %v20169_v62  ;;  %v20170_v49 = vunpack.i.l.bf16 %v20169_v62  ;;  %20193 = vrot.lane.b32.xlu0 %v23772_v45, %s25690_s4  ;;  %7576 = vrot.lane.b32.xlu1 %v7566_v23, %s25687_s3 }
0x185e   : > { %v19110_v21 = vpack.c.bf16 %v20171_v30, %v20170_v49 }
0x185f   : > { %v20164_v12 = vpop.permute.xlu1 %20163  ;;  %v7573_v46 = vpop.permute.xlu0 %7572 }
0x1860   : > { %v20166_v17 = vunpack.i.h.bf16 %v20164_v12  ;;  %v20165_v7 = vunpack.i.l.bf16 %v20164_v12  ;;  %19112 = vmatprep.subr.msk.bf16.mxu0 %vm22880_vm10, %v19110_v21  ;;  %7580 = vrot.lane.b32.xlu0 %v7564_v61, %s25688_s1 }
0x1861   : > { %19115 = vmatpush3.bf16.xpose.msk.msra.mxu0 %vm22880_vm10, %v19110_v21  ;;  %20188 = vrot.lane.b32.xlu1 %v23781_v3, %s25690_s4 }
0x1862   : > { %v19104_v40 = vpack.c.bf16 %v20166_v17, %v20165_v7 }
0x1864   : > { %19106 = vmatprep.subr.msk.bf16.mxu1 %vm22880_vm10, %v19104_v40  ;;  %20198 = vrot.lane.b32.xlu0 %v23775_v0, %s25690_s4 }
0x1865   : > { %19109 = vmatpush3.bf16.xpose.msk.msra.mxu1 %vm22880_vm10, %v19104_v40  ;;  %7582 = vrot.lane.b32.xlu1 %v7565_v38, %s25688_s1 }
0x1868   : > { %18222 = vmatmul.mubr.msk.f32.vlgmr.msra.gmra.mrb[44].mxu0 %vm2842_vm9, %v7567_v15  ;;  %7586 = vrot.lane.b32.xlu0 %v7567_v15, %s25688_s1 }
0x1869   : > { %7584 = vrot.lane.b32.xlu1 %v7566_v23, %s25688_s1 }
0x186c   : > { %18215 = vmatmul.mubr.msk.f32.vlgmr.msra.gmra.mrb[56].mxu1 %vm2842_vm9, %v7565_v38  ;;  %7590 = vrot.lane.b32.xlu0 %v7565_v38, %s25689_s0 }
0x186d   : > { %18228 = vmatprep.mubr.msk.f32.mxu1 %vm2842_vm9, %v7573_v46  ;;  %7588 = vrot.lane.b32.xlu1 %v7564_v61, %s25689_s0 }
0x1870   : > { %7594 = vrot.lane.b32.xlu0 %v7567_v15, %s25689_s0 }
0x1871   : > { %7592 = vrot.lane.b32.xlu1 %v7566_v23, %s25689_s0 }
0x1874   : > { %20203 = vrot.lane.b32.xlu0 %v20132_v11, %s25691_s6 }
0x1875   : > { %20208 = vrot.lane.b32.xlu1 %v20147_v48, %s25691_s6 }
0x1878   : > { %20218 = vrot.lane.b32.xlu0 %v20139_v26, %s25691_s6 }
0x1879   : > { %20213 = vrot.lane.b32.xlu1 %v20134_v6, %s25691_s6 }
0x18a9   : > { %v23816_v19 = vpop.f32.mrb[40].mxu0 }
0x18aa   : > { %v23818_v43 = vpop.f32.mrb[41].mxu0 }
0x18ad   : > { %v23820_v8 = vpop.f32.mrb[42].mxu0 }
0x18ae   : > { %v23822_v50 = vpop.f32.mrb[43].mxu0 }
0x18c2   : > { %v20174_v28 = vpop.permute.xlu1 %20173 }
0x18c3   : > { %v20176_v34 = vunpack.i.h.bf16 %v20174_v28  ;;  %v20175_v37 = vunpack.i.l.bf16 %v20174_v28 }
0x18c5   : > { %v19116_v44 = vpack.c.bf16 %v20176_v34, %v20175_v37 }
0x18c6   : > { %v7575_v41 = vpop.permute.xlu1 %7574  ;;  %v20184_v10 = vpop.permute.xlu0 %20183 }
0x18c7   : > { %v20186_v16 = vunpack.i.h.bf16 %v20184_v10  ;;  %v20185_v36 = vunpack.i.l.bf16 %v20184_v10  ;;  %19118 = vmatprep.subr.msk.bf16.mxu1 %vm22880_vm10, %v19116_v44 }
0x18c8   : > { %19121 = vmatpush3.bf16.xpose.msk.msra.mxu1 %vm22880_vm10, %v19116_v44 }
0x18c9   : > { %v19122_v22 = vpack.c.bf16 %v20186_v16, %v20185_v36 }
0x18ca   : > { %v20179_v35 = vpop.permute.xlu1 %20178  ;;  %v7579_v20 = vpop.permute.xlu0 %7578 }
0x18cb   : > { %v20181_v55 = vunpack.i.h.bf16 %v20179_v35  ;;  %v20180_v13 = vunpack.i.l.bf16 %v20179_v35  ;;  %19124 = vmatprep.subr.msk.bf16.mxu0 %vm22880_vm10, %v19122_v22 }
0x18cc   : > { %19127 = vmatpush3.bf16.xpose.msk.msra.mxu0 %vm22880_vm10, %v19122_v22 }
0x18cd   : > { %v19128_v1 = vpack.c.bf16 %v20181_v55, %v20180_v13 }
0x18ce   : > { %v20194_v39 = vpop.permute.xlu0 %20193  ;;  %v7577_v59 = vpop.permute.xlu1 %7576 }
0x18cf   : > { %v20196_v9 = vunpack.i.h.bf16 %v20194_v39  ;;  %v20195_v32 = vunpack.i.l.bf16 %v20194_v39  ;;  %18229 = vmatmul.mubr.msk.f32.vlgmr.msra.gmra.mrb[58].mxu1 %vm2842_vm9, %v7575_v41  ;;  %19130 = vmatprep.subr.msk.bf16.mxu1 %vm22880_vm10, %v19128_v1 }
0x18d0   : > { %18235 = vmatprep.mubr.msk.f32.mxu0 %vm2842_vm9, %v7577_v59  ;;  %19133 = vmatpush3.bf16.xpose.msk.msra.mxu1 %vm22880_vm10, %v19128_v1 }
0x18d1   : > { %v19134_v25 = vpack.c.bf16 %v20196_v9, %v20195_v32 }
0x18d2   : > { %v7581_v47 = vpop.permute.xlu0 %7580 }
0x18d3   : > { %v20189_v24 = vpop.permute.xlu1 %20188  ;;  %18236 = vmatmul.mubr.msk.f32.vlgmr.msra.gmra.mrb[46].mxu0 %vm2842_vm9, %v7579_v20  ;;  %18242 = vmatprep.mubr.msk.f32.mxu1 %vm2842_vm9, %v7581_v47 }
0x18d4   : > { %v20191_v57 = vunpack.i.h.bf16 %v20189_v24  ;;  %v20190_v18 = vunpack.i.l.bf16 %v20189_v24  ;;  %19136 = vmatprep.subr.msk.bf16.mxu0 %vm22880_vm10, %v19134_v25 }
0x18d5   : > { %19139 = vmatpush3.bf16.xpose.msk.msra.mxu0 %vm22880_vm10, %v19134_v25 }
0x18d6   : > { %v19140_v2 = vpack.c.bf16 %v20191_v57, %v20190_v18  ;;  %v20199_v29 = vpop.permute.xlu0 %20198 }
0x18d7   : > { %v20201_v58 = vunpack.i.h.bf16 %v20199_v29  ;;  %v20200_v54 = vunpack.i.l.bf16 %v20199_v29  ;;  %v7583_v11 = vpop.permute.xlu1 %7582 }
0x18d8   : > { %18243 = vmatmul.mubr.msk.f32.vlgmr.msra.gmra.mrb[60].mxu1 %vm2842_vm9, %v7583_v11  ;;  %19142 = vmatprep.subr.msk.bf16.mxu1 %vm22880_vm10, %v19140_v2 }
0x18d9   : > { %v19146_v61 = vpack.c.bf16 %v20201_v58, %v20200_v54  ;;  %19145 = vmatpush3.bf16.xpose.msk.msra.mxu1 %vm22880_vm10, %v19140_v2 }
0x18da   : > { %v7587_v51 = vpop.permute.xlu0 %7586 }
0x18db   : > { %v7585_v4 = vpop.permute.xlu1 %7584  ;;  %19148 = vmatprep.subr.msk.bf16.mxu0 %vm22880_vm10, %v19146_v61 }
0x18dc   : > { %18249 = vmatprep.mubr.msk.f32.mxu0 %vm2842_vm9, %v7585_v4 }
0x18dd   : > { %18250 = vmatmul.mubr.msk.f32.vlgmr.msra.gmra.mrb[48].mxu0 %vm2842_vm9, %v7587_v51 }
0x18de   : > { %19151 = vmatpush3.bf16.xpose.msk.msra.mxu0 %vm22880_vm10, %v19146_v61  ;;  %v7591_v52 = vpop.permute.xlu0 %7590 }
0x18df   : > { %v7589_v48 = vpop.permute.xlu1 %7588 }
0x18e0   : > { %18256 = vmatprep.mubr.msk.f32.mxu1 %vm2842_vm9, %v7589_v48 }
0x18e1   : > { %18257 = vmatmul.mubr.msk.f32.vlgmr.msra.gmra.mrb[62].mxu1 %vm2842_vm9, %v7591_v52 }
0x18e2   : > { %v7595_v23 = vpop.permute.xlu0 %7594 }
0x18e3   : > { %v7593_v6 = vpop.permute.xlu1 %7592 }
0x18e4   : > { %18263 = vmatprep.mubr.msk.f32.mxu0 %vm2842_vm9, %v7593_v6 }
0x18e5   : > { %18264 = vmatmul.mubr.msk.f32.vlgmr.msra.gmra.mrb[50].mxu0 %vm2842_vm9, %v7595_v23 }
0x18e6   : > { %v20204_v26 = vpop.permute.xlu0 %20203 }
0x18e7   : > { %v20206_v38 = vunpack.i.h.bf16 %v20204_v26  ;;  %v20205_v15 = vunpack.i.l.bf16 %v20204_v26  ;;  %v20209_v62 = vpop.permute.xlu1 %20208 }
0x18e8   : > { %v20211_v30 = vunpack.i.h.bf16 %v20209_v62  ;;  %v20210_v49 = vunpack.i.l.bf16 %v20209_v62 }
0x18e9   : > { %v19152_v21 = vpack.c.bf16 %v20206_v38, %v20205_v15 }
0x18ea   : > { %v23859_v17 = vpack.c.bf16 %v20211_v30, %v20210_v49  ;;  %v23917_v48 = vpop.permute.xlu0 %20218 }
0x18eb   : > { %v20214_v12 = vpop.permute.xlu1 %20213  ;;  %19153 = vmatprep.subr.bf16.mxu1 %v19152_v21 }
0x18ec   : > { %v20216_v7 = vunpack.i.h.bf16 %v20214_v12  ;;  %v20215_v40 = vunpack.i.l.bf16 %v20214_v12  ;;  %19155 = vmatpush3.bf16.msra.mxu1 %v19152_v21 }
0x18ed   : > { %19157 = vmatprep.subr.bf16.mxu1 %v23859_v17 }
0x18ee   : > { %v19160_v46 = vpack.c.bf16 %v20216_v7, %v20215_v40 }
0x18f0   : > { %19161 = vmatprep.subr.bf16.mxu0 %v19160_v46 }
0x18f1   : > { %19163 = vmatpush3.bf16.msra.mxu0 %v19160_v46 }
0x193b   : > { %v18223_v28 = vpop.f32.mrb[44].mxu0 }
0x193c   : > { %v23862_v34 = vpop.f32.mrb[45].mxu0  ;;  %v8329_v16 = vsel %vm3535_vm11, %v18223_v28, -inf }
0x193d   : > { %v8326_v36 = vsel %vm3535_vm11, %v23862_v34, -inf }
0x193f   : > { %v18216_v37 = vpop.f32.mrb[56].mxu1 }
0x1940   : > { %v7702_v44 = vpop.f32.mrb[57].mxu1  ;;  %v8323_v41 = vsel %vm3535_vm11, %v18216_v37, -inf }
0x1941   : > { %8324 = vmax.xlane.f32.xlu0 %v8323_v41  ;;  %v8320_v10 = vsel %vm3535_vm11, %v7702_v44, -inf }
0x1942   : > { %8321 = vmax.xlane.f32.xlu1 %v8320_v10 }
0x1945   : > { %8330 = vmax.xlane.f32.xlu0 %v8329_v16 }
0x1949   : > { %8327 = vmax.xlane.f32.xlu0 %v8326_v36 }
0x19a2   : > { %v23869_v22 = vpop.f32.mrb[58].mxu1 }
0x19a3   : > { %v23871_v35 = vpop.f32.mrb[59].mxu1  ;;  %v8335_v20 = vsel %vm3535_vm11, %v23869_v22, -inf }
0x19a4   : > { %8336 = vmax.xlane.f32.xlu1 %v8335_v20  ;;  %v8332_v1 = vsel %vm3535_vm11, %v23871_v35, -inf }
0x19a6   : > { %v23875_v55 = vpop.f32.mrb[46].mxu0 }
0x19a7   : > { %v23877_v13 = vpop.f32.mrb[47].mxu0  ;;  %v8341_v39 = vsel %vm3535_vm11, %v23875_v55, -inf }
0x19a8   : > { %8333 = vmax.xlane.f32.xlu1 %v8332_v1  ;;  %8342 = vmax.xlane.f32.xlu0 %v8341_v39  ;;  %v8338_v32 = vsel %vm3535_vm11, %v23877_v13, -inf }
0x19ab   : > { %v23883_v9 = vpop.f32.mrb[60].mxu1 }
0x19ac   : > { %v23887_v59 = vpop.f32.mrb[61].mxu1  ;;  %v8347_v25 = vsel %vm3535_vm11, %v23883_v9, -inf  ;;  %8339 = vmax.xlane.f32.xlu0 %v8338_v32 }
0x19ad   : > { %8348 = vmax.xlane.f32.xlu1 %v8347_v25  ;;  %v8344_v24 = vsel %vm3535_vm11, %v23887_v59, -inf }
0x19b0   : > { %v23891_v47 = vpop.f32.mrb[48].mxu0 }
0x19b1   : > { %8345 = vmax.xlane.f32.xlu1 %v8344_v24  ;;  %v23895_v57 = vpop.f32.mrb[49].mxu0  ;;  %v8353_v18 = vsel %vm3535_vm11, %v23891_v47, -inf }
0x19b2   : > { %8354 = vmax.xlane.f32.xlu0 %v8353_v18  ;;  %v8350_v54 = vsel %vm3535_vm11, %v23895_v57, -inf }
0x19b4   : > { %v23899_v2 = vpop.f32.mrb[62].mxu1 }
0x19b5   : > { %v23901_v29 = vpop.f32.mrb[63].mxu1  ;;  %v8359_v58 = vsel %vm3535_vm11, %v23899_v2, -inf }
0x19b6   : > { %8360 = vmax.xlane.f32.xlu1 %v8359_v58  ;;  %8351 = vmax.xlane.f32.xlu0 %v8350_v54  ;;  %v8356_v51 = vsel %vm3535_vm11, %v23901_v29, -inf }
0x19b8   : > { %v23907_v11 = vpop.f32.mrb[50].mxu0 }
0x19b9   : > { %v23909_v61 = vpop.f32.mrb[51].mxu0  ;;  %v8365_v52 = vsel %vm3535_vm11, %v23907_v11, -inf }
0x19ba   : > { %8357 = vmax.xlane.f32.xlu1 %v8356_v51  ;;  %v8362_v4 = vsel %vm3535_vm11, %v23909_v61, -inf }
0x19bb   : > { %8363 = vmax.xlane.f32.xlu0 %v8362_v4 }
0x19be   : > { %8366 = vmax.xlane.f32.xlu1 %v8365_v52 }
0x19ce   : > { %v8325_v23 = vpop.xlane.xlu0 %8324 }
0x19cf   : > { %20223 = vrot.lane.b32.xlu1 %v23777_v60, %s25691_s6  ;;  %v8322_v6 = vpop.xlane.xlu1 %8321  ;;  %v8369_v15 = vsub.f32 %v18216_v37, %v8325_v23 }
0x19d0   : > { %v8368_v38 = vsub.f32 %v7702_v44, %v8322_v6 }
0x19d1   : > { %20228 = vrot.lane.b32.xlu0 %v23772_v45, %s25691_s6  ;;  %v8386_v21 = vmul.f32 1.442695, %v8369_v15 }
0x19d2   : > { %v8331_v26 = vpop.xlane.xlu0 %8330  ;;  %v8384_v62 = vmul.f32 1.442695, %v8368_v38 }
0x19d3   : > { %v8371_v30 = vsub.f32 %v18223_v28, %v8331_v26 }
0x19d4   : > { %20700 = vpow2.f32 %v8384_v62 }
0x19d5   : > { %v8390_v12 = vmul.f32 1.442695, %v8371_v30  ;;  %20702 = vpow2.f32 %v8386_v21 }
0x19d6   : > { %v8328_v49 = vpop.xlane.xlu0 %8327 }
0x19d7   : > { %v8370_v7 = vsub.f32 %v23862_v34, %v8328_v49  ;;  %20704 = vpow2.f32 %v8390_v12 }
0x19d9   : > { %v8388_v40 = vmul.f32 1.442695, %v8370_v7 }
0x19db   : > { %20706 = vpow2.f32 %v8388_v40 }
0x19de   : > { %v23924_v60 = vpop.eup %20700 }
0x19df   : > { %v23926_v45 = vpop.eup %20702  ;;  %v8416_v46 = vsel %vm3535_vm11, %v23924_v60, 0.0 }
0x19e0   : > { %v8419_v28 = vsel %vm3535_vm11, %v23926_v45, 0.0 }
0x19e1   : > { %v23930_v37 = vpop.eup %20704 }
0x19e2   : > { %v8425_v34 = vsel %vm3535_vm11, %v23930_v37, 0.0 }
0x19e5   : > { %v23936_v44 = vpop.eup %20706 }
0x19e6   : > { %v8422_v41 = vsel %vm3535_vm11, %v23936_v44, 0.0 }
0x19f0   : > { %8417 = vadd.xlane.f32.xlu0 %v8416_v46 }
0x19f3   : > { %8420 = vadd.xlane.f32.xlu1 %v8419_v28 }
0x19f4   : > { %8426 = vadd.xlane.f32.xlu0 %v8425_v34 }
0x19f8   : > { %8423 = vadd.xlane.f32.xlu0 %v8422_v41 }
0x1a31   : > { %v8337_v10 = vpop.xlane.xlu1 %8336 }
0x1a32   : > { %v8373_v16 = vsub.f32 %v23869_v22, %v8337_v10 }
0x1a34   : > { %v8394_v36 = vmul.f32 1.442695, %v8373_v16 }
0x1a35   : > { %v8334_v20 = vpop.xlane.xlu1 %8333  ;;  %v8343_v1 = vpop.xlane.xlu0 %8342 }
0x1a36   : > { %20708 = vpow2.f32 %v8394_v36  ;;  %v8372_v39 = vsub.f32 %v23871_v35, %v8334_v20  ;;  %v8375_v32 = vsub.f32 %v23875_v55, %v8343_v1 }
0x1a38   : > { %v8392_v25 = vmul.f32 1.442695, %v8372_v39  ;;  %v8398_v24 = vmul.f32 1.442695, %v8375_v32 }
0x1a39   : > { %v8340_v18 = vpop.xlane.xlu0 %8339 }
0x1a3a   : > { %20710 = vpow2.f32 %v8392_v25  ;;  %v8349_v58 = vpop.xlane.xlu1 %8348  ;;  %v8374_v54 = vsub.f32 %v23877_v13, %v8340_v18 }
0x1a3b   : > { %20712 = vpow2.f32 %v8398_v24  ;;  %v8377_v51 = vsub.f32 %v23883_v9, %v8349_v58 }
0x1a3c   : > { %v8396_v4 = vmul.f32 1.442695, %v8374_v54 }
0x1a3d   : > { %v8402_v22 = vmul.f32 1.442695, %v8377_v51 }
0x1a3e   : > { %20714 = vpow2.f32 %v8396_v4  ;;  %v8346_v52 = vpop.xlane.xlu1 %8345 }
0x1a3f   : > { %20716 = vpow2.f32 %v8402_v22  ;;  %v8376_v23 = vsub.f32 %v23887_v59, %v8346_v52  ;;  %v8355_v35 = vpop.xlane.xlu0 %8354 }
0x1a40   : > { %v23946_v6 = vpop.eup %20708  ;;  %v8379_v55 = vsub.f32 %v23891_v47, %v8355_v35 }
0x1a41   : > { %v8400_v26 = vmul.f32 1.442695, %v8376_v23  ;;  %v8431_v38 = vsel %vm3535_vm11, %v23946_v6, 0.0 }
0x1a42   : > { %v8406_v13 = vmul.f32 1.442695, %v8379_v55  ;;  %8432 = vadd.xlane.f32.xlu1 %v8431_v38 }
0x1a43   : > { %20718 = vpow2.f32 %v8400_v26  ;;  %v8361_v9 = vpop.xlane.xlu1 %8360  ;;  %v8352_v15 = vpop.xlane.xlu0 %8351 }
0x1a44   : > { %v23951_v62 = vpop.eup %20710  ;;  %20720 = vpow2.f32 %v8406_v13  ;;  %v8381_v30 = vsub.f32 %v23899_v2, %v8361_v9  ;;  %v8378_v59 = vsub.f32 %v23895_v57, %v8352_v15 }
0x1a45   : > { %v23955_v49 = vpop.eup %20712  ;;  %v8428_v47 = vsel %vm3535_vm11, %v23951_v62, 0.0 }
0x1a46   : > { %v8410_v21 = vmul.f32 1.442695, %v8381_v30  ;;  %v8404_v12 = vmul.f32 1.442695, %v8378_v59  ;;  %8429 = vadd.xlane.f32.xlu1 %v8428_v47  ;;  %v8437_v7 = vsel %vm3535_vm11, %v23955_v49, 0.0 }
0x1a47   : > { %v8358_v40 = vpop.xlane.xlu1 %8357  ;;  %8438 = vadd.xlane.f32.xlu0 %v8437_v7  ;;  %v20220_v7 = vunpack.i.l.bf16 %v23917_v48 }
0x1a48   : > { %v23961_v46 = vpop.eup %20714  ;;  %20722 = vpow2.f32 %v8410_v21  ;;  %v8380_v2 = vsub.f32 %v23901_v29, %v8358_v40  ;;  %v8364_v28 = vpop.xlane.xlu0 %8363 }
0x1a49   : > { %v23964_v57 = vpop.eup %20716  ;;  %20724 = vpow2.f32 %v8404_v12  ;;  %v8382_v34 = vsub.f32 %v23909_v61, %v8364_v28  ;;  %v8434_v41 = vsel %vm3535_vm11, %v23961_v46, 0.0  ;;  %v20221_v12 = vunpack.i.h.bf16 %v23917_v48 }
0x1a4a   : > { %v8408_v10 = vmul.f32 1.442695, %v8380_v2  ;;  %v8443_v16 = vsel %vm3535_vm11, %v23964_v57, 0.0 }
0x1a4b   : > { %v8412_v36 = vmul.f32 1.442695, %v8382_v34  ;;  %8444 = vadd.xlane.f32.xlu1 %v8443_v16  ;;  %v8367_v20 = vpop.xlane.xlu1 %8366  ;;  %8435 = vadd.xlane.f32.xlu0 %v8434_v41  ;;  %v19164_v40 = vpack.c.bf16 %v20221_v12, %v20220_v7 }
0x1a4c   : > { %20726 = vpow2.f32 %v8408_v10  ;;  %v8383_v29 = vsub.f32 %v23907_v11, %v8367_v20  ;;  %v20229_v13 = vpop.permute.xlu0 %20228 }
0x1a4d   : > { %v23972_v1 = vpop.eup %20718  ;;  %20728 = vpow2.f32 %v8412_v36  ;;  %v20231_v34 = vunpack.i.h.bf16 %v20229_v13  ;;  %v20230_v41 = vunpack.i.l.bf16 %v20229_v13 }
0x1a4e   : > { %v23974_v39 = vpop.eup %20720  ;;  %v8414_v61 = vmul.f32 1.442695, %v8383_v29  ;;  %v8440_v32 = vsel %vm3535_vm11, %v23972_v1, 0.0 }
0x1a4f   : > { %8441 = vadd.xlane.f32.xlu1 %v8440_v32  ;;  %v20224_v25 = vpop.permute.xlu1 %20223  ;;  %v8449_v24 = vsel %vm3535_vm11, %v23974_v39, 0.0  ;;  %v19172_v48 = vpack.c.bf16 %v20231_v34, %v20230_v41 }
0x1a50   : > { %20730 = vpow2.f32 %v8414_v61  ;;  %v20226_v18 = vunpack.i.h.bf16 %v20224_v25  ;;  %v20225_v58 = vunpack.i.l.bf16 %v20224_v25  ;;  %8450 = vadd.xlane.f32.xlu0 %v8449_v24 }
0x1a52   : > { %v23980_v54 = vpop.eup %20722  ;;  %v23982_v11 = vpack.c.bf16 %v20226_v18, %v20225_v58 }
0x1a53   : > { %v23984_v51 = vpop.eup %20724  ;;  %v8455_v4 = vsel %vm3535_vm11, %v23980_v54, 0.0 }
0x1a54   : > { %8456 = vadd.xlane.f32.xlu1 %v8455_v4  ;;  %19169 = vmatprep.subr.bf16.mxu0 %v23982_v11  ;;  %v8446_v22 = vsel %vm3535_vm11, %v23984_v51, 0.0 }
0x1a55   : > { %8447 = vadd.xlane.f32.xlu0 %v8446_v22 }
0x1a56   : > { %v23991_v52 = vpop.eup %20726 }
0x1a57   : > { %v23993_v23 = vpop.eup %20728  ;;  %v8452_v35 = vsel %vm3535_vm11, %v23991_v52, 0.0 }
0x1a58   : > { %8453 = vadd.xlane.f32.xlu1 %v8452_v35  ;;  %v8458_v55 = vsel %vm3535_vm11, %v23993_v23, 0.0 }
0x1a59   : > { %8459 = vadd.xlane.f32.xlu0 %v8458_v55 }
0x1a5a   : > { %v23999_v26 = vpop.eup %20730 }
0x1a5b   : > { %v8461_v38 = vsel %vm3535_vm11, %v23999_v26, 0.0 }
0x1a5c   : > { %8462 = vadd.xlane.f32.xlu1 %v8461_v38 }
0x1a6d   : > { %20233 = vrot.lane.b32.xlu1 %v23781_v3, %s25691_s6 }
0x1a6f   : > { %20238 = vrot.lane.b32.xlu0 %v23775_v0, %s25691_s6 }
0x1a7d   : > { %v8418_v9 = vpop.xlane.xlu0 %8417 }
0x1a7e   : > { %20732 = vrcp.f32 %v8418_v9 }
0x1a80   : > { %v8421_v15 = vpop.xlane.xlu1 %8420 }
0x1a81   : > { %20734 = vrcp.f32 %v8421_v15  ;;  %v8427_v30 = vpop.xlane.xlu0 %8426 }
0x1a82   : > { %20736 = vrcp.f32 %v8427_v30 }
0x1a85   : > { %v8424_v59 = vpop.xlane.xlu0 %8423 }
0x1a86   : > { %20738 = vrcp.f32 %v8424_v59 }
0x1a88   : > { %v20733_v47 = vpop.eup %20732 }
0x1a89   : > { %v8480_v21 = vmul.f32 %v20733_v47, %v23924_v60 }
0x1a8b   : > { %v20735_v3 = vpop.eup %20734  ;;  %18270 = vmatprep.mubr.msk.f32.mxu1 %vm3535_vm11, %v8480_v21 }
0x1a8c   : > { %v8481_v0 = vmul.f32 %v20735_v3, %v23926_v45  ;;  %v20737_v2 = vpop.eup %20736 }
0x1a8d   : > { %v8483_v10 = vmul.f32 %v20737_v2, %v23930_v37 }
0x1a8e   : > { %18271 = vmatmul.mubr.msk.f32.vlgmr.msra.gmra.mrb[64].mxu1 %vm3535_vm11, %v8481_v0 }
0x1a8f   : > { %19159 = vmatpush3.bf16.msra.mxu1 %v23859_v17 }
0x1a90   : > { %v20739_v28 = vpop.eup %20738  ;;  %19165 = vmatprep.subr.bf16.mxu1 %v19164_v40 }
0x1a91   : > { %v8482_v60 = vmul.f32 %v20739_v28, %v23936_v44 }
0x1a93   : > { %18277 = vmatprep.mubr.msk.f32.mxu1 %vm3535_vm11, %v8482_v60 }
0x1a94   : > { %18278 = vmatmul.mubr.msk.f32.vlgmr.msra.gmra.mrb[66].mxu1 %vm3535_vm11, %v8483_v10 }
0x1a95   : > { %19167 = vmatpush3.bf16.msra.mxu1 %v19164_v40 }
0x1a96   : > { %19173 = vmatprep.subr.bf16.mxu1 %v19172_v48 }
0x1acf   : > { %v8433_v45 = vpop.xlane.xlu1 %8432 }
0x1ad0   : > { %20740 = vrcp.f32 %v8433_v45 }
0x1ad3   : > { %v8430_v16 = vpop.xlane.xlu1 %8429 }
0x1ad4   : > { %20742 = vrcp.f32 %v8430_v16  ;;  %v8439_v17 = vpop.xlane.xlu0 %8438 }
0x1ad5   : > { %20744 = vrcp.f32 %v8439_v17  ;;  %v9254_v17 = vld [vmem:[%s25692_s7 + $0x10] sm:$0xff] }
0x1ad8   : > { %v8445_v36 = vpop.xlane.xlu1 %8444  ;;  %v8436_v20 = vpop.xlane.xlu0 %8435 }
0x1ad9   : > { %20746 = vrcp.f32 %v8436_v20 }
0x1ada   : > { %20748 = vrcp.f32 %v8445_v36  ;;  %v20741_v29 = vpop.eup %20740  ;;  %v9255_v36 = vld [vmem:[%s25692_s7 + $0x18] sm:$0xff] }
0x1adb   : > { %v8485_v25 = vmul.f32 %v20741_v29, %v23946_v6  ;;  %v19188_v20 = vpack.c.bf16 %v9255_v36, %v9254_v17 }
0x1adc   : > { %v8442_v44 = vpop.xlane.xlu1 %8441 }
0x1add   : > { %20750 = vrcp.f32 %v8442_v44  ;;  %v8451_v37 = vpop.xlane.xlu0 %8450 }
0x1ade   : > { %v20743_v61 = vpop.eup %20742  ;;  %20752 = vrcp.f32 %v8451_v37 }
0x1adf   : > { %v8484_v32 = vmul.f32 %v20743_v61, %v23951_v62  ;;  %v20745_v58 = vpop.eup %20744 }
0x1ae0   : > { %v8487_v6 = vmul.f32 %v20745_v58, %v23955_v49 }
0x1ae1   : > { %v8457_v24 = vpop.xlane.xlu1 %8456  ;;  %18284 = vmatprep.mubr.msk.f32.mxu0 %vm3535_vm11, %v8484_v32 }
0x1ae2   : > { %v8448_v18 = vpop.xlane.xlu0 %8447  ;;  %18285 = vmatmul.mubr.msk.f32.vlgmr.msra.gmra.mrb[52].mxu0 %vm3535_vm11, %v8485_v25 }
0x1ae3   : > { %20754 = vrcp.f32 %v8448_v18  ;;  %19171 = vmatpush3.bf16.msra.mxu0 %v23982_v11  ;;  %v20747_v4 = vpop.eup %20746 }
0x1ae4   : > { %20756 = vrcp.f32 %v8457_v24  ;;  %v8486_v35 = vmul.f32 %v20747_v4, %v23961_v46  ;;  %v20749_v55 = vpop.eup %20748 }
0x1ae5   : > { %v8454_v22 = vpop.xlane.xlu1 %8453  ;;  %v8489_v9 = vmul.f32 %v20749_v55, %v23964_v57 }
0x1ae6   : > { %20758 = vrcp.f32 %v8454_v22  ;;  %v8460_v62 = vpop.xlane.xlu0 %8459  ;;  %18291 = vmatprep.mubr.msk.f32.mxu1 %vm3535_vm11, %v8486_v35  ;;  %v16980_v22 = vld [vmem:[#allocation31] ss:$0 sm:$0xff] }
0x1ae7   : > { %v20751_v38 = vpop.eup %20750  ;;  %20760 = vrcp.f32 %v8460_v62  ;;  %18292 = vmatmul.mubr.msk.f32.vlgmr.msra.gmra.mrb[68].mxu1 %vm3535_vm11, %v8487_v6  ;;  %v7235_v35 = vadd.f32 %v23816_v19, %v16980_v22  ;;  %v7240_v62 = vadd.f32 %v16980_v22, %v23822_v50  ;;  %v7230_v6 = vadd.f32 %v16980_v22, %v23818_v43 }
0x1ae8   : > { %v8488_v13 = vmul.f32 %v20751_v38, %v23972_v1  ;;  %19175 = vmatpush3.bf16.msra.mxu1 %v19172_v48  ;;  %v20753_v49 = vpop.eup %20752 }
0x1ae9   : > { %v8463_v11 = vpop.xlane.xlu1 %8462  ;;  %v8491_v57 = vmul.f32 %v20753_v49, %v23974_v39  ;;  %v7249_v55 = vadd.f32 %v7235_v35, %v23613_v27  ;;  %v24072_v38 = vadd.f32 %v7240_v62, %v23628_v5 }
0x1aea   : > { %20762 = vrcp.f32 %v8463_v11  ;;  %18298 = vmatprep.mubr.msk.f32.mxu0 %vm3535_vm11, %v8488_v13  ;;  %v20239_v46 = vpop.permute.xlu0 %20238  ;;  %v7248_v11 = vadd.f32 %v7230_v6, %v23616_v63 }
0x1aeb   : > { %v20241_v15 = vunpack.i.h.bf16 %v20239_v46  ;;  %v20240_v30 = vunpack.i.l.bf16 %v20239_v46  ;;  %18299 = vmatmul.mubr.msk.f32.vlgmr.msra.gmra.mrb[54].mxu0 %vm3535_vm11, %v8489_v9  ;;  %v7255_v13 = vsel %vm2566_vm0, %v7249_v55, 0.0  ;;  %v7245_v9 = vadd.f32 %v23820_v8, %v16980_v22 }
0x1aec   : > { %v7258_v46 = vsel %vm2566_vm0, %v24072_v38, 0.0  ;;  %v7252_v19 = vsel %vm2566_vm0, %v7248_v11, 0.0 }
0x1aed   : > { %v20755_v59 = vpop.eup %20754  ;;  %v20234_v47 = vpop.permute.xlu1 %20233  ;;  %v19180_v21 = vpack.c.bf16 %v20241_v15, %v20240_v30  ;;  %v7251_v27 = vadd.f32 %v7245_v9, %v23625_v42 }
0x1aee   : > { %v20236_v12 = vunpack.i.h.bf16 %v20234_v47  ;;  %v20235_v7 = vunpack.i.l.bf16 %v20234_v47  ;;  %v8490_v1 = vmul.f32 %v20755_v59, %v23984_v51  ;;  %v20757_v3 = vpop.eup %20756 }
0x1aef   : > { %19181 = vmatprep.subr.bf16.mxu1 %v19180_v21  ;;  %v8493_v39 = vmul.f32 %v20757_v3, %v23980_v54  ;;  %v9252_v54 = vld [vmem:[%s25692_s7] sm:$0xff]  ;;  %v7261_v43 = vsel %vm2566_vm0, %v7251_v27, 0.0 }
0x1af0   : > { %v20759_v0 = vpop.eup %20758  ;;  %18305 = vmatprep.mubr.msk.f32.mxu1 %vm3535_vm11, %v8490_v1  ;;  %v19176_v40 = vpack.c.bf16 %v20236_v12, %v20235_v7 }
0x1af1   : > { %v20761_v2 = vpop.eup %20760  ;;  %18306 = vmatmul.mubr.msk.f32.vlgmr.msra.gmra.mrb[70].mxu1 %vm3535_vm11, %v8491_v57  ;;  %v8492_v28 = vmul.f32 %v20759_v0, %v23991_v52 }
0x1af2   : > { %19183 = vmatpush3.bf16.msra.mxu1 %v19180_v21  ;;  %19177 = vmatprep.subr.bf16.mxu0 %v19176_v40  ;;  %v8494_v34 = vmul.f32 %v20761_v2, %v23993_v23 }
0x1af3   : > { %19179 = vmatpush3.bf16.msra.mxu0 %v19176_v40  ;;  %18312 = vmatprep.mubr.msk.f32.mxu0 %vm3535_vm11, %v8492_v28 }
0x1af4   : > { %v20763_v51 = vpop.eup %20762  ;;  %18319 = vmatprep.mubr.msk.f32.mxu1 %vm3535_vm11, %v8494_v34 }
0x1af5   : > { %v8495_v41 = vmul.f32 %v20763_v51, %v23999_v26  ;;  %v9253_v26 = vld [vmem:[%s25692_s7 + $0x8] sm:$0xff]  ;;  %s25695_s7 = sld [smem:[#allocation68_spill]] }
0x1af6   : > { %18313 = vmatmul.mubr.msk.f32.vlgmr.msra.gmra.mrb[56].mxu0 %vm3535_vm11, %v8493_v39  ;;  %v19184_v16 = vpack.c.bf16 %v9253_v26, %v9252_v54 }
0x1af7   : > { %18320 = vmatmul.mubr.msk.f32.vlgmr.msra.gmra.mrb[72].mxu1 %vm3535_vm11, %v8495_v41 }
0x1af8   : > { %19185 = vmatprep.subr.bf16.mxu0 %v19184_v16 }
0x1af9   : > { %19187 = vmatpush3.bf16.msra.mxu0 %v19184_v16 }
0x1afa   : > { %19189 = vmatprep.subr.bf16.mxu0 %v19188_v20 }
0x1afd   : > { %19191 = vmatpush3.bf16.msra.mxu0 %v19188_v20 }
0x1b61   : > { %v24043_v52 = vpop.f32.mrb[64].mxu1 }
0x1b62   : > { %v24045_v23 = vpop.f32.mrb[65].mxu1 }
0x1b67   : > { %v24047_v60 = vpop.f32.mrb[66].mxu1 }
0x1b68   : > { %v24049_v10 = vpop.f32.mrb[67].mxu1 }
0x1bb5   : > { %v18286_v48 = vpop.f32.mrb[52].mxu0 }
0x1bb6   : > { %v8748_v45 = vpop.f32.mrb[53].mxu0  ;;  %9198 = vrot.lane.b32.xlu0 %v18286_v48, %s25693_s8 }
0x1bb7   : > { %9196 = vrot.lane.b32.xlu1 %v8748_v45, %s25693_s8 }
0x1bba   : > { %v18293_v44 = vpop.f32.mrb[68].mxu1 }
0x1bbb   : > { %9202 = vrot.lane.b32.xlu0 %v18293_v44, %s25693_s8  ;;  %v8835_v29 = vpop.f32.mrb[69].mxu1 }
0x1bbc   : > { %9200 = vrot.lane.b32.xlu1 %v8835_v29, %s25693_s8 }
0x1bbe   : > { %v18300_v37 = vpop.f32.mrb[54].mxu0 }
0x1bbf   : > { %v8922_v61 = vpop.f32.mrb[55].mxu0  ;;  %9214 = vrot.lane.b32.xlu0 %v18300_v37, %s25694_s10 }
0x1bc0   : > { %9212 = vrot.lane.b32.xlu1 %v8922_v61, %s25694_s10 }
0x1bc4   : > { %v18307_v32 = vpop.f32.mrb[70].mxu1 }
0x1bc5   : > { %9218 = vrot.lane.b32.xlu0 %v18307_v32, %s25694_s10  ;;  %v9009_v25 = vpop.f32.mrb[71].mxu1 }
0x1bc6   : > { %9216 = vrot.lane.b32.xlu1 %v9009_v25, %s25694_s10 }
0x1bc9   : > { %v18314_v24 = vpop.f32.mrb[56].mxu0 }
0x1bca   : > { %v9096_v18 = vpop.f32.mrb[57].mxu0  ;;  %9230 = vrot.lane.b32.xlu0 %v18314_v24, %s25680_s5  ;;  %v18321_v58 = vpop.f32.mrb[72].mxu1 }
0x1bcb   : > { %9228 = vrot.lane.b32.xlu1 %v9096_v18, %s25680_s5  ;;  %v9183_v4 = vpop.f32.mrb[73].mxu1 }
0x1bce   : > { %9234 = vrot.lane.b32.xlu0 %v18321_v58, %s25680_s5 }
0x1bcf   : > { %9232 = vrot.lane.b32.xlu1 %v9183_v4, %s25680_s5 }
0x1bed   : > { %7256 = vadd.xlane.f32.xlu0 %v7255_v13 }
0x1bf1   : > { %7259 = vadd.xlane.f32.xlu0 %v7258_v46 }
0x1bf3   : > { %7253 = vadd.xlane.f32.xlu1 %v7252_v19 }
0x1bf7   : > { %7262 = vadd.xlane.f32.xlu1 %v7261_v43 }
0x1c28   : > { %v9199_v5 = vpop.permute.xlu0 %9198 }
0x1c29   : > { %v9197_v50 = vpop.permute.xlu1 %9196  ;;  %v9241_v42 = vsel %vm2842_vm9, %v24043_v52, %v9199_v5 }
0x1c2a   : > { %v9240_v47 = vsel %vm2842_vm9, %v24045_v23, %v9197_v50 }
0x1c2d   : > { %v9203_v15 = vpop.permute.xlu0 %9202 }
0x1c2e   : > { %v9201_v30 = vpop.permute.xlu1 %9200  ;;  %v9243_v2 = vsel %vm2842_vm9, %v24047_v60, %v9203_v15 }
0x1c2f   : > { %v9242_v0 = vsel %vm2842_vm9, %v24049_v10, %v9201_v30  ;;  %v17042_v10 = vld [vmem:[%s25695_s7] ss:$0 sm:$0xff]  ;;  %s25696_s7 = sld [smem:[#allocation79_spill]] }
0x1c31   : > { %v9215_v49 = vpop.permute.xlu0 %9214 }
0x1c32   : > { %v9213_v63 = vpop.permute.xlu1 %9212  ;;  %v9245_v1 = vsel %vm3535_vm11, %v9241_v42, %v9215_v49 }
0x1c33   : > { %v9244_v12 = vsel %vm3535_vm11, %v9240_v47, %v9213_v63 }
0x1c35   : > { %v9574_v19 = vld [vmem:[%s25696_s7] sm:$0xff]  ;;  %v9575_v43 = vld [vmem:[%s25696_s7 + $0x8] sm:$0xff]  ;;  %v9576_v5 = vld [vmem:[%s25696_s7 + $0x10] sm:$0xff] }
0x1c36   : > { %v19200_v50 = vpack.c.bf16 %v9575_v43, %v9574_v19  ;;  %v9577_v15 = vld [vmem:[%s25696_s7 + $0x18] sm:$0xff]  ;;  %s25697_s7 = sld [smem:[#allocation81_spill]] }
0x1c37   : > { %v9219_v59 = vpop.permute.xlu0 %9218  ;;  %v19204_v30 = vpack.c.bf16 %v9577_v15, %v9576_v5  ;;  %v16985_v15 = vld [vmem:[#allocation42] ss:$0 sm:$0xff] }
0x1c38   : > { %v9217_v8 = vpop.permute.xlu1 %9216  ;;  %v9247_v51 = vsel %vm3535_vm11, %v9243_v2, %v9219_v59  ;;  %19201 = vmatprep.subr.bf16.mxu0 %v19200_v50 }
0x1c39   : > { %v9246_v28 = vsel %vm3535_vm11, %v9242_v0, %v9217_v8 }
0x1c3c   : > { %v9231_v21 = vpop.permute.xlu0 %9230 }
0x1c3d   : > { %v9229_v7 = vpop.permute.xlu1 %9228  ;;  %v9249_v57 = vsel %vm4464_vm12, %v9245_v1, %v9231_v21 }
0x1c3e   : > { %v9248_v3 = vsel %vm4464_vm12, %v9244_v12, %v9229_v7 }
0x1c3f   : > { %18330 = vmatprep.mubr.msk.f32.mxu0 %vm2566_vm0, %v9248_v3 }
0x1c40   : > { %18331 = vmatmul.mubr.msk.f32.vlgmr.msra.gmra.mrb[58].mxu0 %vm2566_vm0, %v9249_v57  ;;  %v9235_v40 = vpop.permute.xlu0 %9234 }
0x1c41   : > { %v9233_v34 = vpop.permute.xlu1 %9232  ;;  %v9251_v41 = vsel %vm4464_vm12, %v9247_v51, %v9235_v40  ;;  %19203 = vmatpush3.bf16.msra.mxu0 %v19200_v50 }
0x1c42   : > { %v9250_v39 = vsel %vm4464_vm12, %v9246_v28, %v9233_v34  ;;  %19205 = vmatprep.subr.bf16.mxu0 %v19204_v30 }
0x1c43   : > { %18333 = vmatprep.mubr.msk.f32.mxu0 %vm2566_vm0, %v9250_v39 }
0x1c44   : > { %18334 = vmatmul.mubr.msk.f32.gmra.mrb[60].mxu0 %vm2566_vm0, %v9251_v41 }
0x1c45   : > { %19207 = vmatpush3.bf16.msra.mxu0 %v19204_v30 }
0x1c7a   : > { %v7257_v23 = vpop.xlane.xlu0 %7256 }
0x1c7b   : > { %v7265_v45 = vmul.f32 0.03125, %v7257_v23 }
0x1c7d   : > { %v24109_v37 = vsub.f32 %v7249_v55, %v7265_v45 }
0x1c7e   : > { %v7260_v36 = vpop.xlane.xlu0 %7259 }
0x1c7f   : > { %v7266_v18 = vmul.f32 0.03125, %v7260_v36  ;;  %v7273_v62 = vmul.f32 %v24109_v37, %v24109_v37 }
0x1c80   : > { %v7254_v52 = vpop.xlane.xlu1 %7253 }
0x1c81   : > { %v7264_v26 = vmul.f32 0.03125, %v7254_v52  ;;  %v24130_v6 = vsub.f32 %v24072_v38, %v7266_v18  ;;  %v7279_v13 = vsel %vm2566_vm0, %v7273_v62, 0.0 }
0x1c83   : > { %v24113_v58 = vsub.f32 %v7248_v11, %v7264_v26  ;;  %v7274_v9 = vmul.f32 %v24130_v6, %v24130_v6 }
0x1c84   : > { %v7263_v16 = vpop.xlane.xlu1 %7262 }
0x1c85   : > { %v7267_v61 = vmul.f32 0.03125, %v7263_v16 }
0x1c87   : > { %v24123_v35 = vsub.f32 %v7251_v27, %v7267_v61  ;;  %v7282_v27 = vsel %vm2566_vm0, %v7274_v9, 0.0 }
0x1c89   : > { %v7275_v11 = vmul.f32 %v24123_v35, %v24123_v35 }
0x1c8b   : > { %v7285_v46 = vsel %vm2566_vm0, %v7275_v11, 0.0 }
0x1d13   : > { %v18332_v48 = vpop.f32.mrb[58].mxu0 }
0x1d14   : > { %v9347_v54 = vadd.f32 %v18332_v48, %v17042_v10  ;;  %v9341_v60 = vpop.f32.mrb[59].mxu0 }
0x1d15   : > { %v9342_v17 = vadd.f32 %v17042_v10, %v9341_v60 }
0x1d16   : > { %v24104_v20 = vadd.f32 %v9347_v54, %v23630_v31 }
0x1d17   : > { %v24107_v44 = vadd.f32 %v9342_v17, %v23610_v53  ;;  %v18335_v29 = vpop.f32.mrb[60].mxu0 }
0x1d18   : > { %v9357_v32 = vadd.f32 %v18335_v29, %v17042_v10  ;;  %v9351_v25 = vpop.f32.mrb[61].mxu0  ;;  %v9367_v24 = vsel %vm2566_vm0, %v24104_v20, 0.0 }
0x1d19   : > { %v9352_v4 = vadd.f32 %v17042_v10, %v9351_v25  ;;  %9368 = vadd.xlane.f32.xlu1 %v9367_v24  ;;  %v9364_v31 = vsel %vm2566_vm0, %v24107_v44, 0.0 }
0x1d1a   : > { %v24118_v53 = vadd.f32 %v9357_v32, %v23638_v33  ;;  %9365 = vadd.xlane.f32.xlu0 %v9364_v31 }
0x1d1b   : > { %v24121_v22 = vadd.f32 %v9352_v4, %v23622_v14  ;;  %v7272_v14 = vmul.f32 %v24113_v58, %v24113_v58 }
0x1d1c   : > { %v9373_v55 = vsel %vm2566_vm0, %v24118_v53, 0.0 }
0x1d1d   : > { %9374 = vadd.xlane.f32.xlu1 %v9373_v55  ;;  %v9370_v33 = vsel %vm2566_vm0, %v24121_v22, 0.0  ;;  %v7276_v38 = vsel %vm2566_vm0, %v7272_v14, 0.0 }
0x1d1e   : > { %9371 = vadd.xlane.f32.xlu0 %v9370_v33 }
0x1d21   : > { %7280 = vadd.xlane.f32.xlu1 %v7279_v13 }
0x1d22   : > { %7277 = vadd.xlane.f32.xlu0 %v7276_v38 }
0x1d25   : > { %7286 = vadd.xlane.f32.xlu1 %v7285_v46 }
0x1d26   : > { %7283 = vadd.xlane.f32.xlu0 %v7282_v27 }
0x1da6   : > { %v9369_v49 = vpop.xlane.xlu1 %9368 }
0x1da7   : > { %v9377_v63 = vmul.f32 0.03125, %v9369_v49  ;;  %v9366_v59 = vpop.xlane.xlu0 %9365 }
0x1da8   : > { %v9376_v8 = vmul.f32 0.03125, %v9366_v59 }
0x1da9   : > { %v24149_v47 = vsub.f32 %v24104_v20, %v9377_v63 }
0x1daa   : > { %v24152_v21 = vsub.f32 %v24107_v44, %v9376_v8  ;;  %v9375_v42 = vpop.xlane.xlu1 %9374  ;;  %v16986_v8 = vld [vmem:[#allocation43] ss:$0 sm:$0xff] }
0x1dab   : > { %v9379_v12 = vmul.f32 0.03125, %v9375_v42  ;;  %v9372_v7 = vpop.xlane.xlu0 %9371  ;;  %v9385_v1 = vmul.f32 %v24149_v47, %v24149_v47 }
0x1dac   : > { %v9378_v3 = vmul.f32 0.03125, %v9372_v7  ;;  %v9384_v57 = vmul.f32 %v24152_v21, %v24152_v21 }
0x1dad   : > { %v24159_v0 = vsub.f32 %v24118_v53, %v9379_v12  ;;  %v9391_v40 = vsel %vm2566_vm0, %v9385_v1, 0.0 }
0x1dae   : > { %v24163_v2 = vsub.f32 %v24121_v22, %v9378_v3  ;;  %9392 = vadd.xlane.f32.xlu1 %v9391_v40  ;;  %v7281_v28 = vpop.xlane.xlu1 %7280  ;;  %v9388_v34 = vsel %vm2566_vm0, %v9384_v57, 0.0 }
0x1daf   : > { %v7289_v51 = vmul.f32 0.032258064, %v7281_v28  ;;  %9389 = vadd.xlane.f32.xlu0 %v9388_v34  ;;  %v7278_v39 = vpop.xlane.xlu0 %7277  ;;  %v9387_v41 = vmul.f32 %v24159_v0, %v24159_v0  ;;  %v9467_v34 = vld [vmem:[%s25697_s7 + $0x8] sm:$0xff] }
0x1db0   : > { %v7288_v52 = vmul.f32 0.032258064, %v7278_v39  ;;  %v9386_v23 = vmul.f32 %v24163_v2, %v24163_v2 }
0x1db1   : > { %20764 = vrsqrt.f32 %v7289_v51  ;;  %v9397_v48 = vsel %vm2566_vm0, %v9387_v41, 0.0  ;;  %vm7301_vm15 = vcmp.eq.f32.partialorder %v7289_v51, inf  ;;  %v7304_v29 = vand.u32 2147483648, %v7289_v51  ;;  %v9469_v41 = vld [vmem:[%s25697_s7 + $0x18] sm:$0xff] }
0x1db2   : > { %20766 = vrsqrt.f32 %v7288_v52  ;;  %v7287_v10 = vpop.xlane.xlu1 %7286  ;;  %v9394_v54 = vsel %vm2566_vm0, %v9386_v23, 0.0  ;;  %9398 = vadd.xlane.f32.xlu1 %v9397_v48  ;;  %vm7303_vm1 = vcmp.eq.f32.partialorder %v7289_v51, 0.0  ;;  %vm7294_vm2 = vcmp.eq.f32.partialorder %v7288_v52, inf }
0x1db3   : > { %v7291_v45 = vmul.f32 0.032258064, %v7287_v10  ;;  %v7284_v60 = vpop.xlane.xlu0 %7283  ;;  %9395 = vadd.xlane.f32.xlu0 %v9394_v54  ;;  %v7297_v25 = vand.u32 2147483648, %v7288_v52  ;;  %vm7296_vm3 = vcmp.eq.f32.partialorder %v7288_v52, 0.0 }
0x1db4   : > { %v7290_v26 = vmul.f32 0.032258064, %v7284_v60 }
0x1db5   : > { %20768 = vrsqrt.f32 %v7291_v45  ;;  %vm7315_vm4 = vcmp.eq.f32.partialorder %v7291_v45, inf  ;;  %vm7317_vm5 = vcmp.eq.f32.partialorder %v7291_v45, 0.0  ;;  %v7318_v13 = vand.u32 2147483648, %v7291_v45 }
0x1db6   : > { %20770 = vrsqrt.f32 %v7290_v26  ;;  %vm7308_vm7 = vcmp.eq.f32.partialorder %v7290_v26, inf  ;;  %v7311_v9 = vand.u32 2147483648, %v7290_v26  ;;  %vm7310_vm8 = vcmp.eq.f32.partialorder %v7290_v26, 0.0 }
0x1dbb   : > { %v20765_v16 = vpop.eup %20764 }
0x1dbc   : > { %v20767_v17 = vpop.eup %20766  ;;  %v7300_v36 = vmul.f32 %v20765_v16, %v7289_v51 }
0x1dbd   : > { %v7293_v61 = vmul.f32 %v20767_v17, %v7288_v52 }
0x1dbe   : > { %v7302_v32 = vsel %vm7301_vm15, %v7289_v51, %v7300_v36  ;;  %v9468_v51 = vld [vmem:[%s25697_s7 + $0x10] sm:$0xff] }
0x1dbf   : > { %v20769_v24 = vpop.eup %20768  ;;  %v7305_v18 = vsel %vm7303_vm1, %v7304_v29, %v7302_v32  ;;  %v7295_v4 = vsel %vm7294_vm2, %v7288_v52, %v7293_v61  ;;  %v19196_v52 = vpack.c.bf16 %v9469_v41, %v9468_v51 }
0x1dc0   : > { %v20771_v31 = vpop.eup %20770  ;;  %v7321_v55 = vadd.f32 1e-06, %v7305_v18  ;;  %v7298_v62 = vsel %vm7296_vm3, %v7297_v25, %v7295_v4  ;;  %v7314_v33 = vmul.f32 %v20769_v24, %v7291_v45 }
0x1dc1   : > { %v7320_v14 = vadd.f32 1e-06, %v7298_v62  ;;  %v7307_v11 = vmul.f32 %v20771_v31, %v7290_v26 }
0x1dc2   : > { %20772 = vrcp.f32 %v7321_v55  ;;  %v7316_v38 = vsel %vm7315_vm4, %v7291_v45, %v7314_v33 }
0x1dc3   : > { %v7319_v46 = vsel %vm7317_vm5, %v7318_v13, %v7316_v38  ;;  %v7309_v27 = vsel %vm7308_vm7, %v7290_v26, %v7307_v11  ;;  %20774 = vrcp.f32 %v7320_v14 }
0x1dc4   : > { %v7323_v19 = vadd.f32 1e-06, %v7319_v46  ;;  %v7312_v43 = vsel %vm7310_vm8, %v7311_v9, %v7309_v27 }
0x1dc5   : > { %v7322_v5 = vadd.f32 1e-06, %v7312_v43 }
0x1dc6   : > { %20776 = vrcp.f32 %v7323_v19 }
0x1dc7   : > { %20778 = vrcp.f32 %v7322_v5 }
0x1dcc   : > { %v20773_v50 = vpop.eup %20772 }
0x1dcd   : > { %v20775_v30 = vpop.eup %20774  ;;  %v7330_v49 = vmul.f32 %v20773_v50, %v24109_v37 }
0x1dce   : > { %v7329_v63 = vmul.f32 %v20775_v30, %v24113_v58  ;;  %v9466_v58 = vld [vmem:[%s25697_s7] sm:$0xff]  ;;  %s25698_s7 = sld [smem:[#allocation77_spill]] }
0x1dcf   : > { %v7340_v59 = vmul.f32 %v16985_v15, %v7330_v49  ;;  %v19192_v39 = vpack.c.bf16 %v9467_v34, %v9466_v58 }
0x1dd0   : > { %v20777_v42 = vpop.eup %20776  ;;  %v7339_v12 = vmul.f32 %v16985_v15, %v7329_v63 }
0x1dd1   : > { %v20779_v7 = vpop.eup %20778  ;;  %v7332_v1 = vmul.f32 %v20777_v42, %v24123_v35  ;;  %v24178_v40 = vadd.f32 %v16986_v8, %v7340_v59  ;;  %19193 = vmatprep.subr.bf16.mxu1 %v19192_v39 }
0x1dd2   : > { %v24175_v3 = vadd.f32 %v16986_v8, %v7339_v12  ;;  %v7331_v57 = vmul.f32 %v20779_v7, %v24130_v6  ;;  %19195 = vmatpush3.bf16.msra.mxu1 %v19192_v39  ;;  %v17054_v39 = vld [vmem:[%s25700_s12] ss:$0 sm:$0xff]  ;;  %s25701_s12 = sld [smem:[#allocation76_spill]] }
0x1dd3   : > { %v7342_v28 = vmul.f32 %v16985_v15, %v7332_v1  ;;  %19197 = vmatprep.subr.bf16.mxu1 %v19196_v52 }
0x1dd4   : > { %18358 = vmatprep.mubr.msk.f32.mxu0 %vm2566_vm0, %v24175_v3  ;;  %v7341_v37 = vmul.f32 %v16985_v15, %v7331_v57  ;;  %v17047_v30 = vld [vmem:[%s25698_s7] ss:$0 sm:$0xff]  ;;  %s25703_s7 = sld [smem:[#allocation75_spill]] }
0x1dd5   : > { %18359 = vmatmul.mubr.msk.f32.vlgmr.msra.gmra.mrb[62].mxu0 %vm2566_vm0, %v24178_v40  ;;  %v24190_v23 = vadd.f32 %v16986_v8, %v7342_v28 }
0x1dd6   : > { %v24188_v35 = vadd.f32 %v16986_v8, %v7341_v37  ;;  %19199 = vmatpush3.bf16.msra.mxu1 %v19196_v52  ;;  %v17048_v8 = vld [vmem:[%s25699_s11] ss:$0 sm:$0xff]  ;;  %s25702_s11 = sld [smem:[#allocation80_spill]] }
0x1dd8   : > { %18361 = vmatprep.mubr.msk.f32.mxu0 %vm2566_vm0, %v24188_v35 }
0x1dd9   : > { %18362 = vmatmul.mubr.msk.f32.gmra.mrb[64].mxu0 %vm2566_vm0, %v24190_v23 }
0x1e3b   : > { %v9393_v6 = vpop.xlane.xlu1 %9392 }
0x1e3c   : > { %v9401_v10 = vmul.f32 0.032258064, %v9393_v6  ;;  %v9390_v48 = vpop.xlane.xlu0 %9389 }
0x1e3d   : > { %v9400_v45 = vmul.f32 0.032258064, %v9390_v48 }
0x1e3e   : > { %20780 = vrsqrt.f32 %v9401_v10  ;;  %vm9413_vm13 = vcmp.eq.f32.partialorder %v9401_v10, inf  ;;  %v9416_v61 = vand.u32 2147483648, %v9401_v10  ;;  %vm9415_vm14 = vcmp.eq.f32.partialorder %v9401_v10, 0.0 }
0x1e3f   : > { %20782 = vrsqrt.f32 %v9400_v45  ;;  %v9399_v54 = vpop.xlane.xlu1 %9398  ;;  %vm9406_vm15 = vcmp.eq.f32.partialorder %v9400_v45, inf  ;;  %v9409_v24 = vand.u32 2147483648, %v9400_v45  ;;  %vm9408_vm1 = vcmp.eq.f32.partialorder %v9400_v45, 0.0 }
0x1e40   : > { %v9396_v60 = vpop.xlane.xlu0 %9395  ;;  %v9403_v26 = vmul.f32 0.032258064, %v9399_v54 }
0x1e41   : > { %v9402_v16 = vmul.f32 0.032258064, %v9396_v60 }
0x1e42   : > { %20784 = vrsqrt.f32 %v9403_v26  ;;  %vm9427_vm2 = vcmp.eq.f32.partialorder %v9403_v26, inf  ;;  %v9430_v11 = vand.u32 2147483648, %v9403_v26  ;;  %vm9429_vm3 = vcmp.eq.f32.partialorder %v9403_v26, 0.0 }
0x1e43   : > { %20786 = vrsqrt.f32 %v9402_v16  ;;  %vm9420_vm4 = vcmp.eq.f32.partialorder %v9402_v16, inf  ;;  %v9423_v46 = vand.u32 2147483648, %v9402_v16  ;;  %vm9422_vm5 = vcmp.eq.f32.partialorder %v9402_v16, 0.0 }
0x1e48   : > { %v20781_v17 = vpop.eup %20780 }
0x1e49   : > { %v20783_v36 = vpop.eup %20782  ;;  %v9412_v29 = vmul.f32 %v20781_v17, %v9401_v10 }
0x1e4a   : > { %v9405_v32 = vmul.f32 %v20783_v36, %v9400_v45 }
0x1e4b   : > { %v9414_v25 = vsel %vm9413_vm13, %v9401_v10, %v9412_v29 }
0x1e4c   : > { %v9417_v18 = vsel %vm9415_vm14, %v9416_v61, %v9414_v25  ;;  %v9407_v4 = vsel %vm9406_vm15, %v9400_v45, %v9405_v32  ;;  %v20785_v62 = vpop.eup %20784 }
0x1e4d   : > { %v9433_v31 = vadd.f32 1e-06, %v9417_v18  ;;  %v9410_v55 = vsel %vm9408_vm1, %v9409_v24, %v9407_v4  ;;  %v20787_v14 = vpop.eup %20786  ;;  %v9426_v13 = vmul.f32 %v20785_v62, %v9403_v26 }
0x1e4e   : > { %v9432_v33 = vadd.f32 1e-06, %v9410_v55  ;;  %v9419_v38 = vmul.f32 %v20787_v14, %v9402_v16 }
0x1e4f   : > { %20788 = vrcp.f32 %v9433_v31  ;;  %v9428_v9 = vsel %vm9427_vm2, %v9403_v26, %v9426_v13 }
0x1e50   : > { %20790 = vrcp.f32 %v9432_v33  ;;  %v9431_v27 = vsel %vm9429_vm3, %v9430_v11, %v9428_v9  ;;  %v9421_v19 = vsel %vm9420_vm4, %v9402_v16, %v9419_v38  ;;  %v17049_v9 = vld [vmem:[%s25701_s12] ss:$0 sm:$0xff]  ;;  %s25704_s12 = sld [smem:[#allocation66_spill]] }
0x1e51   : > { %v9435_v43 = vadd.f32 1e-06, %v9431_v27  ;;  %v9424_v5 = vsel %vm9422_vm5, %v9423_v46, %v9421_v19 }
0x1e52   : > { %v9434_v50 = vadd.f32 1e-06, %v9424_v5 }
0x1e53   : > { %20792 = vrcp.f32 %v9435_v43 }
0x1e54   : > { %20794 = vrcp.f32 %v9434_v50 }
0x1e59   : > { %v20789_v15 = vpop.eup %20788 }
0x1e5a   : > { %v20791_v49 = vpop.eup %20790  ;;  %v9442_v63 = vmul.f32 %v20789_v15, %v24149_v47 }
0x1e5b   : > { %v9441_v59 = vmul.f32 %v20791_v49, %v24152_v21 }
0x1e5c   : > { %v9452_v42 = vmul.f32 %v17047_v30, %v9442_v63 }
0x1e5d   : > { %v9451_v12 = vmul.f32 %v17047_v30, %v9441_v59  ;;  %v20793_v7 = vpop.eup %20792 }
0x1e5e   : > { %v20795_v57 = vpop.eup %20794  ;;  %v9463_v28 = vadd.f32 %v17048_v8, %v9452_v42  ;;  %v9444_v37 = vmul.f32 %v20793_v7, %v24159_v0 }
0x1e5f   : > { %v9462_v1 = vadd.f32 %v17048_v8, %v9451_v12  ;;  %v9443_v58 = vmul.f32 %v20795_v57, %v24163_v2 }
0x1e60   : > { %v9454_v34 = vmul.f32 %v17047_v30, %v9444_v37 }
0x1e61   : > { %18344 = vmatprep.mubr.msk.f32.mxu1 %vm2566_vm0, %v9462_v1  ;;  %v9453_v47 = vmul.f32 %v17047_v30, %v9443_v58 }
0x1e62   : > { %18345 = vmatmul.mubr.msk.f32.vlgmr.msra.gmra.mrb[74].mxu1 %vm2566_vm0, %v9463_v28  ;;  %v9465_v21 = vadd.f32 %v17048_v8, %v9454_v34 }
0x1e63   : > { %v9464_v51 = vadd.f32 %v17048_v8, %v9453_v47 }
0x1e65   : > { %18347 = vmatprep.mubr.msk.f32.mxu1 %vm2566_vm0, %v9464_v51 }
0x1e66   : > { %18348 = vmatmul.mubr.msk.f32.gmra.mrb[76].mxu1 %vm2566_vm0, %v9465_v21 }
0x1ea8   : > { %v18360_v41 = vpop.f32.mrb[62].mxu0 }
0x1ea9   : > { %v9669_v52 = vadd.f32 %v18360_v41, %v17054_v39  ;;  %v9663_v6 = vpop.f32.mrb[63].mxu0 }
0x1eaa   : > { %v9664_v10 = vadd.f32 %v17054_v39, %v9663_v6 }
0x1eac   : > { %v18363_v0 = vpop.f32.mrb[64].mxu0  ;;  %v24207_v48 = vpack.i.bf16 %v9669_v52, %v9664_v10  ;;  %v19208_v45 = vpack.c.bf16 %v9669_v52, %v9664_v10 }
0x1ead   : > { %v9679_v2 = vadd.f32 %v18363_v0, %v17054_v39  ;;  %v9673_v54 = vpop.f32.mrb[65].mxu0 }
0x1eae   : > { %v9674_v60 = vadd.f32 %v17054_v39, %v9673_v54  ;;  %20243 = vrot.lane.b32.xlu0 %v24207_v48, %s25687_s3  ;;  %19210 = vmatprep.subr.msk.bf16.mxu1 %vm22880_vm10, %v19208_v45 }
0x1eaf   : > { %19213 = vmatpush3.bf16.xpose.msk.msra.mxu1 %vm22880_vm10, %v19208_v45 }
0x1eb0   : > { %v20257_v26 = vpack.i.bf16 %v9679_v2, %v9674_v60  ;;  %v19214_v16 = vpack.c.bf16 %v9679_v2, %v9674_v60 }
0x1eb2   : > { %20258 = vrot.lane.b32.xlu0 %v20257_v26, %s25688_s1  ;;  %20248 = vrot.lane.b32.xlu1 %v20257_v26, %s25687_s3 }
0x1eb3   : > { %19216 = vmatprep.subr.msk.bf16.mxu0 %vm22880_vm10, %v19214_v16 }
0x1eb4   : > { %19219 = vmatpush3.bf16.xpose.msk.msra.mxu0 %vm22880_vm10, %v19214_v16 }
0x1eb6   : > { %20253 = vrot.lane.b32.xlu1 %v24207_v48, %s25688_s1 }
0x1eba   : > { %20263 = vrot.lane.b32.xlu1 %v24207_v48, %s25689_s0 }
0x1f20   : > { %v20244_v17 = vpop.permute.xlu0 %20243 }
0x1f21   : > { %v20246_v36 = vunpack.i.h.bf16 %v20244_v17  ;;  %v20245_v29 = vunpack.i.l.bf16 %v20244_v17 }
0x1f23   : > { %v19220_v61 = vpack.c.bf16 %v20246_v36, %v20245_v29 }
0x1f24   : > { %v24225_v32 = vpop.permute.xlu0 %20258  ;;  %v20249_v25 = vpop.permute.xlu1 %20248 }
0x1f25   : > { %v20261_v24 = vunpack.i.h.bf16 %v24225_v32  ;;  %v20260_v18 = vunpack.i.l.bf16 %v24225_v32  ;;  %v20251_v4 = vunpack.i.h.bf16 %v20249_v25  ;;  %v20250_v31 = vunpack.i.l.bf16 %v20249_v25  ;;  %19222 = vmatprep.subr.msk.bf16.mxu1 %vm22880_vm10, %v19220_v61 }
0x1f27   : > { %v19226_v55 = vpack.c.bf16 %v20251_v4, %v20250_v31  ;;  %v19238_v12 = vpack.c.bf16 %v20261_v24, %v20260_v18 }
0x1f28   : > { %v24231_v62 = vpop.permute.xlu1 %20253 }
0x1f29   : > { %v20256_v33 = vunpack.i.h.bf16 %v24231_v62  ;;  %v20255_v14 = vunpack.i.l.bf16 %v24231_v62  ;;  %19228 = vmatprep.subr.msk.bf16.mxu0 %vm22880_vm10, %v19226_v55 }
0x1f2b   : > { %v19232_v30 = vpack.c.bf16 %v20256_v33, %v20255_v14 }
0x1f2c   : > { %v24237_v13 = vpop.permute.xlu1 %20263 }
0x1f2d   : > { %v20266_v11 = vunpack.i.h.bf16 %v24237_v13  ;;  %v20265_v38 = vunpack.i.l.bf16 %v24237_v13 }
0x1f2f   : > { %v19244_v57 = vpack.c.bf16 %v20266_v11, %v20265_v38 }
0x1f35   : > { %v18346_v46 = vpop.f32.mrb[74].mxu1 }
0x1f36   : > { %v9561_v27 = vadd.f32 %v18346_v46, %v17049_v9  ;;  %v9555_v19 = vpop.f32.mrb[75].mxu1 }
0x1f37   : > { %v9556_v43 = vadd.f32 %v17049_v9, %v9555_v19 }
0x1f38   : > { %v9683_v5 = vmul.f32 0.35355338, %v9561_v27 }
0x1f39   : > { %v9682_v50 = vmul.f32 0.35355338, %v9556_v43  ;;  %v18349_v15 = vpop.f32.mrb[76].mxu1 }
0x1f3a   : > { %9692 = vrot.lane.b32.xlu1 %v9683_v5, %s25687_s3  ;;  %v9571_v49 = vadd.f32 %v18349_v15, %v17049_v9  ;;  %v9565_v63 = vpop.f32.mrb[77].mxu1 }
0x1f3b   : > { %9690 = vrot.lane.b32.xlu0 %v9682_v50, %s25687_s3  ;;  %18368 = vmatprep.mubr.msk.f32.mxu1 %vm2842_vm9, %v9682_v50  ;;  %v9566_v59 = vadd.f32 %v17049_v9, %v9565_v63 }
0x1f3c   : > { %18369 = vmatmul.mubr.msk.f32.vlgmr.msra.gmra.mrb[78].mxu1 %vm2842_vm9, %v9683_v5  ;;  %v9685_v42 = vmul.f32 0.35355338, %v9571_v49 }
0x1f3d   : > { %19225 = vmatpush3.bf16.xpose.msk.msra.mxu1 %vm22880_vm10, %v19220_v61  ;;  %v9684_v8 = vmul.f32 0.35355338, %v9566_v59 }
0x1f3e   : > { %19234 = vmatprep.subr.msk.bf16.mxu1 %vm22880_vm10, %v19232_v30 }
0x1f3f   : > { %9698 = vrot.lane.b32.xlu0 %v9682_v50, %s25688_s1  ;;  %9694 = vrot.lane.b32.xlu1 %v9684_v8, %s25687_s3 }
0x1f40   : > { %18375 = vmatprep.mubr.msk.f32.mxu0 %vm2842_vm9, %v9684_v8 }
0x1f41   : > { %18376 = vmatmul.mubr.msk.f32.vlgmr.msra.gmra.mrb[66].mxu0 %vm2842_vm9, %v9685_v42 }
0x1f42   : > { %19231 = vmatpush3.bf16.xpose.msk.msra.mxu0 %vm22880_vm10, %v19226_v55 }
0x1f43   : > { %9696 = vrot.lane.b32.xlu0 %v9685_v42, %s25687_s3  ;;  %19240 = vmatprep.subr.msk.bf16.mxu0 %vm22880_vm10, %v19238_v12 }
0x1f44   : > { %9700 = vrot.lane.b32.xlu1 %v9683_v5, %s25688_s1 }
0x1f47   : > { %20268 = vrot.lane.b32.xlu0 %v20257_v26, %s25689_s0 }
0x1f48   : > { %9702 = vrot.lane.b32.xlu1 %v9684_v8, %s25688_s1 }
0x1f4b   : > { %9704 = vrot.lane.b32.xlu0 %v9685_v42, %s25688_s1 }
0x1f4c   : > { %9706 = vrot.lane.b32.xlu1 %v9682_v50, %s25689_s0 }
0x1f4f   : > { %9708 = vrot.lane.b32.xlu0 %v9683_v5, %s25689_s0 }
0x1f50   : > { %9710 = vrot.lane.b32.xlu1 %v9684_v8, %s25689_s0 }
0x1f53   : > { %9712 = vrot.lane.b32.xlu0 %v9685_v42, %s25689_s0 }
0x1f54   : > { %20278 = vrot.lane.b32.xlu1 %v20257_v26, %s25690_s4 }
0x1f57   : > { %20273 = vrot.lane.b32.xlu0 %v24207_v48, %s25690_s4 }
0x1f58   : > { %20283 = vrot.lane.b32.xlu1 %v20244_v17, %s25690_s4 }
0x1f5b   : > { %20288 = vrot.lane.b32.xlu0 %v20249_v25, %s25690_s4 }
0x1fac   : > { %v9693_v7 = vpop.permute.xlu1 %9692 }
0x1fad   : > { %v9691_v1 = vpop.permute.xlu0 %9690 }
0x1fae   : > { %18382 = vmatprep.mubr.msk.f32.mxu1 %vm2842_vm9, %v9691_v1 }
0x1faf   : > { %18383 = vmatmul.mubr.msk.f32.vlgmr.msra.gmra.mrb[80].mxu1 %vm2842_vm9, %v9693_v7 }
0x1fb0   : > { %19237 = vmatpush3.bf16.xpose.msk.msra.mxu1 %vm22880_vm10, %v19232_v30 }
0x1fb1   : > { %19246 = vmatprep.subr.msk.bf16.mxu1 %vm22880_vm10, %v19244_v57  ;;  %v9699_v28 = vpop.permute.xlu0 %9698  ;;  %v9695_v37 = vpop.permute.xlu1 %9694 }
0x1fb2   : > { %18396 = vmatprep.mubr.msk.f32.mxu1 %vm2842_vm9, %v9699_v28  ;;  %18389 = vmatprep.mubr.msk.f32.mxu0 %vm2842_vm9, %v9695_v37 }
0x1fb5   : > { %v9697_v58 = vpop.permute.xlu0 %9696 }
0x1fb6   : > { %18390 = vmatmul.mubr.msk.f32.vlgmr.msra.gmra.mrb[68].mxu0 %vm2842_vm9, %v9697_v58  ;;  %v9701_v34 = vpop.permute.xlu1 %9700 }
0x1fb7   : > { %19243 = vmatpush3.bf16.xpose.msk.msra.mxu0 %vm22880_vm10, %v19238_v12  ;;  %18397 = vmatmul.mubr.msk.f32.vlgmr.msra.gmra.mrb[82].mxu1 %vm2842_vm9, %v9701_v34 }
0x1fb8   : > { %19249 = vmatpush3.bf16.xpose.msk.msra.mxu1 %vm22880_vm10, %v19244_v57 }
0x1fb9   : > { %v24286_v47 = vpop.permute.xlu0 %20268 }
0x1fba   : > { %v20271_v51 = vunpack.i.h.bf16 %v24286_v47  ;;  %v20270_v21 = vunpack.i.l.bf16 %v24286_v47  ;;  %v9703_v39 = vpop.permute.xlu1 %9702 }
0x1fbb   : > { %18403 = vmatprep.mubr.msk.f32.mxu0 %vm2842_vm9, %v9703_v39 }
0x1fbc   : > { %v19250_v41 = vpack.c.bf16 %v20271_v51, %v20270_v21 }
0x1fbd   : > { %v9705_v52 = vpop.permute.xlu0 %9704 }
0x1fbe   : > { %18404 = vmatmul.mubr.msk.f32.vlgmr.msra.gmra.mrb[70].mxu0 %vm2842_vm9, %v9705_v52  ;;  %19252 = vmatprep.subr.msk.bf16.mxu0 %vm22880_vm10, %v19250_v41  ;;  %v9707_v6 = vpop.permute.xlu1 %9706 }
0x1fbf   : > { %19255 = vmatpush3.bf16.xpose.msk.msra.mxu0 %vm22880_vm10, %v19250_v41  ;;  %18410 = vmatprep.mubr.msk.f32.mxu1 %vm2842_vm9, %v9707_v6 }
0x1fc1   : > { %v9709_v10 = vpop.permute.xlu0 %9708 }
0x1fc2   : > { %18411 = vmatmul.mubr.msk.f32.vlgmr.msra.gmra.mrb[84].mxu1 %vm2842_vm9, %v9709_v10  ;;  %v9711_v0 = vpop.permute.xlu1 %9710 }
0x1fc3   : > { %18417 = vmatprep.mubr.msk.f32.mxu0 %vm2842_vm9, %v9711_v0 }
0x1fc5   : > { %v9713_v48 = vpop.permute.xlu0 %9712 }
0x1fc6   : > { %18418 = vmatmul.mubr.msk.f32.vlgmr.msra.gmra.mrb[72].mxu0 %vm2842_vm9, %v9713_v48  ;;  %v20279_v45 = vpop.permute.xlu1 %20278 }
0x1fc7   : > { %v20281_v54 = vunpack.i.h.bf16 %v20279_v45  ;;  %v20280_v60 = vunpack.i.l.bf16 %v20279_v45 }
0x1fc9   : > { %v20274_v2 = vpop.permute.xlu0 %20273  ;;  %v24300_v24 = vpack.c.bf16 %v20281_v54, %v20280_v60 }
0x1fca   : > { %v20276_v26 = vunpack.i.h.bf16 %v20274_v2  ;;  %v20275_v16 = vunpack.i.l.bf16 %v20274_v2  ;;  %v20284_v17 = vpop.permute.xlu1 %20283 }
0x1fcb   : > { %v20286_v36 = vunpack.i.h.bf16 %v20284_v17  ;;  %v20285_v29 = vunpack.i.l.bf16 %v20284_v17 }
0x1fcc   : > { %v19256_v61 = vpack.c.bf16 %v20276_v26, %v20275_v16 }
0x1fcd   : > { %v19264_v25 = vpack.c.bf16 %v20286_v36, %v20285_v29  ;;  %v24355_v39 = vpop.permute.xlu0 %20288 }
0x1fce   : > { %19257 = vmatprep.subr.bf16.mxu1 %v19256_v61 }
0x1fcf   : > { %19259 = vmatpush3.bf16.msra.mxu1 %v19256_v61  ;;  %19265 = vmatprep.subr.bf16.mxu0 %v19264_v25 }
0x1fd0   : > { %19261 = vmatprep.subr.bf16.mxu1 %v24300_v24  ;;  %19267 = vmatpush3.bf16.msra.mxu0 %v19264_v25 }
0x200f   : > { %v18370_v18 = vpop.f32.mrb[78].mxu1 }
0x2010   : > { %v9816_v4 = vpop.f32.mrb[79].mxu1  ;;  %v10409_v31 = vsel %vm3535_vm11, %v18370_v18, -inf }
0x2011   : > { %10410 = vmax.xlane.f32.xlu0 %v10409_v31  ;;  %v10406_v55 = vsel %vm3535_vm11, %v9816_v4, -inf }
0x2012   : > { %10407 = vmax.xlane.f32.xlu1 %v10406_v55 }
0x2014   : > { %v18377_v33 = vpop.f32.mrb[66].mxu0 }
0x2015   : > { %v9899_v14 = vpop.f32.mrb[67].mxu0  ;;  %v10415_v11 = vsel %vm3535_vm11, %v18377_v33, -inf }
0x2016   : > { %10416 = vmax.xlane.f32.xlu0 %v10415_v11  ;;  %v10412_v38 = vsel %vm3535_vm11, %v9899_v14, -inf }
0x201a   : > { %10413 = vmax.xlane.f32.xlu0 %v10412_v38 }
0x2082   : > { %v24307_v9 = vpop.f32.mrb[80].mxu1 }
0x2083   : > { %v24309_v46 = vpop.f32.mrb[81].mxu1  ;;  %v10421_v27 = vsel %vm3535_vm11, %v24307_v9, -inf }
0x2084   : > { %10422 = vmax.xlane.f32.xlu1 %v10421_v27  ;;  %v10418_v19 = vsel %vm3535_vm11, %v24309_v46, -inf }
0x2088   : > { %10419 = vmax.xlane.f32.xlu1 %v10418_v19 }
0x2089   : > { %v24315_v43 = vpop.f32.mrb[68].mxu0 }
0x208a   : > { %v24317_v5 = vpop.f32.mrb[69].mxu0  ;;  %v10427_v50 = vsel %vm3535_vm11, %v24315_v43, -inf  ;;  %v24321_v15 = vpop.f32.mrb[82].mxu1 }
0x208b   : > { %10428 = vmax.xlane.f32.xlu0 %v10427_v50  ;;  %v24323_v30 = vpop.f32.mrb[83].mxu1  ;;  %v10433_v49 = vsel %vm3535_vm11, %v24321_v15, -inf  ;;  %v10424_v63 = vsel %vm3535_vm11, %v24317_v5, -inf }
0x208c   : > { %10434 = vmax.xlane.f32.xlu1 %v10433_v49  ;;  %v10430_v59 = vsel %vm3535_vm11, %v24323_v30, -inf }
0x208f   : > { %10425 = vmax.xlane.f32.xlu0 %v10424_v63 }
0x2090   : > { %10431 = vmax.xlane.f32.xlu1 %v10430_v59 }
0x2091   : > { %v24331_v8 = vpop.f32.mrb[70].mxu0 }
0x2092   : > { %v24333_v42 = vpop.f32.mrb[71].mxu0  ;;  %v10439_v12 = vsel %vm3535_vm11, %v24331_v8, -inf }
0x2093   : > { %10440 = vmax.xlane.f32.xlu0 %v10439_v12  ;;  %v10436_v28 = vsel %vm3535_vm11, %v24333_v42, -inf }
0x2095   : > { %v24337_v7 = vpop.f32.mrb[84].mxu1 }
0x2096   : > { %v24339_v1 = vpop.f32.mrb[85].mxu1  ;;  %v10445_v57 = vsel %vm3535_vm11, %v24337_v7, -inf }
0x2097   : > { %10446 = vmax.xlane.f32.xlu1 %v10445_v57  ;;  %10437 = vmax.xlane.f32.xlu0 %v10436_v28  ;;  %v10442_v34 = vsel %vm3535_vm11, %v24339_v1, -inf }
0x2099   : > { %v24345_v37 = vpop.f32.mrb[72].mxu0 }
0x209a   : > { %v24347_v58 = vpop.f32.mrb[73].mxu0  ;;  %v10451_v21 = vsel %vm3535_vm11, %v24345_v37, -inf }
0x209b   : > { %10443 = vmax.xlane.f32.xlu1 %v10442_v34  ;;  %v10448_v51 = vsel %vm3535_vm11, %v24347_v58, -inf }
0x209c   : > { %10449 = vmax.xlane.f32.xlu0 %v10448_v51 }
0x209e   : > { %v10411_v41 = vpop.xlane.xlu0 %10410 }
0x209f   : > { %10452 = vmax.xlane.f32.xlu1 %v10451_v21  ;;  %v10408_v52 = vpop.xlane.xlu1 %10407  ;;  %v10455_v0 = vsub.f32 %v18370_v18, %v10411_v41 }
0x20a0   : > { %v10454_v10 = vsub.f32 %v9816_v4, %v10408_v52 }
0x20a1   : > { %v10472_v54 = vmul.f32 1.442695, %v10455_v0 }
0x20a2   : > { %v10470_v48 = vmul.f32 1.442695, %v10454_v10 }
0x20a3   : > { %v10417_v6 = vpop.xlane.xlu0 %10416 }
0x20a4   : > { %v10457_v45 = vsub.f32 %v18377_v33, %v10417_v6  ;;  %20796 = vpow2.f32 %v10470_v48 }
0x20a5   : > { %20798 = vpow2.f32 %v10472_v54 }
0x20a6   : > { %v10476_v60 = vmul.f32 1.442695, %v10457_v45 }
0x20a7   : > { %v10414_v2 = vpop.xlane.xlu0 %10413 }
0x20a8   : > { %v10456_v26 = vsub.f32 %v9899_v14, %v10414_v2  ;;  %20800 = vpow2.f32 %v10476_v60 }
0x20aa   : > { %v10474_v16 = vmul.f32 1.442695, %v10456_v26 }
0x20ac   : > { %20802 = vpow2.f32 %v10474_v16 }
0x20b0   : > { %20293 = vrot.lane.b32.xlu1 %v24231_v62, %s25690_s4  ;;  %v24361_v62 = vpop.eup %20796 }
0x20b1   : > { %v24363_v17 = vpop.eup %20798 }
0x20b2   : > { %20298 = vrot.lane.b32.xlu0 %v24225_v32, %s25690_s4  ;;  %v10502_v32 = vsel %vm3535_vm11, %v24361_v62, 0.0  ;;  %v24367_v36 = vpop.eup %20800  ;;  %v10505_v29 = vsel %vm3535_vm11, %v24363_v17, 0.0 }
0x20b3   : > { %v10511_v61 = vsel %vm3535_vm11, %v24367_v36, 0.0 }
0x20b6   : > { %v24373_v25 = vpop.eup %20802 }
0x20b7   : > { %v10508_v18 = vsel %vm3535_vm11, %v24373_v25, 0.0 }
0x20d1   : > { %10503 = vadd.xlane.f32.xlu0 %v10502_v32 }
0x20d4   : > { %10506 = vadd.xlane.f32.xlu1 %v10505_v29 }
0x20d5   : > { %10512 = vadd.xlane.f32.xlu0 %v10511_v61 }
0x20d9   : > { %10509 = vadd.xlane.f32.xlu0 %v10508_v18 }
0x2111   : > { %v10423_v4 = vpop.xlane.xlu1 %10422 }
0x2112   : > { %v10459_v31 = vsub.f32 %v24307_v9, %v10423_v4 }
0x2114   : > { %v10480_v55 = vmul.f32 1.442695, %v10459_v31 }
0x2115   : > { %v10420_v33 = vpop.xlane.xlu1 %10419 }
0x2116   : > { %20804 = vpow2.f32 %v10480_v55  ;;  %v10458_v14 = vsub.f32 %v24309_v46, %v10420_v33 }
0x2118   : > { %v10478_v11 = vmul.f32 1.442695, %v10458_v14  ;;  %v10429_v38 = vpop.xlane.xlu0 %10428 }
0x2119   : > { %v10461_v27 = vsub.f32 %v24315_v43, %v10429_v38  ;;  %v10435_v19 = vpop.xlane.xlu1 %10434 }
0x211a   : > { %20806 = vpow2.f32 %v10478_v11  ;;  %v10463_v49 = vsub.f32 %v24321_v15, %v10435_v19 }
0x211b   : > { %v10484_v50 = vmul.f32 1.442695, %v10461_v27 }
0x211c   : > { %v10426_v63 = vpop.xlane.xlu0 %10425  ;;  %v10488_v59 = vmul.f32 1.442695, %v10463_v49 }
0x211d   : > { %20808 = vpow2.f32 %v10484_v50  ;;  %v10460_v12 = vsub.f32 %v24317_v5, %v10426_v63  ;;  %v10432_v9 = vpop.xlane.xlu1 %10431 }
0x211e   : > { %20810 = vpow2.f32 %v10488_v59  ;;  %v10462_v28 = vsub.f32 %v24323_v30, %v10432_v9 }
0x211f   : > { %v10482_v57 = vmul.f32 1.442695, %v10460_v12 }
0x2120   : > { %v24383_v46 = vpop.eup %20804  ;;  %v10441_v34 = vpop.xlane.xlu0 %10440  ;;  %v10486_v43 = vmul.f32 1.442695, %v10462_v28 }
0x2121   : > { %20812 = vpow2.f32 %v10482_v57  ;;  %v10465_v51 = vsub.f32 %v24331_v8, %v10441_v34  ;;  %v10517_v15 = vsel %vm3535_vm11, %v24383_v46, 0.0 }
0x2122   : > { %10518 = vadd.xlane.f32.xlu1 %v10517_v15  ;;  %20814 = vpow2.f32 %v10486_v43 }
0x2123   : > { %v10492_v21 = vmul.f32 1.442695, %v10465_v51 }
0x2124   : > { %v24388_v41 = vpop.eup %20806  ;;  %v10447_v5 = vpop.xlane.xlu1 %10446 }
0x2125   : > { %v10438_v52 = vpop.xlane.xlu0 %10437  ;;  %20816 = vpow2.f32 %v10492_v21  ;;  %v10467_v30 = vsub.f32 %v24337_v7, %v10447_v5  ;;  %v10514_v10 = vsel %vm3535_vm11, %v24388_v41, 0.0 }
0x2126   : > { %v10464_v6 = vsub.f32 %v24333_v42, %v10438_v52  ;;  %10515 = vadd.xlane.f32.xlu1 %v10514_v10 }
0x2127   : > { %v24394_v8 = vpop.eup %20808  ;;  %v10496_v0 = vmul.f32 1.442695, %v10467_v30  ;;  %v20291_v30 = vunpack.i.h.bf16 %v24355_v39 }
0x2128   : > { %v10490_v48 = vmul.f32 1.442695, %v10464_v6  ;;  %v10444_v45 = vpop.xlane.xlu1 %10443  ;;  %v10523_v2 = vsel %vm3535_vm11, %v24394_v8, 0.0  ;;  %v24398_v54 = vpop.eup %20810  ;;  %v20290_v6 = vunpack.i.l.bf16 %v24355_v39 }
0x2129   : > { %20818 = vpow2.f32 %v10496_v0  ;;  %v10466_v60 = vsub.f32 %v24339_v1, %v10444_v45  ;;  %10524 = vadd.xlane.f32.xlu0 %v10523_v2  ;;  %v10450_v7 = vpop.xlane.xlu0 %10449  ;;  %v10529_v26 = vsel %vm3535_vm11, %v24398_v54, 0.0 }
0x212a   : > { %20820 = vpow2.f32 %v10490_v48  ;;  %v10468_v42 = vsub.f32 %v24347_v58, %v10450_v7  ;;  %10530 = vadd.xlane.f32.xlu1 %v10529_v26  ;;  %v19268_v10 = vpack.c.bf16 %v20291_v30, %v20290_v6 }
0x212b   : > { %v24404_v16 = vpop.eup %20812  ;;  %v10494_v32 = vmul.f32 1.442695, %v10466_v60 }
0x212c   : > { %v10498_v29 = vmul.f32 1.442695, %v10468_v42  ;;  %v10453_v61 = vpop.xlane.xlu1 %10452  ;;  %v10520_v18 = vsel %vm3535_vm11, %v24404_v16, 0.0  ;;  %v24408_v4 = vpop.eup %20814 }
0x212d   : > { %20822 = vpow2.f32 %v10494_v32  ;;  %v10469_v1 = vsub.f32 %v24345_v37, %v10453_v61  ;;  %10521 = vadd.xlane.f32.xlu0 %v10520_v18  ;;  %v10526_v58 = vsel %vm3535_vm11, %v24408_v4, 0.0  ;;  %v20299_v34 = vpop.permute.xlu0 %20298 }
0x212e   : > { %20824 = vpow2.f32 %v10498_v29  ;;  %10527 = vadd.xlane.f32.xlu1 %v10526_v58  ;;  %v20301_v45 = vunpack.i.h.bf16 %v20299_v34  ;;  %v20300_v2 = vunpack.i.l.bf16 %v20299_v34 }
0x212f   : > { %v24413_v31 = vpop.eup %20816  ;;  %v10500_v55 = vmul.f32 1.442695, %v10469_v1 }
0x2130   : > { %v20294_v33 = vpop.permute.xlu1 %20293  ;;  %v10535_v14 = vsel %vm3535_vm11, %v24413_v31, 0.0  ;;  %v19276_v39 = vpack.c.bf16 %v20301_v45, %v20300_v2 }
0x2131   : > { %20826 = vpow2.f32 %v10500_v55  ;;  %v20296_v11 = vunpack.i.h.bf16 %v20294_v33  ;;  %v20295_v38 = vunpack.i.l.bf16 %v20294_v33  ;;  %10536 = vadd.xlane.f32.xlu0 %v10535_v14 }
0x2133   : > { %v24417_v27 = vpop.eup %20818  ;;  %v24419_v37 = vpack.c.bf16 %v20296_v11, %v20295_v38 }
0x2134   : > { %v24421_v19 = vpop.eup %20820  ;;  %v10541_v50 = vsel %vm3535_vm11, %v24417_v27, 0.0 }
0x2135   : > { %19273 = vmatprep.subr.bf16.mxu0 %v24419_v37  ;;  %10542 = vadd.xlane.f32.xlu1 %v10541_v50  ;;  %v10532_v49 = vsel %vm3535_vm11, %v24421_v19, 0.0 }
0x2136   : > { %10533 = vadd.xlane.f32.xlu0 %v10532_v49 }
0x2137   : > { %v24428_v63 = vpop.eup %20822 }
0x2138   : > { %v24430_v59 = vpop.eup %20824  ;;  %v10538_v12 = vsel %vm3535_vm11, %v24428_v63, 0.0 }
0x2139   : > { %10539 = vadd.xlane.f32.xlu1 %v10538_v12  ;;  %v10544_v9 = vsel %vm3535_vm11, %v24430_v59, 0.0 }
0x213a   : > { %10545 = vadd.xlane.f32.xlu0 %v10544_v9 }
0x213b   : > { %v24436_v57 = vpop.eup %20826 }
0x213c   : > { %v10547_v28 = vsel %vm3535_vm11, %v24436_v57, 0.0 }
0x213d   : > { %10548 = vadd.xlane.f32.xlu1 %v10547_v28 }
0x214e   : > { %20303 = vrot.lane.b32.xlu1 %v24237_v13, %s25690_s4 }
0x2150   : > { %20308 = vrot.lane.b32.xlu0 %v24286_v47, %s25690_s4 }
0x215e   : > { %v10504_v43 = vpop.xlane.xlu0 %10503 }
0x215f   : > { %20828 = vrcp.f32 %v10504_v43 }
0x2161   : > { %v10507_v51 = vpop.xlane.xlu1 %10506 }
0x2162   : > { %20830 = vrcp.f32 %v10507_v51  ;;  %v10513_v15 = vpop.xlane.xlu0 %10512 }
0x2163   : > { %20832 = vrcp.f32 %v10513_v15 }
0x2166   : > { %v10510_v21 = vpop.xlane.xlu0 %10509 }
0x2167   : > { %20834 = vrcp.f32 %v10510_v21 }
0x2169   : > { %v20829_v5 = vpop.eup %20828 }
0x216a   : > { %v10566_v52 = vmul.f32 %v20829_v5, %v24361_v62 }
0x216c   : > { %v20831_v13 = vpop.eup %20830  ;;  %18424 = vmatprep.mubr.msk.f32.mxu1 %vm3535_vm11, %v10566_v52 }
0x216d   : > { %v10567_v47 = vmul.f32 %v20831_v13, %v24363_v17  ;;  %v20833_v0 = vpop.eup %20832 }
0x216e   : > { %v10569_v60 = vmul.f32 %v20833_v0, %v24367_v36 }
0x216f   : > { %18425 = vmatmul.mubr.msk.f32.vlgmr.msra.gmra.mrb[86].mxu1 %vm3535_vm11, %v10567_v47 }
0x2170   : > { %19263 = vmatpush3.bf16.msra.mxu1 %v24300_v24 }
0x2171   : > { %v20835_v48 = vpop.eup %20834  ;;  %19269 = vmatprep.subr.bf16.mxu1 %v19268_v10 }
0x2172   : > { %v10568_v62 = vmul.f32 %v20835_v48, %v24373_v25 }
0x2174   : > { %18431 = vmatprep.mubr.msk.f32.mxu1 %vm3535_vm11, %v10568_v62  ;;  %v11338_v62 = vld [vmem:[%s25702_s11] sm:$0xff] }
0x2175   : > { %18432 = vmatmul.mubr.msk.f32.vlgmr.msra.gmra.mrb[88].mxu1 %vm3535_vm11, %v10569_v60  ;;  %v11339_v60 = vld [vmem:[%s25702_s11 + $0x8] sm:$0xff] }
0x2176   : > { %19271 = vmatpush3.bf16.msra.mxu1 %v19268_v10 }
0x2177   : > { %19277 = vmatprep.subr.bf16.mxu1 %v19276_v39 }
0x21af   : > { %v10519_v17 = vpop.xlane.xlu1 %10518 }
0x21b0   : > { %20836 = vrcp.f32 %v10519_v17  ;;  %v11341_v17 = vld [vmem:[%s25702_s11 + $0x18] sm:$0xff] }
0x21b3   : > { %v10516_v7 = vpop.xlane.xlu1 %10515 }
0x21b4   : > { %20838 = vrcp.f32 %v10516_v7 }
0x21b6   : > { %v10525_v24 = vpop.xlane.xlu0 %10524 }
0x21b7   : > { %v10531_v42 = vpop.xlane.xlu1 %10530  ;;  %20840 = vrcp.f32 %v10525_v24 }
0x21ba   : > { %v10522_v26 = vpop.xlane.xlu0 %10521  ;;  %v20837_v32 = vpop.eup %20836 }
0x21bb   : > { %20842 = vrcp.f32 %v10522_v26  ;;  %v10528_v25 = vpop.xlane.xlu1 %10527  ;;  %v10571_v18 = vmul.f32 %v20837_v32, %v24383_v46 }
0x21bc   : > { %20844 = vrcp.f32 %v10531_v42 }
0x21bd   : > { %20846 = vrcp.f32 %v10528_v25 }
0x21be   : > { %v20839_v36 = vpop.eup %20838  ;;  %v10537_v29 = vpop.xlane.xlu0 %10536 }
0x21bf   : > { %v10570_v61 = vmul.f32 %v20839_v36, %v24388_v41  ;;  %20848 = vrcp.f32 %v10537_v29 }
0x21c1   : > { %18438 = vmatprep.mubr.msk.f32.mxu0 %vm3535_vm11, %v10570_v61  ;;  %v20841_v55 = vpop.eup %20840 }
0x21c2   : > { %18439 = vmatmul.mubr.msk.f32.vlgmr.msra.gmra.mrb[74].mxu0 %vm3535_vm11, %v10571_v18  ;;  %v10543_v1 = vpop.xlane.xlu1 %10542  ;;  %v10573_v50 = vmul.f32 %v20841_v55, %v24394_v8 }
0x21c3   : > { %19275 = vmatpush3.bf16.msra.mxu0 %v24419_v37  ;;  %v10534_v58 = vpop.xlane.xlu0 %10533 }
0x21c4   : > { %20850 = vrcp.f32 %v10534_v58 }
0x21c5   : > { %v20843_v33 = vpop.eup %20842  ;;  %20852 = vrcp.f32 %v10543_v1 }
0x21c6   : > { %v20845_v14 = vpop.eup %20844  ;;  %v10540_v11 = vpop.xlane.xlu1 %10539  ;;  %v10572_v38 = vmul.f32 %v20843_v33, %v24404_v16 }
0x21c7   : > { %v20847_v41 = vpop.eup %20846  ;;  %20854 = vrcp.f32 %v10540_v11  ;;  %v10546_v46 = vpop.xlane.xlu0 %10545  ;;  %v10575_v37 = vmul.f32 %v20845_v14, %v24398_v54 }
0x21c8   : > { %20856 = vrcp.f32 %v10546_v46  ;;  %18445 = vmatprep.mubr.msk.f32.mxu1 %vm3535_vm11, %v10572_v38  ;;  %v10574_v49 = vmul.f32 %v20847_v41, %v24408_v4 }
0x21c9   : > { %18446 = vmatmul.mubr.msk.f32.vlgmr.msra.gmra.mrb[90].mxu1 %vm3535_vm11, %v10573_v50  ;;  %v20849_v8 = vpop.eup %20848 }
0x21ca   : > { %18452 = vmatprep.mubr.msk.f32.mxu0 %vm3535_vm11, %v10574_v49  ;;  %19279 = vmatpush3.bf16.msra.mxu1 %v19276_v39  ;;  %v10549_v12 = vpop.xlane.xlu1 %10548  ;;  %v10577_v54 = vmul.f32 %v20849_v8, %v24413_v31  ;;  %v11340_v39 = vld [vmem:[%s25702_s11 + $0x10] sm:$0xff]  ;;  %s25706_s11 = sld [smem:[#allocation64_spill]] }
0x21cb   : > { %18453 = vmatmul.mubr.msk.f32.vlgmr.msra.gmra.mrb[76].mxu0 %vm3535_vm11, %v10575_v37  ;;  %20858 = vrcp.f32 %v10549_v12  ;;  %v20309_v16 = vpop.permute.xlu0 %20308 }
0x21cc   : > { %v20311_v9 = vunpack.i.h.bf16 %v20309_v16  ;;  %v20310_v28 = vunpack.i.l.bf16 %v20309_v16 }
0x21ce   : > { %v20851_v34 = vpop.eup %20850  ;;  %v20304_v43 = vpop.permute.xlu1 %20303  ;;  %v19284_v51 = vpack.c.bf16 %v20311_v9, %v20310_v28 }
0x21cf   : > { %v20306_v15 = vunpack.i.h.bf16 %v20304_v43  ;;  %v20305_v4 = vunpack.i.l.bf16 %v20304_v43  ;;  %v10576_v21 = vmul.f32 %v20851_v34, %v24421_v19  ;;  %v20853_v5 = vpop.eup %20852 }
0x21d0   : > { %19285 = vmatprep.subr.bf16.mxu1 %v19284_v51  ;;  %v10579_v31 = vmul.f32 %v20853_v5, %v24417_v27  ;;  %v19288_v27 = vpack.c.bf16 %v11339_v60, %v11338_v62 }
0x21d1   : > { %v20855_v52 = vpop.eup %20854  ;;  %18459 = vmatprep.mubr.msk.f32.mxu1 %vm3535_vm11, %v10576_v21  ;;  %v19280_v30 = vpack.c.bf16 %v20306_v15, %v20305_v4 }
0x21d2   : > { %v20857_v6 = vpop.eup %20856  ;;  %18460 = vmatmul.mubr.msk.f32.vlgmr.msra.gmra.mrb[92].mxu1 %vm3535_vm11, %v10577_v54  ;;  %v10578_v13 = vmul.f32 %v20855_v52, %v24428_v63  ;;  %v17107_v54 = vld [vmem:[%s25703_s7] ss:$0 sm:$0xff]  ;;  %s25705_s7 = sld [smem:[#allocation67_spill]] }
0x21d3   : > { %19287 = vmatpush3.bf16.msra.mxu1 %v19284_v51  ;;  %19281 = vmatprep.subr.bf16.mxu0 %v19280_v30  ;;  %v10580_v47 = vmul.f32 %v20857_v6, %v24430_v59 }
0x21d4   : > { %19283 = vmatpush3.bf16.msra.mxu0 %v19280_v30  ;;  %18466 = vmatprep.mubr.msk.f32.mxu0 %vm3535_vm11, %v10578_v13 }
0x21d5   : > { %v20859_v19 = vpop.eup %20858  ;;  %18473 = vmatprep.mubr.msk.f32.mxu1 %vm3535_vm11, %v10580_v47  ;;  %19289 = vmatprep.subr.bf16.mxu0 %v19288_v27 }
0x21d6   : > { %v10581_v10 = vmul.f32 %v20859_v19, %v24436_v57  ;;  %v19292_v57 = vpack.c.bf16 %v11341_v17, %v11340_v39 }
0x21d7   : > { %18467 = vmatmul.mubr.msk.f32.vlgmr.msra.gmra.mrb[78].mxu0 %vm3535_vm11, %v10579_v31 }
0x21d8   : > { %18474 = vmatmul.mubr.msk.f32.vlgmr.msra.gmra.mrb[94].mxu1 %vm3535_vm11, %v10581_v10  ;;  %19291 = vmatpush3.bf16.msra.mxu0 %v19288_v27 }
0x21d9   : > { %19293 = vmatprep.subr.bf16.mxu0 %v19292_v57 }
0x21dc   : > { %19295 = vmatpush3.bf16.msra.mxu0 %v19292_v57 }
0x2242   : > { %v18426_v63 = vpop.f32.mrb[86].mxu1 }
0x2243   : > { %v10660_v59 = vpop.f32.mrb[87].mxu1 }
0x2248   : > { %v18433_v0 = vpop.f32.mrb[88].mxu1 }
0x2249   : > { %v10747_v48 = vpop.f32.mrb[89].mxu1 }
0x2295   : > { %v18440_v45 = vpop.f32.mrb[74].mxu0 }
0x2296   : > { %v10834_v2 = vpop.f32.mrb[75].mxu0  ;;  %11284 = vrot.lane.b32.xlu0 %v18440_v45, %s25693_s8 }
0x2297   : > { %11282 = vrot.lane.b32.xlu1 %v10834_v2, %s25693_s8 }
0x229c   : > { %v18447_v7 = vpop.f32.mrb[90].mxu1 }
0x229d   : > { %11288 = vrot.lane.b32.xlu0 %v18447_v7, %s25693_s8  ;;  %v10921_v24 = vpop.f32.mrb[91].mxu1 }
0x229e   : > { %v18454_v42 = vpop.f32.mrb[76].mxu0  ;;  %11286 = vrot.lane.b32.xlu1 %v10921_v24, %s25693_s8 }
0x229f   : > { %v11008_v26 = vpop.f32.mrb[77].mxu0 }
0x22a1   : > { %11300 = vrot.lane.b32.xlu0 %v18454_v42, %s25694_s10 }
0x22a2   : > { %11298 = vrot.lane.b32.xlu1 %v11008_v26, %s25694_s10 }
0x22a5   : > { %v18461_v25 = vpop.f32.mrb[92].mxu1 }
0x22a6   : > { %11304 = vrot.lane.b32.xlu0 %v18461_v25, %s25694_s10  ;;  %v11095_v32 = vpop.f32.mrb[93].mxu1 }
0x22a7   : > { %11302 = vrot.lane.b32.xlu1 %v11095_v32, %s25694_s10 }
0x22aa   : > { %v18468_v36 = vpop.f32.mrb[78].mxu0 }
0x22ab   : > { %v11182_v29 = vpop.f32.mrb[79].mxu0  ;;  %11316 = vrot.lane.b32.xlu0 %v18468_v36, %s25680_s5  ;;  %v18475_v61 = vpop.f32.mrb[94].mxu1 }
0x22ac   : > { %11314 = vrot.lane.b32.xlu1 %v11182_v29, %s25680_s5  ;;  %v11269_v18 = vpop.f32.mrb[95].mxu1 }
0x22af   : > { %11320 = vrot.lane.b32.xlu0 %v18475_v61, %s25680_s5 }
0x22b0   : > { %11318 = vrot.lane.b32.xlu1 %v11269_v18, %s25680_s5 }
0x2308   : > { %v11285_v1 = vpop.permute.xlu0 %11284 }
0x2309   : > { %v11283_v58 = vpop.permute.xlu1 %11282  ;;  %v11327_v49 = vsel %vm2842_vm9, %v18426_v63, %v11285_v1 }
0x230a   : > { %v11326_v46 = vsel %vm2842_vm9, %v10660_v59, %v11283_v58 }
0x230f   : > { %v11289_v55 = vpop.permute.xlu0 %11288 }
0x2310   : > { %v11287_v33 = vpop.permute.xlu1 %11286  ;;  %v11329_v43 = vsel %vm2842_vm9, %v18433_v0, %v11289_v55  ;;  %v11552_v55 = vld [vmem:[%s25704_s12] sm:$0xff] }
0x2311   : > { %v11328_v8 = vsel %vm2842_vm9, %v10747_v48, %v11287_v33  ;;  %v11553_v33 = vld [vmem:[%s25704_s12 + $0x8] sm:$0xff] }
0x2313   : > { %v11301_v14 = vpop.permute.xlu0 %11300 }
0x2314   : > { %v11299_v11 = vpop.permute.xlu1 %11298  ;;  %v11331_v16 = vsel %vm3535_vm11, %v11327_v49, %v11301_v14  ;;  %v11554_v14 = vld [vmem:[%s25704_s12 + $0x10] sm:$0xff] }
0x2315   : > { %v11330_v37 = vsel %vm3535_vm11, %v11326_v46, %v11299_v11  ;;  %v19296_v11 = vpack.c.bf16 %v11553_v33, %v11552_v55  ;;  %v11664_v46 = vld [vmem:[%s25705_s7] sm:$0xff]  ;;  %v11666_v49 = vld [vmem:[%s25705_s7 + $0x10] sm:$0xff] }
0x2317   : > { %19297 = vmatprep.subr.bf16.mxu1 %v19296_v11 }
0x2318   : > { %v11305_v38 = vpop.permute.xlu0 %11304  ;;  %19299 = vmatpush3.bf16.msra.mxu1 %v19296_v11 }
0x2319   : > { %v11303_v41 = vpop.permute.xlu1 %11302  ;;  %v11333_v4 = vsel %vm3535_vm11, %v11329_v43, %v11305_v38  ;;  %v11555_v38 = vld [vmem:[%s25704_s12 + $0x18] sm:$0xff]  ;;  %s25707_s12 = sld [smem:[#allocation65_spill]] }
0x231a   : > { %v11332_v51 = vsel %vm3535_vm11, %v11328_v8, %v11303_v41  ;;  %v19300_v41 = vpack.c.bf16 %v11555_v38, %v11554_v14 }
0x231c   : > { %19301 = vmatprep.subr.bf16.mxu1 %v19300_v41 }
0x231d   : > { %v11317_v50 = vpop.permute.xlu0 %11316  ;;  %19303 = vmatpush3.bf16.msra.mxu1 %v19300_v41 }
0x231e   : > { %v11315_v12 = vpop.permute.xlu1 %11314  ;;  %v11335_v28 = vsel %vm4464_vm12, %v11331_v16, %v11317_v50  ;;  %v11665_v50 = vld [vmem:[%s25705_s7 + $0x8] sm:$0xff] }
0x231f   : > { %v11334_v9 = vsel %vm4464_vm12, %v11330_v37, %v11315_v12  ;;  %v19304_v37 = vpack.c.bf16 %v11665_v50, %v11664_v46  ;;  %v11667_v12 = vld [vmem:[%s25705_s7 + $0x18] sm:$0xff]  ;;  %v17113_v33 = vld [vmem:[%s25707_s12] ss:$0 sm:$0xff]  ;;  %s25712_s12 = sld [smem:[#allocation97_spill]] }
0x2320   : > { %18484 = vmatprep.mubr.msk.f32.mxu0 %vm2566_vm0, %v11334_v9  ;;  %v19308_v16 = vpack.c.bf16 %v11667_v12, %v11666_v49  ;;  %v11668_v9 = vld [vmem:[%s25705_s7 + $0x20] sm:$0xff] }
0x2321   : > { %18485 = vmatmul.mubr.msk.f32.vlgmr.msra.gmra.mrb[80].mxu0 %vm2566_vm0, %v11335_v28  ;;  %v11321_v34 = vpop.permute.xlu0 %11320  ;;  %v11669_v28 = vld [vmem:[%s25705_s7 + $0x28] sm:$0xff]  ;;  %19305 = vmatprep.subr.bf16.mxu0 %v19304_v37 }
0x2322   : > { %v11319_v15 = vpop.permute.xlu1 %11318  ;;  %v11337_v5 = vsel %vm4464_vm12, %v11333_v4, %v11321_v34  ;;  %19307 = vmatpush3.bf16.msra.mxu0 %v19304_v37  ;;  %v19312_v8 = vpack.c.bf16 %v11669_v28, %v11668_v9  ;;  %v11670_v9 = vld [vmem:[%s25705_s7 + $0x30] sm:$0xff]  ;;  %v11671_v28 = vld [vmem:[%s25705_s7 + $0x38] sm:$0xff] }
0x2323   : > { %v11336_v21 = vsel %vm4464_vm12, %v11332_v51, %v11319_v15  ;;  %19309 = vmatprep.subr.bf16.mxu0 %v19308_v16 }
0x2324   : > { %18487 = vmatprep.mubr.msk.f32.mxu0 %vm2566_vm0, %v11336_v21 }
0x2325   : > { %18488 = vmatmul.mubr.msk.f32.gmra.mrb[82].mxu0 %vm2566_vm0, %v11337_v5 }
0x2326   : > { %19311 = vmatpush3.bf16.msra.mxu0 %v19308_v16 }
0x2327   : > { %19313 = vmatprep.subr.bf16.mxu0 %v19312_v8 }
0x232a   : > { %19315 = vmatpush3.bf16.msra.mxu0 %v19312_v8  ;;  %v19316_v8 = vpack.c.bf16 %v11671_v28, %v11670_v9 }
0x232c   : > { %19317 = vmatprep.subr.bf16.mxu0 %v19316_v8 }
0x232e   : > { %19319 = vmatpush3.bf16.msra.mxu0 %v19316_v8 }
0x23f4   : > { %v18486_v52 = vpop.f32.mrb[80].mxu0 }
0x23f5   : > { %v11433_v30 = vadd.f32 %v18486_v52, %v17107_v54  ;;  %v11427_v6 = vpop.f32.mrb[81].mxu0 }
0x23f6   : > { %v11428_v13 = vadd.f32 %v17107_v54, %v11427_v6 }
0x23f7   : > { %v24514_v47 = vadd.f32 %v11433_v30, %v24104_v20 }
0x23f8   : > { %v24517_v19 = vadd.f32 %v11428_v13, %v24107_v44  ;;  %v18489_v31 = vpop.f32.mrb[82].mxu0 }
0x23f9   : > { %v11443_v10 = vadd.f32 %v18489_v31, %v17107_v54  ;;  %v11437_v63 = vpop.f32.mrb[83].mxu0  ;;  %v11453_v59 = vsel %vm2566_vm0, %v24514_v47, 0.0 }
0x23fa   : > { %v11438_v0 = vadd.f32 %v17107_v54, %v11437_v63  ;;  %11454 = vadd.xlane.f32.xlu0 %v11453_v59  ;;  %v11450_v48 = vsel %vm2566_vm0, %v24517_v19, 0.0 }
0x23fb   : > { %v24524_v45 = vadd.f32 %v11443_v10, %v24118_v53  ;;  %11451 = vadd.xlane.f32.xlu1 %v11450_v48 }
0x23fc   : > { %v24527_v20 = vadd.f32 %v11438_v0, %v24121_v22 }
0x23fd   : > { %v11459_v44 = vsel %vm2566_vm0, %v24524_v45, 0.0 }
0x23fe   : > { %v11456_v2 = vsel %vm2566_vm0, %v24527_v20, 0.0 }
0x23ff   : > { %11460 = vadd.xlane.f32.xlu1 %v11459_v44  ;;  %11457 = vadd.xlane.f32.xlu0 %v11456_v2 }
0x2487   : > { %v11455_v62 = vpop.xlane.xlu0 %11454 }
0x2488   : > { %v11463_v60 = vmul.f32 0.03125, %v11455_v62  ;;  %v11452_v27 = vpop.xlane.xlu1 %11451 }
0x2489   : > { %v11462_v39 = vmul.f32 0.03125, %v11452_v27 }
0x248a   : > { %v24534_v17 = vsub.f32 %v24514_v47, %v11463_v60 }
0x248b   : > { %v24537_v53 = vsub.f32 %v24517_v19, %v11462_v39 }
0x248c   : > { %v11458_v22 = vpop.xlane.xlu0 %11457  ;;  %v11461_v57 = vpop.xlane.xlu1 %11460  ;;  %v11471_v7 = vmul.f32 %v24534_v17, %v24534_v17 }
0x248d   : > { %v11464_v24 = vmul.f32 0.03125, %v11458_v22  ;;  %v11465_v42 = vmul.f32 0.03125, %v11461_v57  ;;  %v11470_v26 = vmul.f32 %v24537_v53, %v24537_v53 }
0x248e   : > { %v11477_v25 = vsel %vm2566_vm0, %v11471_v7, 0.0 }
0x248f   : > { %v24545_v32 = vsub.f32 %v24527_v20, %v11464_v24  ;;  %v24548_v36 = vsub.f32 %v24524_v45, %v11465_v42  ;;  %11478 = vadd.xlane.f32.xlu1 %v11477_v25  ;;  %v11474_v29 = vsel %vm2566_vm0, %v11470_v26, 0.0 }
0x2490   : > { %11475 = vadd.xlane.f32.xlu0 %v11474_v29 }
0x2491   : > { %v11472_v61 = vmul.f32 %v24545_v32, %v24545_v32  ;;  %v11473_v18 = vmul.f32 %v24548_v36, %v24548_v36 }
0x2493   : > { %v11480_v1 = vsel %vm2566_vm0, %v11472_v61, 0.0  ;;  %v11483_v58 = vsel %vm2566_vm0, %v11473_v18, 0.0  ;;  %v17112_v18 = vld [vmem:[%s25706_s11] ss:$0 sm:$0xff]  ;;  %s25709_s11 = sld [smem:[#allocation63_spill]] }
0x2494   : > { %11481 = vadd.xlane.f32.xlu0 %v11480_v1  ;;  %11484 = vadd.xlane.f32.xlu1 %v11483_v58 }
0x251c   : > { %v11479_v34 = vpop.xlane.xlu1 %11478 }
0x251d   : > { %v11487_v43 = vmul.f32 0.032258064, %v11479_v34  ;;  %v11476_v51 = vpop.xlane.xlu0 %11475 }
0x251e   : > { %v11486_v15 = vmul.f32 0.032258064, %v11476_v51 }
0x251f   : > { %20860 = vrsqrt.f32 %v11487_v43  ;;  %vm11499_vm7 = vcmp.eq.f32.partialorder %v11487_v43, inf  ;;  %v11502_v13 = vand.u32 2147483648, %v11487_v43  ;;  %vm11501_vm8 = vcmp.eq.f32.partialorder %v11487_v43, 0.0 }
0x2520   : > { %20862 = vrsqrt.f32 %v11486_v15  ;;  %vm11492_vm13 = vcmp.eq.f32.partialorder %v11486_v15, inf  ;;  %v11495_v63 = vand.u32 2147483648, %v11486_v15  ;;  %vm11494_vm14 = vcmp.eq.f32.partialorder %v11486_v15, 0.0 }
0x2521   : > { %v11482_v4 = vpop.xlane.xlu0 %11481  ;;  %v11485_v21 = vpop.xlane.xlu1 %11484 }
0x2522   : > { %v11488_v5 = vmul.f32 0.032258064, %v11482_v4  ;;  %v11489_v54 = vmul.f32 0.032258064, %v11485_v21 }
0x2524   : > { %20864 = vrsqrt.f32 %v11488_v5  ;;  %vm11506_vm15 = vcmp.eq.f32.partialorder %v11488_v5, inf  ;;  %vm11508_vm1 = vcmp.eq.f32.partialorder %v11488_v5, 0.0  ;;  %v11509_v39 = vand.u32 2147483648, %v11488_v5 }
0x2525   : > { %20866 = vrsqrt.f32 %v11489_v54  ;;  %vm11513_vm2 = vcmp.eq.f32.partialorder %v11489_v54, inf  ;;  %v11516_v7 = vand.u32 2147483648, %v11489_v54  ;;  %vm11515_vm3 = vcmp.eq.f32.partialorder %v11489_v54, 0.0 }
0x2529   : > { %v20861_v52 = vpop.eup %20860 }
0x252a   : > { %v20863_v30 = vpop.eup %20862  ;;  %v11498_v6 = vmul.f32 %v20861_v52, %v11487_v43 }
0x252b   : > { %v11491_v31 = vmul.f32 %v20863_v30, %v11486_v15 }
0x252c   : > { %v11500_v10 = vsel %vm11499_vm7, %v11487_v43, %v11498_v6 }
0x252d   : > { %v11503_v59 = vsel %vm11501_vm8, %v11502_v13, %v11500_v10  ;;  %v11493_v0 = vsel %vm11492_vm13, %v11486_v15, %v11491_v31  ;;  %v17119_v13 = vld [vmem:[%s25709_s11] ss:$0 sm:$0xff]  ;;  %s25713_s11 = sld [smem:[#allocation99_spill]] }
0x252e   : > { %v20865_v48 = vpop.eup %20864  ;;  %v11519_v44 = vadd.f32 1e-06, %v11503_v59  ;;  %v11496_v2 = vsel %vm11494_vm14, %v11495_v63, %v11493_v0 }
0x252f   : > { %v20867_v62 = vpop.eup %20866  ;;  %v11518_v60 = vadd.f32 1e-06, %v11496_v2  ;;  %v11505_v27 = vmul.f32 %v20865_v48, %v11488_v5 }
0x2530   : > { %20868 = vrcp.f32 %v11519_v44  ;;  %v11512_v22 = vmul.f32 %v20867_v62, %v11489_v54 }
0x2531   : > { %v11507_v57 = vsel %vm11506_vm15, %v11488_v5, %v11505_v27  ;;  %20870 = vrcp.f32 %v11518_v60 }
0x2532   : > { %v11510_v24 = vsel %vm11508_vm1, %v11509_v39, %v11507_v57  ;;  %v11514_v42 = vsel %vm11513_vm2, %v11489_v54, %v11512_v22 }
0x2533   : > { %v11520_v26 = vadd.f32 1e-06, %v11510_v24  ;;  %v11517_v25 = vsel %vm11515_vm3, %v11516_v7, %v11514_v42 }
0x2534   : > { %v11521_v29 = vadd.f32 1e-06, %v11517_v25 }
0x2535   : > { %20872 = vrcp.f32 %v11520_v26 }
0x2536   : > { %20874 = vrcp.f32 %v11521_v29 }
0x253a   : > { %v20869_v61 = vpop.eup %20868 }
0x253b   : > { %v20871_v1 = vpop.eup %20870  ;;  %v11528_v58 = vmul.f32 %v20869_v61, %v24534_v17 }
0x253c   : > { %v11527_v55 = vmul.f32 %v20871_v1, %v24537_v53 }
0x253d   : > { %v11538_v14 = vmul.f32 %v17112_v18, %v11528_v58 }
0x253e   : > { %v11537_v11 = vmul.f32 %v17112_v18, %v11527_v55 }
0x253f   : > { %v20873_v38 = vpop.eup %20872  ;;  %v11549_v49 = vadd.f32 %v17113_v33, %v11538_v14 }
0x2540   : > { %v20875_v41 = vpop.eup %20874  ;;  %v11548_v46 = vadd.f32 %v17113_v33, %v11537_v11  ;;  %v11529_v50 = vmul.f32 %v20873_v38, %v24545_v32  ;;  %v17114_v32 = vld [vmem:[%s25708_s13] ss:$0 sm:$0xff]  ;;  %s25710_s13 = sld [smem:[#allocation92_spill]] }
0x2541   : > { %v11530_v37 = vmul.f32 %v20875_v41, %v24548_v36 }
0x2542   : > { %18498 = vmatprep.mubr.msk.f32.mxu1 %vm2566_vm0, %v11548_v46  ;;  %v11539_v12 = vmul.f32 %v17112_v18, %v11529_v50 }
0x2543   : > { %18499 = vmatmul.mubr.msk.f32.vlgmr.msra.gmra.mrb[96].mxu1 %vm2566_vm0, %v11549_v49  ;;  %v11540_v17 = vmul.f32 %v17112_v18, %v11530_v37 }
0x2544   : > { %v11550_v53 = vadd.f32 %v17113_v33, %v11539_v12 }
0x2545   : > { %v11551_v16 = vadd.f32 %v17113_v33, %v11540_v17 }
0x2546   : > { %18501 = vmatprep.mubr.msk.f32.mxu1 %vm2566_vm0, %v11550_v53  ;;  %v11882_v49 = vld [vmem:[%s25710_s13] sm:$0xff]  ;;  %v11883_v37 = vld [vmem:[%s25710_s13 + $0x8] sm:$0xff]  ;;  %v11884_v12 = vld [vmem:[%s25710_s13 + $0x10] sm:$0xff] }
0x2547   : > { %18502 = vmatmul.mubr.msk.f32.gmra.mrb[98].mxu1 %vm2566_vm0, %v11551_v16  ;;  %v19320_v17 = vpack.c.bf16 %v11883_v37, %v11882_v49  ;;  %v11885_v53 = vld [vmem:[%s25710_s13 + $0x18] sm:$0xff] }
0x2548   : > { %v19324_v16 = vpack.c.bf16 %v11885_v53, %v11884_v12 }
0x2549   : > { %19321 = vmatprep.subr.bf16.mxu1 %v19320_v17 }
0x254a   : > { %19323 = vmatpush3.bf16.msra.mxu1 %v19320_v17 }
0x254b   : > { %19325 = vmatprep.subr.bf16.mxu1 %v19324_v16 }
0x254e   : > { %19327 = vmatpush3.bf16.msra.mxu1 %v19324_v16 }
0x2616   : > { %v18500_v34 = vpop.f32.mrb[96].mxu1 }
0x2617   : > { %v11647_v36 = vadd.f32 %v18500_v34, %v17114_v32  ;;  %v11641_v43 = vpop.f32.mrb[97].mxu1 }
0x2618   : > { %v11642_v51 = vadd.f32 %v17114_v32, %v11641_v43 }
0x2619   : > { %v11661_v21 = vmax.f32 %v11647_v36, 0.0 }
0x261a   : > { %v11660_v15 = vmax.f32 %v11642_v51, 0.0  ;;  %v18503_v4 = vpop.f32.mrb[98].mxu1 }
0x261b   : > { %v11657_v5 = vadd.f32 %v18503_v4, %v17114_v32  ;;  %v11651_v54 = vpop.f32.mrb[99].mxu1 }
0x261c   : > { %v11652_v52 = vadd.f32 %v17114_v32, %v11651_v54  ;;  %18520 = vmatprep.mubr.msk.f32.mxu0 %vm4810_vm6, %v11660_v15 }
0x261d   : > { %18521 = vmatmul.mubr.msk.f32.vlgmr.msra.gmra.mrb[84].mxu0 %vm4810_vm6, %v11661_v21  ;;  %v11663_v6 = vmax.f32 %v11657_v5, 0.0 }
0x261e   : > { %v11662_v30 = vmax.f32 %v11652_v52, 0.0 }
0x2620   : > { %18523 = vmatprep.mubr.msk.f32.mxu0 %vm4810_vm6, %v11662_v30 }
0x2621   : > { %18524 = vmatmul.mubr.msk.f32.gmra.mrb[86].mxu0 %vm4810_vm6, %v11663_v6 }
0x26f0   : > { %v18522_v31 = vpop.f32.mrb[84].mxu0 }
0x26f1   : > { %v11763_v10 = vadd.f32 %v18522_v31, %v17119_v13  ;;  %v11757_v63 = vpop.f32.mrb[85].mxu0 }
0x26f2   : > { %v11758_v59 = vadd.f32 %v17119_v13, %v11757_v63 }
0x26f3   : > { %v24586_v0 = vadd.f32 %v11763_v10, %v24514_v47 }
0x26f4   : > { %v24589_v48 = vadd.f32 %v11758_v59, %v24517_v19  ;;  %v18525_v44 = vpop.f32.mrb[86].mxu0 }
0x26f5   : > { %v11773_v2 = vadd.f32 %v18525_v44, %v17119_v13  ;;  %v11767_v62 = vpop.f32.mrb[87].mxu0  ;;  %v11783_v60 = vsel %vm2566_vm0, %v24586_v0, 0.0 }
0x26f6   : > { %v11768_v27 = vadd.f32 %v17119_v13, %v11767_v62  ;;  %11784 = vadd.xlane.f32.xlu1 %v11783_v60  ;;  %v11780_v39 = vsel %vm2566_vm0, %v24589_v48, 0.0 }
0x26f7   : > { %v24596_v22 = vadd.f32 %v11773_v2, %v24524_v45  ;;  %11781 = vadd.xlane.f32.xlu0 %v11780_v39 }
0x26f8   : > { %v24599_v47 = vadd.f32 %v11768_v27, %v24527_v20 }
0x26f9   : > { %v11789_v19 = vsel %vm2566_vm0, %v24596_v22, 0.0 }
0x26fa   : > { %11790 = vadd.xlane.f32.xlu1 %v11789_v19  ;;  %v11786_v57 = vsel %vm2566_vm0, %v24599_v47, 0.0 }
0x26fb   : > { %11787 = vadd.xlane.f32.xlu0 %v11786_v57 }
0x2783   : > { %v11785_v7 = vpop.xlane.xlu1 %11784 }
0x2784   : > { %v11793_v24 = vmul.f32 0.03125, %v11785_v7  ;;  %v11782_v42 = vpop.xlane.xlu0 %11781 }
0x2785   : > { %v11792_v26 = vmul.f32 0.03125, %v11782_v42 }
0x2786   : > { %v24606_v25 = vsub.f32 %v24586_v0, %v11793_v24 }
0x2787   : > { %v24609_v45 = vsub.f32 %v24589_v48, %v11792_v26  ;;  %v11791_v20 = vpop.xlane.xlu1 %11790 }
0x2788   : > { %v11795_v29 = vmul.f32 0.03125, %v11791_v20  ;;  %v11788_v61 = vpop.xlane.xlu0 %11787  ;;  %v11801_v18 = vmul.f32 %v24606_v25, %v24606_v25  ;;  %v17124_v20 = vld [vmem:[#allocation4] ss:$0 sm:$0xff] }
0x2789   : > { %v11794_v1 = vmul.f32 0.03125, %v11788_v61  ;;  %v11800_v58 = vmul.f32 %v24609_v45, %v24609_v45 }
0x278a   : > { %v24616_v55 = vsub.f32 %v24596_v22, %v11795_v29  ;;  %v11807_v33 = vsel %vm2566_vm0, %v11801_v18, 0.0 }
0x278b   : > { %v24620_v14 = vsub.f32 %v24599_v47, %v11794_v1  ;;  %11808 = vadd.xlane.f32.xlu1 %v11807_v33  ;;  %v11804_v11 = vsel %vm2566_vm0, %v11800_v58, 0.0  ;;  %v17125_v58 = vld [vmem:[#allocation6] ss:$0 sm:$0xff] }
0x278c   : > { %11805 = vadd.xlane.f32.xlu0 %v11804_v11  ;;  %v11803_v38 = vmul.f32 %v24616_v55, %v24616_v55 }
0x278d   : > { %v11802_v41 = vmul.f32 %v24620_v14, %v24620_v14 }
0x278e   : > { %v11813_v46 = vsel %vm2566_vm0, %v11803_v38, 0.0 }
0x278f   : > { %11814 = vadd.xlane.f32.xlu1 %v11813_v46  ;;  %v11810_v50 = vsel %vm2566_vm0, %v11802_v41, 0.0 }
0x2790   : > { %11811 = vadd.xlane.f32.xlu0 %v11810_v50 }
0x2818   : > { %v11809_v9 = vpop.xlane.xlu1 %11808 }
0x2819   : > { %v11817_v28 = vmul.f32 0.032258064, %v11809_v9  ;;  %v11806_v8 = vpop.xlane.xlu0 %11805 }
0x281a   : > { %v11816_v32 = vmul.f32 0.032258064, %v11806_v8 }
0x281b   : > { %20876 = vrsqrt.f32 %v11817_v28  ;;  %vm11829_vm4 = vcmp.eq.f32.partialorder %v11817_v28, inf  ;;  %v11832_v5 = vand.u32 2147483648, %v11817_v28  ;;  %vm11831_vm5 = vcmp.eq.f32.partialorder %v11817_v28, 0.0 }
0x281c   : > { %20878 = vrsqrt.f32 %v11816_v32  ;;  %v11815_v34 = vpop.xlane.xlu1 %11814  ;;  %vm11822_vm7 = vcmp.eq.f32.partialorder %v11816_v32, inf  ;;  %v11825_v30 = vand.u32 2147483648, %v11816_v32  ;;  %vm11824_vm8 = vcmp.eq.f32.partialorder %v11816_v32, 0.0 }
0x281d   : > { %v11819_v36 = vmul.f32 0.032258064, %v11815_v34  ;;  %v11812_v43 = vpop.xlane.xlu0 %11811 }
0x281e   : > { %v11818_v51 = vmul.f32 0.032258064, %v11812_v43 }
0x281f   : > { %20880 = vrsqrt.f32 %v11819_v36  ;;  %vm11843_vm13 = vcmp.eq.f32.partialorder %v11819_v36, inf  ;;  %vm11845_vm14 = vcmp.eq.f32.partialorder %v11819_v36, 0.0  ;;  %v11846_v62 = vand.u32 2147483648, %v11819_v36 }
0x2820   : > { %20882 = vrsqrt.f32 %v11818_v51  ;;  %vm11836_vm15 = vcmp.eq.f32.partialorder %v11818_v51, inf  ;;  %v11839_v39 = vand.u32 2147483648, %v11818_v51  ;;  %vm11838_vm1 = vcmp.eq.f32.partialorder %v11818_v51, 0.0 }
0x2825   : > { %v20877_v15 = vpop.eup %20876 }
0x2826   : > { %v20879_v4 = vpop.eup %20878  ;;  %v11828_v21 = vmul.f32 %v20877_v15, %v11817_v28 }
0x2827   : > { %v11821_v54 = vmul.f32 %v20879_v4, %v11816_v32 }
0x2828   : > { %v11830_v52 = vsel %vm11829_vm4, %v11817_v28, %v11828_v21 }
0x2829   : > { %v20881_v6 = vpop.eup %20880  ;;  %v11833_v13 = vsel %vm11831_vm5, %v11832_v5, %v11830_v52  ;;  %v11823_v31 = vsel %vm11822_vm7, %v11816_v32, %v11821_v54 }
0x282a   : > { %v20883_v10 = vpop.eup %20882  ;;  %v11849_v63 = vadd.f32 1e-06, %v11833_v13  ;;  %v11826_v59 = vsel %vm11824_vm8, %v11825_v30, %v11823_v31  ;;  %v11842_v44 = vmul.f32 %v20881_v6, %v11819_v36 }
0x282b   : > { %v11848_v2 = vadd.f32 1e-06, %v11826_v59  ;;  %v11835_v60 = vmul.f32 %v20883_v10, %v11818_v51 }
0x282c   : > { %20884 = vrcp.f32 %v11849_v63  ;;  %v11844_v27 = vsel %vm11843_vm13, %v11819_v36, %v11842_v44 }
0x282d   : > { %v11847_v19 = vsel %vm11845_vm14, %v11846_v62, %v11844_v27  ;;  %v11837_v57 = vsel %vm11836_vm15, %v11818_v51, %v11835_v60  ;;  %20886 = vrcp.f32 %v11848_v2 }
0x282e   : > { %v11851_v7 = vadd.f32 1e-06, %v11847_v19  ;;  %v11840_v24 = vsel %vm11838_vm1, %v11839_v39, %v11837_v57 }
0x282f   : > { %v11850_v42 = vadd.f32 1e-06, %v11840_v24 }
0x2830   : > { %20888 = vrcp.f32 %v11851_v7 }
0x2831   : > { %20890 = vrcp.f32 %v11850_v42 }
0x2836   : > { %v20885_v26 = vpop.eup %20884 }
0x2837   : > { %v20887_v29 = vpop.eup %20886  ;;  %v11858_v61 = vmul.f32 %v20885_v26, %v24606_v25 }
0x2838   : > { %v11857_v18 = vmul.f32 %v20887_v29, %v24609_v45  ;;  %v17126_v45 = vld [vmem:[#allocation2] ss:$0 sm:$0xff] }
0x2839   : > { %v11868_v1 = vmul.f32 %v17124_v20, %v11858_v61 }
0x283a   : > { %v20889_v33 = vpop.eup %20888  ;;  %v11867_v11 = vmul.f32 %v17124_v20, %v11857_v18 }
0x283b   : > { %v20891_v38 = vpop.eup %20890  ;;  %v11860_v41 = vmul.f32 %v20889_v33, %v24616_v55  ;;  %v11879_v49 = vadd.f32 %v17125_v58, %v11868_v1 }
0x283c   : > { %v11878_v46 = vadd.f32 %v17125_v58, %v11867_v11  ;;  %v11859_v50 = vmul.f32 %v20891_v38, %v24620_v14 }
0x283d   : > { %v11870_v37 = vmul.f32 %v17124_v20, %v11860_v41 }
0x283e   : > { %18534 = vmatprep.mubr.msk.f32.mxu1 %vm2566_vm0, %v11878_v46  ;;  %v11869_v12 = vmul.f32 %v17124_v20, %v11859_v50 }
0x283f   : > { %18535 = vmatmul.mubr.msk.f32.vlgmr.msra.gmra.mrb[100].mxu1 %vm2566_vm0, %v11879_v49  ;;  %v11881_v17 = vadd.f32 %v17125_v58, %v11870_v37 }
0x2840   : > { %v11880_v25 = vadd.f32 %v17125_v58, %v11869_v12 }
0x2842   : > { %18537 = vmatprep.mubr.msk.f32.mxu1 %vm2566_vm0, %v11880_v25 }
0x2843   : > { %18538 = vmatmul.mubr.msk.f32.gmra.mrb[102].mxu1 %vm2566_vm0, %v11881_v17 }
0x2912   : > { %v18536_v53 = vpop.f32.mrb[100].mxu1 }
0x2913   : > { %v11977_v16 = vadd.f32 %v18536_v53, %v17126_v45  ;;  %v11971_v55 = vpop.f32.mrb[101].mxu1 }
0x2914   : > { %v11972_v9 = vadd.f32 %v17126_v45, %v11971_v55 }
0x2915   : > { %v11991_v5 = vmul.f32 0.35355338, %v11977_v16 }
0x2916   : > { %v18539_v28 = vpop.f32.mrb[102].mxu1  ;;  %v20312_v14 = vpack.i.bf16 %v11977_v16, %v11972_v9  ;;  %v11990_v8 = vmul.f32 0.35355338, %v11972_v9 }
0x2917   : > { %v11987_v32 = vadd.f32 %v18539_v28, %v17126_v45  ;;  %v11981_v34 = vpop.f32.mrb[103].mxu1 }
0x2918   : > { %v11982_v36 = vadd.f32 %v17126_v45, %v11981_v34  ;;  %20313 = vrot.lane.b32.xlu0 %v20312_v14, %s25687_s3  ;;  %18544 = vmatprep.mubr.msk.f32.mxu1 %vm2842_vm9, %v11990_v8 }
0x2919   : > { %v11993_v30 = vmul.f32 0.35355338, %v11987_v32 }
0x291a   : > { %v20327_v43 = vpack.i.bf16 %v11987_v32, %v11982_v36  ;;  %v11992_v51 = vmul.f32 0.35355338, %v11982_v36 }
0x291c   : > { %20328 = vrot.lane.b32.xlu0 %v20327_v43, %s25688_s1  ;;  %20318 = vrot.lane.b32.xlu1 %v20327_v43, %s25687_s3 }
0x291d   : > { %18551 = vmatprep.mubr.msk.f32.mxu0 %vm2842_vm9, %v11992_v51 }
0x2920   : > { %20338 = vrot.lane.b32.xlu0 %v20327_v43, %s25689_s0  ;;  %20323 = vrot.lane.b32.xlu1 %v20312_v14, %s25688_s1 }
0x2924   : > { %20348 = vrot.lane.b32.xlu0 %v20327_v43, %s25690_s4  ;;  %20333 = vrot.lane.b32.xlu1 %v20312_v14, %s25689_s0 }
0x2928   : > { %11998 = vrot.lane.b32.xlu0 %v11990_v8, %s25687_s3  ;;  %20343 = vrot.lane.b32.xlu1 %v20312_v14, %s25690_s4 }
0x298a   : > { %v20314_v15 = vpop.permute.xlu0 %20313 }
0x298b   : > { %20353 = vrot.lane.b32.xlu1 %v20314_v15, %s25690_s4 }
0x298e   : > { %v24652_v4 = vpop.permute.xlu0 %20328  ;;  %v20319_v21 = vpop.permute.xlu1 %20318 }
0x298f   : > { %12000 = vrot.lane.b32.xlu1 %v11991_v5, %s25687_s3  ;;  %20363 = vrot.lane.b32.xlu0 %v20319_v21, %s25690_s4 }
0x2992   : > { %v24655_v54 = vpop.permute.xlu0 %20338  ;;  %v24657_v52 = vpop.permute.xlu1 %20323 }
0x2993   : > { %20358 = vrot.lane.b32.xlu1 %v24657_v52, %s25690_s4  ;;  %12004 = vrot.lane.b32.xlu0 %v11993_v30, %s25687_s3 }
0x2996   : > { %v20349_v6 = vpop.permute.xlu0 %20348  ;;  %v24661_v13 = vpop.permute.xlu1 %20333 }
0x2997   : > { %v20351_v31 = vunpack.i.h.bf16 %v20349_v6  ;;  %v20350_v10 = vunpack.i.l.bf16 %v20349_v6  ;;  %20373 = vrot.lane.b32.xlu0 %v24652_v4, %s25690_s4  ;;  %12002 = vrot.lane.b32.xlu1 %v11992_v51, %s25687_s3 }
0x2999   : > { %v19334_v63 = vpack.c.bf16 %v20351_v31, %v20350_v10 }
0x299a   : > { %v20344_v59 = vpop.permute.xlu1 %20343  ;;  %v11999_v60 = vpop.permute.xlu0 %11998 }
0x299b   : > { %v20346_v44 = vunpack.i.h.bf16 %v20344_v59  ;;  %v20345_v2 = vunpack.i.l.bf16 %v20344_v59  ;;  %19336 = vmatprep.subr.msk.bf16.mxu0 %vm22880_vm10, %v19334_v63  ;;  %12006 = vrot.lane.b32.xlu0 %v11990_v8, %s25688_s1 }
0x299c   : > { %19339 = vmatpush3.bf16.xpose.msk.msra.mxu0 %vm22880_vm10, %v19334_v63  ;;  %20368 = vrot.lane.b32.xlu1 %v24661_v13, %s25690_s4 }
0x299d   : > { %v19328_v62 = vpack.c.bf16 %v20346_v44, %v20345_v2 }
0x299f   : > { %19330 = vmatprep.subr.msk.bf16.mxu1 %vm22880_vm10, %v19328_v62  ;;  %20378 = vrot.lane.b32.xlu0 %v24655_v54, %s25690_s4 }
0x29a0   : > { %19333 = vmatpush3.bf16.xpose.msk.msra.mxu1 %vm22880_vm10, %v19328_v62  ;;  %12008 = vrot.lane.b32.xlu1 %v11991_v5, %s25688_s1 }
0x29a3   : > { %18552 = vmatmul.mubr.msk.f32.vlgmr.msra.gmra.mrb[88].mxu0 %vm2842_vm9, %v11993_v30  ;;  %12012 = vrot.lane.b32.xlu0 %v11993_v30, %s25688_s1 }
0x29a4   : > { %12010 = vrot.lane.b32.xlu1 %v11992_v51, %s25688_s1 }
0x29a7   : > { %18545 = vmatmul.mubr.msk.f32.vlgmr.msra.gmra.mrb[104].mxu1 %vm2842_vm9, %v11991_v5  ;;  %12016 = vrot.lane.b32.xlu0 %v11991_v5, %s25689_s0 }
0x29a8   : > { %18558 = vmatprep.mubr.msk.f32.mxu1 %vm2842_vm9, %v11999_v60  ;;  %12014 = vrot.lane.b32.xlu1 %v11990_v8, %s25689_s0 }
0x29ab   : > { %12020 = vrot.lane.b32.xlu0 %v11993_v30, %s25689_s0 }
0x29ac   : > { %12018 = vrot.lane.b32.xlu1 %v11992_v51, %s25689_s0 }
0x29af   : > { %20383 = vrot.lane.b32.xlu0 %v20312_v14, %s25691_s6 }
0x29b0   : > { %20388 = vrot.lane.b32.xlu1 %v20327_v43, %s25691_s6 }
0x29b3   : > { %20398 = vrot.lane.b32.xlu0 %v20319_v21, %s25691_s6 }
0x29b4   : > { %20393 = vrot.lane.b32.xlu1 %v20314_v15, %s25691_s6 }
0x29fd   : > { %v20354_v27 = vpop.permute.xlu1 %20353 }
0x29fe   : > { %v20356_v39 = vunpack.i.h.bf16 %v20354_v27  ;;  %v20355_v19 = vunpack.i.l.bf16 %v20354_v27 }
0x2a00   : > { %v19340_v57 = vpack.c.bf16 %v20356_v39, %v20355_v19 }
0x2a01   : > { %v12001_v7 = vpop.permute.xlu1 %12000  ;;  %v20364_v24 = vpop.permute.xlu0 %20363 }
0x2a02   : > { %v20366_v42 = vunpack.i.h.bf16 %v20364_v24  ;;  %v20365_v26 = vunpack.i.l.bf16 %v20364_v24  ;;  %19342 = vmatprep.subr.msk.bf16.mxu1 %vm22880_vm10, %v19340_v57 }
0x2a03   : > { %19345 = vmatpush3.bf16.xpose.msk.msra.mxu1 %vm22880_vm10, %v19340_v57 }
0x2a04   : > { %v19346_v20 = vpack.c.bf16 %v20366_v42, %v20365_v26 }
0x2a05   : > { %v20359_v29 = vpop.permute.xlu1 %20358  ;;  %v12005_v61 = vpop.permute.xlu0 %12004 }
0x2a06   : > { %v20361_v18 = vunpack.i.h.bf16 %v20359_v29  ;;  %v20360_v1 = vunpack.i.l.bf16 %v20359_v29  ;;  %19348 = vmatprep.subr.msk.bf16.mxu0 %vm22880_vm10, %v19346_v20 }
0x2a07   : > { %19351 = vmatpush3.bf16.xpose.msk.msra.mxu0 %vm22880_vm10, %v19346_v20 }
0x2a08   : > { %v19352_v58 = vpack.c.bf16 %v20361_v18, %v20360_v1 }
0x2a09   : > { %v20374_v33 = vpop.permute.xlu0 %20373  ;;  %v12003_v41 = vpop.permute.xlu1 %12002 }
0x2a0a   : > { %v20376_v11 = vunpack.i.h.bf16 %v20374_v33  ;;  %v20375_v38 = vunpack.i.l.bf16 %v20374_v33  ;;  %18559 = vmatmul.mubr.msk.f32.vlgmr.msra.gmra.mrb[106].mxu1 %vm2842_vm9, %v12001_v7  ;;  %19354 = vmatprep.subr.msk.bf16.mxu1 %vm22880_vm10, %v19352_v58 }
0x2a0b   : > { %18565 = vmatprep.mubr.msk.f32.mxu0 %vm2842_vm9, %v12003_v41  ;;  %19357 = vmatpush3.bf16.xpose.msk.msra.mxu1 %vm22880_vm10, %v19352_v58 }
0x2a0c   : > { %v19358_v46 = vpack.c.bf16 %v20376_v11, %v20375_v38 }
0x2a0d   : > { %v12007_v50 = vpop.permute.xlu0 %12006 }
0x2a0e   : > { %v20369_v49 = vpop.permute.xlu1 %20368  ;;  %18566 = vmatmul.mubr.msk.f32.vlgmr.msra.gmra.mrb[90].mxu0 %vm2842_vm9, %v12005_v61  ;;  %18572 = vmatprep.mubr.msk.f32.mxu1 %vm2842_vm9, %v12007_v50 }
0x2a0f   : > { %v20371_v37 = vunpack.i.h.bf16 %v20369_v49  ;;  %v20370_v12 = vunpack.i.l.bf16 %v20369_v49  ;;  %19360 = vmatprep.subr.msk.bf16.mxu0 %vm22880_vm10, %v19358_v46 }
0x2a10   : > { %19363 = vmatpush3.bf16.xpose.msk.msra.mxu0 %vm22880_vm10, %v19358_v46 }
0x2a11   : > { %v19364_v25 = vpack.c.bf16 %v20371_v37, %v20370_v12  ;;  %v20379_v17 = vpop.permute.xlu0 %20378 }
0x2a12   : > { %v20381_v45 = vunpack.i.h.bf16 %v20379_v17  ;;  %v20380_v53 = vunpack.i.l.bf16 %v20379_v17  ;;  %v12009_v16 = vpop.permute.xlu1 %12008 }
0x2a13   : > { %18573 = vmatmul.mubr.msk.f32.vlgmr.msra.gmra.mrb[108].mxu1 %vm2842_vm9, %v12009_v16  ;;  %19366 = vmatprep.subr.msk.bf16.mxu1 %vm22880_vm10, %v19364_v25 }
0x2a14   : > { %v19370_v55 = vpack.c.bf16 %v20381_v45, %v20380_v53  ;;  %19369 = vmatpush3.bf16.xpose.msk.msra.mxu1 %vm22880_vm10, %v19364_v25 }
0x2a15   : > { %v12013_v9 = vpop.permute.xlu0 %12012 }
0x2a16   : > { %v12011_v28 = vpop.permute.xlu1 %12010  ;;  %19372 = vmatprep.subr.msk.bf16.mxu0 %vm22880_vm10, %v19370_v55 }
0x2a17   : > { %18579 = vmatprep.mubr.msk.f32.mxu0 %vm2842_vm9, %v12011_v28 }
0x2a18   : > { %18580 = vmatmul.mubr.msk.f32.vlgmr.msra.gmra.mrb[92].mxu0 %vm2842_vm9, %v12013_v9 }
0x2a19   : > { %19375 = vmatpush3.bf16.xpose.msk.msra.mxu0 %vm22880_vm10, %v19370_v55  ;;  %v12017_v14 = vpop.permute.xlu0 %12016 }
0x2a1a   : > { %v12015_v8 = vpop.permute.xlu1 %12014 }
0x2a1b   : > { %18586 = vmatprep.mubr.msk.f32.mxu1 %vm2842_vm9, %v12015_v8 }
0x2a1c   : > { %18587 = vmatmul.mubr.msk.f32.vlgmr.msra.gmra.mrb[110].mxu1 %vm2842_vm9, %v12017_v14 }
0x2a1d   : > { %v12021_v32 = vpop.permute.xlu0 %12020 }
0x2a1e   : > { %v12019_v34 = vpop.permute.xlu1 %12018 }
0x2a1f   : > { %18593 = vmatprep.mubr.msk.f32.mxu0 %vm2842_vm9, %v12019_v34 }
0x2a20   : > { %18594 = vmatmul.mubr.msk.f32.vlgmr.msra.gmra.mrb[94].mxu0 %vm2842_vm9, %v12021_v32 }
0x2a21   : > { %v20384_v36 = vpop.permute.xlu0 %20383 }
0x2a22   : > { %v20386_v43 = vunpack.i.h.bf16 %v20384_v36  ;;  %v20385_v51 = vunpack.i.l.bf16 %v20384_v36  ;;  %v20389_v15 = vpop.permute.xlu1 %20388 }
0x2a23   : > { %v20391_v21 = vunpack.i.h.bf16 %v20389_v15  ;;  %v20390_v5 = vunpack.i.l.bf16 %v20389_v15 }
0x2a24   : > { %v19376_v30 = vpack.c.bf16 %v20386_v43, %v20385_v51 }
0x2a25   : > { %v24731_v31 = vpack.c.bf16 %v20391_v21, %v20390_v5  ;;  %v24789_v55 = vpop.permute.xlu0 %20398 }
0x2a26   : > { %v20394_v6 = vpop.permute.xlu1 %20393  ;;  %19377 = vmatprep.subr.bf16.mxu1 %v19376_v30 }
0x2a27   : > { %v20396_v10 = vunpack.i.h.bf16 %v20394_v6  ;;  %v20395_v63 = vunpack.i.l.bf16 %v20394_v6  ;;  %19379 = vmatpush3.bf16.msra.mxu1 %v19376_v30 }
0x2a28   : > { %19381 = vmatprep.subr.bf16.mxu1 %v24731_v31 }
0x2a29   : > { %v19384_v59 = vpack.c.bf16 %v20396_v10, %v20395_v63 }
0x2a2b   : > { %19385 = vmatprep.subr.bf16.mxu0 %v19384_v59 }
0x2a2c   : > { %19387 = vmatpush3.bf16.msra.mxu0 %v19384_v59 }
0x2a76   : > { %v18553_v44 = vpop.f32.mrb[88].mxu0 }
0x2a77   : > { %v24734_v2 = vpop.f32.mrb[89].mxu0  ;;  %v12755_v19 = vsel %vm3535_vm11, %v18553_v44, -inf }
0x2a78   : > { %v12752_v57 = vsel %vm3535_vm11, %v24734_v2, -inf }
0x2a7a   : > { %v18546_v62 = vpop.f32.mrb[104].mxu1 }
0x2a7b   : > { %v12128_v60 = vpop.f32.mrb[105].mxu1  ;;  %v12749_v27 = vsel %vm3535_vm11, %v18546_v62, -inf }
0x2a7c   : > { %12750 = vmax.xlane.f32.xlu0 %v12749_v27  ;;  %v12746_v39 = vsel %vm3535_vm11, %v12128_v60, -inf }
0x2a7d   : > { %12747 = vmax.xlane.f32.xlu1 %v12746_v39 }
0x2a80   : > { %12756 = vmax.xlane.f32.xlu0 %v12755_v19 }
0x2a84   : > { %12753 = vmax.xlane.f32.xlu0 %v12752_v57 }
0x2add   : > { %v24741_v7 = vpop.f32.mrb[106].mxu1 }
0x2ade   : > { %v24743_v24 = vpop.f32.mrb[107].mxu1  ;;  %v12761_v42 = vsel %vm3535_vm11, %v24741_v7, -inf }
0x2adf   : > { %12762 = vmax.xlane.f32.xlu1 %v12761_v42  ;;  %v12758_v29 = vsel %vm3535_vm11, %v24743_v24, -inf }
0x2ae1   : > { %v24747_v26 = vpop.f32.mrb[90].mxu0 }
0x2ae2   : > { %v24749_v20 = vpop.f32.mrb[91].mxu0  ;;  %v12767_v61 = vsel %vm3535_vm11, %v24747_v26, -inf }
0x2ae3   : > { %12759 = vmax.xlane.f32.xlu1 %v12758_v29  ;;  %12768 = vmax.xlane.f32.xlu0 %v12767_v61  ;;  %v12764_v1 = vsel %vm3535_vm11, %v24749_v20, -inf }
0x2ae6   : > { %v24755_v18 = vpop.f32.mrb[108].mxu1 }
0x2ae7   : > { %v24759_v58 = vpop.f32.mrb[109].mxu1  ;;  %v12773_v33 = vsel %vm3535_vm11, %v24755_v18, -inf  ;;  %12765 = vmax.xlane.f32.xlu0 %v12764_v1 }
0x2ae8   : > { %12774 = vmax.xlane.f32.xlu1 %v12773_v33  ;;  %v12770_v38 = vsel %vm3535_vm11, %v24759_v58, -inf }
0x2aeb   : > { %v24763_v11 = vpop.f32.mrb[92].mxu0 }
0x2aec   : > { %12771 = vmax.xlane.f32.xlu1 %v12770_v38  ;;  %v24767_v41 = vpop.f32.mrb[93].mxu0  ;;  %v12779_v46 = vsel %vm3535_vm11, %v24763_v11, -inf }
0x2aed   : > { %12780 = vmax.xlane.f32.xlu0 %v12779_v46  ;;  %v12776_v12 = vsel %vm3535_vm11, %v24767_v41, -inf }
0x2aef   : > { %v24771_v50 = vpop.f32.mrb[110].mxu1 }
0x2af0   : > { %v24773_v49 = vpop.f32.mrb[111].mxu1  ;;  %v12785_v37 = vsel %vm3535_vm11, %v24771_v50, -inf }
0x2af1   : > { %12786 = vmax.xlane.f32.xlu1 %v12785_v37  ;;  %12777 = vmax.xlane.f32.xlu0 %v12776_v12  ;;  %v12782_v45 = vsel %vm3535_vm11, %v24773_v49, -inf }
0x2af3   : > { %v24779_v25 = vpop.f32.mrb[94].mxu0 }
0x2af4   : > { %v24781_v17 = vpop.f32.mrb[95].mxu0  ;;  %v12791_v16 = vsel %vm3535_vm11, %v24779_v25, -inf }
0x2af5   : > { %12783 = vmax.xlane.f32.xlu1 %v12782_v45  ;;  %v12788_v53 = vsel %vm3535_vm11, %v24781_v17, -inf }
0x2af6   : > { %12789 = vmax.xlane.f32.xlu0 %v12788_v53 }
0x2af9   : > { %12792 = vmax.xlane.f32.xlu1 %v12791_v16 }
0x2b09   : > { %v12751_v9 = vpop.xlane.xlu0 %12750 }
0x2b0a   : > { %20403 = vrot.lane.b32.xlu1 %v24657_v52, %s25691_s6  ;;  %v12748_v28 = vpop.xlane.xlu1 %12747  ;;  %v12795_v32 = vsub.f32 %v18546_v62, %v12751_v9 }
0x2b0b   : > { %v12794_v8 = vsub.f32 %v12128_v60, %v12748_v28 }
0x2b0c   : > { %20408 = vrot.lane.b32.xlu0 %v24652_v4, %s25691_s6  ;;  %v12812_v51 = vmul.f32 1.442695, %v12795_v32 }
0x2b0d   : > { %v12757_v14 = vpop.xlane.xlu0 %12756  ;;  %v12810_v34 = vmul.f32 1.442695, %v12794_v8 }
0x2b0e   : > { %v12797_v36 = vsub.f32 %v18553_v44, %v12757_v14 }
0x2b0f   : > { %20892 = vpow2.f32 %v12810_v34 }
0x2b10   : > { %v12816_v15 = vmul.f32 1.442695, %v12797_v36  ;;  %20894 = vpow2.f32 %v12812_v51 }
0x2b11   : > { %v12754_v43 = vpop.xlane.xlu0 %12753 }
0x2b12   : > { %v12796_v21 = vsub.f32 %v24734_v2, %v12754_v43  ;;  %20896 = vpow2.f32 %v12816_v15 }
0x2b14   : > { %v12814_v5 = vmul.f32 1.442695, %v12796_v21 }
0x2b16   : > { %20898 = vpow2.f32 %v12814_v5 }
0x2b19   : > { %v24796_v52 = vpop.eup %20892 }
0x2b1a   : > { %v24798_v4 = vpop.eup %20894  ;;  %v12842_v30 = vsel %vm3535_vm11, %v24796_v52, 0.0 }
0x2b1b   : > { %v12845_v10 = vsel %vm3535_vm11, %v24798_v4, 0.0 }
0x2b1c   : > { %v24802_v6 = vpop.eup %20896 }
0x2b1d   : > { %v12851_v63 = vsel %vm3535_vm11, %v24802_v6, 0.0 }
0x2b20   : > { %v24808_v59 = vpop.eup %20898 }
0x2b21   : > { %v12848_v44 = vsel %vm3535_vm11, %v24808_v59, 0.0 }
0x2b2b   : > { %12843 = vadd.xlane.f32.xlu0 %v12842_v30 }
0x2b2e   : > { %12846 = vadd.xlane.f32.xlu1 %v12845_v10 }
0x2b2f   : > { %12852 = vadd.xlane.f32.xlu0 %v12851_v63 }
0x2b33   : > { %12849 = vadd.xlane.f32.xlu0 %v12848_v44 }
0x2b6c   : > { %v12763_v2 = vpop.xlane.xlu1 %12762 }
0x2b6d   : > { %v12799_v62 = vsub.f32 %v24741_v7, %v12763_v2 }
0x2b6f   : > { %v12820_v60 = vmul.f32 1.442695, %v12799_v62 }
0x2b70   : > { %v12760_v27 = vpop.xlane.xlu1 %12759  ;;  %v12769_v39 = vpop.xlane.xlu0 %12768 }
0x2b71   : > { %20900 = vpow2.f32 %v12820_v60  ;;  %v12798_v19 = vsub.f32 %v24743_v24, %v12760_v27  ;;  %v12801_v57 = vsub.f32 %v24747_v26, %v12769_v39 }
0x2b73   : > { %v12818_v42 = vmul.f32 1.442695, %v12798_v19  ;;  %v12824_v29 = vmul.f32 1.442695, %v12801_v57 }
0x2b74   : > { %v12766_v61 = vpop.xlane.xlu0 %12765 }
0x2b75   : > { %20902 = vpow2.f32 %v12818_v42  ;;  %v12775_v1 = vpop.xlane.xlu1 %12774  ;;  %v12800_v33 = vsub.f32 %v24749_v20, %v12766_v61 }
0x2b76   : > { %20904 = vpow2.f32 %v12824_v29  ;;  %v12803_v38 = vsub.f32 %v24755_v18, %v12775_v1 }
0x2b77   : > { %v12822_v46 = vmul.f32 1.442695, %v12800_v33 }
0x2b78   : > { %v12828_v7 = vmul.f32 1.442695, %v12803_v38 }
0x2b79   : > { %20906 = vpow2.f32 %v12822_v46  ;;  %v12772_v37 = vpop.xlane.xlu1 %12771 }
0x2b7a   : > { %20908 = vpow2.f32 %v12828_v7  ;;  %v12802_v12 = vsub.f32 %v24759_v58, %v12772_v37  ;;  %v12781_v24 = vpop.xlane.xlu0 %12780 }
0x2b7b   : > { %v24818_v45 = vpop.eup %20900  ;;  %v12805_v26 = vsub.f32 %v24763_v11, %v12781_v24 }
0x2b7c   : > { %v12826_v53 = vmul.f32 1.442695, %v12802_v12  ;;  %v12857_v16 = vsel %vm3535_vm11, %v24818_v45, 0.0 }
0x2b7d   : > { %v12832_v20 = vmul.f32 1.442695, %v12805_v26  ;;  %12858 = vadd.xlane.f32.xlu1 %v12857_v16 }
0x2b7e   : > { %20910 = vpow2.f32 %v12826_v53  ;;  %v12787_v18 = vpop.xlane.xlu1 %12786  ;;  %v12778_v9 = vpop.xlane.xlu0 %12777 }
0x2b7f   : > { %v24823_v28 = vpop.eup %20902  ;;  %20912 = vpow2.f32 %v12832_v20  ;;  %v12807_v14 = vsub.f32 %v24771_v50, %v12787_v18  ;;  %v12804_v58 = vsub.f32 %v24767_v41, %v12778_v9 }
0x2b80   : > { %v24827_v8 = vpop.eup %20904  ;;  %v12854_v11 = vsel %vm3535_vm11, %v24823_v28, 0.0 }
0x2b81   : > { %v12836_v32 = vmul.f32 1.442695, %v12807_v14  ;;  %v12830_v34 = vmul.f32 1.442695, %v12804_v58  ;;  %12855 = vadd.xlane.f32.xlu1 %v12854_v11  ;;  %v12863_v36 = vsel %vm3535_vm11, %v24827_v8, 0.0  ;;  %v20401_v14 = vunpack.i.h.bf16 %v24789_v55 }
0x2b82   : > { %v12784_v43 = vpop.xlane.xlu1 %12783  ;;  %12864 = vadd.xlane.f32.xlu0 %v12863_v36  ;;  %v20400_v58 = vunpack.i.l.bf16 %v24789_v55 }
0x2b83   : > { %v24833_v51 = vpop.eup %20906  ;;  %20914 = vpow2.f32 %v12836_v32  ;;  %v12806_v50 = vsub.f32 %v24773_v49, %v12784_v43  ;;  %v12790_v15 = vpop.xlane.xlu0 %12789 }
0x2b84   : > { %v24836_v41 = vpop.eup %20908  ;;  %20916 = vpow2.f32 %v12830_v34  ;;  %v12808_v21 = vsub.f32 %v24781_v17, %v12790_v15  ;;  %v12860_v5 = vsel %vm3535_vm11, %v24833_v51, 0.0  ;;  %v19388_v11 = vpack.c.bf16 %v20401_v14, %v20400_v58 }
0x2b85   : > { %v12834_v30 = vmul.f32 1.442695, %v12806_v50  ;;  %v12869_v10 = vsel %vm3535_vm11, %v24836_v41, 0.0 }
0x2b86   : > { %v12838_v63 = vmul.f32 1.442695, %v12808_v21  ;;  %12870 = vadd.xlane.f32.xlu1 %v12869_v10  ;;  %v12793_v44 = vpop.xlane.xlu1 %12792  ;;  %12861 = vadd.xlane.f32.xlu0 %v12860_v5 }
0x2b87   : > { %20918 = vpow2.f32 %v12834_v30  ;;  %v12809_v49 = vsub.f32 %v24779_v25, %v12793_v44  ;;  %v20409_v24 = vpop.permute.xlu0 %20408 }
0x2b88   : > { %v24844_v2 = vpop.eup %20910  ;;  %20920 = vpow2.f32 %v12838_v63  ;;  %v20411_v36 = vunpack.i.h.bf16 %v20409_v24  ;;  %v20410_v43 = vunpack.i.l.bf16 %v20409_v24 }
0x2b89   : > { %v24846_v62 = vpop.eup %20912  ;;  %v12840_v17 = vmul.f32 1.442695, %v12809_v49  ;;  %v12866_v60 = vsel %vm3535_vm11, %v24844_v2, 0.0 }
0x2b8a   : > { %12867 = vadd.xlane.f32.xlu1 %v12866_v60  ;;  %v20404_v27 = vpop.permute.xlu1 %20403  ;;  %v12875_v39 = vsel %vm3535_vm11, %v24846_v62, 0.0  ;;  %v19396_v55 = vpack.c.bf16 %v20411_v36, %v20410_v43 }
0x2b8b   : > { %20922 = vpow2.f32 %v12840_v17  ;;  %v20406_v19 = vunpack.i.h.bf16 %v20404_v27  ;;  %v20405_v57 = vunpack.i.l.bf16 %v20404_v27  ;;  %12876 = vadd.xlane.f32.xlu0 %v12875_v39 }
0x2b8d   : > { %v24852_v42 = vpop.eup %20914  ;;  %v24854_v25 = vpack.c.bf16 %v20406_v19, %v20405_v57 }
0x2b8e   : > { %v24856_v29 = vpop.eup %20916  ;;  %v12881_v61 = vsel %vm3535_vm11, %v24852_v42, 0.0 }
0x2b8f   : > { %12882 = vadd.xlane.f32.xlu1 %v12881_v61  ;;  %19393 = vmatprep.subr.bf16.mxu0 %v24854_v25  ;;  %v12872_v1 = vsel %vm3535_vm11, %v24856_v29, 0.0 }
0x2b90   : > { %12873 = vadd.xlane.f32.xlu0 %v12872_v1 }
0x2b91   : > { %v24863_v33 = vpop.eup %20918 }
0x2b92   : > { %v24865_v38 = vpop.eup %20920  ;;  %v12878_v46 = vsel %vm3535_vm11, %v24863_v33, 0.0 }
0x2b93   : > { %12879 = vadd.xlane.f32.xlu1 %v12878_v46  ;;  %v12884_v7 = vsel %vm3535_vm11, %v24865_v38, 0.0 }
0x2b94   : > { %12885 = vadd.xlane.f32.xlu0 %v12884_v7 }
0x2b95   : > { %v24871_v37 = vpop.eup %20922 }
0x2b96   : > { %v12887_v12 = vsel %vm3535_vm11, %v24871_v37, 0.0 }
0x2b97   : > { %12888 = vadd.xlane.f32.xlu1 %v12887_v12 }
0x2ba8   : > { %20413 = vrot.lane.b32.xlu1 %v24661_v13, %s25691_s6 }
0x2baa   : > { %20418 = vrot.lane.b32.xlu0 %v24655_v54, %s25691_s6  ;;  %s25711_s6 = sld [smem:[#allocation91_spill]] }
0x2bb8   : > { %v12844_v26 = vpop.xlane.xlu0 %12843 }
0x2bb9   : > { %20924 = vrcp.f32 %v12844_v26 }
0x2bbb   : > { %v12847_v53 = vpop.xlane.xlu1 %12846 }
0x2bbc   : > { %20926 = vrcp.f32 %v12847_v53  ;;  %v12853_v16 = vpop.xlane.xlu0 %12852 }
0x2bbd   : > { %20928 = vrcp.f32 %v12853_v16 }
0x2bc0   : > { %v12850_v20 = vpop.xlane.xlu0 %12849 }
0x2bc1   : > { %20930 = vrcp.f32 %v12850_v20 }
0x2bc3   : > { %v20925_v18 = vpop.eup %20924 }
0x2bc4   : > { %v12906_v9 = vmul.f32 %v20925_v18, %v24796_v52 }
0x2bc6   : > { %v20927_v13 = vpop.eup %20926  ;;  %18600 = vmatprep.mubr.msk.f32.mxu1 %vm3535_vm11, %v12906_v9 }
0x2bc7   : > { %v12907_v54 = vmul.f32 %v20927_v13, %v24798_v4  ;;  %v20929_v32 = vpop.eup %20928 }
0x2bc8   : > { %v12909_v50 = vmul.f32 %v20929_v32, %v24802_v6 }
0x2bc9   : > { %18601 = vmatmul.mubr.msk.f32.vlgmr.msra.gmra.mrb[112].mxu1 %vm3535_vm11, %v12907_v54 }
0x2bca   : > { %19383 = vmatpush3.bf16.msra.mxu1 %v24731_v31 }
0x2bcb   : > { %v20931_v34 = vpop.eup %20930  ;;  %19389 = vmatprep.subr.bf16.mxu1 %v19388_v11 }
0x2bcc   : > { %v12908_v52 = vmul.f32 %v20931_v34, %v24808_v59 }
0x2bce   : > { %18607 = vmatprep.mubr.msk.f32.mxu1 %vm3535_vm11, %v12908_v52  ;;  %v13678_v52 = vld [vmem:[%s25711_s6] sm:$0xff] }
0x2bcf   : > { %18608 = vmatmul.mubr.msk.f32.vlgmr.msra.gmra.mrb[114].mxu1 %vm3535_vm11, %v12909_v50  ;;  %v13680_v50 = vld [vmem:[%s25711_s6 + $0x10] sm:$0xff] }
0x2bd0   : > { %19391 = vmatpush3.bf16.msra.mxu1 %v19388_v11 }
0x2bd1   : > { %19397 = vmatprep.subr.bf16.mxu1 %v19396_v55 }
0x2c0a   : > { %v12859_v4 = vpop.xlane.xlu1 %12858 }
0x2c0b   : > { %20932 = vrcp.f32 %v12859_v4 }
0x2c0e   : > { %v12856_v15 = vpop.xlane.xlu1 %12855 }
0x2c0f   : > { %20934 = vrcp.f32 %v12856_v15  ;;  %v12865_v31 = vpop.xlane.xlu0 %12864 }
0x2c10   : > { %20936 = vrcp.f32 %v12865_v31 }
0x2c13   : > { %v12871_v21 = vpop.xlane.xlu1 %12870  ;;  %v12862_v5 = vpop.xlane.xlu0 %12861 }
0x2c14   : > { %20938 = vrcp.f32 %v12862_v5 }
0x2c15   : > { %20940 = vrcp.f32 %v12871_v21  ;;  %v20933_v30 = vpop.eup %20932 }
0x2c16   : > { %v12911_v44 = vmul.f32 %v20933_v30, %v24818_v45  ;;  %v14001_v30 = vld [vmem:[%s25712_s12 + $0x8] sm:$0xff] }
0x2c17   : > { %v12868_v59 = vpop.xlane.xlu1 %12867 }
0x2c18   : > { %20942 = vrcp.f32 %v12868_v59  ;;  %v12877_v6 = vpop.xlane.xlu0 %12876  ;;  %v14000_v59 = vld [vmem:[%s25712_s12] sm:$0xff] }
0x2c19   : > { %v20935_v10 = vpop.eup %20934  ;;  %20944 = vrcp.f32 %v12877_v6  ;;  %v19424_v6 = vpack.c.bf16 %v14001_v30, %v14000_v59 }
0x2c1a   : > { %v12910_v63 = vmul.f32 %v20935_v10, %v24823_v28  ;;  %v20937_v60 = vpop.eup %20936 }
0x2c1b   : > { %v12913_v45 = vmul.f32 %v20937_v60, %v24827_v8 }
0x2c1c   : > { %v12883_v49 = vpop.xlane.xlu1 %12882  ;;  %18614 = vmatprep.mubr.msk.f32.mxu0 %vm3535_vm11, %v12910_v63 }
0x2c1d   : > { %v12874_v17 = vpop.xlane.xlu0 %12873  ;;  %18615 = vmatmul.mubr.msk.f32.vlgmr.msra.gmra.mrb[96].mxu0 %vm3535_vm11, %v12911_v44 }
0x2c1e   : > { %20946 = vrcp.f32 %v12874_v17  ;;  %19395 = vmatpush3.bf16.msra.mxu0 %v24854_v25  ;;  %v20939_v27 = vpop.eup %20938 }
0x2c1f   : > { %20948 = vrcp.f32 %v12883_v49  ;;  %v12912_v19 = vmul.f32 %v20939_v27, %v24833_v51  ;;  %v20941_v57 = vpop.eup %20940 }
0x2c20   : > { %v12880_v39 = vpop.xlane.xlu1 %12879  ;;  %v12915_v46 = vmul.f32 %v20941_v57, %v24836_v41 }
0x2c21   : > { %20950 = vrcp.f32 %v12880_v39  ;;  %v12886_v28 = vpop.xlane.xlu0 %12885  ;;  %18621 = vmatprep.mubr.msk.f32.mxu1 %vm3535_vm11, %v12912_v19 }
0x2c22   : > { %v20943_v61 = vpop.eup %20942  ;;  %20952 = vrcp.f32 %v12886_v28  ;;  %18622 = vmatmul.mubr.msk.f32.vlgmr.msra.gmra.mrb[116].mxu1 %vm3535_vm11, %v12913_v45 }
0x2c23   : > { %v12914_v1 = vmul.f32 %v20943_v61, %v24844_v2  ;;  %19399 = vmatpush3.bf16.msra.mxu1 %v19396_v55  ;;  %v20945_v8 = vpop.eup %20944  ;;  %v13681_v55 = vld [vmem:[%s25711_s6 + $0x18] sm:$0xff] }
0x2c24   : > { %v12889_v25 = vpop.xlane.xlu1 %12888  ;;  %v12917_v41 = vmul.f32 %v20945_v8, %v24846_v62  ;;  %v19412_v4 = vpack.c.bf16 %v13681_v55, %v13680_v50 }
0x2c25   : > { %20954 = vrcp.f32 %v12889_v25  ;;  %18628 = vmatprep.mubr.msk.f32.mxu0 %vm3535_vm11, %v12914_v1  ;;  %v20419_v51 = vpop.permute.xlu0 %20418  ;;  %v14002_v25 = vld [vmem:[%s25712_s12 + $0x10] sm:$0xff] }
0x2c26   : > { %v20421_v7 = vunpack.i.h.bf16 %v20419_v51  ;;  %v20420_v12 = vunpack.i.l.bf16 %v20419_v51  ;;  %18629 = vmatmul.mubr.msk.f32.vlgmr.msra.gmra.mrb[98].mxu0 %vm3535_vm11, %v12915_v46  ;;  %v14003_v46 = vld [vmem:[%s25712_s12 + $0x18] sm:$0xff] }
0x2c28   : > { %v20947_v24 = vpop.eup %20946  ;;  %v20414_v26 = vpop.permute.xlu1 %20413  ;;  %v19404_v53 = vpack.c.bf16 %v20421_v7, %v20420_v12 }
0x2c29   : > { %v20416_v16 = vunpack.i.h.bf16 %v20414_v26  ;;  %v20415_v20 = vunpack.i.l.bf16 %v20414_v26  ;;  %v12916_v2 = vmul.f32 %v20947_v24, %v24856_v29  ;;  %v20949_v18 = vpop.eup %20948 }
0x2c2a   : > { %19405 = vmatprep.subr.bf16.mxu1 %v19404_v53  ;;  %v12919_v62 = vmul.f32 %v20949_v18, %v24852_v42  ;;  %v13679_v42 = vld [vmem:[%s25711_s6 + $0x8] sm:$0xff]  ;;  %s25714_s6 = sld [smem:[#allocation88_spill]] }
0x2c2b   : > { %v20951_v9 = vpop.eup %20950  ;;  %18635 = vmatprep.mubr.msk.f32.mxu1 %vm3535_vm11, %v12916_v2  ;;  %v19400_v14 = vpack.c.bf16 %v20416_v16, %v20415_v20  ;;  %v19428_v16 = vpack.c.bf16 %v14003_v46, %v14002_v25 }
0x2c2c   : > { %v20953_v58 = vpop.eup %20952  ;;  %18636 = vmatmul.mubr.msk.f32.vlgmr.msra.gmra.mrb[118].mxu1 %vm3535_vm11, %v12917_v41  ;;  %v12918_v13 = vmul.f32 %v20951_v9, %v24863_v33 }
0x2c2d   : > { %19407 = vmatpush3.bf16.msra.mxu1 %v19404_v53  ;;  %19401 = vmatprep.subr.bf16.mxu0 %v19400_v14  ;;  %v12920_v54 = vmul.f32 %v20953_v58, %v24865_v38 }
0x2c2e   : > { %19403 = vmatpush3.bf16.msra.mxu0 %v19400_v14  ;;  %18642 = vmatprep.mubr.msk.f32.mxu0 %vm3535_vm11, %v12918_v13 }
0x2c2f   : > { %v20955_v29 = vpop.eup %20954  ;;  %18649 = vmatprep.mubr.msk.f32.mxu1 %vm3535_vm11, %v12920_v54 }
0x2c30   : > { %v12921_v11 = vmul.f32 %v20955_v29, %v24871_v37  ;;  %v19408_v37 = vpack.c.bf16 %v13679_v42, %v13678_v52  ;;  %v13892_v29 = vld [vmem:[%s25713_s11] sm:$0xff] }
0x2c31   : > { %18643 = vmatmul.mubr.msk.f32.vlgmr.msra.gmra.mrb[100].mxu0 %vm3535_vm11, %v12919_v62  ;;  %v13893_v62 = vld [vmem:[%s25713_s11 + $0x8] sm:$0xff] }
0x2c32   : > { %18650 = vmatmul.mubr.msk.f32.vlgmr.msra.gmra.mrb[120].mxu1 %vm3535_vm11, %v12921_v11  ;;  %19409 = vmatprep.subr.bf16.mxu0 %v19408_v37  ;;  %v19416_v11 = vpack.c.bf16 %v13893_v62, %v13892_v29 }
0x2c33   : > { %19411 = vmatpush3.bf16.msra.mxu0 %v19408_v37 }
0x2c34   : > { %19413 = vmatprep.subr.bf16.mxu0 %v19412_v4  ;;  %19417 = vmatprep.subr.bf16.mxu1 %v19416_v11 }
0x2c35   : > { %19419 = vmatpush3.bf16.msra.mxu1 %v19416_v11 }
0x2c37   : > { %19415 = vmatpush3.bf16.msra.mxu0 %v19412_v4 }
0x2c38   : > { %19425 = vmatprep.subr.bf16.mxu0 %v19424_v6 }
0x2c9c   : > { %v18602_v33 = vpop.f32.mrb[112].mxu1 }
0x2c9d   : > { %v13000_v38 = vpop.f32.mrb[113].mxu1 }
0x2ca2   : > { %v24915_v32 = vpop.f32.mrb[114].mxu1 }
0x2ca3   : > { %v13087_v34 = vpop.f32.mrb[115].mxu1 }
0x2cf0   : > { %v18616_v36 = vpop.f32.mrb[96].mxu0 }
0x2cf1   : > { %v13174_v43 = vpop.f32.mrb[97].mxu0  ;;  %13624 = vrot.lane.b32.xlu0 %v18616_v36, %s25693_s8 }
0x2cf2   : > { %13622 = vrot.lane.b32.xlu1 %v13174_v43, %s25693_s8 }
0x2cf5   : > { %v18623_v15 = vpop.f32.mrb[116].mxu1 }
0x2cf6   : > { %13628 = vrot.lane.b32.xlu0 %v18623_v15, %s25693_s8  ;;  %v13261_v31 = vpop.f32.mrb[117].mxu1  ;;  %v17191_v15 = vld [vmem:[#allocation7] ss:$0 sm:$0xff] }
0x2cf7   : > { %13626 = vrot.lane.b32.xlu1 %v13261_v31, %s25693_s8 }
0x2cf9   : > { %v18630_v21 = vpop.f32.mrb[98].mxu0 }
0x2cfa   : > { %v13348_v5 = vpop.f32.mrb[99].mxu0  ;;  %13640 = vrot.lane.b32.xlu0 %v18630_v21, %s25694_s10 }
0x2cfb   : > { %13638 = vrot.lane.b32.xlu1 %v13348_v5, %s25694_s10 }
0x2cff   : > { %v18637_v10 = vpop.f32.mrb[118].mxu1 }
0x2d00   : > { %13644 = vrot.lane.b32.xlu0 %v18637_v10, %s25694_s10  ;;  %v13435_v63 = vpop.f32.mrb[119].mxu1 }
0x2d01   : > { %13642 = vrot.lane.b32.xlu1 %v13435_v63, %s25694_s10 }
0x2d04   : > { %v18644_v44 = vpop.f32.mrb[100].mxu0 }
0x2d05   : > { %v13522_v49 = vpop.f32.mrb[101].mxu0  ;;  %13656 = vrot.lane.b32.xlu0 %v18644_v44, %s25680_s5  ;;  %v18651_v17 = vpop.f32.mrb[120].mxu1 }
0x2d06   : > { %13654 = vrot.lane.b32.xlu1 %v13522_v49, %s25680_s5  ;;  %v13609_v60 = vpop.f32.mrb[121].mxu1 }
0x2d09   : > { %13660 = vrot.lane.b32.xlu0 %v18651_v17, %s25680_s5 }
0x2d0a   : > { %13658 = vrot.lane.b32.xlu1 %v13609_v60, %s25680_s5 }
0x2d63   : > { %v13625_v27 = vpop.permute.xlu0 %13624 }
0x2d64   : > { %v13623_v39 = vpop.permute.xlu1 %13622  ;;  %v13667_v12 = vsel %vm2842_vm9, %v18602_v33, %v13625_v27  ;;  %v13894_v33 = vld [vmem:[%s25713_s11 + $0x10] sm:$0xff] }
0x2d65   : > { %v13666_v51 = vsel %vm2842_vm9, %v13000_v38, %v13623_v39  ;;  %v13895_v38 = vld [vmem:[%s25713_s11 + $0x18] sm:$0xff] }
0x2d68   : > { %v13629_v19 = vpop.permute.xlu0 %13628 }
0x2d69   : > { %v13627_v57 = vpop.permute.xlu1 %13626  ;;  %v13669_v41 = vsel %vm2842_vm9, %v24915_v32, %v13629_v19  ;;  %v19420_v32 = vpack.c.bf16 %v13895_v38, %v13894_v33 }
0x2d6a   : > { %v13668_v2 = vsel %vm2842_vm9, %v13087_v34, %v13627_v57 }
0x2d6b   : > { %19421 = vmatprep.subr.bf16.mxu1 %v19420_v32 }
0x2d6c   : > { %v13641_v28 = vpop.permute.xlu0 %13640  ;;  %19423 = vmatpush3.bf16.msra.mxu1 %v19420_v32 }
0x2d6d   : > { %v13639_v45 = vpop.permute.xlu1 %13638  ;;  %v13671_v26 = vsel %vm3535_vm11, %v13667_v12, %v13641_v28 }
0x2d6e   : > { %v13670_v8 = vsel %vm3535_vm11, %v13666_v51, %v13639_v45 }
0x2d72   : > { %v13645_v61 = vpop.permute.xlu0 %13644 }
0x2d73   : > { %v13643_v1 = vpop.permute.xlu1 %13642  ;;  %v13673_v58 = vsel %vm3535_vm11, %v13669_v41, %v13645_v61 }
0x2d74   : > { %v13672_v9 = vsel %vm3535_vm11, %v13668_v2, %v13643_v1 }
0x2d77   : > { %v13657_v7 = vpop.permute.xlu0 %13656 }
0x2d78   : > { %v13655_v24 = vpop.permute.xlu1 %13654  ;;  %v13675_v20 = vsel %vm4464_vm12, %v13671_v26, %v13657_v7 }
0x2d79   : > { %v13674_v53 = vsel %vm4464_vm12, %v13670_v8, %v13655_v24 }
0x2d7a   : > { %18660 = vmatprep.mubr.msk.f32.mxu0 %vm2566_vm0, %v13674_v53 }
0x2d7b   : > { %18661 = vmatmul.mubr.msk.f32.vlgmr.msra.gmra.mrb[102].mxu0 %vm2566_vm0, %v13675_v20  ;;  %v13661_v18 = vpop.permute.xlu0 %13660 }
0x2d7c   : > { %19427 = vmatpush3.bf16.msra.mxu0 %v19424_v6  ;;  %v13659_v14 = vpop.permute.xlu1 %13658  ;;  %v13677_v54 = vsel %vm4464_vm12, %v13673_v58, %v13661_v18 }
0x2d7d   : > { %v13676_v13 = vsel %vm4464_vm12, %v13672_v9, %v13659_v14  ;;  %19429 = vmatprep.subr.bf16.mxu0 %v19428_v16 }
0x2d7e   : > { %18663 = vmatprep.mubr.msk.f32.mxu0 %vm2566_vm0, %v13676_v13 }
0x2d7f   : > { %18664 = vmatmul.mubr.msk.f32.gmra.mrb[104].mxu0 %vm2566_vm0, %v13677_v54 }
0x2d80   : > { %19431 = vmatpush3.bf16.msra.mxu0 %v19428_v16  ;;  %18688 = vmatprep.mubr.msk.f32.mxu0 %vm2566_vm0, %v24175_v3  ;;  %v17179_v3 = vld [vmem:[%s25714_s6] ss:$0 sm:$0xff]  ;;  %s2421_s6 = scalar_lea.vmem %s22384_s9, %s22791_s2 }
0x2d83   : > { %18689 = vmatmul.mubr.msk.f32.vlgmr.msra.gmra.mrb[106].mxu0 %vm2566_vm0, %v24178_v40 }
0x2d84   : > { %18691 = vmatprep.mubr.msk.f32.mxu0 %vm2566_vm0, %v24188_v35 }
0x2d87   : > { %18692 = vmatmul.mubr.msk.f32.gmra.mrb[108].mxu0 %vm2566_vm0, %v24190_v23 }
0x2e4e   : > { %v18662_v34 = vpop.f32.mrb[102].mxu0 }
0x2e4f   : > { %v13773_v36 = vadd.f32 %v18662_v34, %v17179_v3  ;;  %v13767_v40 = vpop.f32.mrb[103].mxu0 }
0x2e50   : > { %v13768_v43 = vadd.f32 %v17179_v3, %v13767_v40 }
0x2e51   : > { %v24968_v35 = vadd.f32 %v13773_v36, %v24586_v0 }
0x2e52   : > { %v24971_v23 = vadd.f32 %v13768_v43, %v24589_v48  ;;  %v18665_v52 = vpop.f32.mrb[104].mxu0 }
0x2e53   : > { %v13783_v42 = vadd.f32 %v18665_v52, %v17179_v3  ;;  %v13777_v37 = vpop.f32.mrb[105].mxu0  ;;  %v13793_v50 = vsel %vm2566_vm0, %v24968_v35, 0.0 }
0x2e54   : > { %v13778_v55 = vadd.f32 %v17179_v3, %v13777_v37  ;;  %13794 = vadd.xlane.f32.xlu0 %v13793_v50  ;;  %v13790_v4 = vsel %vm2566_vm0, %v24971_v23, 0.0 }
0x2e55   : > { %v24978_v31 = vadd.f32 %v13783_v42, %v24596_v22  ;;  %13791 = vadd.xlane.f32.xlu1 %v13790_v4 }
0x2e56   : > { %v24981_v0 = vadd.f32 %v13778_v55, %v24599_v47  ;;  %v18690_v48 = vpop.f32.mrb[106].mxu0 }
0x2e57   : > { %v14083_v21 = vadd.f32 %v18690_v48, %v17191_v15  ;;  %v14077_v5 = vpop.f32.mrb[107].mxu0  ;;  %v13799_v59 = vsel %vm2566_vm0, %v24978_v31, 0.0 }
0x2e58   : > { %v14078_v30 = vadd.f32 %v17191_v15, %v14077_v5  ;;  %v13796_v6 = vsel %vm2566_vm0, %v24981_v0, 0.0 }
0x2e59   : > { %13800 = vadd.xlane.f32.xlu1 %v13799_v59  ;;  %13797 = vadd.xlane.f32.xlu0 %v13796_v6 }
0x2e5a   : > { %v18693_v10 = vpop.f32.mrb[108].mxu0  ;;  %v24987_v63 = vpack.c.bf16 %v14083_v21, %v14078_v30  ;;  %v24989_v22 = vpack.i.bf16 %v14083_v21, %v14078_v30 }
0x2e5b   : > { %v14093_v44 = vadd.f32 %v18693_v10, %v17191_v15  ;;  %v14087_v47 = vpop.f32.mrb[109].mxu0 }
0x2e5c   : > { %v14088_v49 = vadd.f32 %v17191_v15, %v14087_v47  ;;  %19434 = vmatprep.subr.msk.bf16.mxu1 %vm22880_vm10, %v24987_v63 }
0x2e5e   : > { %v19438_v17 = vpack.c.bf16 %v14093_v44, %v14088_v49  ;;  %v24994_v60 = vpack.i.bf16 %v14093_v44, %v14088_v49 }
0x2e60   : > { %19440 = vmatprep.subr.msk.bf16.mxu0 %vm22880_vm10, %v19438_v17 }
0x2e61   : > { %19443 = vmatpush3.bf16.xpose.msk.msra.mxu0 %vm22880_vm10, %v19438_v17 }
0x2ee1   : > { %v13795_v27 = vpop.xlane.xlu0 %13794 }
0x2ee2   : > { %v13803_v39 = vmul.f32 0.03125, %v13795_v27  ;;  %v13792_v19 = vpop.xlane.xlu1 %13791 }
0x2ee3   : > { %v13802_v57 = vmul.f32 0.03125, %v13792_v19 }
0x2ee4   : > { %v25001_v28 = vsub.f32 %v24968_v35, %v13803_v39 }
0x2ee5   : > { %v25004_v45 = vsub.f32 %v24971_v23, %v13802_v57 }
0x2ee6   : > { %v13798_v61 = vpop.xlane.xlu0 %13797  ;;  %v13801_v1 = vpop.xlane.xlu1 %13800  ;;  %v13811_v25 = vmul.f32 %v25001_v28, %v25001_v28 }
0x2ee7   : > { %v13804_v46 = vmul.f32 0.03125, %v13798_v61  ;;  %v13805_v51 = vmul.f32 0.03125, %v13801_v1  ;;  %v13810_v7 = vmul.f32 %v25004_v45, %v25004_v45 }
0x2ee8   : > { %v13817_v12 = vsel %vm2566_vm0, %v13811_v25, 0.0 }
0x2ee9   : > { %v25012_v8 = vsub.f32 %v24981_v0, %v13804_v46  ;;  %v25015_v24 = vsub.f32 %v24978_v31, %v13805_v51  ;;  %13818 = vadd.xlane.f32.xlu1 %v13817_v12  ;;  %v13814_v26 = vsel %vm2566_vm0, %v13810_v7, 0.0 }
0x2eea   : > { %13815 = vadd.xlane.f32.xlu0 %v13814_v26 }
0x2eeb   : > { %v13812_v53 = vmul.f32 %v25012_v8, %v25012_v8  ;;  %v13813_v16 = vmul.f32 %v25015_v24, %v25015_v24 }
0x2eed   : > { %v13820_v20 = vsel %vm2566_vm0, %v13812_v53, 0.0  ;;  %v13823_v2 = vsel %vm2566_vm0, %v13813_v16, 0.0  ;;  %v17184_v16 = vld [vmem:[#allocation12] ss:$0 sm:$0xff] }
0x2eee   : > { %13821 = vadd.xlane.f32.xlu0 %v13820_v20  ;;  %13824 = vadd.xlane.f32.xlu1 %v13823_v2 }
0x2eff   : > { %20428 = vrot.lane.b32.xlu1 %v24994_v60, %s25687_s3 }
0x2f03   : > { %20433 = vrot.lane.b32.xlu1 %v24989_v22, %s25688_s1 }
0x2f04   : > { %20423 = vrot.lane.b32.xlu0 %v24989_v22, %s25687_s3 }
0x2f07   : > { %20443 = vrot.lane.b32.xlu1 %v24989_v22, %s25689_s0 }
0x2f08   : > { %20438 = vrot.lane.b32.xlu0 %v24994_v60, %s25688_s1 }
0x2f76   : > { %v13819_v18 = vpop.xlane.xlu1 %13818 }
0x2f77   : > { %v13827_v41 = vmul.f32 0.032258064, %v13819_v18  ;;  %v13816_v9 = vpop.xlane.xlu0 %13815 }
0x2f78   : > { %v13826_v14 = vmul.f32 0.032258064, %v13816_v9 }
0x2f79   : > { %20956 = vrsqrt.f32 %v13827_v41  ;;  %vm13839_vm2 = vcmp.eq.f32.partialorder %v13827_v41, inf  ;;  %vm13841_vm3 = vcmp.eq.f32.partialorder %v13827_v41, 0.0  ;;  %v13842_v4 = vand.u32 2147483648, %v13827_v41 }
0x2f7a   : > { %20958 = vrsqrt.f32 %v13826_v14  ;;  %vm13832_vm4 = vcmp.eq.f32.partialorder %v13826_v14, inf  ;;  %v13835_v5 = vand.u32 2147483648, %v13826_v14  ;;  %vm13834_vm5 = vcmp.eq.f32.partialorder %v13826_v14, 0.0 }
0x2f7b   : > { %v13822_v58 = vpop.xlane.xlu0 %13821  ;;  %v13825_v13 = vpop.xlane.xlu1 %13824 }
0x2f7c   : > { %v13828_v54 = vmul.f32 0.032258064, %v13822_v58  ;;  %v13829_v29 = vmul.f32 0.032258064, %v13825_v13 }
0x2f7e   : > { %20960 = vrsqrt.f32 %v13828_v54  ;;  %vm13846_vm7 = vcmp.eq.f32.partialorder %v13828_v54, inf  ;;  %vm13848_vm8 = vcmp.eq.f32.partialorder %v13828_v54, 0.0  ;;  %v13849_v57 = vand.u32 2147483648, %v13828_v54 }
0x2f7f   : > { %20962 = vrsqrt.f32 %v13829_v29  ;;  %v25034_v62 = vpop.permute.xlu0 %20423  ;;  %v25036_v11 = vpop.permute.xlu1 %20428  ;;  %vm13853_vm13 = vcmp.eq.f32.partialorder %v13829_v29, inf  ;;  %v13856_v25 = vand.u32 2147483648, %v13829_v29  ;;  %vm13855_vm14 = vcmp.eq.f32.partialorder %v13829_v29, 0.0 }
0x2f80   : > { %v20426_v33 = vunpack.i.h.bf16 %v25034_v62  ;;  %v20425_v38 = vunpack.i.l.bf16 %v25034_v62  ;;  %v20431_v32 = vunpack.i.h.bf16 %v25036_v11  ;;  %v20430_v3 = vunpack.i.l.bf16 %v25036_v11 }
0x2f82   : > { %v25042_v34 = vpack.c.bf16 %v20431_v32, %v20430_v3 }
0x2f83   : > { %v20957_v36 = vpop.eup %20956  ;;  %v25044_v40 = vpop.permute.xlu0 %20438 }
0x2f84   : > { %v25046_v43 = vpop.permute.xlu1 %20433  ;;  %v20959_v52 = vpop.eup %20958  ;;  %v13838_v42 = vmul.f32 %v20957_v36, %v13827_v41  ;;  %v20441_v37 = vunpack.i.h.bf16 %v25044_v40  ;;  %v20440_v50 = vunpack.i.l.bf16 %v25044_v40  ;;  %19452 = vmatprep.subr.msk.bf16.mxu0 %vm22880_vm10, %v25042_v34 }
0x2f85   : > { %v20436_v55 = vunpack.i.h.bf16 %v25046_v43  ;;  %v13831_v15 = vmul.f32 %v20959_v52, %v13826_v14  ;;  %v20435_v48 = vunpack.i.l.bf16 %v25046_v43 }
0x2f86   : > { %v13840_v21 = vsel %vm13839_vm2, %v13827_v41, %v13838_v42  ;;  %v17185_v41 = vld [vmem:[#allocation13] ss:$0 sm:$0xff] }
0x2f87   : > { %v13843_v59 = vsel %vm13841_vm3, %v13842_v4, %v13840_v21  ;;  %v13833_v30 = vsel %vm13832_vm4, %v13826_v14, %v13831_v15 }
0x2f88   : > { %v25055_v6 = vpop.permute.xlu1 %20443  ;;  %v20961_v10 = vpop.eup %20960  ;;  %v13859_v44 = vadd.f32 1e-06, %v13843_v59  ;;  %v13836_v47 = vsel %vm13834_vm5, %v13835_v5, %v13833_v30 }
0x2f89   : > { %v20446_v49 = vunpack.i.h.bf16 %v25055_v6  ;;  %v20445_v17 = vunpack.i.l.bf16 %v25055_v6  ;;  %v20963_v27 = vpop.eup %20962  ;;  %v13858_v39 = vadd.f32 1e-06, %v13836_v47  ;;  %v13845_v19 = vmul.f32 %v20961_v10, %v13828_v54 }
0x2f8a   : > { %20964 = vrcp.f32 %v13859_v44  ;;  %v13852_v61 = vmul.f32 %v20963_v27, %v13829_v29  ;;  %v19456_v10 = vpack.c.bf16 %v20436_v55, %v20435_v48  ;;  %v19462_v55 = vpack.c.bf16 %v20441_v37, %v20440_v50 }
0x2f8b   : > { %20966 = vrcp.f32 %v13858_v39  ;;  %v13847_v1 = vsel %vm13846_vm7, %v13828_v54, %v13845_v19  ;;  %v19468_v50 = vpack.c.bf16 %v20446_v49, %v20445_v17 }
0x2f8c   : > { %v13850_v46 = vsel %vm13848_vm8, %v13849_v57, %v13847_v1  ;;  %v13854_v51 = vsel %vm13853_vm13, %v13829_v29, %v13852_v61 }
0x2f8d   : > { %v13860_v7 = vadd.f32 1e-06, %v13850_v46  ;;  %v13857_v12 = vsel %vm13855_vm14, %v13856_v25, %v13854_v51 }
0x2f8e   : > { %v13861_v26 = vadd.f32 1e-06, %v13857_v12 }
0x2f8f   : > { %20968 = vrcp.f32 %v13860_v7 }
0x2f90   : > { %20970 = vrcp.f32 %v13861_v26 }
0x2f94   : > { %v20965_v53 = vpop.eup %20964 }
0x2f95   : > { %v20967_v20 = vpop.eup %20966  ;;  %v13868_v2 = vmul.f32 %v20965_v53, %v25001_v28  ;;  %v19444_v28 = vpack.c.bf16 %v20426_v33, %v20425_v38 }
0x2f96   : > { %v13867_v18 = vmul.f32 %v20967_v20, %v25004_v45 }
0x2f97   : > { %v13878_v9 = vmul.f32 %v17184_v16, %v13868_v2 }
0x2f98   : > { %v13877_v14 = vmul.f32 %v17184_v16, %v13867_v18 }
0x2f99   : > { %v20969_v58 = vpop.eup %20968  ;;  %v13889_v32 = vadd.f32 %v17185_v41, %v13878_v9 }
0x2f9a   : > { %v20971_v13 = vpop.eup %20970  ;;  %v13888_v54 = vadd.f32 %v17185_v41, %v13877_v14  ;;  %v13869_v29 = vmul.f32 %v20969_v58, %v25012_v8 }
0x2f9b   : > { %v13870_v3 = vmul.f32 %v20971_v13, %v25015_v24  ;;  %v17186_v24 = vld [vmem:[#allocation10] ss:$0 sm:$0xff] }
0x2f9c   : > { %18674 = vmatprep.mubr.msk.f32.mxu1 %vm2566_vm0, %v13888_v54  ;;  %v13879_v36 = vmul.f32 %v17184_v16, %v13869_v29 }
0x2f9d   : > { %18675 = vmatmul.mubr.msk.f32.vlgmr.msra.gmra.mrb[122].mxu1 %vm2566_vm0, %v13889_v32  ;;  %v13880_v45 = vmul.f32 %v17184_v16, %v13870_v3 }
0x2f9e   : > { %19437 = vmatpush3.bf16.xpose.msk.msra.mxu1 %vm22880_vm10, %v24987_v63  ;;  %v13890_v52 = vadd.f32 %v17185_v41, %v13879_v36 }
0x2f9f   : > { %19446 = vmatprep.subr.msk.bf16.mxu1 %vm22880_vm10, %v19444_v28  ;;  %v13891_v8 = vadd.f32 %v17185_v41, %v13880_v45 }
0x2fa0   : > { %18677 = vmatprep.mubr.msk.f32.mxu1 %vm2566_vm0, %v13890_v52 }
0x2fa1   : > { %18678 = vmatmul.mubr.msk.f32.gmra.mrb[124].mxu1 %vm2566_vm0, %v13891_v8 }
0x3070   : > { %v18676_v42 = vpop.f32.mrb[122].mxu1 }
0x3071   : > { %v13987_v4 = vadd.f32 %v18676_v42, %v17186_v24  ;;  %v13981_v33 = vpop.f32.mrb[123].mxu1 }
0x3072   : > { %v13982_v38 = vadd.f32 %v17186_v24, %v13981_v33 }
0x3073   : > { %v14097_v15 = vmul.f32 0.35355338, %v13987_v4 }
0x3074   : > { %v14096_v21 = vmul.f32 0.35355338, %v13982_v38  ;;  %v18679_v5 = vpop.f32.mrb[124].mxu1 }
0x3075   : > { %14106 = vrot.lane.b32.xlu1 %v14097_v15, %s25687_s3  ;;  %v13991_v63 = vpop.f32.mrb[125].mxu1  ;;  %v13997_v59 = vadd.f32 %v18679_v5, %v17186_v24 }
0x3076   : > { %v13992_v30 = vadd.f32 %v17186_v24, %v13991_v63  ;;  %14104 = vrot.lane.b32.xlu0 %v14096_v21, %s25687_s3  ;;  %18698 = vmatprep.mubr.msk.f32.mxu1 %vm2842_vm9, %v14096_v21 }
0x3077   : > { %18699 = vmatmul.mubr.msk.f32.vlgmr.msra.gmra.mrb[126].mxu1 %vm2842_vm9, %v14097_v15  ;;  %v14099_v47 = vmul.f32 0.35355338, %v13997_v59 }
0x3078   : > { %v14098_v44 = vmul.f32 0.35355338, %v13992_v30  ;;  %19449 = vmatpush3.bf16.xpose.msk.msra.mxu1 %vm22880_vm10, %v19444_v28 }
0x3079   : > { %19458 = vmatprep.subr.msk.bf16.mxu1 %vm22880_vm10, %v19456_v10 }
0x307a   : > { %14112 = vrot.lane.b32.xlu0 %v14096_v21, %s25688_s1  ;;  %14108 = vrot.lane.b32.xlu1 %v14098_v44, %s25687_s3 }
0x307b   : > { %18705 = vmatprep.mubr.msk.f32.mxu0 %vm2842_vm9, %v14098_v44 }
0x307c   : > { %18706 = vmatmul.mubr.msk.f32.vlgmr.msra.gmra.mrb[110].mxu0 %vm2842_vm9, %v14099_v47 }
0x307d   : > { %19455 = vmatpush3.bf16.xpose.msk.msra.mxu0 %vm22880_vm10, %v25042_v34 }
0x307e   : > { %19464 = vmatprep.subr.msk.bf16.mxu0 %vm22880_vm10, %v19462_v55  ;;  %14110 = vrot.lane.b32.xlu0 %v14099_v47, %s25687_s3  ;;  %s25720_s3 = sld [smem:[#allocation82_spill]] }
0x307f   : > { %14114 = vrot.lane.b32.xlu1 %v14097_v15, %s25688_s1 }
0x3082   : > { %20448 = vrot.lane.b32.xlu0 %v24994_v60, %s25689_s0 }
0x3083   : > { %14116 = vrot.lane.b32.xlu1 %v14098_v44, %s25688_s1 }
0x3086   : > { %14118 = vrot.lane.b32.xlu0 %v14099_v47, %s25688_s1  ;;  %s25721_s1 = sld [smem:[#allocation83_spill]] }
0x3087   : > { %14120 = vrot.lane.b32.xlu1 %v14096_v21, %s25689_s0 }
0x308a   : > { %14122 = vrot.lane.b32.xlu0 %v14097_v15, %s25689_s0 }
0x308b   : > { %14124 = vrot.lane.b32.xlu1 %v14098_v44, %s25689_s0 }
0x308e   : > { %14126 = vrot.lane.b32.xlu0 %v14099_v47, %s25689_s0  ;;  %s25719_s0 = sld [smem:[#allocation85_spill]] }
0x308f   : > { %20458 = vrot.lane.b32.xlu1 %v24994_v60, %s25690_s4 }
0x3092   : > { %20453 = vrot.lane.b32.xlu0 %v24989_v22, %s25690_s4 }
0x3093   : > { %20463 = vrot.lane.b32.xlu1 %v25034_v62, %s25690_s4 }
0x3096   : > { %20468 = vrot.lane.b32.xlu0 %v25036_v11, %s25690_s4 }
0x30e7   : > { %v14107_v34 = vpop.permute.xlu1 %14106 }
0x30e8   : > { %v14105_v37 = vpop.permute.xlu0 %14104 }
0x30e9   : > { %18712 = vmatprep.mubr.msk.f32.mxu1 %vm2842_vm9, %v14105_v37 }
0x30ea   : > { %18713 = vmatmul.mubr.msk.f32.vlgmr.msra.gmra.mrb[128].mxu1 %vm2842_vm9, %v14107_v34 }
0x30eb   : > { %19461 = vmatpush3.bf16.xpose.msk.msra.mxu1 %vm22880_vm10, %v19456_v10 }
0x30ec   : > { %19470 = vmatprep.subr.msk.bf16.mxu1 %vm22880_vm10, %v19468_v50  ;;  %v14113_v22 = vpop.permute.xlu0 %14112  ;;  %v14109_v60 = vpop.permute.xlu1 %14108 }
0x30ed   : > { %18719 = vmatprep.mubr.msk.f32.mxu0 %vm2842_vm9, %v14109_v60  ;;  %18726 = vmatprep.mubr.msk.f32.mxu1 %vm2842_vm9, %v14113_v22 }
0x30f0   : > { %v14111_v62 = vpop.permute.xlu0 %14110 }
0x30f1   : > { %v14115_v11 = vpop.permute.xlu1 %14114  ;;  %18720 = vmatmul.mubr.msk.f32.vlgmr.msra.gmra.mrb[112].mxu0 %vm2842_vm9, %v14111_v62 }
0x30f2   : > { %18727 = vmatmul.mubr.msk.f32.vlgmr.msra.gmra.mrb[130].mxu1 %vm2842_vm9, %v14115_v11  ;;  %19467 = vmatpush3.bf16.xpose.msk.msra.mxu0 %vm22880_vm10, %v19462_v55 }
0x30f3   : > { %19473 = vmatpush3.bf16.xpose.msk.msra.mxu1 %vm22880_vm10, %v19468_v50 }
0x30f4   : > { %v25137_v48 = vpop.permute.xlu0 %20448 }
0x30f5   : > { %v20451_v49 = vunpack.i.h.bf16 %v25137_v48  ;;  %v20450_v17 = vunpack.i.l.bf16 %v25137_v48  ;;  %v14117_v27 = vpop.permute.xlu1 %14116 }
0x30f6   : > { %18733 = vmatprep.mubr.msk.f32.mxu0 %vm2842_vm9, %v14117_v27 }
0x30f7   : > { %v19474_v39 = vpack.c.bf16 %v20451_v49, %v20450_v17 }
0x30f8   : > { %v14119_v19 = vpop.permute.xlu0 %14118 }
0x30f9   : > { %v14121_v57 = vpop.permute.xlu1 %14120  ;;  %18734 = vmatmul.mubr.msk.f32.vlgmr.msra.gmra.mrb[114].mxu0 %vm2842_vm9, %v14119_v19  ;;  %19476 = vmatprep.subr.msk.bf16.mxu0 %vm22880_vm10, %v19474_v39 }
0x30fa   : > { %18740 = vmatprep.mubr.msk.f32.mxu1 %vm2842_vm9, %v14121_v57  ;;  %19479 = vmatpush3.bf16.xpose.msk.msra.mxu0 %vm22880_vm10, %v19474_v39 }
0x30fc   : > { %v14123_v61 = vpop.permute.xlu0 %14122 }
0x30fd   : > { %v14125_v1 = vpop.permute.xlu1 %14124  ;;  %18741 = vmatmul.mubr.msk.f32.vlgmr.msra.gmra.mrb[132].mxu1 %vm2842_vm9, %v14123_v61 }
0x30fe   : > { %18747 = vmatprep.mubr.msk.f32.mxu0 %vm2842_vm9, %v14125_v1 }
0x3100   : > { %v14127_v25 = vpop.permute.xlu0 %14126 }
0x3101   : > { %v20459_v46 = vpop.permute.xlu1 %20458  ;;  %18748 = vmatmul.mubr.msk.f32.vlgmr.msra.gmra.mrb[116].mxu0 %vm2842_vm9, %v14127_v25 }
0x3102   : > { %v20461_v7 = vunpack.i.h.bf16 %v20459_v46  ;;  %v20460_v12 = vunpack.i.l.bf16 %v20459_v46 }
0x3104   : > { %v20454_v51 = vpop.permute.xlu0 %20453  ;;  %v25151_v41 = vpack.c.bf16 %v20461_v7, %v20460_v12 }
0x3105   : > { %v20456_v26 = vunpack.i.h.bf16 %v20454_v51  ;;  %v20455_v53 = vunpack.i.l.bf16 %v20454_v51  ;;  %v20464_v16 = vpop.permute.xlu1 %20463 }
0x3106   : > { %v20466_v20 = vunpack.i.h.bf16 %v20464_v16  ;;  %v20465_v2 = vunpack.i.l.bf16 %v20464_v16 }
0x3107   : > { %v19480_v56 = vpack.c.bf16 %v20456_v26, %v20455_v53 }
0x3108   : > { %v19488_v18 = vpack.c.bf16 %v20466_v20, %v20465_v2  ;;  %v25206_v60 = vpop.permute.xlu0 %20468 }
0x3109   : > { %19481 = vmatprep.subr.bf16.mxu1 %v19480_v56 }
0x310a   : > { %19489 = vmatprep.subr.bf16.mxu0 %v19488_v18  ;;  %19483 = vmatpush3.bf16.msra.mxu1 %v19480_v56 }
0x310b   : > { %19491 = vmatpush3.bf16.msra.mxu0 %v19488_v18  ;;  %19485 = vmatprep.subr.bf16.mxu1 %v25151_v41 }
0x314a   : > { %v18700_v9 = vpop.f32.mrb[126].mxu1 }
0x314b   : > { %v14230_v14 = vpop.f32.mrb[127].mxu1  ;;  %v14823_v58 = vsel %vm3535_vm11, %v18700_v9, -inf }
0x314c   : > { %14824 = vmax.xlane.f32.xlu0 %v14823_v58  ;;  %v14820_v13 = vsel %vm3535_vm11, %v14230_v14, -inf }
0x314d   : > { %14821 = vmax.xlane.f32.xlu1 %v14820_v13 }
0x314f   : > { %v18707_v54 = vpop.f32.mrb[110].mxu0 }
0x3150   : > { %v14313_v29 = vpop.f32.mrb[111].mxu0  ;;  %v14829_v32 = vsel %vm3535_vm11, %v18707_v54, -inf }
0x3151   : > { %14830 = vmax.xlane.f32.xlu0 %v14829_v32  ;;  %v14826_v3 = vsel %vm3535_vm11, %v14313_v29, -inf }
0x3155   : > { %14827 = vmax.xlane.f32.xlu0 %v14826_v3 }
0x31bd   : > { %v25158_v36 = vpop.f32.mrb[128].mxu1 }
0x31be   : > { %v25160_v28 = vpop.f32.mrb[129].mxu1  ;;  %v14835_v45 = vsel %vm3535_vm11, %v25158_v36, -inf }
0x31bf   : > { %14836 = vmax.xlane.f32.xlu1 %v14835_v45  ;;  %v14832_v52 = vsel %vm3535_vm11, %v25160_v28, -inf }
0x31c3   : > { %14833 = vmax.xlane.f32.xlu1 %v14832_v52 }
0x31c4   : > { %v25166_v8 = vpop.f32.mrb[112].mxu0 }
0x31c5   : > { %v25168_v24 = vpop.f32.mrb[130].mxu1  ;;  %v25170_v42 = vpop.f32.mrb[113].mxu0  ;;  %v14841_v4 = vsel %vm3535_vm11, %v25166_v8, -inf }
0x31c6   : > { %v25174_v33 = vpop.f32.mrb[131].mxu1  ;;  %14842 = vmax.xlane.f32.xlu0 %v14841_v4  ;;  %v14847_v38 = vsel %vm3535_vm11, %v25168_v24, -inf  ;;  %v14838_v15 = vsel %vm3535_vm11, %v25170_v42, -inf }
0x31c7   : > { %14848 = vmax.xlane.f32.xlu1 %v14847_v38  ;;  %v14844_v21 = vsel %vm3535_vm11, %v25174_v33, -inf }
0x31ca   : > { %14839 = vmax.xlane.f32.xlu0 %v14838_v15 }
0x31cb   : > { %14845 = vmax.xlane.f32.xlu1 %v14844_v21 }
0x31cc   : > { %v25182_v5 = vpop.f32.mrb[114].mxu0 }
0x31cd   : > { %v25184_v63 = vpop.f32.mrb[115].mxu0  ;;  %v14853_v59 = vsel %vm3535_vm11, %v25182_v5, -inf }
0x31ce   : > { %14854 = vmax.xlane.f32.xlu0 %v14853_v59  ;;  %v14850_v47 = vsel %vm3535_vm11, %v25184_v63, -inf }
0x31d0   : > { %v25188_v30 = vpop.f32.mrb[132].mxu1 }
0x31d1   : > { %v25190_v10 = vpop.f32.mrb[133].mxu1  ;;  %v14859_v44 = vsel %vm3535_vm11, %v25188_v30, -inf }
0x31d2   : > { %14860 = vmax.xlane.f32.xlu1 %v14859_v44  ;;  %14851 = vmax.xlane.f32.xlu0 %v14850_v47  ;;  %v14856_v37 = vsel %vm3535_vm11, %v25190_v10, -inf }
0x31d4   : > { %v25196_v55 = vpop.f32.mrb[116].mxu0 }
0x31d5   : > { %v25198_v34 = vpop.f32.mrb[117].mxu0  ;;  %v14865_v22 = vsel %vm3535_vm11, %v25196_v55, -inf }
0x31d6   : > { %14857 = vmax.xlane.f32.xlu1 %v14856_v37  ;;  %v14862_v50 = vsel %vm3535_vm11, %v25198_v34, -inf }
0x31d7   : > { %14863 = vmax.xlane.f32.xlu0 %v14862_v50 }
0x31d9   : > { %v14825_v62 = vpop.xlane.xlu0 %14824 }
0x31da   : > { %14866 = vmax.xlane.f32.xlu1 %v14865_v22  ;;  %v14822_v11 = vpop.xlane.xlu1 %14821  ;;  %v14869_v27 = vsub.f32 %v18700_v9, %v14825_v62 }
0x31db   : > { %v14868_v17 = vsub.f32 %v14230_v14, %v14822_v11 }
0x31dc   : > { %v14886_v61 = vmul.f32 1.442695, %v14869_v27 }
0x31dd   : > { %v14884_v39 = vmul.f32 1.442695, %v14868_v17 }
0x31de   : > { %v14831_v49 = vpop.xlane.xlu0 %14830 }
0x31df   : > { %v14871_v19 = vsub.f32 %v18707_v54, %v14831_v49  ;;  %20972 = vpow2.f32 %v14884_v39 }
0x31e0   : > { %20974 = vpow2.f32 %v14886_v61 }
0x31e1   : > { %v14890_v1 = vmul.f32 1.442695, %v14871_v19 }
0x31e2   : > { %v14828_v57 = vpop.xlane.xlu0 %14827 }
0x31e3   : > { %v14870_v25 = vsub.f32 %v14313_v29, %v14828_v57  ;;  %20976 = vpow2.f32 %v14890_v1 }
0x31e5   : > { %v14888_v46 = vmul.f32 1.442695, %v14870_v25 }
0x31e7   : > { %20978 = vpow2.f32 %v14888_v46 }
0x31eb   : > { %20473 = vrot.lane.b32.xlu1 %v25046_v43, %s25690_s4  ;;  %v25212_v43 = vpop.eup %20972 }
0x31ec   : > { %v25214_v51 = vpop.eup %20974 }
0x31ed   : > { %20478 = vrot.lane.b32.xlu0 %v25044_v40, %s25690_s4  ;;  %v14916_v40 = vsel %vm3535_vm11, %v25212_v43, 0.0  ;;  %v25218_v7 = vpop.eup %20976  ;;  %v14919_v12 = vsel %vm3535_vm11, %v25214_v51, 0.0 }
0x31ee   : > { %v14925_v26 = vsel %vm3535_vm11, %v25218_v7, 0.0 }
0x31f1   : > { %v25224_v53 = vpop.eup %20978 }
0x31f2   : > { %v14922_v16 = vsel %vm3535_vm11, %v25224_v53, 0.0 }
0x320c   : > { %14917 = vadd.xlane.f32.xlu0 %v14916_v40 }
0x320f   : > { %14920 = vadd.xlane.f32.xlu1 %v14919_v12 }
0x3210   : > { %14926 = vadd.xlane.f32.xlu0 %v14925_v26 }
0x3214   : > { %14923 = vadd.xlane.f32.xlu0 %v14922_v16 }
0x324c   : > { %v14837_v20 = vpop.xlane.xlu1 %14836 }
0x324d   : > { %v14873_v2 = vsub.f32 %v25158_v36, %v14837_v20 }
0x324f   : > { %v14894_v56 = vmul.f32 1.442695, %v14873_v2 }
0x3250   : > { %v14834_v18 = vpop.xlane.xlu1 %14833 }
0x3251   : > { %20980 = vpow2.f32 %v14894_v56  ;;  %v14872_v9 = vsub.f32 %v25160_v28, %v14834_v18 }
0x3253   : > { %v14892_v14 = vmul.f32 1.442695, %v14872_v9  ;;  %v14843_v58 = vpop.xlane.xlu0 %14842 }
0x3254   : > { %v14875_v13 = vsub.f32 %v25166_v8, %v14843_v58  ;;  %v14849_v54 = vpop.xlane.xlu1 %14848 }
0x3255   : > { %20982 = vpow2.f32 %v14892_v14  ;;  %v14877_v29 = vsub.f32 %v25168_v24, %v14849_v54 }
0x3256   : > { %v14898_v32 = vmul.f32 1.442695, %v14875_v13 }
0x3257   : > { %v14902_v3 = vmul.f32 1.442695, %v14877_v29  ;;  %v14840_v45 = vpop.xlane.xlu0 %14839 }
0x3258   : > { %20984 = vpow2.f32 %v14898_v32  ;;  %v14874_v52 = vsub.f32 %v25170_v42, %v14840_v45  ;;  %v14846_v36 = vpop.xlane.xlu1 %14845 }
0x3259   : > { %20986 = vpow2.f32 %v14902_v3  ;;  %v14876_v4 = vsub.f32 %v25174_v33, %v14846_v36 }
0x325a   : > { %v14896_v38 = vmul.f32 1.442695, %v14874_v52 }
0x325b   : > { %v25234_v28 = vpop.eup %20980  ;;  %v14900_v15 = vmul.f32 1.442695, %v14876_v4  ;;  %v14855_v21 = vpop.xlane.xlu0 %14854 }
0x325c   : > { %20988 = vpow2.f32 %v14896_v38  ;;  %v14879_v8 = vsub.f32 %v25182_v5, %v14855_v21  ;;  %v14931_v24 = vsel %vm3535_vm11, %v25234_v28, 0.0 }
0x325d   : > { %20990 = vpow2.f32 %v14900_v15  ;;  %14932 = vadd.xlane.f32.xlu1 %v14931_v24  ;;  %v20470_v24 = vunpack.i.l.bf16 %v25206_v60 }
0x325e   : > { %v14906_v59 = vmul.f32 1.442695, %v14879_v8  ;;  %v20471_v8 = vunpack.i.h.bf16 %v25206_v60 }
0x325f   : > { %v25239_v44 = vpop.eup %20982  ;;  %v14861_v42 = vpop.xlane.xlu1 %14860 }
0x3260   : > { %v14852_v47 = vpop.xlane.xlu0 %14851  ;;  %20992 = vpow2.f32 %v14906_v59  ;;  %v14881_v33 = vsub.f32 %v25188_v30, %v14861_v42  ;;  %v14928_v50 = vsel %vm3535_vm11, %v25239_v44, 0.0  ;;  %v19492_v59 = vpack.c.bf16 %v20471_v8, %v20470_v24 }
0x3261   : > { %v14878_v37 = vsub.f32 %v25184_v63, %v14852_v47  ;;  %14929 = vadd.xlane.f32.xlu1 %v14928_v50 }
0x3262   : > { %v25245_v5 = vpop.eup %20984  ;;  %v14910_v22 = vmul.f32 1.442695, %v14881_v33 }
0x3263   : > { %v14904_v62 = vmul.f32 1.442695, %v14878_v37  ;;  %v25247_v11 = vpop.eup %20986  ;;  %v14858_v49 = vpop.xlane.xlu1 %14857  ;;  %v14937_v17 = vsel %vm3535_vm11, %v25245_v5, 0.0 }
0x3264   : > { %20994 = vpow2.f32 %v14910_v22  ;;  %v14880_v27 = vsub.f32 %v25190_v10, %v14858_v49  ;;  %14938 = vadd.xlane.f32.xlu0 %v14937_v17  ;;  %v14864_v30 = vpop.xlane.xlu0 %14863  ;;  %v14943_v63 = vsel %vm3535_vm11, %v25247_v11, 0.0 }
0x3265   : > { %20996 = vpow2.f32 %v14904_v62  ;;  %v14882_v39 = vsub.f32 %v25198_v34, %v14864_v30  ;;  %14944 = vadd.xlane.f32.xlu1 %v14943_v63 }
0x3266   : > { %v25255_v19 = vpop.eup %20988  ;;  %v14908_v57 = vmul.f32 1.442695, %v14880_v27 }
0x3267   : > { %v25257_v61 = vpop.eup %20990  ;;  %v14912_v1 = vmul.f32 1.442695, %v14882_v39  ;;  %v14867_v25 = vpop.xlane.xlu1 %14866  ;;  %v14934_v46 = vsel %vm3535_vm11, %v25255_v19, 0.0 }
0x3268   : > { %20998 = vpow2.f32 %v14908_v57  ;;  %v14883_v10 = vsub.f32 %v25196_v55, %v14867_v25  ;;  %14935 = vadd.xlane.f32.xlu0 %v14934_v46  ;;  %v14940_v40 = vsel %vm3535_vm11, %v25257_v61, 0.0  ;;  %v20479_v45 = vpop.permute.xlu0 %20478 }
0x3269   : > { %21000 = vpow2.f32 %v14912_v1  ;;  %14941 = vadd.xlane.f32.xlu1 %v14940_v40  ;;  %v20481_v33 = vunpack.i.h.bf16 %v20479_v45  ;;  %v20480_v37 = vunpack.i.l.bf16 %v20479_v45 }
0x326a   : > { %v25264_v34 = vpop.eup %20992  ;;  %v14914_v12 = vmul.f32 1.442695, %v14883_v10 }
0x326b   : > { %v20474_v26 = vpop.permute.xlu1 %20473  ;;  %v14949_v16 = vsel %vm3535_vm11, %v25264_v34, 0.0  ;;  %v19500_v60 = vpack.c.bf16 %v20481_v33, %v20480_v37 }
0x326c   : > { %21002 = vpow2.f32 %v14914_v12  ;;  %v20476_v20 = vunpack.i.h.bf16 %v20474_v26  ;;  %v20475_v2 = vunpack.i.l.bf16 %v20474_v26  ;;  %14950 = vadd.xlane.f32.xlu0 %v14949_v16 }
0x326e   : > { %v25268_v56 = vpop.eup %20994  ;;  %v25270_v55 = vpack.c.bf16 %v20476_v20, %v20475_v2 }
0x326f   : > { %v25272_v18 = vpop.eup %20996  ;;  %v14955_v9 = vsel %vm3535_vm11, %v25268_v56, 0.0 }
0x3270   : > { %19497 = vmatprep.subr.bf16.mxu0 %v25270_v55  ;;  %14956 = vadd.xlane.f32.xlu1 %v14955_v9  ;;  %v14946_v14 = vsel %vm3535_vm11, %v25272_v18, 0.0 }
0x3271   : > { %14947 = vadd.xlane.f32.xlu0 %v14946_v14 }
0x3272   : > { %v25279_v58 = vpop.eup %20998 }
0x3273   : > { %v25281_v13 = vpop.eup %21000  ;;  %v14952_v54 = vsel %vm3535_vm11, %v25279_v58, 0.0 }
0x3274   : > { %14953 = vadd.xlane.f32.xlu1 %v14952_v54  ;;  %v14958_v29 = vsel %vm3535_vm11, %v25281_v13, 0.0 }
0x3275   : > { %14959 = vadd.xlane.f32.xlu0 %v14958_v29 }
0x3276   : > { %v25287_v32 = vpop.eup %21002 }
0x3277   : > { %v14961_v3 = vsel %vm3535_vm11, %v25287_v32, 0.0 }
0x3278   : > { %14962 = vadd.xlane.f32.xlu1 %v14961_v3 }
0x3289   : > { %20483 = vrot.lane.b32.xlu1 %v25055_v6, %s25690_s4 }
0x328b   : > { %20488 = vrot.lane.b32.xlu0 %v25137_v48, %s25690_s4  ;;  %s25715_s4 = sld [smem:[#allocation98_spill]] }
0x3291   : > { %v15755_v33 = vld [vmem:[%s25715_s4 + $0x18] sm:$0xff] }
0x3299   : > { %v14918_v52 = vpop.xlane.xlu0 %14917 }
0x329a   : > { %21004 = vrcp.f32 %v14918_v52 }
0x329c   : > { %v14921_v36 = vpop.xlane.xlu1 %14920 }
0x329d   : > { %21006 = vrcp.f32 %v14921_v36  ;;  %v14927_v4 = vpop.xlane.xlu0 %14926 }
0x329e   : > { %21008 = vrcp.f32 %v14927_v4 }
0x32a1   : > { %v14924_v38 = vpop.xlane.xlu0 %14923 }
0x32a2   : > { %21010 = vrcp.f32 %v14924_v38 }
0x32a4   : > { %v21005_v15 = vpop.eup %21004 }
0x32a5   : > { %v14980_v21 = vmul.f32 %v21005_v15, %v25212_v43 }
0x32a7   : > { %v21007_v6 = vpop.eup %21006  ;;  %18754 = vmatprep.mubr.msk.f32.mxu1 %vm3535_vm11, %v14980_v21 }
0x32a8   : > { %v14981_v48 = vmul.f32 %v21007_v6, %v25214_v51  ;;  %v21009_v42 = vpop.eup %21008 }
0x32a9   : > { %v14983_v50 = vmul.f32 %v21009_v42, %v25218_v7 }
0x32aa   : > { %18755 = vmatmul.mubr.msk.f32.vlgmr.msra.gmra.mrb[134].mxu1 %vm3535_vm11, %v14981_v48 }
0x32ab   : > { %19487 = vmatpush3.bf16.msra.mxu1 %v25151_v41 }
0x32ac   : > { %v21011_v47 = vpop.eup %21010  ;;  %19493 = vmatprep.subr.bf16.mxu1 %v19492_v59 }
0x32ad   : > { %v14982_v43 = vmul.f32 %v21011_v47, %v25224_v53  ;;  %v15754_v47 = vld [vmem:[%s25715_s4 + $0x10] sm:$0xff] }
0x32af   : > { %18761 = vmatprep.mubr.msk.f32.mxu1 %vm3535_vm11, %v14982_v43 }
0x32b0   : > { %18762 = vmatmul.mubr.msk.f32.vlgmr.msra.gmra.mrb[136].mxu1 %vm3535_vm11, %v14983_v50 }
0x32b1   : > { %19495 = vmatpush3.bf16.msra.mxu1 %v19492_v59  ;;  %v15753_v59 = vld [vmem:[%s25715_s4 + $0x8] sm:$0xff] }
0x32b2   : > { %19501 = vmatprep.subr.bf16.mxu1 %v19500_v60 }
0x32ea   : > { %v14933_v51 = vpop.xlane.xlu1 %14932 }
0x32eb   : > { %21012 = vrcp.f32 %v14933_v51 }
0x32ee   : > { %v14930_v22 = vpop.xlane.xlu1 %14929 }
0x32ef   : > { %21014 = vrcp.f32 %v14930_v22 }
0x32f1   : > { %v14939_v41 = vpop.xlane.xlu0 %14938 }
0x32f2   : > { %v14945_v62 = vpop.xlane.xlu1 %14944  ;;  %21016 = vrcp.f32 %v14939_v41 }
0x32f3   : > { %21018 = vrcp.f32 %v14945_v62 }
0x32f5   : > { %v14936_v49 = vpop.xlane.xlu0 %14935  ;;  %v21013_v7 = vpop.eup %21012 }
0x32f6   : > { %21020 = vrcp.f32 %v14936_v49  ;;  %v14942_v53 = vpop.xlane.xlu1 %14941  ;;  %v14985_v63 = vmul.f32 %v21013_v7, %v25234_v28 }
0x32f7   : > { %21022 = vrcp.f32 %v14942_v53 }
0x32f9   : > { %v21015_v17 = vpop.eup %21014  ;;  %v14951_v27 = vpop.xlane.xlu0 %14950 }
0x32fa   : > { %v14984_v30 = vmul.f32 %v21015_v17, %v25239_v44  ;;  %21024 = vrcp.f32 %v14951_v27 }
0x32fc   : > { %18768 = vmatprep.mubr.msk.f32.mxu0 %vm3535_vm11, %v14984_v30  ;;  %v21017_v57 = vpop.eup %21016 }
0x32fd   : > { %18769 = vmatmul.mubr.msk.f32.vlgmr.msra.gmra.mrb[118].mxu0 %vm3535_vm11, %v14985_v63  ;;  %v14957_v39 = vpop.xlane.xlu1 %14956  ;;  %v21019_v25 = vpop.eup %21018  ;;  %v14987_v28 = vmul.f32 %v21017_v57, %v25245_v5 }
0x32fe   : > { %19499 = vmatpush3.bf16.msra.mxu0 %v25270_v55  ;;  %v14948_v1 = vpop.xlane.xlu0 %14947  ;;  %v14989_v16 = vmul.f32 %v21019_v25, %v25247_v11 }
0x32ff   : > { %21026 = vrcp.f32 %v14948_v1 }
0x3300   : > { %v21021_v46 = vpop.eup %21020  ;;  %21028 = vrcp.f32 %v14957_v39 }
0x3301   : > { %v21023_v10 = vpop.eup %21022  ;;  %v14954_v40 = vpop.xlane.xlu1 %14953  ;;  %v14986_v44 = vmul.f32 %v21021_v46, %v25255_v19 }
0x3302   : > { %21030 = vrcp.f32 %v14954_v40  ;;  %v14960_v12 = vpop.xlane.xlu0 %14959  ;;  %v14988_v26 = vmul.f32 %v21023_v10, %v25257_v61 }
0x3303   : > { %21032 = vrcp.f32 %v14960_v12  ;;  %18775 = vmatprep.mubr.msk.f32.mxu1 %vm3535_vm11, %v14986_v44 }
0x3304   : > { %18776 = vmatmul.mubr.msk.f32.vlgmr.msra.gmra.mrb[138].mxu1 %vm3535_vm11, %v14987_v28  ;;  %18782 = vmatprep.mubr.msk.f32.mxu0 %vm3535_vm11, %v14988_v26  ;;  %v21025_v55 = vpop.eup %21024 }
0x3305   : > { %19503 = vmatpush3.bf16.msra.mxu1 %v19500_v60  ;;  %18783 = vmatmul.mubr.msk.f32.vlgmr.msra.gmra.mrb[120].mxu0 %vm3535_vm11, %v14989_v16  ;;  %v14963_v20 = vpop.xlane.xlu1 %14962  ;;  %v14991_v45 = vmul.f32 %v21025_v55, %v25264_v34 }
0x3306   : > { %21034 = vrcp.f32 %v14963_v20  ;;  %v20489_v19 = vpop.permute.xlu0 %20488 }
0x3307   : > { %v20491_v5 = vunpack.i.h.bf16 %v20489_v19  ;;  %v20490_v2 = vunpack.i.l.bf16 %v20489_v19 }
0x3309   : > { %v21027_v9 = vpop.eup %21026  ;;  %v19508_v61 = vpack.c.bf16 %v20491_v5, %v20490_v2  ;;  %v20484_v14 = vpop.permute.xlu1 %20483 }
0x330a   : > { %v20486_v11 = vunpack.i.h.bf16 %v20484_v14  ;;  %v20485_v54 = vunpack.i.l.bf16 %v20484_v14  ;;  %v14990_v29 = vmul.f32 %v21027_v9, %v25272_v18  ;;  %v21029_v3 = vpop.eup %21028  ;;  %v17244_v14 = vld [vmem:[#allocation9] ss:$0 sm:$0xff] }
0x330b   : > { %19509 = vmatprep.subr.bf16.mxu1 %v19508_v61  ;;  %v14993_v18 = vmul.f32 %v21029_v3, %v25268_v56  ;;  %v15752_v56 = vld [vmem:[%s25715_s4] sm:$0xff] }
0x330c   : > { %v21031_v52 = vpop.eup %21030  ;;  %v19504_v36 = vpack.c.bf16 %v20486_v11, %v20485_v54  ;;  %18789 = vmatprep.mubr.msk.f32.mxu1 %vm3535_vm11, %v14990_v29  ;;  %v19512_v42 = vpack.c.bf16 %v15753_v59, %v15752_v56 }
0x330d   : > { %v21033_v4 = vpop.eup %21032  ;;  %18790 = vmatmul.mubr.msk.f32.vlgmr.msra.gmra.mrb[140].mxu1 %vm3535_vm11, %v14991_v45  ;;  %v14992_v38 = vmul.f32 %v21031_v52, %v25279_v58 }
0x330e   : > { %19511 = vmatpush3.bf16.msra.mxu1 %v19508_v61  ;;  %19505 = vmatprep.subr.bf16.mxu0 %v19504_v36  ;;  %v14994_v15 = vmul.f32 %v21033_v4, %v25281_v13 }
0x330f   : > { %19507 = vmatpush3.bf16.msra.mxu0 %v19504_v36  ;;  %18796 = vmatprep.mubr.msk.f32.mxu0 %vm3535_vm11, %v14992_v38 }
0x3310   : > { %v21035_v34 = vpop.eup %21034  ;;  %18803 = vmatprep.mubr.msk.f32.mxu1 %vm3535_vm11, %v14994_v15  ;;  %19513 = vmatprep.subr.bf16.mxu0 %v19512_v42 }
0x3311   : > { %v14995_v21 = vmul.f32 %v21035_v34, %v25287_v32  ;;  %v19516_v32 = vpack.c.bf16 %v15755_v33, %v15754_v47 }
0x3312   : > { %18797 = vmatmul.mubr.msk.f32.vlgmr.msra.gmra.mrb[122].mxu0 %vm3535_vm11, %v14993_v18 }
0x3313   : > { %18804 = vmatmul.mubr.msk.f32.vlgmr.msra.gmra.mrb[142].mxu1 %vm3535_vm11, %v14995_v21  ;;  %19515 = vmatpush3.bf16.msra.mxu0 %v19512_v42 }
0x3314   : > { %19517 = vmatprep.subr.bf16.mxu0 %v19516_v32 }
0x3317   : > { %19519 = vmatpush3.bf16.msra.mxu0 %v19516_v32 }
0x337d   : > { %v18756_v58 = vpop.f32.mrb[134].mxu1 }
0x337e   : > { %v15074_v13 = vpop.f32.mrb[135].mxu1 }
0x3383   : > { %v18763_v8 = vpop.f32.mrb[136].mxu1 }
0x3384   : > { %v15161_v24 = vpop.f32.mrb[137].mxu1 }
0x33d0   : > { %v18770_v6 = vpop.f32.mrb[118].mxu0 }
0x33d1   : > { %v15248_v48 = vpop.f32.mrb[119].mxu0  ;;  %15698 = vrot.lane.b32.xlu0 %v18770_v6, %s25693_s8 }
0x33d2   : > { %15696 = vrot.lane.b32.xlu1 %v15248_v48, %s25693_s8 }
0x33d7   : > { %v18777_v37 = vpop.f32.mrb[138].mxu1 }
0x33d8   : > { %v18784_v43 = vpop.f32.mrb[120].mxu0  ;;  %15702 = vrot.lane.b32.xlu0 %v18777_v37, %s25693_s8  ;;  %v15335_v50 = vpop.f32.mrb[139].mxu1 }
0x33d9   : > { %v15422_v60 = vpop.f32.mrb[121].mxu0  ;;  %15700 = vrot.lane.b32.xlu1 %v15335_v50, %s25693_s8  ;;  %s25716_s8 = sld [smem:[#allocation86_spill]] }
0x33dc   : > { %15714 = vrot.lane.b32.xlu0 %v18784_v43, %s25694_s10 }
0x33dd   : > { %15712 = vrot.lane.b32.xlu1 %v15422_v60, %s25694_s10 }
0x33e0   : > { %v18791_v51 = vpop.f32.mrb[140].mxu1 }
0x33e1   : > { %15718 = vrot.lane.b32.xlu0 %v18791_v51, %s25694_s10  ;;  %v15509_v22 = vpop.f32.mrb[141].mxu1 }
0x33e2   : > { %15716 = vrot.lane.b32.xlu1 %v15509_v22, %s25694_s10  ;;  %s25717_s10 = sld [smem:[#allocation87_spill]] }
0x33e5   : > { %v18798_v41 = vpop.f32.mrb[122].mxu0 }
0x33e6   : > { %v15596_v62 = vpop.f32.mrb[123].mxu0  ;;  %15730 = vrot.lane.b32.xlu0 %v18798_v41, %s25680_s5  ;;  %v18805_v49 = vpop.f32.mrb[142].mxu1 }
0x33e7   : > { %15728 = vrot.lane.b32.xlu1 %v15596_v62, %s25680_s5  ;;  %v15683_v53 = vpop.f32.mrb[143].mxu1  ;;  %v15966_v62 = vld [vmem:[%s25716_s8] sm:$0xff] }
0x33ea   : > { %15734 = vrot.lane.b32.xlu0 %v18805_v49, %s25680_s5  ;;  %v15967_v49 = vld [vmem:[%s25716_s8 + $0x8] sm:$0xff] }
0x33eb   : > { %15732 = vrot.lane.b32.xlu1 %v15683_v53, %s25680_s5  ;;  %v15968_v53 = vld [vmem:[%s25716_s8 + $0x10] sm:$0xff]  ;;  %s25718_s5 = sld [smem:[#allocation84_spill]] }
0x3443   : > { %v15699_v7 = vpop.permute.xlu0 %15698 }
0x3444   : > { %v15697_v17 = vpop.permute.xlu1 %15696  ;;  %v15741_v10 = vsel %vm2842_vm9, %v18756_v58, %v15699_v7  ;;  %v19520_v7 = vpack.c.bf16 %v15967_v49, %v15966_v62 }
0x3445   : > { %v15740_v25 = vsel %vm2842_vm9, %v15074_v13, %v15697_v17  ;;  %v15969_v17 = vld [vmem:[%s25716_s8 + $0x18] sm:$0xff] }
0x3446   : > { %19521 = vmatprep.subr.bf16.mxu1 %v19520_v7 }
0x3447   : > { %19523 = vmatpush3.bf16.msra.mxu1 %v19520_v7 }
0x344a   : > { %v15703_v27 = vpop.permute.xlu0 %15702 }
0x344b   : > { %v15701_v30 = vpop.permute.xlu1 %15700  ;;  %v15743_v19 = vsel %vm2842_vm9, %v18763_v8, %v15703_v27  ;;  %v19524_v27 = vpack.c.bf16 %v15969_v17, %v15968_v53 }
0x344c   : > { %v15742_v16 = vsel %vm2842_vm9, %v15161_v24, %v15701_v30  ;;  %v16078_v30 = vld [vmem:[%s25717_s10] sm:$0xff] }
0x344d   : > { %19525 = vmatprep.subr.bf16.mxu1 %v19524_v27 }
0x344e   : > { %v15715_v63 = vpop.permute.xlu0 %15714  ;;  %19527 = vmatpush3.bf16.msra.mxu1 %v19524_v27 }
0x344f   : > { %v15713_v39 = vpop.permute.xlu1 %15712  ;;  %v15745_v28 = vsel %vm3535_vm11, %v15741_v10, %v15715_v63  ;;  %v16079_v63 = vld [vmem:[%s25717_s10 + $0x8] sm:$0xff] }
0x3450   : > { %v15744_v40 = vsel %vm3535_vm11, %v15740_v25, %v15713_v39  ;;  %v16080_v39 = vld [vmem:[%s25717_s10 + $0x10] sm:$0xff]  ;;  %v16083_v10 = vld [vmem:[%s25717_s10 + $0x28] sm:$0xff] }
0x3453   : > { %v15719_v57 = vpop.permute.xlu0 %15718 }
0x3454   : > { %v15717_v1 = vpop.permute.xlu1 %15716  ;;  %v15747_v55 = vsel %vm3535_vm11, %v15743_v19, %v15719_v57  ;;  %v19528_v57 = vpack.c.bf16 %v16079_v63, %v16078_v30  ;;  %v16084_v63 = vld [vmem:[%s25717_s10 + $0x30] sm:$0xff] }
0x3455   : > { %v15746_v5 = vsel %vm3535_vm11, %v15742_v16, %v15717_v1  ;;  %v16081_v1 = vld [vmem:[%s25717_s10 + $0x18] sm:$0xff] }
0x3456   : > { %v19532_v25 = vpack.c.bf16 %v16081_v1, %v16080_v39  ;;  %19529 = vmatprep.subr.bf16.mxu0 %v19528_v57  ;;  %v16085_v39 = vld [vmem:[%s25717_s10 + $0x38] sm:$0xff] }
0x3458   : > { %v15731_v46 = vpop.permute.xlu0 %15730 }
0x3459   : > { %v15729_v44 = vpop.permute.xlu1 %15728  ;;  %v15749_v26 = vsel %vm4464_vm12, %v15745_v28, %v15731_v46  ;;  %v16082_v46 = vld [vmem:[%s25717_s10 + $0x20] sm:$0xff] }
0x345a   : > { %v15748_v12 = vsel %vm4464_vm12, %v15744_v40, %v15729_v44  ;;  %v19536_v40 = vpack.c.bf16 %v16083_v10, %v16082_v46 }
0x345b   : > { %18814 = vmatprep.mubr.msk.f32.mxu0 %vm2566_vm0, %v15748_v12 }
0x345c   : > { %18815 = vmatmul.mubr.msk.f32.vlgmr.msra.gmra.mrb[124].mxu0 %vm2566_vm0, %v15749_v26  ;;  %v15735_v20 = vpop.permute.xlu0 %15734 }
0x345d   : > { %v15733_v2 = vpop.permute.xlu1 %15732  ;;  %v15751_v61 = vsel %vm4464_vm12, %v15747_v55, %v15735_v20  ;;  %19531 = vmatpush3.bf16.msra.mxu0 %v19528_v57  ;;  %v19540_v57 = vpack.c.bf16 %v16085_v39, %v16084_v63 }
0x345e   : > { %v15750_v9 = vsel %vm4464_vm12, %v15746_v5, %v15733_v2  ;;  %19533 = vmatprep.subr.bf16.mxu0 %v19532_v25 }
0x345f   : > { %18817 = vmatprep.mubr.msk.f32.mxu0 %vm2566_vm0, %v15750_v9 }
0x3460   : > { %18818 = vmatmul.mubr.msk.f32.gmra.mrb[126].mxu0 %vm2566_vm0, %v15751_v61 }
0x3461   : > { %19535 = vmatpush3.bf16.msra.mxu0 %v19532_v25 }
0x3462   : > { %19537 = vmatprep.subr.bf16.mxu0 %v19536_v40 }
0x3465   : > { %19539 = vmatpush3.bf16.msra.mxu0 %v19536_v40 }
0x3466   : > { %19541 = vmatprep.subr.bf16.mxu0 %v19540_v57 }
0x3469   : > { %19543 = vmatpush3.bf16.msra.mxu0 %v19540_v57 }
0x352f   : > { %v18816_v11 = vpop.f32.mrb[124].mxu0 }
0x3530   : > { %v15847_v54 = vadd.f32 %v18816_v11, %v17244_v14  ;;  %v15841_v29 = vpop.f32.mrb[125].mxu0 }
0x3531   : > { %v15842_v3 = vadd.f32 %v17244_v14, %v15841_v29 }
0x3532   : > { %v25364_v45 = vadd.f32 %v15847_v54, %v24968_v35 }
0x3533   : > { %v25367_v52 = vadd.f32 %v15842_v3, %v24971_v23  ;;  %v18819_v36 = vpop.f32.mrb[126].mxu0 }
0x3534   : > { %v15857_v4 = vadd.f32 %v18819_v36, %v17244_v14  ;;  %v15851_v38 = vpop.f32.mrb[127].mxu0  ;;  %v15867_v15 = vsel %vm2566_vm0, %v25364_v45, 0.0 }
0x3535   : > { %v15852_v34 = vadd.f32 %v17244_v14, %v15851_v38  ;;  %15868 = vadd.xlane.f32.xlu0 %v15867_v15  ;;  %v15864_v18 = vsel %vm2566_vm0, %v25367_v52, 0.0 }
0x3536   : > { %v25374_v21 = vadd.f32 %v15857_v4, %v24978_v31  ;;  %15865 = vadd.xlane.f32.xlu1 %v15864_v18 }
0x3537   : > { %v25377_v35 = vadd.f32 %v15852_v34, %v24981_v0 }
0x3538   : > { %v15873_v23 = vsel %vm2566_vm0, %v25374_v21, 0.0 }
0x3539   : > { %v15870_v58 = vsel %vm2566_vm0, %v25377_v35, 0.0 }
0x353a   : > { %15874 = vadd.xlane.f32.xlu1 %v15873_v23  ;;  %15871 = vadd.xlane.f32.xlu0 %v15870_v58 }
0x35c2   : > { %v15869_v13 = vpop.xlane.xlu0 %15868 }
0x35c3   : > { %v15877_v8 = vmul.f32 0.03125, %v15869_v13  ;;  %v15866_v24 = vpop.xlane.xlu1 %15865 }
0x35c4   : > { %v15876_v6 = vmul.f32 0.03125, %v15866_v24 }
0x35c5   : > { %v25384_v48 = vsub.f32 %v25364_v45, %v15877_v8 }
0x35c6   : > { %v25387_v31 = vsub.f32 %v25367_v52, %v15876_v6 }
0x35c7   : > { %v15872_v0 = vpop.xlane.xlu0 %15871  ;;  %v15875_v56 = vpop.xlane.xlu1 %15874  ;;  %v15885_v59 = vmul.f32 %v25384_v48, %v25384_v48 }
0x35c8   : > { %v15878_v42 = vmul.f32 0.03125, %v15872_v0  ;;  %v15879_v47 = vmul.f32 0.03125, %v15875_v56  ;;  %v15884_v33 = vmul.f32 %v25387_v31, %v25387_v31 }
0x35c9   : > { %v15891_v32 = vsel %vm2566_vm0, %v15885_v59, 0.0 }
0x35ca   : > { %v25395_v37 = vsub.f32 %v25377_v35, %v15878_v42  ;;  %v25398_v43 = vsub.f32 %v25374_v21, %v15879_v47  ;;  %15892 = vadd.xlane.f32.xlu1 %v15891_v32  ;;  %v15888_v50 = vsel %vm2566_vm0, %v15884_v33, 0.0  ;;  %v17249_v47 = vld [vmem:[%s25718_s5] ss:$0 sm:$0xff] }
0x35cb   : > { %15889 = vadd.xlane.f32.xlu0 %v15888_v50 }
0x35cc   : > { %v15886_v60 = vmul.f32 %v25395_v37, %v25395_v37  ;;  %v15887_v51 = vmul.f32 %v25398_v43, %v25398_v43 }
0x35ce   : > { %v15894_v22 = vsel %vm2566_vm0, %v15886_v60, 0.0  ;;  %v15897_v41 = vsel %vm2566_vm0, %v15887_v51, 0.0  ;;  %v17250_v60 = vld [vmem:[%s25719_s0] ss:$0 sm:$0xff] }
0x35cf   : > { %15895 = vadd.xlane.f32.xlu0 %v15894_v22  ;;  %15898 = vadd.xlane.f32.xlu1 %v15897_v41 }
0x3657   : > { %v15893_v44 = vpop.xlane.xlu1 %15892 }
0x3658   : > { %v15901_v28 = vmul.f32 0.032258064, %v15893_v44  ;;  %v15890_v12 = vpop.xlane.xlu0 %15889 }
0x3659   : > { %v15900_v26 = vmul.f32 0.032258064, %v15890_v12 }
0x365a   : > { %21036 = vrsqrt.f32 %v15901_v28  ;;  %vm15913_vm9 = vcmp.eq.f32.partialorder %v15901_v28, inf  ;;  %v15916_v61 = vand.u32 2147483648, %v15901_v28  ;;  %vm15915_vm10 = vcmp.eq.f32.partialorder %v15901_v28, 0.0 }
0x365b   : > { %21038 = vrsqrt.f32 %v15900_v26  ;;  %vm15906_vm12 = vcmp.eq.f32.partialorder %v15900_v26, inf  ;;  %v15909_v54 = vand.u32 2147483648, %v15900_v26  ;;  %vm15908_vm15 = vcmp.eq.f32.partialorder %v15900_v26, 0.0 }
0x365c   : > { %v15896_v16 = vpop.xlane.xlu0 %15895  ;;  %v15899_v20 = vpop.xlane.xlu1 %15898 }
0x365d   : > { %v15902_v19 = vmul.f32 0.032258064, %v15896_v16  ;;  %v15903_v5 = vmul.f32 0.032258064, %v15899_v20 }
0x365f   : > { %21040 = vrsqrt.f32 %v15902_v19  ;;  %vm15920_vm1 = vcmp.eq.f32.partialorder %v15902_v19, inf  ;;  %vm15922_vm2 = vcmp.eq.f32.partialorder %v15902_v19, 0.0  ;;  %v15923_v23 = vand.u32 2147483648, %v15902_v19 }
0x3660   : > { %21042 = vrsqrt.f32 %v15903_v5  ;;  %vm15927_vm3 = vcmp.eq.f32.partialorder %v15903_v5, inf  ;;  %v15930_v8 = vand.u32 2147483648, %v15903_v5  ;;  %vm15929_vm4 = vcmp.eq.f32.partialorder %v15903_v5, 0.0 }
0x3664   : > { %v21037_v2 = vpop.eup %21036 }
0x3665   : > { %v21039_v55 = vpop.eup %21038  ;;  %v15912_v9 = vmul.f32 %v21037_v2, %v15901_v28 }
0x3666   : > { %v15905_v14 = vmul.f32 %v21039_v55, %v15900_v26 }
0x3667   : > { %v15914_v11 = vsel %vm15913_vm9, %v15901_v28, %v15912_v9 }
0x3668   : > { %v15917_v29 = vsel %vm15915_vm10, %v15916_v61, %v15914_v11  ;;  %v15907_v3 = vsel %vm15906_vm12, %v15900_v26, %v15905_v14 }
0x3669   : > { %v21041_v36 = vpop.eup %21040  ;;  %v15933_v4 = vadd.f32 1e-06, %v15917_v29  ;;  %v15910_v38 = vsel %vm15908_vm15, %v15909_v54, %v15907_v3 }
0x366a   : > { %v21043_v15 = vpop.eup %21042  ;;  %v15932_v34 = vadd.f32 1e-06, %v15910_v38  ;;  %v15919_v18 = vmul.f32 %v21041_v36, %v15902_v19 }
0x366b   : > { %21044 = vrcp.f32 %v15933_v4  ;;  %v15926_v58 = vmul.f32 %v21043_v15, %v15903_v5 }
0x366c   : > { %21046 = vrcp.f32 %v15932_v34  ;;  %v15921_v13 = vsel %vm15920_vm1, %v15902_v19, %v15919_v18  ;;  %v17256_v19 = vld [vmem:[%s25721_s1] ss:$0 sm:$0xff] }
0x366d   : > { %v15924_v24 = vsel %vm15922_vm2, %v15923_v23, %v15921_v13  ;;  %v15928_v6 = vsel %vm15927_vm3, %v15903_v5, %v15926_v58 }
0x366e   : > { %v15934_v0 = vadd.f32 1e-06, %v15924_v24  ;;  %v15931_v56 = vsel %vm15929_vm4, %v15930_v8, %v15928_v6 }
0x366f   : > { %v15935_v59 = vadd.f32 1e-06, %v15931_v56 }
0x3670   : > { %21048 = vrcp.f32 %v15934_v0 }
0x3671   : > { %21050 = vrcp.f32 %v15935_v59 }
0x3675   : > { %v21045_v42 = vpop.eup %21044 }
0x3676   : > { %v21047_v33 = vpop.eup %21046  ;;  %v15942_v32 = vmul.f32 %v21045_v42, %v25384_v48 }
0x3677   : > { %v15941_v50 = vmul.f32 %v21047_v33, %v25387_v31 }
0x3678   : > { %v15952_v51 = vmul.f32 %v17249_v47, %v15942_v32 }
0x3679   : > { %v15951_v22 = vmul.f32 %v17249_v47, %v15941_v50 }
0x367a   : > { %v21049_v41 = vpop.eup %21048  ;;  %v15963_v7 = vadd.f32 %v17250_v60, %v15952_v51 }
0x367b   : > { %v21051_v62 = vpop.eup %21050  ;;  %v15962_v49 = vadd.f32 %v17250_v60, %v15951_v22  ;;  %v15943_v53 = vmul.f32 %v21049_v41, %v25395_v37  ;;  %v17251_v37 = vld [vmem:[%s25720_s3] ss:$0 sm:$0xff] }
0x367c   : > { %v15944_v17 = vmul.f32 %v21051_v62, %v25398_v43 }
0x367d   : > { %18828 = vmatprep.mubr.msk.f32.mxu1 %vm2566_vm0, %v15962_v49  ;;  %v15953_v27 = vmul.f32 %v17249_v47, %v15943_v53 }
0x367e   : > { %18829 = vmatmul.mubr.msk.f32.vlgmr.msra.gmra.mrb[144].mxu1 %vm2566_vm0, %v15963_v7  ;;  %v15954_v48 = vmul.f32 %v17249_v47, %v15944_v17 }
0x367f   : > { %v15964_v31 = vadd.f32 %v17250_v60, %v15953_v27 }
0x3680   : > { %v15965_v30 = vadd.f32 %v17250_v60, %v15954_v48 }
0x3681   : > { %18831 = vmatprep.mubr.msk.f32.mxu1 %vm2566_vm0, %v15964_v31 }
0x3682   : > { %18832 = vmatmul.mubr.msk.f32.gmra.mrb[146].mxu1 %vm2566_vm0, %v15965_v30 }
0x3751   : > { %v18830_v1 = vpop.f32.mrb[144].mxu1 }
0x3752   : > { %v16061_v43 = vadd.f32 %v18830_v1, %v17251_v37  ;;  %v16055_v25 = vpop.f32.mrb[145].mxu1 }
0x3753   : > { %v16056_v46 = vadd.f32 %v17251_v37, %v16055_v25 }
0x3754   : > { %v16075_v44 = vmax.f32 %v16061_v43, 0.0 }
0x3755   : > { %v16074_v10 = vmax.f32 %v16056_v46, 0.0  ;;  %v18833_v40 = vpop.f32.mrb[146].mxu1 }
0x3756   : > { %v16071_v28 = vadd.f32 %v18833_v40, %v17251_v37  ;;  %v16065_v12 = vpop.f32.mrb[147].mxu1 }
0x3757   : > { %v16066_v26 = vadd.f32 %v17251_v37, %v16065_v12  ;;  %18850 = vmatprep.mubr.msk.f32.mxu0 %vm4810_vm6, %v16074_v10 }
0x3758   : > { %18851 = vmatmul.mubr.msk.f32.vlgmr.msra.gmra.mrb[128].mxu0 %vm4810_vm6, %v16075_v44  ;;  %v16077_v20 = vmax.f32 %v16071_v28, 0.0 }
0x3759   : > { %v16076_v16 = vmax.f32 %v16066_v26, 0.0 }
0x375b   : > { %18853 = vmatprep.mubr.msk.f32.mxu0 %vm4810_vm6, %v16076_v16 }
0x375c   : > { %18854 = vmatmul.mubr.msk.f32.gmra.mrb[130].mxu0 %vm4810_vm6, %v16077_v20 }
0x382b   : > { %v18852_v5 = vpop.f32.mrb[128].mxu0 }
0x382c   : > { %v16171_v2 = vpop.f32.mrb[129].mxu0  ;;  %v16177_v55 = vadd.f32 %v18852_v5, %v17256_v19 }
0x382d   : > { %v16172_v9 = vadd.f32 %v17256_v19, %v16171_v2 }
0x382e   : > { %v16191_v54 = vadd.f32 %v16177_v55, %v25364_v45 }
0x382f   : > { %v16190_v61 = vadd.f32 %v16172_v9, %v25367_v52  ;;  %v18855_v14 = vpop.f32.mrb[130].mxu0 }
0x3830   : > { %v16181_v11 = vpop.f32.mrb[131].mxu0  ;;  %v16187_v29 = vadd.f32 %v18855_v14, %v17256_v19  ;;  %v16197_v15 = vsel %vm2566_vm0, %v16191_v54, 0.0  ;;  %v17261_v14 = vld [vmem:[#allocation15] ss:$0 sm:$0xff] }
0x3831   : > { %v16182_v3 = vadd.f32 %v17256_v19, %v16181_v11  ;;  %v16194_v36 = vsel %vm2566_vm0, %v16190_v61, 0.0 }
0x3832   : > { %16195 = vadd.xlane.f32.xlu0 %v16194_v36  ;;  %v16193_v38 = vadd.f32 %v16187_v29, %v25374_v21 }
0x3833   : > { %v16192_v4 = vadd.f32 %v16182_v3, %v25377_v35 }
0x3834   : > { %v16203_v52 = vsel %vm2566_vm0, %v16193_v38, 0.0 }
0x3835   : > { %v16200_v34 = vsel %vm2566_vm0, %v16192_v4, 0.0 }
0x3836   : > { %16198 = vadd.xlane.f32.xlu0 %v16197_v15  ;;  %16201 = vadd.xlane.f32.xlu1 %v16200_v34 }
0x383a   : > { %16204 = vadd.xlane.f32.xlu1 %v16203_v52 }
0x38bf   : > { %v16196_v18 = vpop.xlane.xlu0 %16195 }
0x38c0   : > { %v16206_v45 = vmul.f32 0.03125, %v16196_v18 }
0x38c2   : > { %v25443_v23 = vsub.f32 %v16190_v61, %v16206_v45 }
0x38c3   : > { %v16199_v58 = vpop.xlane.xlu0 %16198  ;;  %v16202_v13 = vpop.xlane.xlu1 %16201 }
0x38c4   : > { %v16207_v8 = vmul.f32 0.03125, %v16199_v58  ;;  %v16208_v24 = vmul.f32 0.03125, %v16202_v13  ;;  %v16214_v21 = vmul.f32 %v25443_v23, %v25443_v23 }
0x38c6   : > { %v25447_v35 = vsub.f32 %v16191_v54, %v16207_v8  ;;  %v25449_v6 = vsub.f32 %v16192_v4, %v16208_v24  ;;  %v16218_v0 = vsel %vm2566_vm0, %v16214_v21, 0.0  ;;  %v17262_v54 = vld [vmem:[#allocation16] ss:$0 sm:$0xff] }
0x38c7   : > { %16219 = vadd.xlane.f32.xlu0 %v16218_v0  ;;  %v16205_v56 = vpop.xlane.xlu1 %16204 }
0x38c8   : > { %v16209_v59 = vmul.f32 0.03125, %v16205_v56  ;;  %v16215_v42 = vmul.f32 %v25447_v35, %v25447_v35  ;;  %v16216_v47 = vmul.f32 %v25449_v6, %v25449_v6 }
0x38ca   : > { %v25456_v33 = vsub.f32 %v16193_v38, %v16209_v59  ;;  %v16221_v32 = vsel %vm2566_vm0, %v16215_v42, 0.0  ;;  %v16224_v50 = vsel %vm2566_vm0, %v16216_v47, 0.0 }
0x38cb   : > { %16222 = vadd.xlane.f32.xlu0 %v16221_v32  ;;  %16225 = vadd.xlane.f32.xlu1 %v16224_v50 }
0x38cc   : > { %v16217_v60 = vmul.f32 %v25456_v33, %v25456_v33 }
0x38ce   : > { %v16227_v51 = vsel %vm2566_vm0, %v16217_v60, 0.0 }
0x38cf   : > { %16228 = vadd.xlane.f32.xlu1 %v16227_v51 }
0x3954   : > { %v16220_v22 = vpop.xlane.xlu0 %16219 }
0x3955   : > { %v16230_v41 = vmul.f32 0.032258064, %v16220_v22 }
0x3957   : > { %21052 = vrsqrt.f32 %v16230_v41  ;;  %vm16236_vm6 = vcmp.eq.f32.partialorder %v16230_v41, inf  ;;  %v16239_v30 = vand.u32 2147483648, %v16230_v41  ;;  %vm16238_vm5 = vcmp.eq.f32.partialorder %v16230_v41, 0.0 }
0x3958   : > { %v16223_v62 = vpop.xlane.xlu0 %16222  ;;  %v16226_v49 = vpop.xlane.xlu1 %16225 }
0x3959   : > { %v16231_v53 = vmul.f32 0.032258064, %v16223_v62  ;;  %v16232_v7 = vmul.f32 0.032258064, %v16226_v49 }
0x395b   : > { %21054 = vrsqrt.f32 %v16231_v53  ;;  %vm16243_vm0 = vcmp.eq.f32.partialorder %v16231_v53, inf  ;;  %vm16245_vm7 = vcmp.eq.f32.partialorder %v16231_v53, 0.0  ;;  %v16246_v25 = vand.u32 2147483648, %v16231_v53 }
0x395c   : > { %21056 = vrsqrt.f32 %v16232_v7  ;;  %v16229_v17 = vpop.xlane.xlu1 %16228  ;;  %vm16250_vm8 = vcmp.eq.f32.partialorder %v16232_v7, inf  ;;  %v16253_v40 = vand.u32 2147483648, %v16232_v7  ;;  %vm16252_vm13 = vcmp.eq.f32.partialorder %v16232_v7, 0.0 }
0x395d   : > { %v16233_v27 = vmul.f32 0.032258064, %v16229_v17 }
0x395f   : > { %21058 = vrsqrt.f32 %v16233_v27  ;;  %vm16257_vm14 = vcmp.eq.f32.partialorder %v16233_v27, inf  ;;  %v16260_v5 = vand.u32 2147483648, %v16233_v27  ;;  %vm16259_vm9 = vcmp.eq.f32.partialorder %v16233_v27, 0.0 }
0x3961   : > { %v21053_v48 = vpop.eup %21052 }
0x3962   : > { %v16235_v31 = vmul.f32 %v21053_v48, %v16230_v41 }
0x3964   : > { %v16237_v63 = vsel %vm16236_vm6, %v16230_v41, %v16235_v31 }
0x3965   : > { %v21055_v39 = vpop.eup %21054  ;;  %v16240_v57 = vsel %vm16238_vm5, %v16239_v30, %v16237_v63 }
0x3966   : > { %v21057_v37 = vpop.eup %21056  ;;  %v16262_v1 = vadd.f32 1e-06, %v16240_v57  ;;  %v16242_v43 = vmul.f32 %v21055_v39, %v16231_v53 }
0x3967   : > { %v16249_v46 = vmul.f32 %v21057_v37, %v16232_v7 }
0x3968   : > { %21060 = vrcp.f32 %v16262_v1  ;;  %v16244_v10 = vsel %vm16243_vm0, %v16231_v53, %v16242_v43 }
0x3969   : > { %v21059_v44 = vpop.eup %21058  ;;  %v16247_v28 = vsel %vm16245_vm7, %v16246_v25, %v16244_v10  ;;  %v16251_v12 = vsel %vm16250_vm8, %v16232_v7, %v16249_v46 }
0x396a   : > { %v16263_v26 = vadd.f32 1e-06, %v16247_v28  ;;  %v16254_v16 = vsel %vm16252_vm13, %v16253_v40, %v16251_v12  ;;  %v16256_v20 = vmul.f32 %v21059_v44, %v16233_v27 }
0x396b   : > { %v16264_v19 = vadd.f32 1e-06, %v16254_v16 }
0x396c   : > { %21062 = vrcp.f32 %v16263_v26  ;;  %v16258_v2 = vsel %vm16257_vm14, %v16233_v27, %v16256_v20 }
0x396d   : > { %21064 = vrcp.f32 %v16264_v19  ;;  %v16261_v55 = vsel %vm16259_vm9, %v16260_v5, %v16258_v2 }
0x396e   : > { %v16265_v9 = vadd.f32 1e-06, %v16261_v55 }
0x3970   : > { %21066 = vrcp.f32 %v16265_v9 }
0x3972   : > { %v21061_v61 = vpop.eup %21060 }
0x3973   : > { %v16271_v11 = vmul.f32 %v21061_v61, %v25443_v23 }
0x3975   : > { %v16281_v29 = vmul.f32 %v17261_v14, %v16271_v11 }
0x3976   : > { %v21063_v3 = vpop.eup %21062 }
0x3977   : > { %v21065_v36 = vpop.eup %21064  ;;  %v16292_v4 = vadd.f32 %v17262_v54, %v16281_v29  ;;  %v16272_v38 = vmul.f32 %v21063_v3, %v25447_v35 }
0x3978   : > { %v16273_v15 = vmul.f32 %v21065_v36, %v25449_v6 }
0x3979   : > { %16296 = vxpose.xlu0.b32.start [1/2] (short) (narrow) %v16292_v4, 32  ;;  %v16282_v34 = vmul.f32 %v17261_v14, %v16272_v38 }
0x397a   : > { %v21067_v52 = vpop.eup %21066  ;;  %v16283_v18 = vmul.f32 %v17261_v14, %v16273_v15 }
0x397b   : > { %v16293_v45 = vadd.f32 %v17262_v54, %v16282_v34  ;;  %v16274_v58 = vmul.f32 %v21067_v52, %v25456_v33 }
0x397c   : > { %v16294_v13 = vadd.f32 %v17262_v54, %v16283_v18 }
0x397d   : > { %16297 = vxpose.xlu0.b32.end [2/2] (short) (narrow) %v16293_v45, 32  ;;  %v16284_v23 = vmul.f32 %v17261_v14, %v16274_v58 }
0x397e   : > { %16328 = vxpose.xlu1.b32.start [1/2] (short) (narrow) %v16294_v13, 32 }
0x397f   : > { %v16295_v8 = vadd.f32 %v17262_v54, %v16284_v23 }
0x3982   : > { %16329 = vxpose.xlu1.b32.end [2/2] (short) (narrow) %v16295_v8, 32 }
0x39f9   : > { %v16312_v24 = vpop.trf.xlu0 }
0x39fa   : > { %16360 = vst.msk [vmem:[%s2421_s6] sm:$0xff] %vm3535_vm11, %v16312_v24 }
0x39fd   : > { %v16313_v21 = vpop.trf.xlu0 }
0x39fe   : > { %v16344_v35 = vpop.trf.xlu1  ;;  %16361 = vst.msk [vmem:[%s2421_s6 + $0x8] sm:$0xff] %vm3535_vm11, %v16313_v21 }
0x39ff   : > { %16364 = vst.msk [vmem:[%s2421_s6 + $0x20] sm:$0xff] %vm3535_vm11, %v16344_v35 }
0x3a01   : > { %v16314_v6 = vpop.trf.xlu0 }
0x3a02   : > { %v16345_v0 = vpop.trf.xlu1  ;;  %16362 = vst.msk [vmem:[%s2421_s6 + $0x10] sm:$0xff] %vm3535_vm11, %v16314_v6 }
0x3a03   : > { %16365 = vst.msk [vmem:[%s2421_s6 + $0x28] sm:$0xff] %vm3535_vm11, %v16345_v0 }
0x3a05   : > { %v16315_v56 = vpop.trf.xlu0 }
0x3a06   : > { %v16346_v59 = vpop.trf.xlu1  ;;  %16363 = vst.msk [vmem:[%s2421_s6 + $0x18] sm:$0xff] %vm3535_vm11, %v16315_v56 }
0x3a07   : > { %16366 = vst.msk [vmem:[%s2421_s6 + $0x30] sm:$0xff] %vm3535_vm11, %v16346_v59 }
0x3a0a   : > { %v16347_v42 = vpop.trf.xlu1 }
0x3a0b   : > { %16367 = vst.msk [vmem:[%s2421_s6 + $0x38] sm:$0xff] %vm3535_vm11, %v16347_v42 }
0x3a0c PF: > { %s166_s15 = sadd.s32 1, %s21918_s15  }
0x3a0d   : > { %p163_p13 = scmp.ge.s32.totalorder %s166_s15, 4  }
0x3a0f   :  { %165 = sbr.rel (!%p163_p13) target bundleno = 151 (0x97), region = 516 }
0x3a16   :  { %16389 = vsyncpa [#allocation3], 1 }
0x3a17   :  { %16391 = vsyncpa [#allocation3 + $0x1], 1 }
0x3a18   :  { %16392 = vsyncpa [#allocation5], 1 }
0x3a19   :  { %16393 = vsyncpa [#allocation8], 1 }
0x3a1a   :  { %16394 = vsyncpa [#allocation11], 1 }
0x3a1b   :  { %16395 = vsyncpa [#allocation14], 1 }
0x3a1c   :  { %16396 = vsyncpa [#allocation17], 1 }
0x3a1d   :  { %16397 = vsyncpa [#allocation20], 1 }
0x3a1e   :  { %16398 = vsyncpa [#allocation23], 1 }
0x3a1f   :  { %16399 = vsyncpa [#allocation26], 1 }
0x3a20   :  { %16400 = vsyncpa [#allocation29], 1 }
0x3a21   :  { %16401 = vsyncpa [#allocation32], 1 }
0x3a22   :  { %16402 = vsyncpa [#allocation35], 1 }
0x3a23   :  { %16403 = vsyncpa [#allocation38], 1 }
0x3a24   :  { %16404 = vsyncpa [#allocation41], 1 }
0x3a25   :  { %16405 = vsyncpa [#allocation44], 1 }

</bundles_post_ra>
